<compile_context>
chip_gen: v5e
topology: v5e:2x2
jax: 0.10.0
libtpu: 0.0.40
codegen_flags: <defaults>
</compile_context>

<pallas_src>
import jax
import jax.numpy as jnp
import numpy as np
from jax import lax
from jax.experimental import pallas as pl
from jax.experimental.pallas import tpu as pltpu

_EPS = 1e-5


# ----------------------------- traced helpers (used inside the kernel) --------

def _conv3x3_im2col(xp, w_bf16, N, H, W, cin, cout):
    """3x3 'same' conv on a pre-padded NHWC f32 value via one im2col MXU matmul.

    xp: (N, H+2, W+2, cin) f32 value.  w_bf16: (9*cin, cout) bf16 value.
    Returns (N*H*W, cout) f32 rows (accumulated in f32 on the MXU).
    """
    # Tap order (dy, dx) with cin contiguous per tap matches w.reshape(9*cin, cout)
    # of an HWIO (3, 3, cin, cout) weight.  Cast per tap so the concat + big reshape
    # run at bf16 width (numerically identical to casting after the concat).
    taps = [xp[:, dy:dy + H, dx:dx + W, :].astype(jnp.bfloat16)
            for dy in range(3) for dx in range(3)]
    patch = jnp.concatenate(taps, axis=-1)                 # (N, H, W, 9*cin) bf16
    patch = patch.reshape(N * H * W, 9 * cin)              # leading-dim merge (cheap)
    return jnp.dot(patch, w_bf16,
                   preferred_element_type=jnp.float32)     # (N*H*W, cout) f32


def _batchnorm_relu(rows):
    """Training-mode BatchNorm2d (gamma=1, beta=0, biased var, eps=1e-5) + ReLU.

    rows: (N*H*W, C) f32.  Statistics are over the full batch (axis 0), in f32.
    """
    mean = jnp.mean(rows, axis=0, keepdims=True)
    var = jnp.mean(jnp.square(rows - mean), axis=0, keepdims=True)
    return jnp.maximum((rows - mean) * lax.rsqrt(var + _EPS), 0.0)


# ----------------------------------- fused kernel -----------------------------

def _double_conv_kernel(x_ref, w1_ref, w2_ref, o_ref, xp1_ref, xp2_ref):
    # x_ref : (N, H, W, Cin)  f32   (unpadded NHWC input)
    # w1_ref: (9*Cin,  Cout)  bf16
    # w2_ref: (9*Cout, Cout)  bf16
    # o_ref : (N, H//2, W-1, Cout) f32  (H pooled; W holds pairwise maxima, even cols valid)
    # xp1_ref/xp2_ref: f32 VMEM scratch for in-kernel zero padding.
    N, H, W, cin = x_ref.shape
    cout = o_ref.shape[-1]

    # ---- stage 1: pad -> conv1 -> BN -> ReLU (bias dropped: cancelled by BN mean) ----
    xp1_ref[...] = jnp.zeros_like(xp1_ref)
    xp1_ref[:, 1:H + 1, 1:W + 1, :] = x_ref[...]
    rows1 = _conv3x3_im2col(xp1_ref[...], w1_ref[...], N, H, W, cin, cout)
    y1 = _batchnorm_relu(rows1).reshape(N, H, W, cout)

    # ---- stage 2: pad -> conv2 -> BN -> ReLU (y1 never leaves VMEM) ----
    xp2_ref[...] = jnp.zeros_like(xp2_ref)
    xp2_ref[:, 1:H + 1, 1:W + 1, :] = y1
    rows2 = _conv3x3_im2col(xp2_ref[...], w2_ref[...], N, H, W, cout, cout)
    y2 = _batchnorm_relu(rows2).reshape(N, H, W, cout)

    # ---- MaxPool2d(2, 2) ----
    # H: split a leading dim and reduce -> free (no relayout).
    yh = jnp.max(y2.reshape(N, H // 2, 2, W, cout), axis=2)        # (N, H/2, W, C)
    # W: unit-stride shift + elementwise max; column w holds max(w, w+1), so the even
    # columns are the pooled values (compacted by a tiny XLA slice in the wrapper).
    wpair = jnp.maximum(yh[:, :, :W - 1, :], yh[:, :, 1:, :])      # (N, H/2, W-1, C)
    o_ref[...] = wpair


# ----------------------------------- wrapper ----------------------------------

def double_conv(x_nchw, params):
    """Forward pass of DoubleConv. x_nchw: (N, Cin, H, W) -> (N, Cout, H/2, W/2)."""
    w1, _b1, w2, _b2 = params            # biases unused: no-op under training-mode BN
    x = jnp.transpose(x_nchw, (0, 2, 3, 1)).astype(jnp.float32)    # NHWC
    N, H, W, cin = x.shape
    cout = w1.shape[-1]
    assert H % 2 == 0 and W % 2 == 0

    # HWIO -> (9*cin, cout), bf16 MXU operands (BN statistics stay in f32).
    w1_2d = w1.reshape(9 * cin, cout).astype(jnp.bfloat16)
    w2_2d = w2.reshape(9 * cout, cout).astype(jnp.bfloat16)

    vm = pl.BlockSpec(memory_space=pltpu.MemorySpace.VMEM)

    out = pl.pallas_call(
        _double_conv_kernel,
        out_shape=jax.ShapeDtypeStruct((N, H // 2, W - 1, cout), jnp.float32),
        in_specs=[vm, vm, vm],
        out_specs=vm,
        scratch_shapes=[
            pltpu.VMEM((N, H + 2, W + 2, cin), jnp.float32),   # padded conv1 input
            pltpu.VMEM((N, H + 2, W + 2, cout), jnp.float32),  # padded conv2 input
        ],
        compiler_params=pltpu.CompilerParams(vmem_limit_bytes=32 * 1024 * 1024),
    )(x, w1_2d, w2_2d)

    pooled = out[:, :, ::2, :]                   # keep even-w pairwise maxima (tiny)
    return jnp.transpose(pooled, (0, 3, 1, 2))   # NHWC -> NCHW


# ------------------------------- pure-JAX reference ---------------------------

def reference(x_nchw, params):
    w1, b1, w2, b2 = params
    x = jnp.transpose(x_nchw, (0, 2, 3, 1)).astype(jnp.float32)
    dn = ('NHWC', 'HWIO', 'NHWC')

    def bn_relu(y):
        mean = jnp.mean(y, axis=(0, 1, 2), keepdims=True)
        var = jnp.mean(jnp.square(y - mean), axis=(0, 1, 2), keepdims=True)
        return jnp.maximum((y - mean) * lax.rsqrt(var + _EPS), 0.0)

    y = lax.conv_general_dilated(x, w1, (1, 1), ((1, 1), (1, 1)),
                                 dimension_numbers=dn,
                                 precision=lax.Precision.HIGHEST) + b1
    y = bn_relu(y)
    y = lax.conv_general_dilated(y, w2, (1, 1), ((1, 1), (1, 1)),
                                 dimension_numbers=dn,
                                 precision=lax.Precision.HIGHEST) + b2
    y = bn_relu(y)
    y = lax.reduce_window(y, -jnp.inf, lax.max, (1, 2, 2, 1), (1, 2, 2, 1), 'VALID')
    return jnp.transpose(y, (0, 3, 1, 2))


# ------------------------------------ main -------------------------------------

if __name__ == "__main__":
    key = jax.random.PRNGKey(0)
    kx, k1, k2, k3, k4 = jax.random.split(key, 5)
    N, Cin, H, W = 2, 4, 16, 16
    Cout = 8

    x = jax.random.normal(kx, (N, Cin, H, W), jnp.float32)
    # Deterministic synthetic parameters (shapes from the module __init__).
    w1 = jax.random.normal(k1, (3, 3, Cin, Cout), jnp.float32) * 0.1
    b1 = jax.random.normal(k2, (Cout,), jnp.float32) * 0.1
    w2 = jax.random.normal(k3, (3, 3, Cout, Cout), jnp.float32) * 0.1
    b2 = jax.random.normal(k4, (Cout,), jnp.float32) * 0.1
    params = (w1, b1, w2, b2)

    out = jax.block_until_ready(double_conv(x, params))
    ref = jax.block_until_ready(reference(x, params))

    assert out.shape == (N, Cout, H // 2, W // 2), out.shape
    np.testing.assert_allclose(np.asarray(out), np.asarray(ref), atol=5e-2, rtol=5e-2)
    print("KERNEL_OK")
</pallas_src>

<mosaic_0001>
module attributes {stable_mosaic.version = 11 : i64} {
  func.func @_double_conv_kernel(%arg0: memref<2x16x16x4xf32, #tpu.memory_space<vmem>>, %arg1: memref<36x8xbf16, #tpu.memory_space<vmem>>, %arg2: memref<72x8xbf16, #tpu.memory_space<vmem>>, %arg3: memref<2x8x15x8xf32, #tpu.memory_space<vmem>>, %arg4: memref<2x18x18x4xf32, #tpu.memory_space<vmem>>, %arg5: memref<2x18x18x8xf32, #tpu.memory_space<vmem>>) attributes {dimension_semantics = [], scalar_prefetch = 0 : i64, scratch_operands = 2 : i64, tpu.core_type = #tpu.core_type<tc>} {
    %cst = arith.constant 0.000000e+00 : f32
    %0 = vector.broadcast %cst : f32 to vector<2x18x18x4xf32>
    %c0 = arith.constant 0 : index
    %c0_0 = arith.constant 0 : index
    %c0_1 = arith.constant 0 : index
    %c0_2 = arith.constant 0 : index
    %1 = vector.load %arg4[%c0, %c0_0, %c0_1, %c0_2] : memref<2x18x18x4xf32, #tpu.memory_space<vmem>>, vector<2x18x18x4xf32>
    tpu.vector_store %arg4[%c0, %c0_0, %c0_1, %c0_2], %0 {strides = array<i32>} : memref<2x18x18x4xf32, #tpu.memory_space<vmem>>, vector<2x18x18x4xf32>,
    %c0_3 = arith.constant 0 : index
    %c0_4 = arith.constant 0 : index
    %c0_5 = arith.constant 0 : index
    %c0_6 = arith.constant 0 : index
    %2 = vector.load %arg0[%c0_3, %c0_4, %c0_5, %c0_6] : memref<2x16x16x4xf32, #tpu.memory_space<vmem>>, vector<2x16x16x4xf32>
    %c0_7 = arith.constant 0 : index
    %c1 = arith.constant 1 : index
    %c1_8 = arith.constant 1 : index
    %c0_9 = arith.constant 0 : index
    %3 = vector.load %arg4[%c0_7, %c1, %c1_8, %c0_9] : memref<2x18x18x4xf32, #tpu.memory_space<vmem>>, vector<2x16x16x4xf32>
    tpu.vector_store %arg4[%c0_7, %c1, %c1_8, %c0_9], %2 {strides = array<i32>} : memref<2x18x18x4xf32, #tpu.memory_space<vmem>>, vector<2x16x16x4xf32>,
    %c0_10 = arith.constant 0 : index
    %c0_11 = arith.constant 0 : index
    %c0_12 = arith.constant 0 : index
    %c0_13 = arith.constant 0 : index
    %4 = vector.load %arg4[%c0_10, %c0_11, %c0_12, %c0_13] : memref<2x18x18x4xf32, #tpu.memory_space<vmem>>, vector<2x18x18x4xf32>
    %c0_14 = arith.constant 0 : index
    %c0_15 = arith.constant 0 : index
    %5 = vector.load %arg1[%c0_14, %c0_15] : memref<36x8xbf16, #tpu.memory_space<vmem>>, vector<36x8xbf16>
    %6 = vector.extract_strided_slice %4 {offsets = [0, 0, 0, 0], sizes = [2, 16, 16, 4], strides = [1, 1, 1, 1]} : vector<2x18x18x4xf32> to vector<2x16x16x4xf32>
    %7 = arith.truncf %6 : vector<2x16x16x4xf32> to vector<2x16x16x4xbf16>
    %8 = vector.extract_strided_slice %4 {offsets = [0, 0, 1, 0], sizes = [2, 16, 16, 4], strides = [1, 1, 1, 1]} : vector<2x18x18x4xf32> to vector<2x16x16x4xf32>
    %9 = arith.truncf %8 : vector<2x16x16x4xf32> to vector<2x16x16x4xbf16>
    %10 = vector.extract_strided_slice %4 {offsets = [0, 0, 2, 0], sizes = [2, 16, 16, 4], strides = [1, 1, 1, 1]} : vector<2x18x18x4xf32> to vector<2x16x16x4xf32>
    %11 = arith.truncf %10 : vector<2x16x16x4xf32> to vector<2x16x16x4xbf16>
    %12 = vector.extract_strided_slice %4 {offsets = [0, 1, 0, 0], sizes = [2, 16, 16, 4], strides = [1, 1, 1, 1]} : vector<2x18x18x4xf32> to vector<2x16x16x4xf32>
    %13 = arith.truncf %12 : vector<2x16x16x4xf32> to vector<2x16x16x4xbf16>
    %14 = vector.extract_strided_slice %4 {offsets = [0, 1, 1, 0], sizes = [2, 16, 16, 4], strides = [1, 1, 1, 1]} : vector<2x18x18x4xf32> to vector<2x16x16x4xf32>
    %15 = arith.truncf %14 : vector<2x16x16x4xf32> to vector<2x16x16x4xbf16>
    %16 = vector.extract_strided_slice %4 {offsets = [0, 1, 2, 0], sizes = [2, 16, 16, 4], strides = [1, 1, 1, 1]} : vector<2x18x18x4xf32> to vector<2x16x16x4xf32>
    %17 = arith.truncf %16 : vector<2x16x16x4xf32> to vector<2x16x16x4xbf16>
    %18 = vector.extract_strided_slice %4 {offsets = [0, 2, 0, 0], sizes = [2, 16, 16, 4], strides = [1, 1, 1, 1]} : vector<2x18x18x4xf32> to vector<2x16x16x4xf32>
    %19 = arith.truncf %18 : vector<2x16x16x4xf32> to vector<2x16x16x4xbf16>
    %20 = vector.extract_strided_slice %4 {offsets = [0, 2, 1, 0], sizes = [2, 16, 16, 4], strides = [1, 1, 1, 1]} : vector<2x18x18x4xf32> to vector<2x16x16x4xf32>
    %21 = arith.truncf %20 : vector<2x16x16x4xf32> to vector<2x16x16x4xbf16>
    %22 = vector.extract_strided_slice %4 {offsets = [0, 2, 2, 0], sizes = [2, 16, 16, 4], strides = [1, 1, 1, 1]} : vector<2x18x18x4xf32> to vector<2x16x16x4xf32>
    %23 = arith.truncf %22 : vector<2x16x16x4xf32> to vector<2x16x16x4xbf16>
    %24 = tpu.concatenate %7, %9, %11, %13, %15, %17, %19, %21, %23 in 3 : vector<2x16x16x4xbf16>, vector<2x16x16x4xbf16>, vector<2x16x16x4xbf16>, vector<2x16x16x4xbf16>, vector<2x16x16x4xbf16>, vector<2x16x16x4xbf16>, vector<2x16x16x4xbf16>, vector<2x16x16x4xbf16>, vector<2x16x16x4xbf16> -> vector<2x16x16x36xbf16>
    %25 = vector.shape_cast %24 : vector<2x16x16x36xbf16> to vector<512x36xbf16>
    %cst_16 = arith.constant dense<0.000000e+00> : vector<512x8xf32>
    %26 = tpu.matmul %25, %5, %cst_16 {dimension_numbers = #tpu.dot_dimension_numbers<[1], [0], [0], [1], [0, 0, 1, 1], [], []>} : vector<512x36xbf16>, vector<36x8xbf16>, vector<512x8xf32> -> vector<512x8xf32>
    %cst_17 = arith.constant dense<0.000000e+00> : vector<8xf32>
    %27 = vector.multi_reduction <add>, %26, %cst_17 [0] : vector<512x8xf32> to vector<8xf32>
    %28 = vector.shape_cast %27 : vector<8xf32> to vector<1x8xf32>
    %cst_18 = arith.constant 5.120000e+02 : f32
    %29 = vector.broadcast %cst_18 : f32 to vector<1x8xf32>
    %30 = arith.divf %28, %29 : vector<1x8xf32>
    %31 = vector.broadcast %30 : vector<1x8xf32> to vector<512x8xf32>
    %32 = arith.subf %26, %31 : vector<512x8xf32>
    %33 = arith.mulf %32, %32 : vector<512x8xf32>
    %cst_19 = arith.constant dense<0.000000e+00> : vector<8xf32>
    %34 = vector.multi_reduction <add>, %33, %cst_19 [0] : vector<512x8xf32> to vector<8xf32>
    %35 = vector.shape_cast %34 : vector<8xf32> to vector<1x8xf32>
    %cst_20 = arith.constant 5.120000e+02 : f32
    %36 = vector.broadcast %cst_20 : f32 to vector<1x8xf32>
    %37 = arith.divf %35, %36 : vector<1x8xf32>
    %38 = vector.broadcast %30 : vector<1x8xf32> to vector<512x8xf32>
    %39 = arith.subf %26, %38 : vector<512x8xf32>
    %cst_21 = arith.constant 9.99999974E-6 : f32
    %40 = vector.broadcast %cst_21 : f32 to vector<1x8xf32>
    %41 = arith.addf %37, %40 : vector<1x8xf32>
    %42 = math.rsqrt %41 : vector<1x8xf32>
    %43 = vector.broadcast %42 : vector<1x8xf32> to vector<512x8xf32>
    %44 = arith.mulf %39, %43 : vector<512x8xf32>
    %cst_22 = arith.constant 0.000000e+00 : f32
    %45 = vector.broadcast %cst_22 : f32 to vector<512x8xf32>
    %46 = arith.maximumf %44, %45 : vector<512x8xf32>
    %47 = vector.shape_cast %46 : vector<512x8xf32> to vector<2x16x16x8xf32>
    %cst_23 = arith.constant 0.000000e+00 : f32
    %48 = vector.broadcast %cst_23 : f32 to vector<2x18x18x8xf32>
    %c0_24 = arith.constant 0 : index
    %c0_25 = arith.constant 0 : index
    %c0_26 = arith.constant 0 : index
    %c0_27 = arith.constant 0 : index
    %49 = vector.load %arg5[%c0_24, %c0_25, %c0_26, %c0_27] : memref<2x18x18x8xf32, #tpu.memory_space<vmem>>, vector<2x18x18x8xf32>
    tpu.vector_store %arg5[%c0_24, %c0_25, %c0_26, %c0_27], %48 {strides = array<i32>} : memref<2x18x18x8xf32, #tpu.memory_space<vmem>>, vector<2x18x18x8xf32>,
    %c0_28 = arith.constant 0 : index
    %c1_29 = arith.constant 1 : index
    %c1_30 = arith.constant 1 : index
    %c0_31 = arith.constant 0 : index
    %50 = vector.load %arg5[%c0_28, %c1_29, %c1_30, %c0_31] : memref<2x18x18x8xf32, #tpu.memory_space<vmem>>, vector<2x16x16x8xf32>
    tpu.vector_store %arg5[%c0_28, %c1_29, %c1_30, %c0_31], %47 {strides = array<i32>} : memref<2x18x18x8xf32, #tpu.memory_space<vmem>>, vector<2x16x16x8xf32>,
    %c0_32 = arith.constant 0 : index
    %c0_33 = arith.constant 0 : index
    %c0_34 = arith.constant 0 : index
    %c0_35 = arith.constant 0 : index
    %51 = vector.load %arg5[%c0_32, %c0_33, %c0_34, %c0_35] : memref<2x18x18x8xf32, #tpu.memory_space<vmem>>, vector<2x18x18x8xf32>
    %c0_36 = arith.constant 0 : index
    %c0_37 = arith.constant 0 : index
    %52 = vector.load %arg2[%c0_36, %c0_37] : memref<72x8xbf16, #tpu.memory_space<vmem>>, vector<72x8xbf16>
    %53 = vector.extract_strided_slice %51 {offsets = [0, 0, 0, 0], sizes = [2, 16, 16, 8], strides = [1, 1, 1, 1]} : vector<2x18x18x8xf32> to vector<2x16x16x8xf32>
    %54 = arith.truncf %53 : vector<2x16x16x8xf32> to vector<2x16x16x8xbf16>
    %55 = vector.extract_strided_slice %51 {offsets = [0, 0, 1, 0], sizes = [2, 16, 16, 8], strides = [1, 1, 1, 1]} : vector<2x18x18x8xf32> to vector<2x16x16x8xf32>
    %56 = arith.truncf %55 : vector<2x16x16x8xf32> to vector<2x16x16x8xbf16>
    %57 = vector.extract_strided_slice %51 {offsets = [0, 0, 2, 0], sizes = [2, 16, 16, 8], strides = [1, 1, 1, 1]} : vector<2x18x18x8xf32> to vector<2x16x16x8xf32>
    %58 = arith.truncf %57 : vector<2x16x16x8xf32> to vector<2x16x16x8xbf16>
    %59 = vector.extract_strided_slice %51 {offsets = [0, 1, 0, 0], sizes = [2, 16, 16, 8], strides = [1, 1, 1, 1]} : vector<2x18x18x8xf32> to vector<2x16x16x8xf32>
    %60 = arith.truncf %59 : vector<2x16x16x8xf32> to vector<2x16x16x8xbf16>
    %61 = vector.extract_strided_slice %51 {offsets = [0, 1, 1, 0], sizes = [2, 16, 16, 8], strides = [1, 1, 1, 1]} : vector<2x18x18x8xf32> to vector<2x16x16x8xf32>
    %62 = arith.truncf %61 : vector<2x16x16x8xf32> to vector<2x16x16x8xbf16>
    %63 = vector.extract_strided_slice %51 {offsets = [0, 1, 2, 0], sizes = [2, 16, 16, 8], strides = [1, 1, 1, 1]} : vector<2x18x18x8xf32> to vector<2x16x16x8xf32>
    %64 = arith.truncf %63 : vector<2x16x16x8xf32> to vector<2x16x16x8xbf16>
    %65 = vector.extract_strided_slice %51 {offsets = [0, 2, 0, 0], sizes = [2, 16, 16, 8], strides = [1, 1, 1, 1]} : vector<2x18x18x8xf32> to vector<2x16x16x8xf32>
    %66 = arith.truncf %65 : vector<2x16x16x8xf32> to vector<2x16x16x8xbf16>
    %67 = vector.extract_strided_slice %51 {offsets = [0, 2, 1, 0], sizes = [2, 16, 16, 8], strides = [1, 1, 1, 1]} : vector<2x18x18x8xf32> to vector<2x16x16x8xf32>
    %68 = arith.truncf %67 : vector<2x16x16x8xf32> to vector<2x16x16x8xbf16>
    %69 = vector.extract_strided_slice %51 {offsets = [0, 2, 2, 0], sizes = [2, 16, 16, 8], strides = [1, 1, 1, 1]} : vector<2x18x18x8xf32> to vector<2x16x16x8xf32>
    %70 = arith.truncf %69 : vector<2x16x16x8xf32> to vector<2x16x16x8xbf16>
    %71 = tpu.concatenate %54, %56, %58, %60, %62, %64, %66, %68, %70 in 3 : vector<2x16x16x8xbf16>, vector<2x16x16x8xbf16>, vector<2x16x16x8xbf16>, vector<2x16x16x8xbf16>, vector<2x16x16x8xbf16>, vector<2x16x16x8xbf16>, vector<2x16x16x8xbf16>, vector<2x16x16x8xbf16>, vector<2x16x16x8xbf16> -> vector<2x16x16x72xbf16>
    %72 = vector.shape_cast %71 : vector<2x16x16x72xbf16> to vector<512x72xbf16>
    %cst_38 = arith.constant dense<0.000000e+00> : vector<512x8xf32>
    %73 = tpu.matmul %72, %52, %cst_38 {dimension_numbers = #tpu.dot_dimension_numbers<[1], [0], [0], [1], [0, 0, 1, 1], [], []>} : vector<512x72xbf16>, vector<72x8xbf16>, vector<512x8xf32> -> vector<512x8xf32>
    %cst_39 = arith.constant dense<0.000000e+00> : vector<8xf32>
    %74 = vector.multi_reduction <add>, %73, %cst_39 [0] : vector<512x8xf32> to vector<8xf32>
    %75 = vector.shape_cast %74 : vector<8xf32> to vector<1x8xf32>
    %cst_40 = arith.constant 5.120000e+02 : f32
    %76 = vector.broadcast %cst_40 : f32 to vector<1x8xf32>
    %77 = arith.divf %75, %76 : vector<1x8xf32>
    %78 = vector.broadcast %77 : vector<1x8xf32> to vector<512x8xf32>
    %79 = arith.subf %73, %78 : vector<512x8xf32>
    %80 = arith.mulf %79, %79 : vector<512x8xf32>
    %cst_41 = arith.constant dense<0.000000e+00> : vector<8xf32>
    %81 = vector.multi_reduction <add>, %80, %cst_41 [0] : vector<512x8xf32> to vector<8xf32>
    %82 = vector.shape_cast %81 : vector<8xf32> to vector<1x8xf32>
    %cst_42 = arith.constant 5.120000e+02 : f32
    %83 = vector.broadcast %cst_42 : f32 to vector<1x8xf32>
    %84 = arith.divf %82, %83 : vector<1x8xf32>
    %85 = vector.broadcast %77 : vector<1x8xf32> to vector<512x8xf32>
    %86 = arith.subf %73, %85 : vector<512x8xf32>
    %cst_43 = arith.constant 9.99999974E-6 : f32
    %87 = vector.broadcast %cst_43 : f32 to vector<1x8xf32>
    %88 = arith.addf %84, %87 : vector<1x8xf32>
    %89 = math.rsqrt %88 : vector<1x8xf32>
    %90 = vector.broadcast %89 : vector<1x8xf32> to vector<512x8xf32>
    %91 = arith.mulf %86, %90 : vector<512x8xf32>
    %cst_44 = arith.constant 0.000000e+00 : f32
    %92 = vector.broadcast %cst_44 : f32 to vector<512x8xf32>
    %93 = arith.maximumf %91, %92 : vector<512x8xf32>
    %94 = vector.shape_cast %93 : vector<512x8xf32> to vector<2x16x16x8xf32>
    %95 = vector.shape_cast %94 : vector<2x16x16x8xf32> to vector<2x8x2x16x8xf32>
    %cst_45 = arith.constant dense<0xFF800000> : vector<2x8x16x8xf32>
    %96 = vector.multi_reduction <maximumf>, %95, %cst_45 [2] : vector<2x8x2x16x8xf32> to vector<2x8x16x8xf32>
    %97 = vector.extract_strided_slice %96 {offsets = [0, 0, 0, 0], sizes = [2, 8, 15, 8], strides = [1, 1, 1, 1]} : vector<2x8x16x8xf32> to vector<2x8x15x8xf32>
    %98 = vector.extract_strided_slice %96 {offsets = [0, 0, 1, 0], sizes = [2, 8, 15, 8], strides = [1, 1, 1, 1]} : vector<2x8x16x8xf32> to vector<2x8x15x8xf32>
    %99 = arith.maximumf %97, %98 : vector<2x8x15x8xf32>
    %c0_46 = arith.constant 0 : index
    %c0_47 = arith.constant 0 : index
    %c0_48 = arith.constant 0 : index
    %c0_49 = arith.constant 0 : index
    %100 = vector.load %arg3[%c0_46, %c0_47, %c0_48, %c0_49] : memref<2x8x15x8xf32, #tpu.memory_space<vmem>>, vector<2x8x15x8xf32>
    tpu.vector_store %arg3[%c0_46, %c0_47, %c0_48, %c0_49], %99 {strides = array<i32>} : memref<2x8x15x8xf32, #tpu.memory_space<vmem>>, vector<2x8x15x8xf32>,
    return
  }
}

</mosaic_0001>

<bundles_post_ra>
// kernel: tpu_custom_call.1
= control target key start
LH: loop header
LB: loop body
LE: loop exit
PB: predicated region body
PF: predicated region fallthrough
CT: control target
= control target key end

     0   :  { %vm15_vm0 = vcmask 31744   ;;  %v12863_v0 = vmov 0.0   ;;  %vm18_vm1 = vcmask 25600   ;;  %vm731_vm2 = vsmask.f32 7424  ;;  %s6587_s12 = smov 4   ;;  %s12859_s0 = inlined_call_operand.vmem [shape: f32[2,16,16,4], index: 0, kind: input, shape index: {}]   ;;  %s12860_s1 = inlined_call_operand.vmem [shape: bf16[36,8], index: 1, kind: input, shape index: {}]   ;;  %s12861_s2 = inlined_call_operand.vmem [shape: bf16[72,8], index: 2, kind: input, shape index: {}]   ;;  %s12862_s3 = inlined_call_operand.vmem [shape: f32[2,8,15,8], index: 3, kind: output, shape index: {}]  }
   0x1   :  { %16 = vst.msk [vmem:[#allocation2] sm:$0xff] %vm15_vm0, %v12863_v0  ;;  %v131_v19 = vld [vmem:[%s12859_s0 + $0x30] sm:$0xff]  ;;  %v132_v20 = vld [vmem:[%s12859_s0 + $0x38] sm:$0xff]  ;;  %v125_v23 = vld [vmem:[%s12859_s0] sm:$0xff]  ;;  %vm1180_vm3 = vcmask 1046528   ;;  %s6588_s29 = smov 8  }
   0x2   :  { %17 = vst.msk [vmem:[#allocation2 + $0x8] sm:$0xff] %vm15_vm0, %v12863_v0  ;;  %v127_v21 = vld [vmem:[%s12859_s0 + $0x10] sm:$0xff]  ;;  %v128_v22 = vld [vmem:[%s12859_s0 + $0x18] sm:$0xff]  ;;  %v126_v24 = vld [vmem:[%s12859_s0 + $0x8] sm:$0xff]  ;;  %vm1881_vm4 = vcmask 64512   ;;  %s6590_s30 = smov 16  }
   0x3   :  { %19 = vst.msk [vmem:[#allocation2 + $0x10] sm:$0x3] %vm18_vm1, %v12863_v0  ;;  %v133_v25 = vld [vmem:[%s12859_s0 + $0x40] sm:$0xff]  ;;  %v134_v26 = vld [vmem:[%s12859_s0 + $0x48] sm:$0xff]  ;;  %v135_v30 = vld [vmem:[%s12859_s0 + $0x50] sm:$0xff]  ;;  %s6591_s4 = smov 24  }
   0x4   :  { %20 = vst.msk [vmem:[#allocation2 + $0x18] sm:$0xff] %vm15_vm0, %v12863_v0  ;;  %v129_v27 = vld [vmem:[%s12859_s0 + $0x20] sm:$0xff]  ;;  %v130_v28 = vld [vmem:[%s12859_s0 + $0x28] sm:$0xff]  ;;  %v136_v34 = vld [vmem:[%s12859_s0 + $0x58] sm:$0xff]  ;;  %s6592_s5 = smov 20   ;;  %s6593_s6 = smov 28  }
   0x5   :  { %21 = vst.msk [vmem:[#allocation2 + $0x20] sm:$0xff] %vm15_vm0, %v12863_v0  ;;  %v139_v38 = vld [vmem:[%s12859_s0 + $0x70] sm:$0xff]  ;;  %v140_v43 = vld [vmem:[%s12859_s0 + $0x78] sm:$0xff]  ;;  %v137_v49 = vld [vmem:[%s12859_s0 + $0x60] sm:$0xff]  ;;  %s6594_s7 = smov 32   ;;  %vm2416_vm5 = vcmask 1041408  }
   0x6   :  { %22 = vst.msk [vmem:[#allocation2 + $0x28] sm:$0x3] %vm18_vm1, %v12863_v0  ;;  %v138_v54 = vld [vmem:[%s12859_s0 + $0x68] sm:$0xff]  ;;  %v141_v60 = vld [vmem:[%s12859_s0 + $0x80] sm:$0xff]  ;;  %vm1946_vm6 = vcmask 97280   ;;  %vm2011_vm7 = vcmask 130048  }
   0x7   :  { %23 = vst.msk [vmem:[#allocation2 + $0x30] sm:$0xff] %vm15_vm0, %v12863_v0  ;;  %vm2076_vm8 = vcmask 162816   ;;  %vm2141_vm9 = vcmask 195584   ;;  %vm2206_vm10 = vcmask 228352   ;;  %vm2271_vm11 = vcmask 261120   ;;  %s6597_s22 = smov 48  }
   0x8   :  { %v254_v1 = vld [vmem:[#allocation2] sm:$0xff]  ;;  %24 = vst.msk [vmem:[#allocation2 + $0x38] sm:$0xff] %vm15_vm0, %v12863_v0  ;;  %vm2351_vm12 = vcmask 293888   ;;  %vm3133_vm13 = vcmask 58368   ;;  %s6598_s23 = smov 64   ;;  %s6599_s24 = smov 56  }
   0x9   :  { %v255_v2 = vld [vmem:[#allocation2 + $0x8] sm:$0xff]  ;;  %v367_v3 = vpack.c.bf16 %v254_v1, %v254_v1  ;;  %25 = vst.msk [vmem:[#allocation2 + $0x40] sm:$0x3] %vm18_vm1, %v12863_v0 }
   0xa   :  { %v256_v4 = vld [vmem:[#allocation2 + $0x10] sm:$0x3]  ;;  %v368_v5 = vpack.c.bf16 %v255_v2, %v255_v2  ;;  %26 = vst.msk [vmem:[#allocation2 + $0x48] sm:$0xff] %vm15_vm0, %v12863_v0 }
   0xb   :  { %v431_v6 = vpack.c.bf16 %v256_v4, %v256_v4  ;;  %v539_v7 = vunpack.c.l.b16 %v367_v3  ;;  %27 = vst.msk [vmem:[#allocation2 + $0x50] sm:$0xff] %vm15_vm0, %v12863_v0  ;;  %v142_v3 = vld [vmem:[%s12859_s0 + $0x88] sm:$0xff]  ;;  %v145_v4 = vld [vmem:[%s12859_s0 + $0xa0] sm:$0xff] }
   0xc   :  { %v540_v8 = vunpack.c.l.b16 %v368_v5  ;;  %28 = vst.msk [vmem:[#allocation2 + $0x58] sm:$0x3] %vm18_vm1, %v12863_v0 }
   0xd   :  { %v667_v9 = vunpack.c.l.b16 %v431_v6  ;;  %29 = vst.msk [vmem:[#allocation2 + $0x60] sm:$0xff] %vm15_vm0, %v12863_v0 }
   0xe   :  { %v6646_v10 = vpack.c.b16 %v540_v8, %v539_v7  ;;  %30 = vst.msk [vmem:[#allocation2 + $0x68] sm:$0xff] %vm15_vm0, %v12863_v0 }
   0xf   :  { %v6650_v11 = vpack.c.b16 %v667_v9, %v667_v9  ;;  %31 = vst.msk [vmem:[#allocation2 + $0x70] sm:$0x3] %vm18_vm1, %v12863_v0 }
  0x10   :  { %v733_v12 = vshrl.u32 %v6646_v10, 16  ;;  %v735_v13 = vshll.u32 %v6646_v10, 16  ;;  %32 = vst.msk [vmem:[#allocation2 + $0x78] sm:$0xff] %vm15_vm0, %v12863_v0 }
  0x11   :  { %v740_v14 = vshll.u32 %v6650_v11, 16  ;;  %33 = vst.msk [vmem:[#allocation2 + $0x80] sm:$0xff] %vm15_vm0, %v12863_v0 }
  0x12   :  { %v737_v15 = vrot.slane %v735_v13, 1  ;;  %34 = vst.msk [vmem:[#allocation2 + $0x88] sm:$0x3] %vm18_vm1, %v12863_v0 }
  0x13   :  { %v742_v16 = vrot.slane %v740_v14, 1  ;;  %35 = vst.msk [vmem:[#allocation2 + $0x90] sm:$0xff] %vm15_vm0, %v12863_v0 }
  0x14   :  { %v738_v17 = vor.u32 %v737_v15, %v733_v12  ;;  %36 = vst.msk [vmem:[#allocation2 + $0x98] sm:$0xff] %vm15_vm0, %v12863_v0 }
  0x15   :  { %37 = vst.msk [vmem:[#allocation2 + $0xa0] sm:$0x3] %vm18_vm1, %v12863_v0 }
  0x16   :  { %v743_v18 = vsel %vm731_vm2, %v738_v17, %v742_v16  ;;  %38 = vst.msk [vmem:[#allocation2 + $0xa8] sm:$0xff] %vm15_vm0, %v12863_v0  ;;  %v146_v16 = vld [vmem:[%s12859_s0 + $0xa8] sm:$0xff] }
  0x17   :  { %1116 = vrot.lane.b32.xlu0 %v743_v18, %s6587_s12  ;;  %39 = vst.msk [vmem:[#allocation2 + $0xb0] sm:$0xff] %vm15_vm0, %v12863_v0 }
  0x18   :  { %40 = vst.msk [vmem:[#allocation2 + $0xb8] sm:$0x3] %vm18_vm1, %v12863_v0 }
  0x19   :  { %41 = vst.msk [vmem:[#allocation2 + $0xc0] sm:$0xff] %vm15_vm0, %v12863_v0 }
  0x1a   :  { %42 = vst.msk [vmem:[#allocation2 + $0xc8] sm:$0xff] %vm15_vm0, %v12863_v0 }
  0x1b   :  { %43 = vst.msk [vmem:[#allocation2 + $0xd0] sm:$0x3] %vm18_vm1, %v12863_v0 }
  0x1c   :  { %44 = vst.msk [vmem:[#allocation2 + $0xd8] sm:$0xff] %vm15_vm0, %v12863_v0 }
  0x1d   :  { %45 = vst.msk [vmem:[#allocation2 + $0xe0] sm:$0xff] %vm15_vm0, %v12863_v0 }
  0x1e   :  { %46 = vst.msk [vmem:[#allocation2 + $0xe8] sm:$0x3] %vm18_vm1, %v12863_v0 }
  0x1f   :  { %47 = vst.msk [vmem:[#allocation2 + $0xf0] sm:$0xff] %vm15_vm0, %v12863_v0 }
  0x20   :  { %48 = vst.msk [vmem:[#allocation2 + $0xf8] sm:$0xff] %vm15_vm0, %v12863_v0 }
  0x21   :  { %49 = vst.msk [vmem:[#allocation2 + $0x100] sm:$0x3] %vm18_vm1, %v12863_v0 }
  0x22   :  { %50 = vst.msk [vmem:[#allocation2 + $0x108] sm:$0xff] %vm15_vm0, %v12863_v0 }
  0x23   :  { %51 = vst.msk [vmem:[#allocation2 + $0x110] sm:$0xff] %vm15_vm0, %v12863_v0 }
  0x24   :  { %52 = vst.msk [vmem:[#allocation2 + $0x118] sm:$0x3] %vm18_vm1, %v12863_v0 }
  0x25   :  { %53 = vst.msk [vmem:[#allocation2 + $0x120] sm:$0xff] %vm15_vm0, %v12863_v0 }
  0x26   :  { %54 = vst.msk [vmem:[#allocation2 + $0x128] sm:$0xff] %vm15_vm0, %v12863_v0 }
  0x27   :  { %55 = vst.msk [vmem:[#allocation2 + $0x130] sm:$0x3] %vm18_vm1, %v12863_v0 }
  0x28   :  { %56 = vst.msk [vmem:[#allocation2 + $0x138] sm:$0xff] %vm15_vm0, %v12863_v0 }
  0x29   :  { %57 = vst.msk [vmem:[#allocation2 + $0x140] sm:$0xff] %vm15_vm0, %v12863_v0 }
  0x2a   :  { %58 = vst.msk [vmem:[#allocation2 + $0x148] sm:$0x3] %vm18_vm1, %v12863_v0 }
  0x2b   :  { %59 = vst.msk [vmem:[#allocation2 + $0x150] sm:$0xff] %vm15_vm0, %v12863_v0 }
  0x2c   :  { %60 = vst.msk [vmem:[#allocation2 + $0x158] sm:$0xff] %vm15_vm0, %v12863_v0 }
  0x2d   :  { %61 = vst.msk [vmem:[#allocation2 + $0x160] sm:$0x3] %vm18_vm1, %v12863_v0 }
  0x2e   :  { %62 = vst.msk [vmem:[#allocation2 + $0x168] sm:$0xff] %vm15_vm0, %v12863_v0 }
  0x2f   :  { %63 = vst.msk [vmem:[#allocation2 + $0x170] sm:$0xff] %vm15_vm0, %v12863_v0 }
  0x30   :  { %64 = vst.msk [vmem:[#allocation2 + $0x178] sm:$0x3] %vm18_vm1, %v12863_v0 }
  0x31   :  { %65 = vst.msk [vmem:[#allocation2 + $0x180] sm:$0xff] %vm15_vm0, %v12863_v0 }
  0x32   :  { %66 = vst.msk [vmem:[#allocation2 + $0x188] sm:$0xff] %vm15_vm0, %v12863_v0 }
  0x33   :  { %67 = vst.msk [vmem:[#allocation2 + $0x190] sm:$0x3] %vm18_vm1, %v12863_v0 }
  0x34   :  { %68 = vst.msk [vmem:[#allocation2 + $0x198] sm:$0xff] %vm15_vm0, %v12863_v0 }
  0x35   :  { %69 = vst.msk [vmem:[#allocation2 + $0x1a0] sm:$0xff] %vm15_vm0, %v12863_v0 }
  0x36   :  { %70 = vst.msk [vmem:[#allocation2 + $0x1a8] sm:$0x3] %vm18_vm1, %v12863_v0 }
  0x37   :  { %71 = vst.msk [vmem:[#allocation2 + $0x1b0] sm:$0xff] %vm15_vm0, %v12863_v0 }
  0x38   :  { %72 = vst.msk [vmem:[#allocation2 + $0x1b8] sm:$0xff] %vm15_vm0, %v12863_v0 }
  0x39   :  { %73 = vst.msk [vmem:[#allocation2 + $0x1c0] sm:$0x3] %vm18_vm1, %v12863_v0 }
  0x3a   :  { %74 = vst.msk [vmem:[#allocation2 + $0x1c8] sm:$0xff] %vm15_vm0, %v12863_v0 }
  0x3b   :  { %75 = vst.msk [vmem:[#allocation2 + $0x1d0] sm:$0xff] %vm15_vm0, %v12863_v0 }
  0x3c   :  { %76 = vst.msk [vmem:[#allocation2 + $0x1d8] sm:$0x3] %vm18_vm1, %v12863_v0 }
  0x3d   :  { %77 = vst.msk [vmem:[#allocation2 + $0x1e0] sm:$0xff] %vm15_vm0, %v12863_v0 }
  0x3e   :  { %78 = vst.msk [vmem:[#allocation2 + $0x1e8] sm:$0xff] %vm15_vm0, %v12863_v0 }
  0x3f   :  { %79 = vst.msk [vmem:[#allocation2 + $0x1f0] sm:$0x3] %vm18_vm1, %v12863_v0 }
  0x40   :  { %80 = vst.msk [vmem:[#allocation2 + $0x1f8] sm:$0xff] %vm15_vm0, %v12863_v0 }
  0x41   :  { %81 = vst.msk [vmem:[#allocation2 + $0x200] sm:$0xff] %vm15_vm0, %v12863_v0 }
  0x42   :  { %82 = vst.msk [vmem:[#allocation2 + $0x208] sm:$0x3] %vm18_vm1, %v12863_v0 }
  0x43   :  { %83 = vst.msk [vmem:[#allocation2 + $0x210] sm:$0xff] %vm15_vm0, %v12863_v0 }
  0x44   :  { %84 = vst.msk [vmem:[#allocation2 + $0x218] sm:$0xff] %vm15_vm0, %v12863_v0 }
  0x45   :  { %85 = vst.msk [vmem:[#allocation2 + $0x220] sm:$0x3] %vm18_vm1, %v12863_v0 }
  0x46   :  { %86 = vst.msk [vmem:[#allocation2 + $0x228] sm:$0xff] %vm15_vm0, %v12863_v0 }
  0x47   :  { %87 = vst.msk [vmem:[#allocation2 + $0x230] sm:$0xff] %vm15_vm0, %v12863_v0 }
  0x48   :  { %88 = vst.msk [vmem:[#allocation2 + $0x238] sm:$0x3] %vm18_vm1, %v12863_v0 }
  0x49   :  { %89 = vst.msk [vmem:[#allocation2 + $0x240] sm:$0xff] %vm15_vm0, %v12863_v0 }
  0x4a   :  { %90 = vst.msk [vmem:[#allocation2 + $0x248] sm:$0xff] %vm15_vm0, %v12863_v0 }
  0x4b   :  { %91 = vst.msk [vmem:[#allocation2 + $0x250] sm:$0x3] %vm18_vm1, %v12863_v0 }
  0x4c   :  { %92 = vst.msk [vmem:[#allocation2 + $0x258] sm:$0xff] %vm15_vm0, %v12863_v0 }
  0x4d   :  { %93 = vst.msk [vmem:[#allocation2 + $0x260] sm:$0xff] %vm15_vm0, %v12863_v0 }
  0x4e   :  { %94 = vst.msk [vmem:[#allocation2 + $0x268] sm:$0x3] %vm18_vm1, %v12863_v0 }
  0x4f   :  { %95 = vst.msk [vmem:[#allocation2 + $0x270] sm:$0xff] %vm15_vm0, %v12863_v0 }
  0x50   :  { %96 = vst.msk [vmem:[#allocation2 + $0x278] sm:$0xff] %vm15_vm0, %v12863_v0 }
  0x51   :  { %97 = vst.msk [vmem:[#allocation2 + $0x280] sm:$0x3] %vm18_vm1, %v12863_v0 }
  0x52   :  { %98 = vst.msk [vmem:[#allocation2 + $0x288] sm:$0xff] %vm15_vm0, %v12863_v0 }
  0x53   :  { %99 = vst.msk [vmem:[#allocation2 + $0x290] sm:$0xff] %vm15_vm0, %v12863_v0 }
  0x54   :  { %100 = vst.msk [vmem:[#allocation2 + $0x298] sm:$0x3] %vm18_vm1, %v12863_v0 }
  0x55   :  { %101 = vst.msk [vmem:[#allocation2 + $0x2a0] sm:$0xff] %vm15_vm0, %v12863_v0 }
  0x56   :  { %102 = vst.msk [vmem:[#allocation2 + $0x2a8] sm:$0xff] %vm15_vm0, %v12863_v0 }
  0x57   :  { %103 = vst.msk [vmem:[#allocation2 + $0x2b0] sm:$0x3] %vm18_vm1, %v12863_v0 }
  0x58   :  { %104 = vst.msk [vmem:[#allocation2 + $0x2b8] sm:$0xff] %vm15_vm0, %v12863_v0 }
  0x59   :  { %105 = vst.msk [vmem:[#allocation2 + $0x2c0] sm:$0xff] %vm15_vm0, %v12863_v0 }
  0x5a   :  { %106 = vst.msk [vmem:[#allocation2 + $0x2c8] sm:$0x3] %vm18_vm1, %v12863_v0 }
  0x5b   :  { %107 = vst.msk [vmem:[#allocation2 + $0x2d0] sm:$0xff] %vm15_vm0, %v12863_v0 }
  0x5c   :  { %108 = vst.msk [vmem:[#allocation2 + $0x2d8] sm:$0xff] %vm15_vm0, %v12863_v0 }
  0x5d   :  { %109 = vst.msk [vmem:[#allocation2 + $0x2e0] sm:$0x3] %vm18_vm1, %v12863_v0 }
  0x5e   :  { %110 = vst.msk [vmem:[#allocation2 + $0x2e8] sm:$0xff] %vm15_vm0, %v12863_v0 }
  0x5f   :  { %111 = vst.msk [vmem:[#allocation2 + $0x2f0] sm:$0xff] %vm15_vm0, %v12863_v0 }
  0x60   :  { %112 = vst.msk [vmem:[#allocation2 + $0x2f8] sm:$0x3] %vm18_vm1, %v12863_v0 }
  0x61   :  { %113 = vst.msk [vmem:[#allocation2 + $0x300] sm:$0xff] %vm15_vm0, %v12863_v0 }
  0x62   :  { %114 = vst.msk [vmem:[#allocation2 + $0x308] sm:$0xff] %vm15_vm0, %v12863_v0 }
  0x63   :  { %115 = vst.msk [vmem:[#allocation2 + $0x310] sm:$0x3] %vm18_vm1, %v12863_v0 }
  0x64   :  { %116 = vst.msk [vmem:[#allocation2 + $0x318] sm:$0xff] %vm15_vm0, %v12863_v0 }
  0x65   :  { %117 = vst.msk [vmem:[#allocation2 + $0x320] sm:$0xff] %vm15_vm0, %v12863_v0 }
  0x66   :  { %118 = vst.msk [vmem:[#allocation2 + $0x328] sm:$0x3] %vm18_vm1, %v12863_v0 }
  0x67   :  { %119 = vst.msk [vmem:[#allocation2 + $0x330] sm:$0xff] %vm15_vm0, %v12863_v0 }
  0x68   :  { %120 = vst.msk [vmem:[#allocation2 + $0x338] sm:$0xff] %vm15_vm0, %v12863_v0 }
  0x69   :  { %121 = vst.msk [vmem:[#allocation2 + $0x340] sm:$0x3] %vm18_vm1, %v12863_v0 }
  0x6a   :  { %122 = vst.msk [vmem:[#allocation2 + $0x348] sm:$0xff] %vm15_vm0, %v12863_v0 }
  0x6b   :  { %123 = vst.msk [vmem:[#allocation2 + $0x350] sm:$0xff] %vm15_vm0, %v12863_v0 }
  0x6c   :  { %124 = vst.msk [vmem:[#allocation2 + $0x358] sm:$0x3] %vm18_vm1, %v12863_v0 }
  0x6d   :  { %196 = vst.msk [vmem:[#allocation2 + $0x61] sm:$0xff] %vm15_vm0, %v131_v19 }
  0x6e   :  { %197 = vst.msk [vmem:[#allocation2 + $0x69] sm:$0xff] %vm15_vm0, %v132_v20 }
  0x6f   :  { %192 = vst.msk [vmem:[#allocation2 + $0x31] sm:$0xff] %vm15_vm0, %v127_v21  ;;  %v143_v21 = vld [vmem:[%s12859_s0 + $0x90] sm:$0xff] }
  0x70   :  { %193 = vst.msk [vmem:[#allocation2 + $0x39] sm:$0xff] %vm15_vm0, %v128_v22 }
  0x71   :  { %190 = vst.msk [vmem:[#allocation2 + $0x19] sm:$0xff] %vm15_vm0, %v125_v23 }
  0x72   :  { %191 = vst.msk [vmem:[#allocation2 + $0x21] sm:$0xff] %vm15_vm0, %v126_v24 }
  0x73   :  { %198 = vst.msk [vmem:[#allocation2 + $0x79] sm:$0xff] %vm15_vm0, %v133_v25 }
  0x74   :  { %v266_v29 = vld [vmem:[#allocation2 + $0x60] sm:$0xff]  ;;  %199 = vst.msk [vmem:[#allocation2 + $0x81] sm:$0xff] %vm15_vm0, %v134_v26  ;;  %v144_v26 = vld [vmem:[%s12859_s0 + $0x98] sm:$0xff] }
  0x75   :  { %v267_v31 = vld [vmem:[#allocation2 + $0x68] sm:$0xff]  ;;  %v268_v32 = vld [vmem:[#allocation2 + $0x70] sm:$0x3]  ;;  %v375_v33 = vpack.c.bf16 %v266_v29, %v266_v29  ;;  %194 = vst.msk [vmem:[#allocation2 + $0x49] sm:$0xff] %vm15_vm0, %v129_v27 }
  0x76   :  { %v376_v35 = vpack.c.bf16 %v267_v31, %v267_v31  ;;  %v435_v36 = vpack.c.bf16 %v268_v32, %v268_v32  ;;  %v260_v37 = vld [vmem:[#allocation2 + $0x30] sm:$0xff]  ;;  %195 = vst.msk [vmem:[#allocation2 + $0x51] sm:$0xff] %vm15_vm0, %v130_v28 }
  0x77   :  { %v547_v39 = vunpack.c.l.b16 %v375_v33  ;;  %v261_v40 = vld [vmem:[#allocation2 + $0x38] sm:$0xff]  ;;  %v262_v41 = vld [vmem:[#allocation2 + $0x40] sm:$0x3]  ;;  %v371_v42 = vpack.c.bf16 %v260_v37, %v260_v37  ;;  %200 = vst.msk [vmem:[#allocation2 + $0x91] sm:$0xff] %vm15_vm0, %v135_v30  ;;  %v147_v33 = vld [vmem:[%s12859_s0 + $0xb0] sm:$0xff] }
  0x78   :  { %v548_v44 = vunpack.c.l.b16 %v376_v35  ;;  %v671_v45 = vunpack.c.l.b16 %v435_v36  ;;  %v372_v46 = vpack.c.bf16 %v261_v40, %v261_v40  ;;  %v433_v47 = vpack.c.bf16 %v262_v41, %v262_v41  ;;  %v257_v48 = vld [vmem:[#allocation2 + $0x18] sm:$0xff]  ;;  %201 = vst.msk [vmem:[#allocation2 + $0x99] sm:$0xff] %vm15_vm0, %v136_v34 }
  0x79   :  { %v543_v50 = vunpack.c.l.b16 %v371_v42  ;;  %v258_v51 = vld [vmem:[#allocation2 + $0x20] sm:$0xff]  ;;  %v259_v52 = vld [vmem:[#allocation2 + $0x28] sm:$0x3]  ;;  %v369_v53 = vpack.c.bf16 %v257_v48, %v257_v48  ;;  %204 = vst.msk [vmem:[#allocation2 + $0xc1] sm:$0xff] %vm15_vm0, %v139_v38  ;;  %v148_v38 = vld [vmem:[%s12859_s0 + $0xb8] sm:$0xff] }
  0x7a   :  { %v6906_v55 = vpack.c.b16 %v548_v44, %v547_v39  ;;  %v6908_v56 = vpack.c.b16 %v671_v45, %v671_v45  ;;  %v544_v57 = vunpack.c.l.b16 %v372_v46  ;;  %v669_v58 = vunpack.c.l.b16 %v433_v47  ;;  %v269_v59 = vld [vmem:[#allocation2 + $0x78] sm:$0xff]  ;;  %205 = vst.msk [vmem:[#allocation2 + $0xc9] sm:$0xff] %vm15_vm0, %v140_v43  ;;  %v151_v44 = vld [vmem:[%s12859_s0 + $0xd0] sm:$0xff] }
  0x7b   :  { %v370_v61 = vpack.c.bf16 %v258_v51, %v258_v51  ;;  %v432_v62 = vpack.c.bf16 %v259_v52, %v259_v52  ;;  %v541_v63 = vunpack.c.l.b16 %v369_v53  ;;  %v270_v1 = vld [vmem:[#allocation2 + $0x80] sm:$0xff]  ;;  %v377_v2 = vpack.c.bf16 %v269_v59, %v269_v59  ;;  %202 = vst.msk [vmem:[#allocation2 + $0xa9] sm:$0xff] %vm15_vm0, %v137_v49  ;;  %v271_v9 = vld [vmem:[#allocation2 + $0x88] sm:$0x3]  ;;  %v152_v51 = vld [vmem:[%s12859_s0 + $0xd8] sm:$0xff] }
  0x7c   :  { %v781_v5 = vshrl.u32 %v6906_v55, 16  ;;  %v783_v6 = vshll.u32 %v6906_v55, 16  ;;  %v788_v7 = vshll.u32 %v6908_v56, 16  ;;  %v6924_v8 = vpack.c.b16 %v544_v57, %v543_v50  ;;  %203 = vst.msk [vmem:[#allocation2 + $0xb1] sm:$0xff] %vm15_vm0, %v138_v54  ;;  %v263_v31 = vld [vmem:[#allocation2 + $0x48] sm:$0xff]  ;;  %v149_v59 = vld [vmem:[%s12859_s0 + $0xc0] sm:$0xff] }
  0x7d   :  { %v6927_v12 = vpack.c.b16 %v669_v58, %v669_v58  ;;  %v542_v13 = vunpack.c.l.b16 %v370_v61  ;;  %v668_v14 = vunpack.c.l.b16 %v432_v62  ;;  %v378_v15 = vpack.c.bf16 %v270_v1, %v270_v1  ;;  %206 = vst.msk [vmem:[#allocation2 + $0xd9] sm:$0xff] %vm15_vm0, %v141_v60  ;;  %v264_v32 = vld [vmem:[#allocation2 + $0x50] sm:$0xff]  ;;  %v265_v43 = vld [vmem:[#allocation2 + $0x58] sm:$0x3]  ;;  %v150_v1 = vld [vmem:[%s12859_s0 + $0xc8] sm:$0xff] }
  0x7e   :  { %v785_v17 = vrot.slane %v783_v6, 1  ;;  %v790_v18 = vrot.slane %v788_v7, 1  ;;  %v757_v19 = vshrl.u32 %v6924_v8, 16  ;;  %v759_v20 = vshll.u32 %v6924_v8, 16  ;;  %207 = vst.msk [vmem:[#allocation2 + $0xe1] sm:$0xff] %vm15_vm0, %v142_v3  ;;  %v272_v49 = vld [vmem:[#allocation2 + $0x90] sm:$0xff] }
  0x7f   :  { %v764_v22 = vshll.u32 %v6927_v12, 16  ;;  %v6940_v23 = vpack.c.b16 %v542_v13, %v541_v63  ;;  %v6942_v24 = vpack.c.b16 %v668_v14, %v668_v14  ;;  %v436_v25 = vpack.c.bf16 %v271_v9, %v271_v9  ;;  %210 = vst.msk [vmem:[#allocation2 + $0x109] sm:$0xff] %vm15_vm0, %v145_v4  ;;  %v273_v50 = vld [vmem:[#allocation2 + $0x98] sm:$0xff]  ;;  %v274_v58 = vld [vmem:[#allocation2 + $0xa0] sm:$0x3] }
  0x80   :  { %v786_v27 = vor.u32 %v785_v17, %v781_v5  ;;  %v761_v28 = vrot.slane %v759_v20, 1  ;;  %v549_v29 = vunpack.c.l.b16 %v377_v2  ;;  %v550_v30 = vunpack.c.l.b16 %v378_v15  ;;  %211 = vst.msk [vmem:[#allocation2 + $0x111] sm:$0xff] %vm15_vm0, %v146_v16  ;;  %v153_v6 = vld [vmem:[%s12859_s0 + $0xe0] sm:$0xff]  ;;  %v154_v17 = vld [vmem:[%s12859_s0 + $0xe8] sm:$0xff] }
  0x81   :  { %v766_v34 = vrot.slane %v764_v22, 1  ;;  %v745_v35 = vshrl.u32 %v6940_v23, 16  ;;  %v747_v36 = vshll.u32 %v6940_v23, 16  ;;  %v752_v37 = vshll.u32 %v6942_v24, 16  ;;  %208 = vst.msk [vmem:[#allocation2 + $0xf1] sm:$0xff] %vm15_vm0, %v143_v21  ;;  %v278_v15 = vld [vmem:[#allocation2 + $0xc0] sm:$0xff] }
  0x82   :  { %v6960_v39 = vsel %vm731_vm2, %v786_v27, %v790_v18  ;;  %v762_v40 = vor.u32 %v761_v28, %v757_v19  ;;  %v6962_v41 = vpack.c.b16 %v550_v30, %v549_v29  ;;  %v672_v42 = vunpack.c.l.b16 %v436_v25  ;;  %209 = vst.msk [vmem:[#allocation2 + $0xf9] sm:$0xff] %vm15_vm0, %v144_v26  ;;  %v279_v16 = vld [vmem:[#allocation2 + $0xc8] sm:$0xff]  ;;  %v280_v22 = vld [vmem:[#allocation2 + $0xd0] sm:$0x3]  ;;  %v157_v25 = vld [vmem:[%s12859_s0 + $0x100] sm:$0xff] }
  0x83   :  { %13151 = vst [vmem:[#allocation4_spill] sm:$0xff] %v6960_v39  ;;  %1124 = vrot.lane.b32.xlu2 %v6960_v39, %s6587_s12  ;;  %v749_v45 = vrot.slane %v747_v36, 1  ;;  %v754_v46 = vrot.slane %v752_v37, 1  ;;  %v373_v47 = vpack.c.bf16 %v263_v31, %v263_v31  ;;  %v374_v48 = vpack.c.bf16 %v264_v32, %v264_v32  ;;  %v158_v30 = vld [vmem:[%s12859_s0 + $0x108] sm:$0xff] }
  0x84   :  { %212 = vst.msk [vmem:[#allocation2 + $0x121] sm:$0xff] %vm15_vm0, %v147_v33  ;;  %v6975_v52 = vsel %vm731_vm2, %v762_v40, %v766_v34  ;;  %v6977_v53 = vpack.c.b16 %v672_v42, %v672_v42  ;;  %v793_v54 = vshrl.u32 %v6962_v41, 16  ;;  %v795_v57 = vshll.u32 %v6962_v41, 16  ;;  %v275_v40 = vld [vmem:[#allocation2 + $0xa8] sm:$0xff]  ;;  %v276_v42 = vld [vmem:[#allocation2 + $0xb0] sm:$0xff] }
  0x85   :  { %13152 = vst [vmem:[#allocation5_spill] sm:$0xff] %v6975_v52  ;;  %1120 = vrot.lane.b32.xlu1 %v6975_v52, %s6587_s12  ;;  %v750_v60 = vor.u32 %v749_v45, %v745_v35  ;;  %v434_v61 = vpack.c.bf16 %v265_v43, %v265_v43  ;;  %v545_v62 = vunpack.c.l.b16 %v373_v47  ;;  %v546_v63 = vunpack.c.l.b16 %v374_v48  ;;  %v277_v47 = vld [vmem:[#allocation2 + $0xb8] sm:$0x3] }
  0x86   :  { %213 = vst.msk [vmem:[#allocation2 + $0x129] sm:$0xff] %vm15_vm0, %v148_v38  ;;  %v797_v2 = vrot.slane %v795_v57, 1  ;;  %v800_v3 = vshll.u32 %v6977_v53, 16  ;;  %v379_v4 = vpack.c.bf16 %v272_v49, %v272_v49  ;;  %v380_v5 = vpack.c.bf16 %v273_v50, %v273_v50 }
  0x87   :  { %216 = vst.msk [vmem:[#allocation2 + $0x151] sm:$0xff] %vm15_vm0, %v151_v44  ;;  %v6997_v7 = vsel %vm731_vm2, %v750_v60, %v754_v46  ;;  %v6999_v9 = vpack.c.b16 %v546_v63, %v545_v62  ;;  %v670_v13 = vunpack.c.l.b16 %v434_v61  ;;  %v437_v14 = vpack.c.bf16 %v274_v58, %v274_v58  ;;  %v281_v60 = vld [vmem:[#allocation2 + $0xd8] sm:$0xff]  ;;  %v159_v61 = vld [vmem:[%s12859_s0 + $0x110] sm:$0xff] }
  0x88   :  { %217 = vst.msk [vmem:[#allocation2 + $0x159] sm:$0xff] %vm15_vm0, %v152_v51  ;;  %1118 = vrot.lane.b32.xlu0 %v6997_v7, %s6587_s12  ;;  %v798_v18 = vor.u32 %v797_v2, %v793_v54  ;;  %v802_v19 = vrot.slane %v800_v3, 1  ;;  %v551_v20 = vunpack.c.l.b16 %v379_v4  ;;  %v552_v21 = vunpack.c.l.b16 %v380_v5  ;;  %v282_v3 = vld [vmem:[#allocation2 + $0xe0] sm:$0xff]  ;;  %v283_v4 = vld [vmem:[#allocation2 + $0xe8] sm:$0x3]  ;;  %v160_v5 = vld [vmem:[%s12859_s0 + $0x118] sm:$0xff] }
  0x89   :  { %13153 = vst [vmem:[#allocation6_spill] sm:$0xff] %v6997_v7  ;;  %v7011_v26 = vpack.c.b16 %v670_v13, %v670_v13  ;;  %v769_v27 = vshrl.u32 %v6999_v9, 16  ;;  %v771_v28 = vshll.u32 %v6999_v9, 16  ;;  %v673_v29 = vunpack.c.l.b16 %v437_v14 }
  0x8a   :  { %214 = vst.msk [vmem:[#allocation2 + $0x139] sm:$0xff] %vm15_vm0, %v149_v59  ;;  %v7020_v31 = vsel %vm731_vm2, %v798_v18, %v802_v19  ;;  %v7022_v32 = vpack.c.b16 %v552_v21, %v551_v20  ;;  %v383_v33 = vpack.c.bf16 %v278_v15, %v278_v15  ;;  %v384_v34 = vpack.c.bf16 %v279_v16, %v279_v16  ;;  %v163_v16 = vld [vmem:[%s12859_s0 + $0x130] sm:$0xff] }
  0x8b   :  { %215 = vst.msk [vmem:[#allocation2 + $0x141] sm:$0xff] %vm15_vm0, %v150_v1  ;;  %1126 = vrot.lane.b32.xlu2 %v7020_v31, %s6587_s12  ;;  %v773_v35 = vrot.slane %v771_v28, 1  ;;  %v776_v36 = vshll.u32 %v7011_v26, 16  ;;  %v7028_v37 = vpack.c.b16 %v673_v29, %v673_v29  ;;  %v439_v38 = vpack.c.bf16 %v280_v22, %v280_v22  ;;  %v287_v22 = vld [vmem:[#allocation2 + $0x108] sm:$0xff] }
  0x8c   :  { %218 = vst.msk [vmem:[#allocation2 + $0x169] sm:$0xff] %vm15_vm0, %v153_v6  ;;  %v805_v43 = vshrl.u32 %v7022_v32, 16  ;;  %v807_v44 = vshll.u32 %v7022_v32, 16  ;;  %v555_v45 = vunpack.c.l.b16 %v383_v33  ;;  %v556_v46 = vunpack.c.l.b16 %v384_v34  ;;  %v288_v33 = vld [vmem:[#allocation2 + $0x110] sm:$0xff]  ;;  %v162_v34 = vld [vmem:[%s12859_s0 + $0x128] sm:$0xff] }
  0x8d   :  { %13154 = vst [vmem:[#allocation7_spill] sm:$0xff] %v7020_v31  ;;  %v774_v48 = vor.u32 %v773_v35, %v769_v27  ;;  %v778_v49 = vrot.slane %v776_v36, 1  ;;  %v812_v50 = vshll.u32 %v7028_v37, 16  ;;  %v675_v51 = vunpack.c.l.b16 %v439_v38 }
  0x8e   :  { %219 = vst.msk [vmem:[#allocation2 + $0x171] sm:$0xff] %vm15_vm0, %v154_v17  ;;  %v809_v54 = vrot.slane %v807_v44, 1  ;;  %v7035_v57 = vpack.c.b16 %v556_v46, %v555_v45  ;;  %v381_v58 = vpack.c.bf16 %v275_v40, %v275_v40  ;;  %v382_v59 = vpack.c.bf16 %v276_v42, %v276_v42  ;;  %v164_v17 = vld [vmem:[%s12859_s0 + $0x138] sm:$0xff] }
  0x8f   :  { %222 = vst.msk [vmem:[#allocation2 + $0x1c9] sm:$0xff] %vm15_vm0, %v157_v25  ;;  %v7041_v62 = vsel %vm731_vm2, %v774_v48, %v778_v49  ;;  %v814_v63 = vrot.slane %v812_v50, 1  ;;  %v7043_v1 = vpack.c.b16 %v675_v51, %v675_v51  ;;  %v438_v2 = vpack.c.bf16 %v277_v47, %v277_v47  ;;  %v161_v25 = vld [vmem:[%s12859_s0 + $0x120] sm:$0xff]  ;;  %v289_v42 = vld [vmem:[#allocation2 + $0x118] sm:$0x3] }
  0x90   :  { %223 = vst.msk [vmem:[#allocation2 + $0x1d1] sm:$0xff] %vm15_vm0, %v158_v30  ;;  %1122 = vrot.lane.b32.xlu1 %v7041_v62, %s6587_s12  ;;  %v810_v6 = vor.u32 %v809_v54, %v805_v43  ;;  %v829_v13 = vshrl.u32 %v7035_v57, 16  ;;  %v831_v14 = vshll.u32 %v7035_v57, 16  ;;  %v553_v15 = vunpack.c.l.b16 %v381_v58 }
  0x91   :  { %13155 = vst [vmem:[#allocation8_spill] sm:$0xff] %v7041_v62  ;;  %v836_v18 = vshll.u32 %v7043_v1, 16  ;;  %v554_v19 = vunpack.c.l.b16 %v382_v59  ;;  %v674_v20 = vunpack.c.l.b16 %v438_v2  ;;  %v385_v21 = vpack.c.bf16 %v281_v60, %v281_v60  ;;  %v284_v60 = vld [vmem:[#allocation2 + $0xf0] sm:$0xff] }
  0x92   :  { %224 = vst.msk [vmem:[#allocation2 + $0x1e1] sm:$0xff] %vm15_vm0, %v159_v61  ;;  %v7066_v27 = vsel %vm731_vm2, %v810_v6, %v814_v63  ;;  %v833_v28 = vrot.slane %v831_v14, 1  ;;  %v386_v29 = vpack.c.bf16 %v282_v3, %v282_v3  ;;  %v440_v30 = vpack.c.bf16 %v283_v4, %v283_v4  ;;  %v285_v61 = vld [vmem:[#allocation2 + $0xf8] sm:$0xff] }
  0x93   :  { %225 = vst.msk [vmem:[#allocation2 + $0x1e9] sm:$0xff] %vm15_vm0, %v160_v5  ;;  %1128 = vrot.lane.b32.xlu0 %v7066_v27, %s6587_s12  ;;  %v838_v35 = vrot.slane %v836_v18, 1  ;;  %v7074_v36 = vpack.c.b16 %v554_v19, %v553_v15  ;;  %v7076_v38 = vpack.c.b16 %v674_v20, %v674_v20  ;;  %v557_v40 = vunpack.c.l.b16 %v385_v21  ;;  %v286_v5 = vld [vmem:[#allocation2 + $0x100] sm:$0x3]  ;;  %v292_v21 = vld [vmem:[#allocation2 + $0x130] sm:$0x3] }
  0x94   :  { %228 = vst.msk [vmem:[#allocation2 + $0x211] sm:$0xff] %vm15_vm0, %v163_v16  ;;  %v834_v43 = vor.u32 %v833_v28, %v829_v13  ;;  %v558_v44 = vunpack.c.l.b16 %v386_v29  ;;  %v676_v45 = vunpack.c.l.b16 %v440_v30  ;;  %v389_v46 = vpack.c.bf16 %v287_v22, %v287_v22  ;;  %v290_v20 = vld [vmem:[#allocation2 + $0x120] sm:$0xff] }
  0x95   :  { %13156 = vst [vmem:[#allocation9_spill] sm:$0xff] %v7066_v27  ;;  %v817_v47 = vshrl.u32 %v7074_v36, 16  ;;  %v819_v48 = vshll.u32 %v7074_v36, 16  ;;  %v824_v49 = vshll.u32 %v7076_v38, 16  ;;  %v390_v50 = vpack.c.bf16 %v288_v33, %v288_v33  ;;  %v165_v22 = vld [vmem:[%s12859_s0 + $0x140] sm:$0xff]  ;;  %v291_v33 = vld [vmem:[#allocation2 + $0x128] sm:$0xff] }
  0x96   :  { %229 = vst.msk [vmem:[#allocation2 + $0x219] sm:$0xff] %vm15_vm0, %v164_v17  ;;  %v7084_v51 = vsel %vm731_vm2, %v834_v43, %v838_v35  ;;  %v7086_v54 = vpack.c.b16 %v558_v44, %v557_v40  ;;  %v7088_v58 = vpack.c.b16 %v676_v45, %v676_v45  ;;  %v442_v59 = vpack.c.bf16 %v289_v42, %v289_v42  ;;  %v169_v35 = vld [vmem:[%s12859_s0 + $0x160] sm:$0xff] }
  0x97   :  { %226 = vst.msk [vmem:[#allocation2 + $0x1f9] sm:$0xff] %vm15_vm0, %v161_v25  ;;  %1132 = vrot.lane.b32.xlu2 %v7084_v51, %s6587_s12  ;;  %v821_v63 = vrot.slane %v819_v48, 1  ;;  %v826_v2 = vrot.slane %v824_v49, 1  ;;  %v561_v3 = vunpack.c.l.b16 %v389_v46  ;;  %v562_v4 = vunpack.c.l.b16 %v390_v50  ;;  %v170_v49 = vld [vmem:[%s12859_s0 + $0x168] sm:$0xff]  ;;  %v167_v50 = vld [vmem:[%s12859_s0 + $0x150] sm:$0xff] }
  0x98   :  { %227 = vst.msk [vmem:[#allocation2 + $0x201] sm:$0xff] %vm15_vm0, %v162_v34  ;;  %v841_v6 = vshrl.u32 %v7086_v54, 16  ;;  %v843_v13 = vshll.u32 %v7086_v54, 16  ;;  %v848_v14 = vshll.u32 %v7088_v58, 16  ;;  %v678_v15 = vunpack.c.l.b16 %v442_v59  ;;  %v166_v34 = vld [vmem:[%s12859_s0 + $0x148] sm:$0xff]  ;;  %v168_v59 = vld [vmem:[%s12859_s0 + $0x158] sm:$0xff] }
  0x99   :  { %13157 = vst [vmem:[#allocation10_spill] sm:$0xff] %v7084_v51  ;;  %v822_v16 = vor.u32 %v821_v63, %v817_v47  ;;  %v7095_v17 = vpack.c.b16 %v562_v4, %v561_v3  ;;  %v387_v18 = vpack.c.bf16 %v284_v60, %v284_v60  ;;  %v388_v19 = vpack.c.bf16 %v285_v61, %v285_v61  ;;  %v296_v3 = vld [vmem:[#allocation2 + $0x150] sm:$0xff]  ;;  %v313_v0 = vld [vmem:[#allocation2 + $0x1d8] sm:$0x3] }
  0x9a   :  { %v845_v25 = vrot.slane %v843_v13, 1  ;;  %v850_v28 = vrot.slane %v848_v14, 1  ;;  %v7100_v29 = vpack.c.b16 %v678_v15, %v678_v15  ;;  %v441_v30 = vpack.c.bf16 %v286_v5, %v286_v5  ;;  %230 = vst.msk [vmem:[#allocation2 + $0x229] sm:$0xff] %vm15_vm0, %v165_v22  ;;  %v297_v14 = vld [vmem:[#allocation2 + $0x158] sm:$0xff] }
  0x9b   :  { %v7110_v40 = vsel %vm731_vm2, %v822_v16, %v826_v2  ;;  %v865_v42 = vshrl.u32 %v7095_v17, 16  ;;  %v867_v43 = vshll.u32 %v7095_v17, 16  ;;  %v559_v44 = vunpack.c.l.b16 %v387_v18  ;;  %231 = vst.msk [vmem:[#allocation2 + $0x231] sm:$0xff] %vm15_vm0, %v166_v34 }
  0x9c   :  { %13158 = vst [vmem:[#allocation11_spill] sm:$0xff] %v7110_v40  ;;  %1130 = vrot.lane.b32.xlu1 %v7110_v40, %s6587_s12  ;;  %v846_v45 = vor.u32 %v845_v25, %v841_v6  ;;  %v872_v46 = vshll.u32 %v7100_v29, 16  ;;  %v560_v47 = vunpack.c.l.b16 %v388_v19  ;;  %v677_v48 = vunpack.c.l.b16 %v441_v30 }
  0x9d   :  { %234 = vst.msk [vmem:[#allocation2 + $0x259] sm:$0xff] %vm15_vm0, %v169_v35  ;;  %v869_v60 = vrot.slane %v867_v43, 1  ;;  %v391_v61 = vpack.c.bf16 %v290_v20, %v290_v20  ;;  %v392_v63 = vpack.c.bf16 %v291_v33, %v291_v33  ;;  %v443_v2 = vpack.c.bf16 %v292_v21, %v292_v21  ;;  %v298_v20 = vld [vmem:[#allocation2 + $0x160] sm:$0x3] }
  0x9e   :  { %235 = vst.msk [vmem:[#allocation2 + $0x261] sm:$0xff] %vm15_vm0, %v170_v49  ;;  %v7130_v4 = vsel %vm731_vm2, %v846_v45, %v850_v28  ;;  %v874_v5 = vrot.slane %v872_v46, 1  ;;  %v7132_v6 = vpack.c.b16 %v560_v47, %v559_v44  ;;  %v7134_v13 = vpack.c.b16 %v677_v48, %v677_v48  ;;  %v294_v43 = vld [vmem:[#allocation2 + $0x140] sm:$0xff]  ;;  %v295_v48 = vld [vmem:[#allocation2 + $0x148] sm:$0x3] }
  0x9f   :  { %13159 = vst [vmem:[#allocation12_spill] sm:$0xff] %v7130_v4  ;;  %1134 = vrot.lane.b32.xlu0 %v7130_v4, %s6587_s12  ;;  %v870_v15 = vor.u32 %v869_v60, %v865_v42  ;;  %v563_v16 = vunpack.c.l.b16 %v391_v61  ;;  %v564_v18 = vunpack.c.l.b16 %v392_v63  ;;  %v679_v19 = vunpack.c.l.b16 %v443_v2  ;;  %v293_v42 = vld [vmem:[#allocation2 + $0x138] sm:$0xff] }
  0xa0   :  { %232 = vst.msk [vmem:[#allocation2 + $0x241] sm:$0xff] %vm15_vm0, %v167_v50  ;;  %v853_v21 = vshrl.u32 %v7132_v6, 16  ;;  %v855_v22 = vshll.u32 %v7132_v6, 16  ;;  %v860_v25 = vshll.u32 %v7134_v13, 16  ;;  %v395_v28 = vpack.c.bf16 %v296_v3, %v296_v3 }
  0xa1   :  { %233 = vst.msk [vmem:[#allocation2 + $0x249] sm:$0xff] %vm15_vm0, %v168_v59  ;;  %v7144_v30 = vsel %vm731_vm2, %v870_v15, %v874_v5  ;;  %v7146_v33 = vpack.c.b16 %v564_v18, %v563_v16  ;;  %v7148_v34 = vpack.c.b16 %v679_v19, %v679_v19  ;;  %v396_v35 = vpack.c.bf16 %v297_v14, %v297_v14  ;;  %v299_v5 = vld [vmem:[#allocation2 + $0x168] sm:$0xff]  ;;  %v300_v19 = vld [vmem:[#allocation2 + $0x170] sm:$0xff] }
  0xa2   :  { %13160 = vst [vmem:[#allocation13_spill] sm:$0xff] %v7144_v30  ;;  %1138 = vrot.lane.b32.xlu2 %v7144_v30, %s6587_s12  ;;  %v857_v44 = vrot.slane %v855_v22, 1  ;;  %v862_v45 = vrot.slane %v860_v25, 1  ;;  %v445_v46 = vpack.c.bf16 %v298_v20, %v298_v20  ;;  %v567_v47 = vunpack.c.l.b16 %v395_v28  ;;  %v171_v20 = vld [vmem:[%s12859_s0 + $0x170] sm:$0xff]  ;;  %v172_v22 = vld [vmem:[%s12859_s0 + $0x178] sm:$0xff]  ;;  %v323_v39 = vld [vmem:[#allocation2 + $0x228] sm:$0xff] }
  0xa3   :  { %v877_v49 = vshrl.u32 %v7146_v33, 16  ;;  %v879_v50 = vshll.u32 %v7146_v33, 16  ;;  %v884_v59 = vshll.u32 %v7148_v34, 16  ;;  %v568_v60 = vunpack.c.l.b16 %v396_v35  ;;  %236 = vst.msk [vmem:[#allocation2 + $0x271] sm:$0xff] %vm15_vm0, %v171_v20  ;;  %v311_v20 = vld [vmem:[#allocation2 + $0x1c8] sm:$0xff] }
  0xa4   :  { %v858_v61 = vor.u32 %v857_v44, %v853_v21  ;;  %v681_v63 = vunpack.c.l.b16 %v445_v46  ;;  %v393_v2 = vpack.c.bf16 %v293_v42, %v293_v42  ;;  %v394_v3 = vpack.c.bf16 %v294_v43, %v294_v43  ;;  %v301_v42 = vld [vmem:[#allocation2 + $0x178] sm:$0x3]  ;;  %v175_v43 = vld [vmem:[%s12859_s0 + $0x190] sm:$0xff]  ;;  %237 = vst.msk [vmem:[#allocation2 + $0x279] sm:$0xff] %vm15_vm0, %v172_v22 }
  0xa5   :  { %v881_v14 = vrot.slane %v879_v50, 1  ;;  %v886_v15 = vrot.slane %v884_v59, 1  ;;  %v7155_v16 = vpack.c.b16 %v568_v60, %v567_v47  ;;  %v444_v18 = vpack.c.bf16 %v295_v48, %v295_v48  ;;  %v176_v48 = vld [vmem:[%s12859_s0 + $0x198] sm:$0xff]  ;;  %v173_v50 = vld [vmem:[%s12859_s0 + $0x180] sm:$0xff]  ;;  %240 = vst.msk [vmem:[#allocation2 + $0x2a1] sm:$0xff] %vm15_vm0, %v175_v43  ;;  %v312_v22 = vld [vmem:[#allocation2 + $0x1d0] sm:$0xff] }
  0xa6   :  { %v7164_v21 = vsel %vm731_vm2, %v858_v61, %v862_v45  ;;  %v7166_v25 = vpack.c.b16 %v681_v63, %v681_v63  ;;  %v565_v28 = vunpack.c.l.b16 %v393_v2  ;;  %v566_v35 = vunpack.c.l.b16 %v394_v3  ;;  %v174_v63 = vld [vmem:[%s12859_s0 + $0x188] sm:$0xff]  ;;  %241 = vst.msk [vmem:[#allocation2 + $0x2a9] sm:$0xff] %vm15_vm0, %v176_v48  ;;  %v325_v52 = vld [vmem:[#allocation2 + $0x238] sm:$0x3] }
  0xa7   :  { %13161 = vst [vmem:[#allocation14_spill] sm:$0xff] %v7155_v16  ;;  %1136 = vrot.lane.b32.xlu1 %v7164_v21, %s6587_s12  ;;  %v882_v44 = vor.u32 %v881_v14, %v877_v49  ;;  %v901_v46 = vshrl.u32 %v7155_v16, 16  ;;  %v903_v45 = vshll.u32 %v7155_v16, 16  ;;  %v680_v47 = vunpack.c.l.b16 %v444_v18 }
  0xa8   :  { %13162 = vst [vmem:[#allocation15_spill] sm:$0xff] %v7164_v21  ;;  %v908_v59 = vshll.u32 %v7166_v25, 16  ;;  %v7184_v60 = vpack.c.b16 %v566_v35, %v565_v28  ;;  %v397_v49 = vpack.c.bf16 %v299_v5, %v299_v5  ;;  %v398_v61 = vpack.c.bf16 %v300_v19, %v300_v19 }
  0xa9   :  { %v7191_v2 = vsel %vm731_vm2, %v882_v44, %v886_v15  ;;  %v905_v3 = vrot.slane %v903_v45, 1  ;;  %v7193_v14 = vpack.c.b16 %v680_v47, %v680_v47  ;;  %v446_v18 = vpack.c.bf16 %v301_v42, %v301_v42  ;;  %238 = vst.msk [vmem:[#allocation2 + $0x289] sm:$0xff] %vm15_vm0, %v173_v50 }
  0xaa   :  { %13163 = vst [vmem:[#allocation16_spill] sm:$0xff] %v7191_v2  ;;  %1140 = vrot.lane.b32.xlu0 %v7191_v2, %s6587_s12  ;;  %v910_v5 = vrot.slane %v908_v59, 1  ;;  %v889_v19 = vshrl.u32 %v7184_v60, 16  ;;  %v891_v28 = vshll.u32 %v7184_v60, 16  ;;  %v569_v35 = vunpack.c.l.b16 %v397_v49  ;;  %v308_v2 = vld [vmem:[#allocation2 + $0x1b0] sm:$0xff] }
  0xab   :  { %v906_v15 = vor.u32 %v905_v3, %v901_v46  ;;  %v896_v43 = vshll.u32 %v7193_v14, 16  ;;  %v570_v42 = vunpack.c.l.b16 %v398_v61  ;;  %v682_v44 = vunpack.c.l.b16 %v446_v18  ;;  %239 = vst.msk [vmem:[#allocation2 + $0x291] sm:$0xff] %vm15_vm0, %v174_v63  ;;  %v309_v46 = vld [vmem:[#allocation2 + $0x1b8] sm:$0xff]  ;;  %v310_v18 = vld [vmem:[#allocation2 + $0x1c0] sm:$0x3] }
  0xac   :  { %v893_v45 = vrot.slane %v891_v28, 1  ;;  %v401_v47 = vpack.c.bf16 %v311_v20, %v311_v20  ;;  %v402_v48 = vpack.c.bf16 %v312_v22, %v312_v22  ;;  %v448_v30 = vpack.c.bf16 %v313_v0, %v313_v0  ;;  %v314_v28 = vld [vmem:[#allocation2 + $0x1e0] sm:$0xff] }
  0xad   :  { %v7204_v59 = vsel %vm731_vm2, %v906_v15, %v910_v5  ;;  %v898_v21 = vrot.slane %v896_v43, 1  ;;  %v7206_v4 = vpack.c.b16 %v570_v42, %v569_v35  ;;  %v7208_v49 = vpack.c.b16 %v682_v44, %v682_v44  ;;  %v315_v42 = vld [vmem:[#allocation2 + $0x1e8] sm:$0xff]  ;;  %v316_v44 = vld [vmem:[#allocation2 + $0x1f0] sm:$0x3] }
  0xae   :  { %13164 = vst [vmem:[#allocation17_spill] sm:$0xff] %v7204_v59  ;;  %1144 = vrot.lane.b32.xlu2 %v7204_v59, %s6587_s12  ;;  %v894_v50 = vor.u32 %v893_v45, %v889_v19  ;;  %v573_v61 = vunpack.c.l.b16 %v401_v47  ;;  %v574_v63 = vunpack.c.l.b16 %v402_v48  ;;  %v684_v3 = vunpack.c.l.b16 %v448_v30  ;;  %v177_v30 = vld [vmem:[%s12859_s0 + $0x1a0] sm:$0xff]  ;;  %v179_v59 = vld [vmem:[%s12859_s0 + $0x1b0] sm:$0xff] }
  0xaf   :  { %13165 = vst [vmem:[#allocation18_spill] sm:$0xff] %v7206_v4  ;;  %v913_v0 = vshrl.u32 %v7206_v4, 16  ;;  %v915_v20 = vshll.u32 %v7206_v4, 16  ;;  %v920_v22 = vshll.u32 %v7208_v49, 16  ;;  %v399_v5 = vpack.c.bf16 %v308_v2, %v308_v2 }
  0xb0   :  { %v7216_v35 = vsel %vm731_vm2, %v894_v50, %v898_v21  ;;  %v7218_v15 = vpack.c.b16 %v574_v63, %v573_v61  ;;  %v7220_v43 = vpack.c.b16 %v684_v3, %v684_v3  ;;  %v400_v19 = vpack.c.bf16 %v309_v46, %v309_v46  ;;  %v178_v21 = vld [vmem:[%s12859_s0 + $0x1a8] sm:$0xff]  ;;  %242 = vst.msk [vmem:[#allocation2 + $0x2b9] sm:$0xff] %vm15_vm0, %v177_v30  ;;  %v181_v46 = vld [vmem:[%s12859_s0 + $0x1c0] sm:$0xff] }
  0xb1   :  { %13166 = vst [vmem:[#allocation19_spill] sm:$0xff] %v7216_v35  ;;  %1142 = vrot.lane.b32.xlu1 %v7216_v35, %s6587_s12  ;;  %v917_v45 = vrot.slane %v915_v20, 1  ;;  %v922_v2 = vrot.slane %v920_v22, 1  ;;  %v447_v47 = vpack.c.bf16 %v310_v18, %v310_v18  ;;  %v571_v48 = vunpack.c.l.b16 %v399_v5  ;;  %v182_v30 = vld [vmem:[%s12859_s0 + $0x1c8] sm:$0xff] }
  0xb2   :  { %13167 = vst [vmem:[#allocation20_spill] sm:$0xff] %v7218_v15  ;;  %v937_v50 = vshrl.u32 %v7218_v15, 16  ;;  %v939_v61 = vshll.u32 %v7218_v15, 16  ;;  %v944_v63 = vshll.u32 %v7220_v43, 16  ;;  %v572_v3 = vunpack.c.l.b16 %v400_v19  ;;  %v320_v19 = vld [vmem:[#allocation2 + $0x210] sm:$0xff] }
  0xb3   :  { %13168 = vst [vmem:[#allocation21_spill] sm:$0xff] %v7220_v43  ;;  %v918_v20 = vor.u32 %v917_v45, %v913_v0  ;;  %v683_v18 = vunpack.c.l.b16 %v447_v47  ;;  %v403_v22 = vpack.c.bf16 %v314_v28, %v314_v28  ;;  %v404_v5 = vpack.c.bf16 %v315_v42, %v315_v42  ;;  %v321_v0 = vld [vmem:[#allocation2 + $0x218] sm:$0xff] }
  0xb4   :  { %243 = vst.msk [vmem:[#allocation2 + $0x2c1] sm:$0xff] %vm15_vm0, %v178_v21  ;;  %v941_v35 = vrot.slane %v939_v61, 1  ;;  %v946_v51 = vrot.slane %v944_v63, 1  ;;  %v7244_v40 = vpack.c.b16 %v572_v3, %v571_v48  ;;  %v449_v27 = vpack.c.bf16 %v316_v44, %v316_v44  ;;  %v180_v28 = vld [vmem:[%s12859_s0 + $0x1b8] sm:$0xff]  ;;  %v322_v61 = vld [vmem:[#allocation2 + $0x220] sm:$0x3] }
  0xb5   :  { %246 = vst.msk [vmem:[#allocation2 + $0x2e9] sm:$0xff] %vm15_vm0, %v181_v46  ;;  %v7251_v42 = vsel %vm731_vm2, %v918_v20, %v922_v2  ;;  %v7253_v45 = vpack.c.b16 %v683_v18, %v683_v18  ;;  %v575_v47 = vunpack.c.l.b16 %v403_v22  ;;  %v576_v21 = vunpack.c.l.b16 %v404_v5 }
  0xb6   :  { %13169 = vst [vmem:[#allocation22_spill] sm:$0xff] %v7244_v40  ;;  %1146 = vrot.lane.b32.xlu0 %v7251_v42, %s6587_s12  ;;  %v942_v44 = vor.u32 %v941_v35, %v937_v50  ;;  %v925_v48 = vshrl.u32 %v7244_v40, 16  ;;  %v927_v46 = vshll.u32 %v7244_v40, 16  ;;  %v685_v63 = vunpack.c.l.b16 %v449_v27  ;;  %v319_v27 = vld [vmem:[#allocation2 + $0x208] sm:$0x3] }
  0xb7   :  { %13170 = vst [vmem:[#allocation23_spill] sm:$0xff] %v7251_v42  ;;  %v932_v2 = vshll.u32 %v7253_v45, 16  ;;  %v7262_v3 = vpack.c.b16 %v576_v21, %v575_v47  ;;  %v407_v20 = vpack.c.bf16 %v320_v19, %v320_v19  ;;  %v408_v18 = vpack.c.bf16 %v321_v0, %v321_v0  ;;  %v318_v42 = vld [vmem:[#allocation2 + $0x200] sm:$0xff] }
  0xb8   :  { %247 = vst.msk [vmem:[#allocation2 + $0x2f1] sm:$0xff] %vm15_vm0, %v182_v30  ;;  %v7266_v22 = vsel %vm731_vm2, %v942_v44, %v946_v51  ;;  %v929_v5 = vrot.slane %v927_v46, 1  ;;  %v7268_v35 = vpack.c.b16 %v685_v63, %v685_v63  ;;  %v451_v50 = vpack.c.bf16 %v322_v61, %v322_v61  ;;  %v317_v30 = vld [vmem:[#allocation2 + $0x1f8] sm:$0xff] }
  0xb9   :  { %244 = vst.msk [vmem:[#allocation2 + $0x2d1] sm:$0xff] %vm15_vm0, %v179_v59  ;;  %1150 = vrot.lane.b32.xlu2 %v7266_v22, %s6587_s12  ;;  %v934_v59 = vrot.slane %v932_v2, 1  ;;  %v949_v47 = vshrl.u32 %v7262_v3, 16  ;;  %v951_v19 = vshll.u32 %v7262_v3, 16  ;;  %v579_v0 = vunpack.c.l.b16 %v407_v20  ;;  %v184_v2 = vld [vmem:[%s12859_s0 + $0x1d8] sm:$0xff] }
  0xba   :  { %245 = vst.msk [vmem:[#allocation2 + $0x2d9] sm:$0xff] %vm15_vm0, %v180_v28  ;;  %v930_v28 = vor.u32 %v929_v5, %v925_v48  ;;  %v956_v51 = vshll.u32 %v7268_v35, 16  ;;  %v580_v21 = vunpack.c.l.b16 %v408_v18  ;;  %v687_v44 = vunpack.c.l.b16 %v451_v50  ;;  %v324_v50 = vld [vmem:[#allocation2 + $0x230] sm:$0xff] }
  0xbb   :  { %13171 = vst [vmem:[#allocation24_spill] sm:$0xff] %v7266_v22  ;;  %v953_v46 = vrot.slane %v951_v19, 1  ;;  %v405_v63 = vpack.c.bf16 %v317_v30, %v317_v30  ;;  %v406_v61 = vpack.c.bf16 %v318_v42, %v318_v42  ;;  %v450_v31 = vpack.c.bf16 %v319_v27, %v319_v27  ;;  %v183_v22 = vld [vmem:[%s12859_s0 + $0x1d0] sm:$0xff]  ;;  %v185_v42 = vld [vmem:[%s12859_s0 + $0x1e0] sm:$0xff] }
  0xbc   :  { %v935_v20 = vsel %vm731_vm2, %v930_v28, %v934_v59  ;;  %v958_v48 = vrot.slane %v956_v51, 1  ;;  %v7282_v5 = vpack.c.b16 %v580_v21, %v579_v0  ;;  %v7284_v18 = vpack.c.b16 %v687_v44, %v687_v44  ;;  %248 = vst.msk [vmem:[#allocation2 + $0x301] sm:$0xff] %vm15_vm0, %v183_v22  ;;  %v186_v59 = vld [vmem:[%s12859_s0 + $0x1e8] sm:$0xff] }
  0xbd   :  { %1148 = vrot.lane.b32.xlu1 %v935_v20, %s6587_s12  ;;  %v954_v30 = vor.u32 %v953_v46, %v949_v47  ;;  %v577_v27 = vunpack.c.l.b16 %v405_v63  ;;  %v578_v19 = vunpack.c.l.b16 %v406_v61  ;;  %v686_v62 = vunpack.c.l.b16 %v450_v31  ;;  %249 = vst.msk [vmem:[#allocation2 + $0x309] sm:$0xff] %vm15_vm0, %v184_v2  ;;  %v329_v46 = vld [vmem:[#allocation2 + $0x258] sm:$0xff]  ;;  %v330_v63 = vld [vmem:[#allocation2 + $0x260] sm:$0xff] }
  0xbe   :  { %13172 = vst [vmem:[#allocation25_spill] sm:$0xff] %v7282_v5  ;;  %v973_v0 = vshrl.u32 %v7282_v5, 16  ;;  %v975_v22 = vshll.u32 %v7282_v5, 16  ;;  %v980_v28 = vshll.u32 %v7284_v18, 16  ;;  %v409_v51 = vpack.c.bf16 %v323_v39, %v323_v39  ;;  %v331_v39 = vld [vmem:[#allocation2 + $0x268] sm:$0x3] }
  0xbf   :  { %13173 = vst [vmem:[#allocation26_spill] sm:$0xff] %v7284_v18  ;;  %v7299_v21 = vsel %vm731_vm2, %v954_v30, %v958_v48  ;;  %v7301_v47 = vpack.c.b16 %v578_v19, %v577_v27  ;;  %v7303_v31 = vpack.c.b16 %v686_v62, %v686_v62  ;;  %v410_v44 = vpack.c.bf16 %v324_v50, %v324_v50 }
  0xc0   :  { %13174 = vst [vmem:[#allocation27_spill] sm:$0xff] %v7299_v21  ;;  %1152 = vrot.lane.b32.xlu0 %v7299_v21, %s6587_s12  ;;  %v977_v61 = vrot.slane %v975_v22, 1  ;;  %v982_v2 = vrot.slane %v980_v28, 1  ;;  %v452_v20 = vpack.c.bf16 %v325_v52, %v325_v52  ;;  %v581_v7 = vunpack.c.l.b16 %v409_v51  ;;  %v326_v28 = vld [vmem:[#allocation2 + $0x240] sm:$0xff]  ;;  %v327_v51 = vld [vmem:[#allocation2 + $0x248] sm:$0xff] }
  0xc1   :  { %13175 = vst [vmem:[#allocation28_spill] sm:$0xff] %v7301_v47  ;;  %v961_v48 = vshrl.u32 %v7301_v47, 16  ;;  %v963_v62 = vshll.u32 %v7301_v47, 16  ;;  %v968_v50 = vshll.u32 %v7303_v31, 16  ;;  %v582_v30 = vunpack.c.l.b16 %v410_v44 }
  0xc2   :  { %13176 = vst [vmem:[#allocation29_spill] sm:$0xff] %v7303_v31  ;;  %v978_v27 = vor.u32 %v977_v61, %v973_v0  ;;  %v688_v19 = vunpack.c.l.b16 %v452_v20  ;;  %v414_v18 = vpack.c.bf16 %v330_v63, %v330_v63  ;;  %v454_v52 = vpack.c.bf16 %v331_v39, %v331_v39  ;;  %v328_v31 = vld [vmem:[#allocation2 + $0x250] sm:$0x3] }
  0xc3   :  { %250 = vst.msk [vmem:[#allocation2 + $0x319] sm:$0xff] %vm15_vm0, %v185_v42  ;;  %v413_v42 = vpack.c.bf16 %v329_v46, %v329_v46  ;;  %v965_v5 = vrot.slane %v963_v62, 1  ;;  %v970_v21 = vrot.slane %v968_v50, 1  ;;  %v7312_v22 = vpack.c.b16 %v582_v30, %v581_v7  ;;  %v332_v30 = vld [vmem:[#allocation2 + $0x270] sm:$0xff] }
  0xc4   :  { %251 = vst.msk [vmem:[#allocation2 + $0x321] sm:$0xff] %vm15_vm0, %v186_v59  ;;  %v7315_v59 = vsel %vm731_vm2, %v978_v27, %v982_v2  ;;  %v7317_v43 = vpack.c.b16 %v688_v19, %v688_v19  ;;  %v586_v15 = vunpack.c.l.b16 %v414_v18  ;;  %v690_v46 = vunpack.c.l.b16 %v454_v52 }
  0xc5   :  { %13177 = vst [vmem:[#allocation30_spill] sm:$0xff] %v7312_v22  ;;  %v585_v47 = vunpack.c.l.b16 %v413_v42  ;;  %1156 = vrot.lane.b32.xlu2 %v7315_v59, %s6587_s12  ;;  %v966_v0 = vor.u32 %v965_v5, %v961_v48  ;;  %v985_v44 = vshrl.u32 %v7312_v22, 16  ;;  %v987_v7 = vshll.u32 %v7312_v22, 16  ;;  %v333_v5 = vld [vmem:[#allocation2 + $0x278] sm:$0xff]  ;;  %v334_v48 = vld [vmem:[#allocation2 + $0x280] sm:$0x3] }
  0xc6   :  { %13178 = vst [vmem:[#allocation31_spill] sm:$0xff] %v7315_v59  ;;  %v992_v63 = vshll.u32 %v7317_v43, 16  ;;  %v411_v2 = vpack.c.bf16 %v326_v28, %v326_v28  ;;  %v412_v20 = vpack.c.bf16 %v327_v51, %v327_v51  ;;  %v7329_v62 = vpack.c.b16 %v690_v46, %v690_v46  ;;  %v338_v46 = vld [vmem:[#allocation2 + $0x2a0] sm:$0xff] }
  0xc7   :  { %13179 = vst [vmem:[#allocation32_spill] sm:$0xff] %v7317_v43  ;;  %v7324_v61 = vpack.c.b16 %v586_v15, %v585_v47  ;;  %v7327_v39 = vsel %vm731_vm2, %v966_v0, %v970_v21  ;;  %v989_v18 = vrot.slane %v987_v7, 1  ;;  %v453_v50 = vpack.c.bf16 %v328_v31, %v328_v31 }
  0xc8   :  { %13181 = vst [vmem:[#allocation34_spill] sm:$0xff] %v7327_v39  ;;  %1154 = vrot.lane.b32.xlu1 %v7327_v39, %s6587_s12  ;;  %v994_v27 = vrot.slane %v992_v63, 1  ;;  %v583_v47 = vunpack.c.l.b16 %v411_v2  ;;  %v1016_v21 = vshll.u32 %v7329_v62, 16  ;;  %v584_v52 = vunpack.c.l.b16 %v412_v20 }
  0xc9   :  { %13180 = vst [vmem:[#allocation33_spill] sm:$0xff] %v7324_v61  ;;  %v1009_v19 = vshrl.u32 %v7324_v61, 16  ;;  %v1011_v15 = vshll.u32 %v7324_v61, 16  ;;  %v990_v42 = vor.u32 %v989_v18, %v985_v44  ;;  %v689_v28 = vunpack.c.l.b16 %v453_v50  ;;  %v339_v61 = vld [vmem:[#allocation2 + $0x2a8] sm:$0xff]  ;;  %v340_v50 = vld [vmem:[#allocation2 + $0x2b0] sm:$0x3] }
  0xca   :  { %13182 = vst [vmem:[#allocation35_spill] sm:$0xff] %v7329_v62  ;;  %v415_v0 = vpack.c.bf16 %v332_v30, %v332_v30  ;;  %v416_v31 = vpack.c.bf16 %v333_v5, %v333_v5  ;;  %v455_v7 = vpack.c.bf16 %v334_v48, %v334_v48  ;;  %v1018_v22 = vrot.slane %v1016_v21, 1 }
  0xcb   :  { %v1013_v51 = vrot.slane %v1011_v15, 1  ;;  %v7337_v43 = vsel %vm731_vm2, %v990_v42, %v994_v27  ;;  %v7339_v63 = vpack.c.b16 %v584_v52, %v583_v47  ;;  %v7341_v59 = vpack.c.b16 %v689_v28, %v689_v28  ;;  %v336_v52 = vld [vmem:[#allocation2 + $0x290] sm:$0xff] }
  0xcc   :  { %13183 = vst [vmem:[#allocation36_spill] sm:$0xff] %v7337_v43  ;;  %1158 = vrot.lane.b32.xlu0 %v7337_v43, %s6587_s12  ;;  %v587_v2 = vunpack.c.l.b16 %v415_v0  ;;  %v588_v20 = vunpack.c.l.b16 %v416_v31  ;;  %v691_v18 = vunpack.c.l.b16 %v455_v7  ;;  %v419_v27 = vpack.c.bf16 %v338_v46, %v338_v46  ;;  %v337_v7 = vld [vmem:[#allocation2 + $0x298] sm:$0x3] }
  0xcd   :  { %13184 = vst [vmem:[#allocation37_spill] sm:$0xff] %v7339_v63  ;;  %v1014_v44 = vor.u32 %v1013_v51, %v1009_v19  ;;  %v997_v30 = vshrl.u32 %v7339_v63, 16  ;;  %v999_v5 = vshll.u32 %v7339_v63, 16  ;;  %v1004_v48 = vshll.u32 %v7341_v59, 16  ;;  %v335_v19 = vld [vmem:[#allocation2 + $0x288] sm:$0xff] }
  0xce   :  { %13185 = vst [vmem:[#allocation38_spill] sm:$0xff] %v7341_v59  ;;  %v7351_v47 = vpack.c.b16 %v588_v20, %v587_v2  ;;  %v7353_v42 = vpack.c.b16 %v691_v18, %v691_v18  ;;  %v420_v21 = vpack.c.bf16 %v339_v61, %v339_v61  ;;  %v457_v0 = vpack.c.bf16 %v340_v50, %v340_v50  ;;  %v342_v50 = vld [vmem:[#allocation2 + $0x2c0] sm:$0xff] }
  0xcf   :  { %v7349_v15 = vsel %vm731_vm2, %v1014_v44, %v1018_v22  ;;  %v1001_v28 = vrot.slane %v999_v5, 1  ;;  %v1006_v51 = vrot.slane %v1004_v48, 1  ;;  %v591_v31 = vunpack.c.l.b16 %v419_v27  ;;  %v341_v48 = vld [vmem:[#allocation2 + $0x2b8] sm:$0xff] }
  0xd0   :  { %13186 = vst [vmem:[#allocation39_spill] sm:$0xff] %v7349_v15  ;;  %1162 = vrot.lane.b32.xlu2 %v7349_v15, %s6587_s12  ;;  %v1021_v46 = vshrl.u32 %v7351_v47, 16  ;;  %v1023_v22 = vshll.u32 %v7351_v47, 16  ;;  %v1028_v44 = vshll.u32 %v7353_v42, 16  ;;  %v592_v2 = vunpack.c.l.b16 %v420_v21 }
  0xd1   :  { %13187 = vst [vmem:[#allocation40_spill] sm:$0xff] %v7351_v47  ;;  %v1002_v20 = vor.u32 %v1001_v28, %v997_v30  ;;  %v693_v18 = vunpack.c.l.b16 %v457_v0  ;;  %v417_v61 = vpack.c.bf16 %v335_v19, %v335_v19  ;;  %v418_v62 = vpack.c.bf16 %v336_v52, %v336_v52 }
  0xd2   :  { %13188 = vst [vmem:[#allocation41_spill] sm:$0xff] %v7353_v42  ;;  %v1025_v59 = vrot.slane %v1023_v22, 1  ;;  %v1030_v63 = vrot.slane %v1028_v44, 1  ;;  %v7360_v43 = vpack.c.b16 %v592_v2, %v591_v31  ;;  %v456_v5 = vpack.c.bf16 %v337_v7, %v337_v7  ;;  %v343_v42 = vld [vmem:[#allocation2 + $0x2c8] sm:$0x3] }
  0xd3   :  { %v7363_v27 = vsel %vm731_vm2, %v1002_v20, %v1006_v51  ;;  %v7365_v15 = vpack.c.b16 %v693_v18, %v693_v18  ;;  %v589_v47 = vunpack.c.l.b16 %v417_v61  ;;  %v590_v39 = vunpack.c.l.b16 %v418_v62  ;;  %v347_v2 = vld [vmem:[#allocation2 + $0x2e8] sm:$0xff] }
  0xd4   :  { %13189 = vst [vmem:[#allocation42_spill] sm:$0xff] %v7360_v43  ;;  %1160 = vrot.lane.b32.xlu1 %v7363_v27, %s6587_s12  ;;  %v1026_v30 = vor.u32 %v1025_v59, %v1021_v46  ;;  %v1045_v21 = vshrl.u32 %v7360_v43, 16  ;;  %v1047_v19 = vshll.u32 %v7360_v43, 16  ;;  %v692_v52 = vunpack.c.l.b16 %v456_v5  ;;  %v348_v59 = vld [vmem:[#allocation2 + $0x2f0] sm:$0xff]  ;;  %v349_v46 = vld [vmem:[#allocation2 + $0x2f8] sm:$0x3] }
  0xd5   :  { %13190 = vst [vmem:[#allocation43_spill] sm:$0xff] %v7365_v15  ;;  %v1052_v28 = vshll.u32 %v7365_v15, 16  ;;  %v7372_v0 = vpack.c.b16 %v590_v39, %v589_v47  ;;  %v421_v51 = vpack.c.bf16 %v341_v48, %v341_v48  ;;  %v422_v31 = vpack.c.bf16 %v342_v50, %v342_v50 }
  0xd6   :  { %v7375_v7 = vsel %vm731_vm2, %v1026_v30, %v1030_v63  ;;  %v1049_v62 = vrot.slane %v1047_v19, 1  ;;  %v7377_v22 = vpack.c.b16 %v692_v52, %v692_v52  ;;  %v458_v44 = vpack.c.bf16 %v343_v42, %v343_v42  ;;  %v344_v52 = vld [vmem:[#allocation2 + $0x2d0] sm:$0xff] }
  0xd7   :  { %13191 = vst [vmem:[#allocation44_spill] sm:$0xff] %v7372_v0  ;;  %1164 = vrot.lane.b32.xlu0 %v7375_v7, %s6587_s12  ;;  %v1054_v20 = vrot.slane %v1052_v28, 1  ;;  %v1033_v18 = vshrl.u32 %v7372_v0, 16  ;;  %v1035_v39 = vshll.u32 %v7372_v0, 16  ;;  %v593_v47 = vunpack.c.l.b16 %v421_v51  ;;  %v345_v0 = vld [vmem:[#allocation2 + $0x2d8] sm:$0xff] }
  0xd8   :  { %13192 = vst [vmem:[#allocation45_spill] sm:$0xff] %v7375_v7  ;;  %v1050_v61 = vor.u32 %v1049_v62, %v1045_v21  ;;  %v1040_v63 = vshll.u32 %v7377_v22, 16  ;;  %v594_v5 = vunpack.c.l.b16 %v422_v31  ;;  %v694_v48 = vunpack.c.l.b16 %v458_v44  ;;  %v346_v44 = vld [vmem:[#allocation2 + $0x2e0] sm:$0x3] }
  0xd9   :  { %13193 = vst [vmem:[#allocation46_spill] sm:$0xff] %v7377_v22  ;;  %v1037_v50 = vrot.slane %v1035_v39, 1  ;;  %v425_v30 = vpack.c.bf16 %v347_v2, %v347_v2  ;;  %v426_v42 = vpack.c.bf16 %v348_v59, %v348_v59  ;;  %v460_v19 = vpack.c.bf16 %v349_v46, %v349_v46 }
  0xda   :  { %v7385_v15 = vsel %vm731_vm2, %v1050_v61, %v1054_v20  ;;  %v1042_v43 = vrot.slane %v1040_v63, 1  ;;  %v7387_v28 = vpack.c.b16 %v594_v5, %v593_v47  ;;  %v7389_v7 = vpack.c.b16 %v694_v48, %v694_v48  ;;  %v351_v5 = vld [vmem:[#allocation2 + $0x308] sm:$0xff] }
  0xdb   :  { %13194 = vst [vmem:[#allocation47_spill] sm:$0xff] %v7385_v15  ;;  %1168 = vrot.lane.b32.xlu2 %v7385_v15, %s6587_s12  ;;  %v1038_v21 = vor.u32 %v1037_v50, %v1033_v18  ;;  %v597_v51 = vunpack.c.l.b16 %v425_v30  ;;  %v598_v31 = vunpack.c.l.b16 %v426_v42  ;;  %v696_v62 = vunpack.c.l.b16 %v460_v19  ;;  %v350_v18 = vld [vmem:[#allocation2 + $0x300] sm:$0xff]  ;;  %v352_v19 = vld [vmem:[#allocation2 + $0x310] sm:$0x3] }
  0xdc   :  { %13195 = vst [vmem:[#allocation48_spill] sm:$0xff] %v7387_v28  ;;  %v1057_v2 = vshrl.u32 %v7387_v28, 16  ;;  %v1059_v59 = vshll.u32 %v7387_v28, 16  ;;  %v1064_v46 = vshll.u32 %v7389_v7, 16  ;;  %v423_v20 = vpack.c.bf16 %v344_v52, %v344_v52 }
  0xdd   :  { %13196 = vst [vmem:[#allocation49_spill] sm:$0xff] %v7389_v7  ;;  %v7397_v39 = vsel %vm731_vm2, %v1038_v21, %v1042_v43  ;;  %v7399_v47 = vpack.c.b16 %v598_v31, %v597_v51  ;;  %v7401_v61 = vpack.c.b16 %v696_v62, %v696_v62  ;;  %v424_v63 = vpack.c.bf16 %v345_v0, %v345_v0 }
  0xde   :  { %13197 = vst [vmem:[#allocation50_spill] sm:$0xff] %v7397_v39  ;;  %1166 = vrot.lane.b32.xlu1 %v7397_v39, %s6587_s12  ;;  %v1061_v48 = vrot.slane %v1059_v59, 1  ;;  %v1066_v50 = vrot.slane %v1064_v46, 1  ;;  %v459_v30 = vpack.c.bf16 %v346_v44, %v346_v44  ;;  %v595_v42 = vunpack.c.l.b16 %v423_v20 }
  0xdf   :  { %13198 = vst [vmem:[#allocation51_spill] sm:$0xff] %v7399_v47  ;;  %v1081_v52 = vshrl.u32 %v7399_v47, 16  ;;  %v1083_v43 = vshll.u32 %v7399_v47, 16  ;;  %v1088_v21 = vshll.u32 %v7401_v61, 16  ;;  %v596_v51 = vunpack.c.l.b16 %v424_v63  ;;  %v13227_v47 = vld [vmem:[#allocation26_spill] sm:$0xff] }
  0xe0   :  { %13199 = vst [vmem:[#allocation52_spill] sm:$0xff] %v7401_v61  ;;  %v1062_v31 = vor.u32 %v1061_v48, %v1057_v2  ;;  %v695_v62 = vunpack.c.l.b16 %v459_v30  ;;  %v427_v0 = vpack.c.bf16 %v350_v18, %v350_v18  ;;  %v428_v7 = vpack.c.bf16 %v351_v5, %v351_v5  ;;  %v353_v48 = vld [vmem:[#allocation2 + $0x318] sm:$0xff] }
  0xe1   :  { %v1085_v28 = vrot.slane %v1083_v43, 1  ;;  %v1090_v15 = vrot.slane %v1088_v21, 1  ;;  %v7408_v22 = vpack.c.b16 %v596_v51, %v595_v42  ;;  %v461_v59 = vpack.c.bf16 %v352_v19, %v352_v19 }
  0xe2   :  { %v7411_v44 = vsel %vm731_vm2, %v1062_v31, %v1066_v50  ;;  %v7413_v46 = vpack.c.b16 %v695_v62, %v695_v62  ;;  %v599_v20 = vunpack.c.l.b16 %v427_v0  ;;  %v600_v39 = vunpack.c.l.b16 %v428_v7  ;;  %v354_v50 = vld [vmem:[#allocation2 + $0x320] sm:$0xff]  ;;  %v7432_v62 = vpop.permute.xlu2 %1124 }
  0xe3   :  { %13200 = vst [vmem:[#allocation53_spill] sm:$0xff] %v7408_v22  ;;  %1170 = vrot.lane.b32.xlu0 %v7411_v44, %s6587_s12  ;;  %v1086_v63 = vor.u32 %v1085_v28, %v1081_v52  ;;  %v1069_v2 = vshrl.u32 %v7408_v22, 16  ;;  %v1071_v18 = vshll.u32 %v7408_v22, 16  ;;  %v697_v5 = vunpack.c.l.b16 %v461_v59  ;;  %v355_v28 = vld [vmem:[#allocation2 + $0x328] sm:$0x3] }
  0xe4   :  { %13201 = vst [vmem:[#allocation54_spill] sm:$0xff] %v7411_v44  ;;  %v1076_v30 = vshll.u32 %v7413_v46, 16  ;;  %v7420_v42 = vpack.c.b16 %v600_v39, %v599_v20  ;;  %v1181_v21 = vrot.slane %v6646_v10, 1  ;;  %v429_v39 = vpack.c.bf16 %v353_v48, %v353_v48 }
  0xe5   :  { %13202 = vst [vmem:[#allocation55_spill] sm:$0xff] %v7413_v46  ;;  %v7423_v19 = vsel %vm731_vm2, %v1086_v63, %v1090_v15  ;;  %v1073_v43 = vrot.slane %v1071_v18, 1  ;;  %v7425_v7 = vpack.c.b16 %v697_v5, %v697_v5  ;;  %v1182_v59 = vrot.slane %v6650_v11, 1 }
  0xe6   :  { %13203 = vst [vmem:[#allocation56_spill] sm:$0xff] %v7420_v42  ;;  %1174 = vrot.lane.b32.xlu2 %v7423_v19, %s6587_s12  ;;  %v1078_v52 = vrot.slane %v1076_v30, 1  ;;  %v1093_v51 = vshrl.u32 %v7420_v42, 16  ;;  %v1095_v31 = vshll.u32 %v7420_v42, 16  ;;  %v430_v20 = vpack.c.bf16 %v354_v50, %v354_v50 }
  0xe7   :  { %13204 = vst [vmem:[#allocation57_spill] sm:$0xff] %v7423_v19  ;;  %v1074_v0 = vor.u32 %v1073_v43, %v1069_v2  ;;  %v1100_v15 = vshll.u32 %v7425_v7, 16  ;;  %v462_v18 = vpack.c.bf16 %v355_v28, %v355_v28  ;;  %v601_v5 = vunpack.c.l.b16 %v429_v39 }
  0xe8   :  { %13205 = vst [vmem:[#allocation58_spill] sm:$0xff] %v7425_v7  ;;  %v1097_v63 = vrot.slane %v1095_v31, 1  ;;  %v602_v61 = vunpack.c.l.b16 %v430_v20  ;;  %v1183_v2 = vsel %vm1180_vm3, %v1181_v21, %v1182_v59  ;;  %v1185_v21 = vrot.slane %v6942_v24, 1  ;;  %v13221_v7 = vld [vmem:[#allocation29_spill] sm:$0xff] }
  0xe9   :  { %v7437_v19 = vsel %vm731_vm2, %v1074_v0, %v1078_v52  ;;  %v1102_v30 = vrot.slane %v1100_v15, 1  ;;  %v698_v42 = vunpack.c.l.b16 %v462_v18  ;;  %v1191_v39 = vrot.slane %v7011_v26, 1 }
  0xea   :  { %13206 = vst [vmem:[#allocation59_spill] sm:$0xff] %v7437_v19  ;;  %1172 = vrot.lane.b32.xlu1 %v7437_v19, %s6587_s12  ;;  %v1098_v48 = vor.u32 %v1097_v63, %v1093_v51  ;;  %v7442_v43 = vpack.c.b16 %v602_v61, %v601_v5  ;;  %v1184_v61 = vrot.slane %v6940_v23, 1  ;;  %v7459_v15 = vpop.permute.xlu2 %1126  ;;  %v1187_v24 = vrot.slane %v6924_v8, 1 }
  0xeb   :  { %v7447_v50 = vpack.c.b16 %v698_v42, %v698_v42  ;;  %v1190_v42 = vrot.slane %v6999_v9, 1  ;;  %v1188_v26 = vrot.slane %v6927_v12, 1  ;;  %v1193_v5 = vrot.slane %v6906_v55, 1 }
  0xec   :  { %13207 = vst [vmem:[#allocation60_spill] sm:$0xff] %v7442_v43  ;;  %v7445_v11 = vsel %vm731_vm2, %v1098_v48, %v1102_v30  ;;  %v1105_v28 = vshrl.u32 %v7442_v43, 16  ;;  %v1107_v52 = vshll.u32 %v7442_v43, 16  ;;  %v7462_v20 = vsel %vm1180_vm3, %v1184_v61, %v1185_v21  ;;  %v7493_v61 = vpop.permute.xlu0 %1116 }
  0xed   :  { %13208 = vst [vmem:[#allocation61_spill] sm:$0xff] %v7445_v11  ;;  %1176 = vrot.lane.b32.xlu0 %v7445_v11, %s6587_s12  ;;  %v1112_v51 = vshll.u32 %v7447_v50, 16  ;;  %v7468_v18 = vsel %vm1180_vm3, %v1190_v42, %v1191_v39  ;;  %v1194_v30 = vrot.slane %v6908_v56, 1  ;;  %v1199_v48 = vrot.slane %v7022_v32, 1 }
  0xee   :  { %13209 = vst [vmem:[#allocation62_spill] sm:$0xff] %v7447_v50  ;;  %1277 = vrot.lane.b32.xlu2 %v1183_v2, %s6588_s29  ;;  %v1109_v31 = vrot.slane %v1107_v52, 1  ;;  %v1200_v2 = vrot.slane %v7028_v37, 1  ;;  %v1196_v56 = vrot.slane %v6962_v41, 1  ;;  %v1197_v37 = vrot.slane %v6977_v53, 1 }
  0xef   :  { %v1114_v0 = vrot.slane %v1112_v51, 1  ;;  %v7486_v52 = vsel %vm1180_vm3, %v1193_v5, %v1194_v30  ;;  %v1202_v21 = vrot.slane %v7074_v36, 1  ;;  %v1208_v42 = vrot.slane %v7086_v54, 1 }
  0xf0   :  { %v1110_v59 = vor.u32 %v1109_v31, %v1105_v28  ;;  %v7483_v28 = vsel %vm1180_vm3, %v1187_v24, %v1188_v26  ;;  %v7491_v12 = vsel %vm1180_vm3, %v1199_v48, %v1200_v2  ;;  %v1203_v31 = vrot.slane %v7076_v38, 1 }
  0xf1   :  { %v1209_v39 = vrot.slane %v7088_v58, 1  ;;  %v1205_v38 = vrot.slane %v7035_v57, 1  ;;  %v1206_v58 = vrot.slane %v7043_v1, 1  ;;  %v1211_v30 = vrot.slane %v7132_v6, 1 }
  0xf2   :  { %v7465_v63 = vsel %vm731_vm2, %v1110_v59, %v1114_v0  ;;  %v7488_v51 = vpop.permute.xlu2 %1132  ;;  %v7508_v0 = vsel %vm1180_vm3, %v1196_v56, %v1197_v37  ;;  %v7511_v59 = vsel %vm1180_vm3, %v1202_v21, %v1203_v31  ;;  %v1212_v48 = vrot.slane %v7134_v13, 1 }
  0xf3   :  { %13210 = vst [vmem:[#allocation63_spill] sm:$0xff] %v7465_v63  ;;  %1178 = vrot.lane.b32.xlu1 %v7465_v63, %s6587_s12  ;;  %v7516_v53 = vsel %vm1180_vm3, %v1208_v42, %v1209_v39  ;;  %v1217_v2 = vrot.slane %v7146_v33, 1  ;;  %v1218_v56 = vrot.slane %v7148_v34, 1  ;;  %v7535_v37 = vsel %vm1180_vm3, %v1205_v38, %v1206_v58  ;;  %s6589_s12 = smov 12  }
  0xf4   :  { %v7538_v21 = vsel %vm1180_vm3, %v1211_v30, %v1212_v48  ;;  %v1214_v13 = vrot.slane %v7095_v17, 1  ;;  %v1215_v34 = vrot.slane %v7100_v29, 1  ;;  %v1220_v42 = vrot.slane %v7184_v60, 1 }
  0xf5   :  { %1279 = vrot.lane.b32.xlu0 %v7462_v20, %s6588_s29  ;;  %v7541_v1 = vsel %vm1180_vm3, %v1217_v2, %v1218_v56  ;;  %v1221_v39 = vrot.slane %v7193_v14, 1  ;;  %v1226_v58 = vrot.slane %v7206_v4, 1  ;;  %v1227_v30 = vrot.slane %v7208_v49, 1 }
  0xf6   :  { %1283 = vrot.lane.b32.xlu2 %v7468_v18, %s6588_s29  ;;  %v7562_v2 = vsel %vm1180_vm3, %v1214_v13, %v1215_v34  ;;  %v1223_v14 = vrot.slane %v7155_v16, 1  ;;  %v1224_v49 = vrot.slane %v7166_v25, 1  ;;  %v1229_v13 = vrot.slane %v7244_v40, 1 }
  0xf7   :  { %v7513_v24 = vpop.permute.xlu1 %1120  ;;  %v7565_v29 = vsel %vm1180_vm3, %v1220_v42, %v1221_v39  ;;  %v7568_v56 = vsel %vm1180_vm3, %v1226_v58, %v1227_v30  ;;  %v1230_v34 = vrot.slane %v7253_v45, 1  ;;  %v1235_v39 = vrot.slane %v7262_v3, 1  ;;  %v13218_v45 = vld [vmem:[#allocation20_spill] sm:$0xff] }
  0xf8   :  { %13213 = vst [vmem:[#allocation66_spill] sm:$0xff] %v7565_v29  ;;  %v1236_v58 = vrot.slane %v7268_v35, 1  ;;  %v1232_v40 = vrot.slane %v13218_v45, 1  ;;  %v13219_v35 = vld [vmem:[#allocation21_spill] sm:$0xff]  ;;  %v1239_v11 = vrot.slane %v13221_v7, 1  ;;  %v1242_v46 = vrot.slane %v13227_v47, 1 }
  0xf9   :  { %13214 = vst [vmem:[#allocation67_spill] sm:$0xff] %v7568_v56  ;;  %v1231_v25 = vsel %vm1180_vm3, %v1229_v13, %v1230_v34  ;;  %v1233_v43 = vrot.slane %v13219_v35, 1  ;;  %v13226_v35 = vld [vmem:[#allocation25_spill] sm:$0xff]  ;;  %v1818_v16 = vsel %vm15_vm0, %v6646_v10, %v7493_v61 }
  0xfa   :  { %v7526_v5 = vpop.permute.xlu0 %1118  ;;  %v7593_v63 = vsel %vm1180_vm3, %v1235_v39, %v1236_v58  ;;  %v1241_v7 = vrot.slane %v13226_v35, 1 }
  0xfb   :  { %1281 = vrot.lane.b32.xlu1 %v7483_v28, %s6588_s29  ;;  %13217 = vst [vmem:[#allocation70_spill] sm:$0xff] %v7593_v63  ;;  %v7607_v34 = vsel %vm1180_vm3, %v1232_v40, %v1233_v43 }
  0xfc   :  { %v7520_v26 = vpop.permute.xlu2 %1138  ;;  %13223 = vst [vmem:[#allocation21_spill] sm:$0xff] %v7607_v34  ;;  %v7625_v40 = vsel %vm1180_vm3, %v1241_v7, %v1242_v46  ;;  %v13234_v7 = vld [vmem:[#allocation5_spill] sm:$0xff] }
  0xfd   :  { %1285 = vrot.lane.b32.xlu0 %v7486_v52, %s6588_s29  ;;  %13211 = vst [vmem:[#allocation64_spill] sm:$0xff] %v7520_v26 }
  0xfe   :  { %1289 = vrot.lane.b32.xlu2 %v7491_v12, %s6588_s29 }
 0x102   :  { %v7545_v31 = vpop.permute.xlu1 %1122 }
 0x103   :  { %1287 = vrot.lane.b32.xlu1 %v7508_v0, %s6588_s29 }
 0x105   :  { %1291 = vrot.lane.b32.xlu0 %v7511_v59, %s6588_s29  ;;  %v7559_v48 = vpop.permute.xlu0 %1128 }
 0x106   :  { %1295 = vrot.lane.b32.xlu2 %v7516_v53, %s6588_s29 }
 0x108   :  { %v7555_v38 = vpop.permute.xlu2 %1144 }
 0x109   :  { %13212 = vst [vmem:[#allocation65_spill] sm:$0xff] %v7555_v38  ;;  %v7587_v38 = vsel %vm1180_vm3, %v1223_v14, %v1224_v49  ;;  %v13220_v14 = vld [vmem:[#allocation28_spill] sm:$0xff] }
 0x10a   :  { %13215 = vst [vmem:[#allocation68_spill] sm:$0xff] %v7587_v38  ;;  %v1238_v49 = vrot.slane %v13220_v14, 1 }
 0x10b   :  { %1293 = vrot.lane.b32.xlu1 %v7535_v37, %s6588_s29 }
 0x10c   :  { %v7610_v39 = vsel %vm1180_vm3, %v1238_v49, %v1239_v11  ;;  %v13230_v49 = vld [vmem:[#allocation6_spill] sm:$0xff] }
 0x10d   :  { %1297 = vrot.lane.b32.xlu0 %v7538_v21, %s6588_s29 }
 0x10e   :  { %1301 = vrot.lane.b32.xlu2 %v7541_v1, %s6588_s29  ;;  %v7580_v42 = vpop.permute.xlu1 %1130 }
 0x111   :  { %v7589_v50 = vpop.permute.xlu0 %1134 }
 0x112   :  { %13216 = vst [vmem:[#allocation69_spill] sm:$0xff] %v7589_v50 }
 0x113   :  { %1299 = vrot.lane.b32.xlu1 %v7562_v2, %s6588_s29  ;;  %v7584_v30 = vpop.permute.xlu2 %1150 }
 0x115   :  { %1303 = vrot.lane.b32.xlu0 %v7565_v29, %s6588_s29 }
 0x116   :  { %1307 = vrot.lane.b32.xlu2 %v7568_v56, %s6588_s29  ;;  %v366_v56 = vld [vmem:[%s12860_s1 + $0x10] sm:$0x3] }
 0x117   :  { %v2345_v4 = vunpack.c.l.b16 %v366_v56 }
 0x119   :  { %v7604_v13 = vpop.permute.xlu1 %1136 }
 0x11a   :  { %13222 = vst [vmem:[#allocation20_spill] sm:$0xff] %v7604_v13 }
 0x11b   :  { %1305 = vrot.lane.b32.xlu1 %v7587_v38, %s6588_s29 }
 0x11d   :  { %1309 = vrot.lane.b32.xlu0 %v1231_v25, %s6588_s29  ;;  %v7614_v25 = vpop.permute.xlu0 %1140 }
 0x11e   :  { %1313 = vrot.lane.b32.xlu2 %v7593_v63, %s6588_s29  ;;  %13225 = vst [vmem:[#allocation29_spill] sm:$0xff] %v7614_v25  ;;  %v13242_v25 = vld [vmem:[#allocation4_spill] sm:$0xff] }
 0x11f   :  { %v7612_v58 = vpop.permute.xlu2 %1156 }
 0x120   :  { %13224 = vst [vmem:[#allocation28_spill] sm:$0xff] %v7612_v58 }
 0x123   :  { %1311 = vrot.lane.b32.xlu1 %v7607_v34, %s6588_s29  ;;  %v7627_v43 = vpop.permute.xlu1 %1142  ;;  %v13232_v34 = vmov 0.0  }
 0x124   :  { %13228 = vst [vmem:[#allocation25_spill] sm:$0xff] %v7627_v43 }
 0x125   :  { %1315 = vrot.lane.b32.xlu0 %v7610_v39, %s6588_s29  ;;  %3131 = vst.msk [vmem:[#allocation3] sm:$0xff] %vm1881_vm4, %v13232_v34 }
 0x126   :  { %1351 = vrot.lane.b32.xlu2 %v6940_v23, %s6589_s12  ;;  %3132 = vst.msk [vmem:[#allocation3 + $0x8] sm:$0xff] %vm1881_vm4, %v13232_v34 }
 0x127   :  { %3135 = vst.msk [vmem:[#allocation3 + $0x18] sm:$0xff] %vm1881_vm4, %v13232_v34 }
 0x128   :  { %v7635_v47 = vpop.permute.xlu0 %1146  ;;  %3136 = vst.msk [vmem:[#allocation3 + $0x20] sm:$0xff] %vm1881_vm4, %v13232_v34 }
 0x129   :  { %13231 = vst [vmem:[#allocation6_spill] sm:$0xff] %v7635_v47 }
 0x12a   :  { %v7631_v11 = vpop.permute.xlu2 %1162  ;;  %3138 = vst.msk [vmem:[#allocation3 + $0x30] sm:$0xff] %vm1881_vm4, %v13232_v34 }
 0x12b   :  { %1317 = vrot.lane.b32.xlu1 %v7625_v40, %s6588_s29  ;;  %13229 = vst [vmem:[#allocation26_spill] sm:$0xff] %v7631_v11 }
 0x12c   :  { %3139 = vst.msk [vmem:[#allocation3 + $0x38] sm:$0xff] %vm1881_vm4, %v13232_v34 }
 0x12d   :  { %1445 = vrot.lane.b32.xlu0 %v13230_v49, %s6590_s30  ;;  %3141 = vst.msk [vmem:[#allocation3 + $0x48] sm:$0xff] %vm1881_vm4, %v13232_v34 }
 0x12e   :  { %1589 = vrot.lane.b32.xlu2 %v6924_v8, %s6591_s4  ;;  %3142 = vst.msk [vmem:[#allocation3 + $0x50] sm:$0xff] %vm1881_vm4, %v13232_v34 }
 0x12f   :  { %v7655_v46 = vpop.permute.xlu1 %1148  ;;  %3144 = vst.msk [vmem:[#allocation3 + $0x60] sm:$0xff] %vm1881_vm4, %v13232_v34 }
 0x130   :  { %13233 = vst [vmem:[#allocation71_spill] sm:$0xff] %v7655_v46 }
 0x131   :  { %3145 = vst.msk [vmem:[#allocation3 + $0x68] sm:$0xff] %vm1881_vm4, %v13232_v34 }
 0x132   :  { %3147 = vst.msk [vmem:[#allocation3 + $0x78] sm:$0xff] %vm1881_vm4, %v13232_v34 }
 0x133   :  { %1515 = vrot.lane.b32.xlu1 %v7462_v20, %s6592_s5  ;;  %v7669_v20 = vpop.permute.xlu0 %1152  ;;  %3148 = vst.msk [vmem:[#allocation3 + $0x80] sm:$0xff] %vm1881_vm4, %v13232_v34 }
 0x134   :  { %3150 = vst.msk [vmem:[#allocation3 + $0x90] sm:$0xff] %vm1881_vm4, %v13232_v34 }
 0x135   :  { %1683 = vrot.lane.b32.xlu0 %v13234_v7, %s6593_s6  ;;  %v7665_v49 = vpop.permute.xlu2 %1168  ;;  %3151 = vst.msk [vmem:[#allocation3 + $0x98] sm:$0xff] %vm1881_vm4, %v13232_v34 }
 0x136   :  { %1353 = vrot.lane.b32.xlu2 %v6924_v8, %s6589_s12  ;;  %13235 = vst [vmem:[#allocation5_spill] sm:$0xff] %v7665_v49 }
 0x137   :  { %3153 = vst.msk [vmem:[#allocation3 + $0xa8] sm:$0xff] %vm1881_vm4, %v13232_v34 }
 0x138   :  { %3154 = vst.msk [vmem:[#allocation3 + $0xb0] sm:$0xff] %vm1881_vm4, %v13232_v34 }
 0x139   :  { %3156 = vst.msk [vmem:[#allocation3 + $0xc0] sm:$0xff] %vm1881_vm4, %v13232_v34 }
 0x13a   :  { %v7691_v46 = vpop.permute.xlu1 %1154  ;;  %3157 = vst.msk [vmem:[#allocation3 + $0xc8] sm:$0xff] %vm1881_vm4, %v13232_v34 }
 0x13b   :  { %1753 = vrot.lane.b32.xlu1 %v7483_v28, %s6594_s7  ;;  %3159 = vst.msk [vmem:[#allocation3 + $0xd8] sm:$0xff] %vm1881_vm4, %v13232_v34 }
 0x13c   :  { %3160 = vst.msk [vmem:[#allocation3 + $0xe0] sm:$0xff] %vm1881_vm4, %v13232_v34 }
 0x13d   :  { %1447 = vrot.lane.b32.xlu0 %v13234_v7, %s6590_s30  ;;  %3162 = vst.msk [vmem:[#allocation3 + $0xf0] sm:$0xff] %vm1881_vm4, %v13232_v34 }
 0x13e   :  { %1591 = vrot.lane.b32.xlu2 %v6999_v9, %s6591_s4  ;;  %v7701_v7 = vpop.permute.xlu0 %1158  ;;  %3163 = vst.msk [vmem:[#allocation3 + $0xf8] sm:$0xff] %vm1881_vm4, %v13232_v34 }
 0x13f   :  { %13237 = vst [vmem:[#allocation73_spill] sm:$0xff] %v7701_v7  ;;  %v2348_v7 = vpack.c.b16 %v2345_v4, %v2345_v4  ;;  %v6553_v4 = vld [vmem:[%s12860_s1 + $0x8] sm:$0xff] }
 0x140   :  { %v7697_v47 = vpop.permute.xlu2 %1174  ;;  %3165 = vst.msk [vmem:[#allocation3 + $0x108] sm:$0xff] %vm1881_vm4, %v13232_v34 }
 0x141   :  { %13236 = vst [vmem:[#allocation72_spill] sm:$0xff] %v7697_v47  ;;  %v13238_v47 = vld [vmem:[#allocation8_spill] sm:$0xff] }
 0x142   :  { %3166 = vst.msk [vmem:[#allocation3 + $0x110] sm:$0xff] %vm1881_vm4, %v13232_v34 }
 0x143   :  { %1517 = vrot.lane.b32.xlu1 %v7483_v28, %s6592_s5  ;;  %3168 = vst.msk [vmem:[#allocation3 + $0x120] sm:$0xff] %vm1881_vm4, %v13232_v34 }
 0x144   :  { %3169 = vst.msk [vmem:[#allocation3 + $0x128] sm:$0xff] %vm1881_vm4, %v13232_v34 }
 0x145   :  { %1685 = vrot.lane.b32.xlu0 %v13238_v47, %s6593_s6  ;;  %3171 = vst.msk [vmem:[#allocation3 + $0x138] sm:$0xff] %vm1881_vm4, %v13232_v34 }
 0x146   :  { %1355 = vrot.lane.b32.xlu2 %v6999_v9, %s6589_s12  ;;  %3172 = vst.msk [vmem:[#allocation3 + $0x140] sm:$0xff] %vm1881_vm4, %v13232_v34  ;;  %v7727_v28 = vpop.permute.xlu1 %1160 }
 0x147   :  { %13239 = vst [vmem:[#allocation8_spill] sm:$0xff] %v7727_v28 }
 0x148   :  { %v7723_v49 = vpop.permute.xlu2 %1277  ;;  %3174 = vst.msk [vmem:[#allocation3 + $0x150] sm:$0xff] %vm1881_vm4, %v13232_v34 }
 0x149   :  { %3175 = vst.msk [vmem:[#allocation3 + $0x158] sm:$0xff] %vm1881_vm4, %v13232_v34  ;;  %v7735_v43 = vpop.permute.xlu0 %1164  ;;  %v1883_v58 = vsel %vm1881_vm4, %v1818_v16, %v7723_v49 }
 0x14a   :  { %3177 = vst.msk [vmem:[#allocation3 + $0x168] sm:$0xff] %vm1881_vm4, %v13232_v34 }
 0x14b   :  { %13240 = vst [vmem:[#allocation74_spill] sm:$0xff] %v7735_v43  ;;  %1755 = vrot.lane.b32.xlu1 %v7468_v18, %s6594_s7 }
 0x14c   :  { %3178 = vst.msk [vmem:[#allocation3 + $0x170] sm:$0xff] %vm1881_vm4, %v13232_v34 }
 0x14d   :  { %3180 = vst.msk [vmem:[#allocation3 + $0x180] sm:$0xff] %vm1881_vm4, %v13232_v34  ;;  %1449 = vrot.lane.b32.xlu0 %v13238_v47, %s6590_s30 }
 0x14e   :  { %3181 = vst.msk [vmem:[#allocation3 + $0x188] sm:$0xff] %vm1881_vm4, %v13232_v34  ;;  %1593 = vrot.lane.b32.xlu2 %v6906_v55, %s6591_s4 }
 0x14f   :  { %3183 = vst.msk [vmem:[#allocation3 + $0x198] sm:$0xff] %vm1881_vm4, %v13232_v34 }
 0x150   :  { %3184 = vst.msk [vmem:[#allocation3 + $0x1a0] sm:$0xff] %vm1881_vm4, %v13232_v34  ;;  %v7753_v43 = vpop.permute.xlu2 %1283  ;;  %v7759_v47 = vpop.permute.xlu1 %1166 }
 0x151   :  { %3186 = vst.msk [vmem:[#allocation3 + $0x1b0] sm:$0xff] %vm1881_vm4, %v13232_v34 }
 0x152   :  { %3187 = vst.msk [vmem:[#allocation3 + $0x1b8] sm:$0xff] %vm1881_vm4, %v13232_v34 }
 0x153   :  { %13241 = vst [vmem:[#allocation75_spill] sm:$0xff] %v7759_v47  ;;  %1519 = vrot.lane.b32.xlu1 %v7468_v18, %s6592_s5 }
 0x154   :  { %3189 = vst.msk [vmem:[#allocation3 + $0x1c8] sm:$0xff] %vm1881_vm4, %v13232_v34 }
 0x155   :  { %3190 = vst.msk [vmem:[#allocation3 + $0x1d0] sm:$0xff] %vm1881_vm4, %v13232_v34  ;;  %1687 = vrot.lane.b32.xlu0 %v13242_v25, %s6593_s6  ;;  %v7771_v11 = vpop.permute.xlu0 %1170 }
 0x156   :  { %3192 = vst.msk [vmem:[#allocation3 + $0x1e0] sm:$0xff] %vm1881_vm4, %v13232_v34  ;;  %1357 = vrot.lane.b32.xlu2 %v6906_v55, %s6589_s12 }
 0x157   :  { %13243 = vst [vmem:[#allocation4_spill] sm:$0xff] %v7771_v11 }
 0x158   :  { %3193 = vst.msk [vmem:[#allocation3 + $0x1e8] sm:$0xff] %vm1881_vm4, %v13232_v34  ;;  %v7781_v18 = vpop.permute.xlu2 %1289 }
 0x159   :  { %3195 = vst.msk [vmem:[#allocation3 + $0x1f8] sm:$0xff] %vm1881_vm4, %v13232_v34 }
 0x15a   :  { %3196 = vst.msk [vmem:[#allocation3 + $0x200] sm:$0xff] %vm1881_vm4, %v13232_v34 }
 0x15b   :  { %3198 = vst.msk [vmem:[#allocation3 + $0x210] sm:$0xff] %vm1881_vm4, %v13232_v34  ;;  %1757 = vrot.lane.b32.xlu1 %v7486_v52, %s6594_s7 }
 0x15c   :  { %3199 = vst.msk [vmem:[#allocation3 + $0x218] sm:$0xff] %vm1881_vm4, %v13232_v34  ;;  %v7793_v11 = vpop.permute.xlu1 %1172 }
 0x15d   :  { %3201 = vst.msk [vmem:[#allocation3 + $0x228] sm:$0xff] %vm1881_vm4, %v13232_v34  ;;  %1451 = vrot.lane.b32.xlu0 %v13242_v25, %s6590_s30  ;;  %v13247_v25 = vld [vmem:[#allocation7_spill] sm:$0xff] }
 0x15e   :  { %3202 = vst.msk [vmem:[#allocation3 + $0x230] sm:$0xff] %vm1881_vm4, %v13232_v34  ;;  %1595 = vrot.lane.b32.xlu2 %v6962_v41, %s6591_s4 }
 0x15f   :  { %13244 = vst [vmem:[#allocation76_spill] sm:$0xff] %v7793_v11  ;;  %v7805_v47 = vpop.permute.xlu0 %1176 }
 0x160   :  { %3204 = vst.msk [vmem:[#allocation3 + $0x240] sm:$0xff] %vm1881_vm4, %v13232_v34  ;;  %v7809_v11 = vpop.permute.xlu2 %1295 }
 0x161   :  { %3205 = vst.msk [vmem:[#allocation3 + $0x248] sm:$0xff] %vm1881_vm4, %v13232_v34 }
 0x162   :  { %3207 = vst.msk [vmem:[#allocation3 + $0x258] sm:$0xff] %vm1881_vm4, %v13232_v34 }
 0x163   :  { %13245 = vst [vmem:[#allocation77_spill] sm:$0xff] %v7805_v47  ;;  %1521 = vrot.lane.b32.xlu1 %v7486_v52, %s6592_s5 }
 0x164   :  { %3208 = vst.msk [vmem:[#allocation3 + $0x260] sm:$0xff] %vm1881_vm4, %v13232_v34 }
 0x165   :  { %13246 = vst [vmem:[#allocation78_spill] sm:$0xff] %v7809_v11  ;;  %1689 = vrot.lane.b32.xlu0 %v13247_v25, %s6593_s6  ;;  %v7827_v47 = vpop.permute.xlu1 %1178  ;;  %v2418_v11 = vsel %vm2416_vm5, %v2348_v7, 0  ;;  %v13257_v7 = vld [vmem:[#allocation27_spill] sm:$0xff]  ;;  %vm5478_vm5 = vcmask 1043456  }
 0x166   :  { %3210 = vst.msk [vmem:[#allocation3 + $0x270] sm:$0xff] %vm1881_vm4, %v13232_v34  ;;  %1359 = vrot.lane.b32.xlu2 %v6962_v41, %s6589_s12  ;;  %2425 = vmatpush.bf16.msra.mxu0 %v2418_v11 }
 0x167   :  { %3211 = vst.msk [vmem:[#allocation3 + $0x278] sm:$0xff] %vm1881_vm4, %v13232_v34  ;;  %v7833_v19 = vpop.permute.xlu0 %1279  ;;  %6558 = vmatpush.bf16.msra.mxu3 %v2418_v11 }
 0x168   :  { %3213 = vst.msk [vmem:[#allocation3 + $0x288] sm:$0xff] %vm1881_vm4, %v13232_v34  ;;  %v7837_v52 = vpop.permute.xlu2 %1301 }
 0x169   :  { %3214 = vst.msk [vmem:[#allocation3 + $0x290] sm:$0xff] %vm1881_vm4, %v13232_v34 }
 0x16a   :  { %3216 = vst.msk [vmem:[#allocation3 + $0x2a0] sm:$0xff] %vm1881_vm4, %v13232_v34  ;;  %2426 = vmatpush.bf16.msra.mxu0 %v6553_v4 }
 0x16b   :  { %3217 = vst.msk [vmem:[#allocation3 + $0x2a8] sm:$0xff] %vm1881_vm4, %v13232_v34  ;;  %1759 = vrot.lane.b32.xlu1 %v7508_v0, %s6594_s7  ;;  %6559 = vmatpush.bf16.msra.mxu3 %v6553_v4 }
 0x16c   :  { %13248 = vst [vmem:[#allocation7_spill] sm:$0xff] %v7827_v47 }
 0x16d   :  { %3219 = vst.msk [vmem:[#allocation3 + $0x2b8] sm:$0xff] %vm1881_vm4, %v13232_v34  ;;  %1453 = vrot.lane.b32.xlu0 %v13247_v25, %s6590_s30  ;;  %v7855_v47 = vpop.permute.xlu1 %1281  ;;  %v13251_v25 = vld [vmem:[#allocation9_spill] sm:$0xff] }
 0x16e   :  { %3220 = vst.msk [vmem:[#allocation3 + $0x2c0] sm:$0xff] %vm1881_vm4, %v13232_v34  ;;  %1597 = vrot.lane.b32.xlu2 %v7022_v32, %s6591_s4 }
 0x16f   :  { %13249 = vst [vmem:[#allocation79_spill] sm:$0xff] %v7837_v52  ;;  %v7861_v52 = vpop.permute.xlu0 %1285 }
 0x170   :  { %3222 = vst.msk [vmem:[#allocation3 + $0x2d0] sm:$0xff] %vm1881_vm4, %v13232_v34  ;;  %v7865_v22 = vpop.permute.xlu2 %1307 }
 0x171   :  { %3223 = vst.msk [vmem:[#allocation3 + $0x2d8] sm:$0xff] %vm1881_vm4, %v13232_v34 }
 0x172   :  { %3225 = vst.msk [vmem:[#allocation3 + $0x2e8] sm:$0xff] %vm1881_vm4, %v13232_v34 }
 0x173   :  { %3226 = vst.msk [vmem:[#allocation3 + $0x2f0] sm:$0xff] %vm1881_vm4, %v13232_v34  ;;  %1523 = vrot.lane.b32.xlu1 %v7508_v0, %s6592_s5 }
 0x174   :  { %3228 = vst.msk [vmem:[#allocation3 + $0x300] sm:$0xff] %vm1881_vm4, %v13232_v34 }
 0x175   :  { %3229 = vst.msk [vmem:[#allocation3 + $0x308] sm:$0xff] %vm1881_vm4, %v13232_v34  ;;  %1691 = vrot.lane.b32.xlu0 %v13251_v25, %s6593_s6  ;;  %v7879_v26 = vpop.permute.xlu1 %1287 }
 0x176   :  { %3231 = vst.msk [vmem:[#allocation3 + $0x318] sm:$0xff] %vm1881_vm4, %v13232_v34  ;;  %1361 = vrot.lane.b32.xlu2 %v7022_v32, %s6589_s12 }
 0x177   :  { %3232 = vst.msk [vmem:[#allocation3 + $0x320] sm:$0xff] %vm1881_vm4, %v13232_v34 }
 0x178   :  { %13250 = vst [vmem:[#allocation80_spill] sm:$0xff] %v7865_v22  ;;  %v7883_v22 = vpop.permute.xlu0 %1291  ;;  %v7885_v28 = vpop.permute.xlu2 %1313 }
 0x179   :  { %3234 = vst.msk [vmem:[#allocation3 + $0x330] sm:$0xff] %vm1881_vm4, %v13232_v34 }
 0x17a   :  { %3235 = vst.msk [vmem:[#allocation3 + $0x338] sm:$0xff] %vm1881_vm4, %v13232_v34 }
 0x17b   :  { %3237 = vst.msk [vmem:[#allocation3 + $0x348] sm:$0xff] %vm1881_vm4, %v13232_v34  ;;  %1761 = vrot.lane.b32.xlu1 %v7491_v12, %s6594_s7 }
 0x17c   :  { %3238 = vst.msk [vmem:[#allocation3 + $0x350] sm:$0xff] %vm1881_vm4, %v13232_v34 }
 0x17d   :  { %1455 = vrot.lane.b32.xlu0 %v13251_v25, %s6590_s30  ;;  %v7891_v44 = vpop.permute.xlu1 %1293  ;;  %v13254_v25 = vld [vmem:[#allocation11_spill] sm:$0xff]  ;;  %3137 = vst.msk [vmem:[#allocation3 + $0x28] sm:$0x3] %vm3133_vm13, %v13232_v34 }
 0x17e   :  { %13252 = vst [vmem:[#allocation9_spill] sm:$0xff] %v7891_v44  ;;  %1599 = vrot.lane.b32.xlu2 %v7074_v36, %s6591_s4 }
 0x17f   :  { %3134 = vst.msk [vmem:[#allocation3 + $0x10] sm:$0x3] %vm3133_vm13, %v13232_v34 }
 0x180   :  { %v7895_v0 = vpop.permute.xlu0 %1297  ;;  %v1352_v13 = vpop.permute.xlu2 %1351  ;;  %3140 = vst.msk [vmem:[#allocation3 + $0x40] sm:$0x3] %vm3133_vm13, %v13232_v34 }
 0x181   :  { %13253 = vst [vmem:[#allocation81_spill] sm:$0xff] %v7895_v0  ;;  %v1948_v29 = vsel %vm1946_vm6, %v1883_v58, %v1352_v13 }
 0x182   :  { %3143 = vst.msk [vmem:[#allocation3 + $0x58] sm:$0x3] %vm3133_vm13, %v13232_v34 }
 0x183   :  { %1525 = vrot.lane.b32.xlu1 %v7491_v12, %s6592_s5  ;;  %v6552_v12 = vld [vmem:[%s12860_s1] sm:$0xff]  ;;  %3146 = vst.msk [vmem:[#allocation3 + $0x70] sm:$0x3] %vm3133_vm13, %v13232_v34 }
 0x184   :  { %2427 = vmatpush.bf16.msra.mxu0 %v6552_v12  ;;  %6560 = vmatpush.bf16.msra.mxu3 %v6552_v12  ;;  %3149 = vst.msk [vmem:[#allocation3 + $0x88] sm:$0x3] %vm3133_vm13, %v13232_v34 }
 0x185   :  { %1693 = vrot.lane.b32.xlu0 %v13254_v25, %s6593_s6  ;;  %v7904_v50 = vpop.permute.xlu1 %1299  ;;  %3152 = vst.msk [vmem:[#allocation3 + $0xa0] sm:$0x3] %vm3133_vm13, %v13232_v34 }
 0x186   :  { %13255 = vst [vmem:[#allocation11_spill] sm:$0xff] %v7904_v50  ;;  %1385 = vrot.lane.b32.xlu2 %v7262_v3, %s6589_s12  ;;  %v13260_v50 = vld [vmem:[#allocation34_spill] sm:$0xff] }
 0x187   :  { %3155 = vst.msk [vmem:[#allocation3 + $0xb8] sm:$0x3] %vm3133_vm13, %v13232_v34 }
 0x188   :  { %v7908_v0 = vpop.permute.xlu0 %1303  ;;  %v1590_v56 = vpop.permute.xlu2 %1589  ;;  %3158 = vst.msk [vmem:[#allocation3 + $0xd0] sm:$0x3] %vm3133_vm13, %v13232_v34 }
 0x189   :  { %13256 = vst [vmem:[#allocation82_spill] sm:$0xff] %v7908_v0 }
 0x18a   :  { %3161 = vst.msk [vmem:[#allocation3 + $0xe8] sm:$0x3] %vm3133_vm13, %v13232_v34 }
 0x18b   :  { %1763 = vrot.lane.b32.xlu1 %v7511_v59, %s6594_s7  ;;  %3164 = vst.msk [vmem:[#allocation3 + $0x100] sm:$0x3] %vm3133_vm13, %v13232_v34 }
 0x18c   :  { %3167 = vst.msk [vmem:[#allocation3 + $0x118] sm:$0x3] %vm3133_vm13, %v13232_v34 }
 0x18d   :  { %1479 = vrot.lane.b32.xlu0 %v13257_v7, %s6590_s30  ;;  %v7920_v11 = vpop.permute.xlu1 %1305  ;;  %3170 = vst.msk [vmem:[#allocation3 + $0x130] sm:$0x3] %vm3133_vm13, %v13232_v34 }
 0x18e   :  { %13258 = vst [vmem:[#allocation83_spill] sm:$0xff] %v7920_v11  ;;  %1623 = vrot.lane.b32.xlu2 %v13220_v14, %s6591_s4 }
 0x18f   :  { %3173 = vst.msk [vmem:[#allocation3 + $0x148] sm:$0x3] %vm3133_vm13, %v13232_v34 }
 0x190   :  { %v7924_v0 = vpop.permute.xlu0 %1309  ;;  %v1354_v4 = vpop.permute.xlu2 %1353  ;;  %3176 = vst.msk [vmem:[#allocation3 + $0x160] sm:$0x3] %vm3133_vm13, %v13232_v34 }
 0x191   :  { %13259 = vst [vmem:[#allocation84_spill] sm:$0xff] %v7924_v0 }
 0x192   :  { %3179 = vst.msk [vmem:[#allocation3 + $0x178] sm:$0x3] %vm3133_vm13, %v13232_v34 }
 0x193   :  { %1549 = vrot.lane.b32.xlu1 %v7593_v63, %s6592_s5  ;;  %3182 = vst.msk [vmem:[#allocation3 + $0x190] sm:$0x3] %vm3133_vm13, %v13232_v34 }
 0x194   :  { %3185 = vst.msk [vmem:[#allocation3 + $0x1a8] sm:$0x3] %vm3133_vm13, %v13232_v34 }
 0x195   :  { %1717 = vrot.lane.b32.xlu0 %v13260_v50, %s6593_s6  ;;  %v7930_v38 = vpop.permute.xlu1 %1311  ;;  %3188 = vst.msk [vmem:[#allocation3 + $0x1c0] sm:$0x3] %vm3133_vm13, %v13232_v34 }
 0x196   :  { %1363 = vrot.lane.b32.xlu2 %v7074_v36, %s6589_s12  ;;  %3191 = vst.msk [vmem:[#allocation3 + $0x1d8] sm:$0x3] %vm3133_vm13, %v13232_v34 }
 0x197   :  { %3194 = vst.msk [vmem:[#allocation3 + $0x1f0] sm:$0x3] %vm3133_vm13, %v13232_v34 }
 0x198   :  { %v7934_v7 = vpop.permute.xlu0 %1315  ;;  %v1592_v11 = vpop.permute.xlu2 %1591  ;;  %3197 = vst.msk [vmem:[#allocation3 + $0x208] sm:$0x3] %vm3133_vm13, %v13232_v34 }
 0x199   :  { %3200 = vst.msk [vmem:[#allocation3 + $0x220] sm:$0x3] %vm3133_vm13, %v13232_v34 }
 0x19a   :  { %3203 = vst.msk [vmem:[#allocation3 + $0x238] sm:$0x3] %vm3133_vm13, %v13232_v34 }
 0x19b   :  { %1787 = vrot.lane.b32.xlu1 %v7610_v39, %s6594_s7  ;;  %3206 = vst.msk [vmem:[#allocation3 + $0x250] sm:$0x3] %vm3133_vm13, %v13232_v34 }
 0x19c   :  { %3209 = vst.msk [vmem:[#allocation3 + $0x268] sm:$0x3] %vm3133_vm13, %v13232_v34 }
 0x19d   :  { %1457 = vrot.lane.b32.xlu0 %v13254_v25, %s6590_s30  ;;  %v7940_v12 = vpop.permute.xlu1 %1317  ;;  %3212 = vst.msk [vmem:[#allocation3 + $0x280] sm:$0x3] %vm3133_vm13, %v13232_v34 }
 0x19e   :  { %13261 = vst [vmem:[#allocation34_spill] sm:$0xff] %v7940_v12  ;;  %1601 = vrot.lane.b32.xlu2 %v7035_v57, %s6591_s4  ;;  %v13262_v12 = vld [vmem:[#allocation10_spill] sm:$0xff] }
 0x19f   :  { %3215 = vst.msk [vmem:[#allocation3 + $0x298] sm:$0x3] %vm3133_vm13, %v13232_v34 }
 0x1a0   :  { %v1446_v0 = vpop.permute.xlu0 %1445  ;;  %v1356_v63 = vpop.permute.xlu2 %1355  ;;  %3218 = vst.msk [vmem:[#allocation3 + $0x2b0] sm:$0x3] %vm3133_vm13, %v13232_v34 }
 0x1a1   :  { %v2013_v25 = vsel %vm2011_vm7, %v1948_v29, %v1446_v0  ;;  %v1820_v0 = vsel %vm15_vm0, %v6940_v23, %v7526_v5  ;;  %3221 = vst.msk [vmem:[#allocation3 + $0x2c8] sm:$0x3] %vm3133_vm13, %v13232_v34 }
 0x1a2   :  { %3224 = vst.msk [vmem:[#allocation3 + $0x2e0] sm:$0x3] %vm3133_vm13, %v13232_v34 }
 0x1a3   :  { %1527 = vrot.lane.b32.xlu1 %v7511_v59, %s6592_s5  ;;  %3227 = vst.msk [vmem:[#allocation3 + $0x2f8] sm:$0x3] %vm3133_vm13, %v13232_v34 }
 0x1a4   :  { %3230 = vst.msk [vmem:[#allocation3 + $0x310] sm:$0x3] %vm3133_vm13, %v13232_v34 }
 0x1a5   :  { %1695 = vrot.lane.b32.xlu0 %v13262_v12, %s6593_s6  ;;  %v1516_v44 = vpop.permute.xlu1 %1515  ;;  %3233 = vst.msk [vmem:[#allocation3 + $0x328] sm:$0x3] %vm3133_vm13, %v13232_v34 }
 0x1a6   :  { %1387 = vrot.lane.b32.xlu2 %v13220_v14, %s6589_s12  ;;  %v2078_v61 = vsel %vm2076_vm8, %v2013_v25, %v1516_v44  ;;  %3236 = vst.msk [vmem:[#allocation3 + $0x340] sm:$0x3] %vm3133_vm13, %v13232_v34 }
 0x1a7   :  { %v2143_v13 = vsel %vm2141_vm9, %v2078_v61, %v1590_v56  ;;  %v1885_v56 = vsel %vm1881_vm4, %v1820_v0, %v7833_v19  ;;  %3239 = vst.msk [vmem:[#allocation3 + $0x358] sm:$0x3] %vm3133_vm13, %v13232_v34  ;;  %vm5321_vm13 = vcmask 523264  }
 0x1a8   :  { %v1684_v10 = vpop.permute.xlu0 %1683  ;;  %v1594_v16 = vpop.permute.xlu2 %1593  ;;  %v1950_v25 = vsel %vm1946_vm6, %v1885_v56, %v1354_v4  ;;  %v13264_v56 = vld [vmem:[#allocation12_spill] sm:$0xff] }
 0x1a9   :  { %v2208_v59 = vsel %vm2206_vm10, %v2143_v13, %v1684_v10  ;;  %v13263_v10 = vld [vmem:[#allocation31_spill] sm:$0xff] }
 0x1ab   :  { %1765 = vrot.lane.b32.xlu1 %v7535_v37, %s6594_s7 }
 0x1ad   :  { %1481 = vrot.lane.b32.xlu0 %v13260_v50, %s6590_s30  ;;  %v1754_v29 = vpop.permute.xlu1 %1753 }
 0x1ae   :  { %1625 = vrot.lane.b32.xlu2 %v13226_v35, %s6591_s4  ;;  %v2273_v44 = vsel %vm2271_vm11, %v2208_v59, %v1754_v29 }
 0x1af   :  { %6472 = vmatmul.msk.bf16.vlgmr.msra.gmra.mxu0 %vm2351_vm12, %v2273_v44 }
 0x1b0   :  { %v1448_v58 = vpop.permute.xlu0 %1447  ;;  %v1358_v49 = vpop.permute.xlu2 %1357 }
 0x1b1   :  { %v2015_v50 = vsel %vm2011_vm7, %v1950_v25, %v1448_v58 }
 0x1b3   :  { %1551 = vrot.lane.b32.xlu1 %v7610_v39, %s6592_s5 }
 0x1b5   :  { %1719 = vrot.lane.b32.xlu0 %v13263_v10, %s6593_s6  ;;  %v1518_v61 = vpop.permute.xlu1 %1517 }
 0x1b6   :  { %1365 = vrot.lane.b32.xlu2 %v7035_v57, %s6589_s12  ;;  %v2080_v23 = vsel %vm2076_vm8, %v2015_v50, %v1518_v61  ;;  %v13265_v61 = vld [vmem:[#allocation30_spill] sm:$0xff] }
 0x1b7   :  { %v2145_v19 = vsel %vm2141_vm9, %v2080_v23, %v1592_v11  ;;  %v1822_v11 = vsel %vm15_vm0, %v6924_v8, %v7513_v24 }
 0x1b8   :  { %v1686_v13 = vpop.permute.xlu0 %1685  ;;  %v1596_v5 = vpop.permute.xlu2 %1595  ;;  %v1887_v58 = vsel %vm1881_vm4, %v1822_v11, %v7855_v47  ;;  %v13267_v11 = vld [vmem:[#allocation32_spill] sm:$0xff] }
 0x1b9   :  { %v2210_v39 = vsel %vm2206_vm10, %v2145_v19, %v1686_v13  ;;  %v1952_v0 = vsel %vm1946_vm6, %v1887_v58, %v1356_v63  ;;  %v1245_v58 = vrot.slane %v13267_v11, 1 }
 0x1bb   :  { %1789 = vrot.lane.b32.xlu1 %v7625_v40, %s6594_s7 }
 0x1bd   :  { %1459 = vrot.lane.b32.xlu0 %v13262_v12, %s6590_s30  ;;  %v1756_v4 = vpop.permute.xlu1 %1755 }
 0x1be   :  { %1603 = vrot.lane.b32.xlu2 %v7086_v54, %s6591_s4  ;;  %v2275_v59 = vsel %vm2271_vm11, %v2210_v39, %v1756_v4 }
 0x1bf   :  { %6473 = vmatmul.msk.bf16.gmra.mxu0 %vm2351_vm12, %v2275_v59  ;;  %v13266_v59 = vld [vmem:[#allocation36_spill] sm:$0xff] }
 0x1c0   :  { %v1450_v29 = vpop.permute.xlu0 %1449  ;;  %v1360_v44 = vpop.permute.xlu2 %1359 }
 0x1c1   :  { %v2017_v12 = vsel %vm2011_vm7, %v1952_v0, %v1450_v29  ;;  %v1244_v29 = vrot.slane %v13265_v61, 1 }
 0x1c3   :  { %1529 = vrot.lane.b32.xlu1 %v7535_v37, %s6592_s5 }
 0x1c5   :  { %1697 = vrot.lane.b32.xlu0 %v13264_v56, %s6593_s6  ;;  %v1520_v25 = vpop.permute.xlu1 %1519 }
 0x1c6   :  { %1389 = vrot.lane.b32.xlu2 %v13226_v35, %s6589_s12  ;;  %v2082_v8 = vsel %vm2076_vm8, %v2017_v12, %v1520_v25 }
 0x1c7   :  { %v2147_v47 = vsel %vm2141_vm9, %v2082_v8, %v1594_v16  ;;  %v1824_v16 = vsel %vm15_vm0, %v6999_v9, %v7545_v31 }
 0x1c8   :  { %v1688_v50 = vpop.permute.xlu0 %1687  ;;  %v1598_v24 = vpop.permute.xlu2 %1597  ;;  %v1889_v39 = vsel %vm1881_vm4, %v1824_v16, %v7753_v43 }
 0x1c9   :  { %v2212_v63 = vsel %vm2206_vm10, %v2147_v47, %v1688_v50  ;;  %v1954_v4 = vsel %vm1946_vm6, %v1889_v39, %v1358_v49  ;;  %v8033_v49 = vsel %vm1180_vm3, %v1244_v29, %v1245_v58  ;;  %v13269_v39 = vld [vmem:[#allocation37_spill] sm:$0xff] }
 0x1cb   :  { %1767 = vrot.lane.b32.xlu1 %v7516_v53, %s6594_s7 }
 0x1cd   :  { %1483 = vrot.lane.b32.xlu0 %v13263_v10, %s6590_s30  ;;  %v1758_v37 = vpop.permute.xlu1 %1757 }
 0x1ce   :  { %1627 = vrot.lane.b32.xlu2 %v13265_v61, %s6591_s4  ;;  %v2277_v13 = vsel %vm2271_vm11, %v2212_v63, %v1758_v37 }
 0x1cf   :  { %6474 = vmatmul.msk.bf16.gmra.mxu0 %vm2351_vm12, %v2277_v13  ;;  %v13268_v13 = vld [vmem:[#allocation15_spill] sm:$0xff] }
 0x1d0   :  { %v1452_v23 = vpop.permute.xlu0 %1451  ;;  %v1362_v19 = vpop.permute.xlu2 %1361 }
 0x1d1   :  { %v2019_v10 = vsel %vm2011_vm7, %v1954_v4, %v1452_v23 }
 0x1d3   :  { %1553 = vrot.lane.b32.xlu1 %v7625_v40, %s6592_s5 }
 0x1d5   :  { %1721 = vrot.lane.b32.xlu0 %v13266_v59, %s6593_s6  ;;  %v1522_v0 = vpop.permute.xlu1 %1521 }
 0x1d6   :  { %1367 = vrot.lane.b32.xlu2 %v7086_v54, %s6589_s12  ;;  %v2084_v31 = vsel %vm2076_vm8, %v2019_v10, %v1522_v0  ;;  %v1247_v0 = vrot.slane %v13269_v39, 1 }
 0x1d7   :  { %v2149_v40 = vsel %vm2141_vm9, %v2084_v31, %v1596_v5  ;;  %v1826_v5 = vsel %vm15_vm0, %v6906_v55, %v7432_v62 }
 0x1d8   :  { %v1690_v9 = vpop.permute.xlu0 %1689  ;;  %v1600_v43 = vpop.permute.xlu2 %1599  ;;  %v1891_v63 = vsel %vm1881_vm4, %v1826_v5, %v7861_v52 }
 0x1d9   :  { %v2214_v12 = vsel %vm2206_vm10, %v2149_v40, %v1690_v9  ;;  %v1956_v37 = vsel %vm1946_vm6, %v1891_v63, %v1360_v44  ;;  %v13270_v9 = vld [vmem:[#allocation38_spill] sm:$0xff] }
 0x1da   :  { %v1248_v31 = vrot.slane %v13270_v9, 1 }
 0x1db   :  { %1791 = vrot.lane.b32.xlu1 %v8033_v49, %s6594_s7 }
 0x1dd   :  { %1461 = vrot.lane.b32.xlu0 %v13264_v56, %s6590_s30  ;;  %v1760_v25 = vpop.permute.xlu1 %1759 }
 0x1de   :  { %1605 = vrot.lane.b32.xlu2 %v7132_v6, %s6591_s4  ;;  %v2279_v50 = vsel %vm2271_vm11, %v2214_v12, %v1760_v25 }
 0x1df   :  { %6475 = vmatmul.msk.bf16.gmra.mxu0 %vm2351_vm12, %v2279_v50 }
 0x1e0   :  { %v1454_v8 = vpop.permute.xlu0 %1453  ;;  %v1386_v47 = vpop.permute.xlu2 %1385 }
 0x1e1   :  { %v2021_v56 = vsel %vm2011_vm7, %v1956_v37, %v1454_v8 }
 0x1e3   :  { %1531 = vrot.lane.b32.xlu1 %v7516_v53, %s6592_s5 }
 0x1e5   :  { %1699 = vrot.lane.b32.xlu0 %v13268_v13, %s6593_s6  ;;  %v1524_v23 = vpop.permute.xlu1 %1523 }
 0x1e6   :  { %1391 = vrot.lane.b32.xlu2 %v13265_v61, %s6589_s12  ;;  %v2086_v55 = vsel %vm2076_vm8, %v2021_v56, %v1524_v23  ;;  %v13271_v23 = vld [vmem:[#allocation13_spill] sm:$0xff] }
 0x1e7   :  { %v2151_v52 = vsel %vm2141_vm9, %v2086_v55, %v1598_v24  ;;  %v1828_v24 = vsel %vm15_vm0, %v6962_v41, %v7459_v15 }
 0x1e8   :  { %v1692_v16 = vpop.permute.xlu0 %1691  ;;  %v1624_v62 = vpop.permute.xlu2 %1623  ;;  %v1893_v11 = vsel %vm1881_vm4, %v1828_v24, %v7879_v26  ;;  %v13273_v24 = vld [vmem:[#allocation35_spill] sm:$0xff] }
 0x1e9   :  { %v2216_v53 = vsel %vm2206_vm10, %v2151_v52, %v1692_v16  ;;  %v1958_v58 = vsel %vm1946_vm6, %v1893_v11, %v1362_v19  ;;  %v8086_v19 = vsel %vm1180_vm3, %v1247_v0, %v1248_v31  ;;  %v1251_v11 = vrot.slane %v13273_v24, 1 }
 0x1eb   :  { %1769 = vrot.lane.b32.xlu1 %v7538_v21, %s6594_s7 }
 0x1ed   :  { %1485 = vrot.lane.b32.xlu0 %v13266_v59, %s6590_s30  ;;  %v1762_v44 = vpop.permute.xlu1 %1761 }
 0x1ee   :  { %1629 = vrot.lane.b32.xlu2 %v13269_v39, %s6591_s4  ;;  %v2281_v4 = vsel %vm2271_vm11, %v2216_v53, %v1762_v44 }
 0x1ef   :  { %6476 = vmatmul.msk.bf16.gmra.mxu0 %vm2351_vm12, %v2281_v4  ;;  %v13272_v4 = vld [vmem:[#allocation33_spill] sm:$0xff] }
 0x1f0   :  { %v1456_v10 = vpop.permute.xlu0 %1455  ;;  %v1364_v29 = vpop.permute.xlu2 %1363 }
 0x1f1   :  { %v2023_v59 = vsel %vm2011_vm7, %v1958_v58, %v1456_v10  ;;  %v1250_v10 = vrot.slane %v13272_v4, 1 }
 0x1f3   :  { %1555 = vrot.lane.b32.xlu1 %v8033_v49, %s6592_s5 }
 0x1f5   :  { %1723 = vrot.lane.b32.xlu0 %v7363_v27, %s6593_s6  ;;  %v1526_v40 = vpop.permute.xlu1 %1525 }
 0x1f6   :  { %1369 = vrot.lane.b32.xlu2 %v7132_v6, %s6589_s12  ;;  %v2088_v15 = vsel %vm2076_vm8, %v2023_v59, %v1526_v40  ;;  %v8134_v59 = vsel %vm1180_vm3, %v1250_v10, %v1251_v11 }
 0x1f7   :  { %v2153_v12 = vsel %vm2141_vm9, %v2088_v15, %v1600_v43  ;;  %v1852_v43 = vsel %vm15_vm0, %v13218_v45, %v7584_v30 }
 0x1f8   :  { %v1694_v41 = vpop.permute.xlu0 %1693  ;;  %v1602_v26 = vpop.permute.xlu2 %1601  ;;  %v1917_v37 = vsel %vm1881_vm4, %v1852_v43, %v7930_v38  ;;  %v13275_v43 = vld [vmem:[#allocation16_spill] sm:$0xff] }
 0x1f9   :  { %v2218_v25 = vsel %vm2206_vm10, %v2153_v12, %v1694_v41  ;;  %v1982_v56 = vsel %vm1946_vm6, %v1917_v37, %v1386_v47 }
 0x1fb   :  { %1793 = vrot.lane.b32.xlu1 %v8086_v19, %s6594_s7 }
 0x1fd   :  { %1463 = vrot.lane.b32.xlu0 %v13268_v13, %s6590_s30  ;;  %v1764_v50 = vpop.permute.xlu1 %1763 }
 0x1fe   :  { %1607 = vrot.lane.b32.xlu2 %v7095_v17, %s6591_s4  ;;  %v2283_v8 = vsel %vm2271_vm11, %v2218_v25, %v1764_v50 }
 0x1ff   :  { %6477 = vmatmul.msk.bf16.gmra.mxu0 %vm2351_vm12, %v2283_v8 }
 0x200   :  { %v1480_v5 = vpop.permute.xlu0 %1479  ;;  %v1388_v63 = vpop.permute.xlu2 %1387 }
 0x201   :  { %v2047_v13 = vsel %vm2011_vm7, %v1982_v56, %v1480_v5 }
 0x203   :  { %1533 = vrot.lane.b32.xlu1 %v7538_v21, %s6592_s5 }
 0x205   :  { %1701 = vrot.lane.b32.xlu0 %v13271_v23, %s6593_s6  ;;  %v1550_v16 = vpop.permute.xlu1 %1549 }
 0x206   :  { %1771 = vrot.lane.b32.xlu2 %v7562_v2, %s6594_s7  ;;  %v2112_v30 = vsel %vm2076_vm8, %v2047_v13, %v1550_v16 }
 0x207   :  { %v2177_v38 = vsel %vm2141_vm9, %v2112_v30, %v1624_v62 }
 0x208   :  { %v1718_v55 = vpop.permute.xlu0 %1717  ;;  %v8112_v52 = vpop.permute.xlu2 %1625 }
 0x209   :  { %v2242_v21 = vsel %vm2206_vm10, %v2177_v38, %v1718_v55  ;;  %v1832_v55 = vsel %vm15_vm0, %v7074_v36, %v7580_v42  ;;  %v13276_v42 = vld [vmem:[#allocation45_spill] sm:$0xff]  ;;  %v13277_v38 = vld [vmem:[#allocation40_spill] sm:$0xff] }
 0x20a   :  { %v1897_v30 = vsel %vm1881_vm4, %v1832_v55, %v7883_v22 }
 0x20b   :  { %1319 = vrot.lane.b32.xlu1 %v8033_v49, %s6588_s29  ;;  %v1830_v49 = vsel %vm15_vm0, %v7022_v32, %v7559_v48 }
 0x20c   :  { %v1895_v58 = vsel %vm1881_vm4, %v1830_v49, %v7781_v18 }
 0x20d   :  { %1393 = vrot.lane.b32.xlu0 %v13269_v39, %s6589_s12  ;;  %v1788_v47 = vpop.permute.xlu1 %1787  ;;  %v1960_v0 = vsel %vm1946_vm6, %v1895_v58, %v1364_v29  ;;  %v13274_v29 = vld [vmem:[#allocation39_spill] sm:$0xff] }
 0x20e   :  { %1557 = vrot.lane.b32.xlu2 %v8086_v19, %s6592_s5  ;;  %v2307_v53 = vsel %vm2271_vm11, %v2242_v21, %v1788_v47  ;;  %v1253_v21 = vrot.slane %v13277_v38, 1  ;;  %v13278_v47 = vld [vmem:[#allocation41_spill] sm:$0xff] }
 0x20f   :  { %6489 = vmatmul.msk.bf16.vlgmr.msra.gmra.mxu3 %vm2351_vm12, %v2307_v53  ;;  %v1254_v53 = vrot.slane %v13278_v47, 1 }
 0x210   :  { %v1458_v44 = vpop.permute.xlu0 %1457  ;;  %v8126_v62 = vpop.permute.xlu2 %1365 }
 0x211   :  { %v2025_v9 = vsel %vm2011_vm7, %v1960_v0, %v1458_v44  ;;  %v8274_v11 = vsel %vm1180_vm3, %v1253_v21, %v1254_v53  ;;  %v13286_v21 = vld [vmem:[#allocation34_spill] sm:$0xff] }
 0x213   :  { %1487 = vrot.lane.b32.xlu1 %v7363_v27, %s6590_s30 }
 0x215   :  { %1631 = vrot.lane.b32.xlu0 %v13272_v4, %s6591_s4  ;;  %v1528_v31 = vpop.permute.xlu1 %1527 }
 0x216   :  { %1795 = vrot.lane.b32.xlu2 %v8134_v59, %s6594_s7  ;;  %v2090_v48 = vsel %vm2076_vm8, %v2025_v9, %v1528_v31  ;;  %v1856_v31 = vsel %vm15_vm0, %v13220_v14, %v7691_v46 }
 0x217   :  { %v2155_v27 = vsel %vm2141_vm9, %v2090_v48, %v1602_v26 }
 0x218   :  { %v1696_v32 = vpop.permute.xlu0 %1695  ;;  %v8145_v18 = vpop.permute.xlu2 %1603 }
 0x219   :  { %v2220_v40 = vsel %vm2206_vm10, %v2155_v27, %v1696_v32  ;;  %v1921_v32 = vsel %vm1881_vm4, %v1856_v31, %v7934_v7  ;;  %v13289_v31 = vld [vmem:[#allocation68_spill] sm:$0xff] }
 0x21b   :  { %1725 = vrot.lane.b32.xlu1 %v13274_v29, %s6593_s6 }
 0x21d   :  { %1371 = vrot.lane.b32.xlu0 %v7095_v17, %s6589_s12  ;;  %v1766_v41 = vpop.permute.xlu1 %1765 }
 0x21e   :  { %1535 = vrot.lane.b32.xlu2 %v7562_v2, %s6592_s5  ;;  %v2285_v15 = vsel %vm2271_vm11, %v2220_v40, %v1766_v41  ;;  %v1854_v2 = vsel %vm15_vm0, %v7262_v3, %v7669_v20 }
 0x21f   :  { %6478 = vmatmul.msk.bf16.gmra.mxu0 %vm2351_vm12, %v2285_v15  ;;  %v1919_v25 = vsel %vm1881_vm4, %v1854_v2, %v7885_v28  ;;  %v1834_v2 = vsel %vm15_vm0, %v7035_v57, %v7488_v51 }
 0x220   :  { %v1482_v26 = vpop.permute.xlu0 %1481  ;;  %v8173_v12 = vpop.permute.xlu2 %1389  ;;  %v1984_v50 = vsel %vm1946_vm6, %v1919_v25, %v1388_v63  ;;  %v13280_v25 = vld [vmem:[#allocation9_spill] sm:$0xff] }
 0x221   :  { %v2049_v8 = vsel %vm2011_vm7, %v1984_v50, %v1482_v26  ;;  %v1986_v48 = vsel %vm1946_vm6, %v1921_v32, %v8173_v12  ;;  %v1899_v50 = vsel %vm1881_vm4, %v1834_v2, %v13280_v25  ;;  %v13293_v2 = vld [vmem:[#allocation43_spill] sm:$0xff] }
 0x222   :  { %v1260_v25 = vrot.slane %v13293_v2, 1  ;;  %v13301_v2 = vld [vmem:[#allocation54_spill] sm:$0xff] }
 0x223   :  { %1465 = vrot.lane.b32.xlu1 %v13271_v23, %s6590_s30 }
 0x225   :  { %1609 = vrot.lane.b32.xlu0 %v7146_v33, %s6591_s4  ;;  %v1552_v20 = vpop.permute.xlu1 %1551 }
 0x226   :  { %1321 = vrot.lane.b32.xlu2 %v8086_v19, %s6588_s29  ;;  %v2114_v5 = vsel %vm2076_vm8, %v2049_v8, %v1552_v20 }
 0x227   :  { %v2179_v19 = vsel %vm2141_vm9, %v2114_v5, %v8112_v52  ;;  %v1962_v52 = vsel %vm1946_vm6, %v1897_v30, %v8126_v62  ;;  %v13282_v5 = vld [vmem:[#allocation44_spill] sm:$0xff] }
 0x228   :  { %v1720_v28 = vpop.permute.xlu0 %1719  ;;  %v8205_v63 = vpop.permute.xlu2 %1627 }
 0x229   :  { %v2244_v37 = vsel %vm2206_vm10, %v2179_v19, %v1720_v28 }
 0x22b   :  { %1703 = vrot.lane.b32.xlu1 %v13275_v43, %s6593_s6 }
 0x22d   :  { %1773 = vrot.lane.b32.xlu0 %v7541_v1, %s6594_s7  ;;  %v1790_v56 = vpop.permute.xlu1 %1789 }
 0x22e   :  { %1489 = vrot.lane.b32.xlu2 %v13274_v29, %s6590_s30  ;;  %v2309_v13 = vsel %vm2271_vm11, %v2244_v37, %v1790_v56  ;;  %v13279_v29 = vld [vmem:[#allocation19_spill] sm:$0xff]  ;;  %v13283_v37 = vld [vmem:[#allocation50_spill] sm:$0xff]  ;;  %v1256_v56 = vrot.slane %v13282_v5, 1 }
 0x22f   :  { %6490 = vmatmul.msk.bf16.gmra.mxu3 %vm2351_vm12, %v2309_v13  ;;  %v13284_v13 = vld [vmem:[#allocation46_spill] sm:$0xff] }
 0x230   :  { %v1460_v23 = vpop.permute.xlu0 %1459  ;;  %v1368_v16 = vpop.permute.xlu2 %1367 }
 0x231   :  { %v2027_v36 = vsel %vm2011_vm7, %v1962_v52, %v1460_v23  ;;  %v1964_v8 = vsel %vm1946_vm6, %v1899_v50, %v1368_v16  ;;  %v1257_v23 = vrot.slane %v13284_v13, 1 }
 0x233   :  { %1395 = vrot.lane.b32.xlu1 %v13272_v4, %s6589_s12 }
 0x235   :  { %1559 = vrot.lane.b32.xlu0 %v8134_v59, %s6592_s5  ;;  %v1530_v22 = vpop.permute.xlu1 %1529 }
 0x236   :  { %1727 = vrot.lane.b32.xlu2 %v13276_v42, %s6593_s6  ;;  %v2092_v10 = vsel %vm2076_vm8, %v2027_v36, %v1530_v22  ;;  %v8342_v36 = vsel %vm1180_vm3, %v1256_v56, %v1257_v23  ;;  %v13285_v22 = vld [vmem:[#allocation28_spill] sm:$0xff]  ;;  %v13295_v56 = vld [vmem:[#allocation47_spill] sm:$0xff] }
 0x237   :  { %v2157_v62 = vsel %vm2141_vm9, %v2092_v10, %v8145_v18 }
 0x238   :  { %v1698_v44 = vpop.permute.xlu0 %1697  ;;  %v1606_v24 = vpop.permute.xlu2 %1605 }
 0x239   :  { %v2222_v49 = vsel %vm2206_vm10, %v2157_v62, %v1698_v44 }
 0x23b   :  { %1633 = vrot.lane.b32.xlu1 %v13277_v38, %s6591_s4 }
 0x23d   :  { %1797 = vrot.lane.b32.xlu0 %v8274_v11, %s6594_s7  ;;  %v1768_v58 = vpop.permute.xlu1 %1767 }
 0x23e   :  { %1467 = vrot.lane.b32.xlu2 %v13275_v43, %s6590_s30  ;;  %v2287_v0 = vsel %vm2271_vm11, %v2222_v49, %v1768_v58 }
 0x23f   :  { %6479 = vmatmul.msk.bf16.gmra.mxu0 %vm2351_vm12, %v2287_v0 }
 0x240   :  { %v1484_v9 = vpop.permute.xlu0 %1483  ;;  %v1392_v34 = vpop.permute.xlu2 %1391 }
 0x241   :  { %v2051_v18 = vsel %vm2011_vm7, %v1986_v48, %v1484_v9  ;;  %v13288_v9 = vld [vmem:[#allocation17_spill] sm:$0xff] }
 0x243   :  { %1373 = vrot.lane.b32.xlu1 %v7146_v33, %s6589_s12 }
 0x245   :  { %1537 = vrot.lane.b32.xlu0 %v7541_v1, %s6592_s5  ;;  %v1554_v27 = vpop.permute.xlu1 %1553 }
 0x246   :  { %1705 = vrot.lane.b32.xlu2 %v13279_v29, %s6593_s6  ;;  %v2116_v14 = vsel %vm2076_vm8, %v2051_v18, %v1554_v27  ;;  %v13290_v27 = vld [vmem:[#allocation69_spill] sm:$0xff] }
 0x247   :  { %v2181_v7 = vsel %vm2141_vm9, %v2116_v14, %v8205_v63 }
 0x248   :  { %v1722_v40 = vpop.permute.xlu0 %1721  ;;  %v1630_v46 = vpop.permute.xlu2 %1629 }
 0x249   :  { %v2246_v41 = vsel %vm2206_vm10, %v2181_v7, %v1722_v40  ;;  %v13291_v40 = vld [vmem:[#allocation78_spill] sm:$0xff] }
 0x24b   :  { %1611 = vrot.lane.b32.xlu1 %v7184_v60, %s6591_s4 }
 0x24d   :  { %1323 = vrot.lane.b32.xlu0 %v8134_v59, %s6588_s29  ;;  %v1792_v1 = vpop.permute.xlu1 %1791  ;;  %v13281_v59 = vld [vmem:[#allocation66_spill] sm:$0xff] }
 0x24e   :  { %1397 = vrot.lane.b32.xlu2 %v13277_v38, %s6589_s12  ;;  %v2311_v15 = vsel %vm2271_vm11, %v2246_v41, %v1792_v1 }
 0x24f   :  { %6491 = vmatmul.msk.bf16.gmra.mxu3 %vm2351_vm12, %v2311_v15  ;;  %v13292_v15 = vld [vmem:[#allocation42_spill] sm:$0xff] }
 0x250   :  { %v1462_v26 = vpop.permute.xlu0 %1461  ;;  %v1370_v12 = vpop.permute.xlu2 %1369 }
 0x251   :  { %v2029_v20 = vsel %vm2011_vm7, %v1964_v8, %v1462_v26  ;;  %v1259_v26 = vrot.slane %v13292_v15, 1 }
 0x253   :  { %1775 = vrot.lane.b32.xlu1 %v13281_v59, %s6594_s7 }
 0x255   :  { %1491 = vrot.lane.b32.xlu0 %v13276_v42, %s6590_s30  ;;  %v1532_v28 = vpop.permute.xlu1 %1531  ;;  %v1858_v42 = vsel %vm15_vm0, %v13226_v35, %v13285_v22  ;;  %v13296_v22 = vld [vmem:[#allocation18_spill] sm:$0xff] }
 0x256   :  { %1635 = vrot.lane.b32.xlu2 %v13282_v5, %s6591_s4  ;;  %v2094_v57 = vsel %vm2076_vm8, %v2029_v20, %v1532_v28  ;;  %v1923_v47 = vsel %vm1881_vm4, %v1858_v42, %v13286_v21  ;;  %v155_v28 = vld [vmem:[%s12859_s0 + $0xf0] sm:$0xff] }
 0x257   :  { %v2159_v19 = vsel %vm2141_vm9, %v2094_v57, %v1606_v24  ;;  %v1988_v53 = vsel %vm1946_vm6, %v1923_v47, %v1392_v34  ;;  %v13287_v24 = vld [vmem:[#allocation14_spill] sm:$0xff]  ;;  %220 = vst.msk [vmem:[#allocation2 + $0x181] sm:$0xff] %vm15_vm0, %v155_v28 }
 0x258   :  { %v1700_v63 = vpop.permute.xlu0 %1699  ;;  %v1608_v51 = vpop.permute.xlu2 %1607 }
 0x259   :  { %v2224_v43 = vsel %vm2206_vm10, %v2159_v19, %v1700_v63  ;;  %v156_v63 = vld [vmem:[%s12859_s0 + $0xf8] sm:$0xff]  ;;  %v13294_v19 = vld [vmem:[#allocation73_spill] sm:$0xff] }
 0x25a   :  { %221 = vst.msk [vmem:[#allocation2 + $0x189] sm:$0xff] %vm15_vm0, %v156_v63 }
 0x25b   :  { %1561 = vrot.lane.b32.xlu1 %v8274_v11, %s6592_s5 }
 0x25d   :  { %1729 = vrot.lane.b32.xlu0 %v13283_v37, %s6593_s6  ;;  %v1770_v16 = vpop.permute.xlu1 %1769 }
 0x25e   :  { %1375 = vrot.lane.b32.xlu2 %v7184_v60, %s6589_s12  ;;  %v2289_v55 = vsel %vm2271_vm11, %v2224_v43, %v1770_v16  ;;  %v1860_v43 = vsel %vm15_vm0, %v13265_v61, %v13294_v19 }
 0x25f   :  { %6480 = vmatmul.msk.bf16.gmra.mxu0 %vm2351_vm12, %v2289_v55 }
 0x260   :  { %v1486_v30 = vpop.permute.xlu0 %1485  ;;  %v1772_v52 = vpop.permute.xlu2 %1771 }
 0x261   :  { %v2053_v44 = vsel %vm2011_vm7, %v1988_v53, %v1486_v30 }
 0x263   :  { %1799 = vrot.lane.b32.xlu1 %v8342_v36, %s6594_s7 }
 0x265   :  { %1469 = vrot.lane.b32.xlu0 %v13279_v29, %s6590_s30  ;;  %v1556_v10 = vpop.permute.xlu1 %1555  ;;  %v1836_v29 = vsel %vm15_vm0, %v7086_v54, %v13290_v27 }
 0x266   :  { %1613 = vrot.lane.b32.xlu2 %v13287_v24, %s6591_s4  ;;  %v2118_v35 = vsel %vm2076_vm8, %v2053_v44, %v1556_v10  ;;  %v1901_v14 = vsel %vm1881_vm4, %v1836_v29, %v13291_v40  ;;  %v302_v10 = vld [vmem:[#allocation2 + $0x180] sm:$0xff] }
 0x267   :  { %v2183_v58 = vsel %vm2141_vm9, %v2118_v35, %v1630_v46  ;;  %v1966_v46 = vsel %vm1946_vm6, %v1901_v14, %v1370_v12  ;;  %v13297_v35 = vld [vmem:[#allocation20_spill] sm:$0xff] }
 0x268   :  { %v1724_v62 = vpop.permute.xlu0 %1723  ;;  %v1558_v49 = vpop.permute.xlu2 %1557 }
 0x269   :  { %v2248_v0 = vsel %vm2206_vm10, %v2183_v58, %v1724_v62  ;;  %v303_v62 = vld [vmem:[#allocation2 + $0x188] sm:$0xff]  ;;  %v463_v58 = vpack.c.bf16 %v302_v10, %v302_v10 }
 0x26b   :  { %1539 = vrot.lane.b32.xlu1 %v13281_v59, %s6592_s5  ;;  %v8389_v59 = vsel %vm1180_vm3, %v1259_v26, %v1260_v25  ;;  %v1345_v29 = vunpack.c.l.b16 %v463_v58  ;;  %v13302_v25 = vld [vmem:[#allocation48_spill] sm:$0xff] }
 0x26d   :  { %1707 = vrot.lane.b32.xlu0 %v13288_v9, %s6593_s6  ;;  %v1794_v34 = vpop.permute.xlu1 %1793 }
 0x26e   :  { %1777 = vrot.lane.b32.xlu2 %v13289_v31, %s6594_s7  ;;  %v2313_v32 = vsel %vm2271_vm11, %v2248_v0, %v1794_v34  ;;  %v464_v0 = vpack.c.bf16 %v303_v62, %v303_v62  ;;  %v13299_v34 = vld [vmem:[#allocation23_spill] sm:$0xff] }
 0x26f   :  { %6492 = vmatmul.msk.bf16.gmra.mxu3 %vm2351_vm12, %v2313_v32 }
 0x270   :  { %v1464_v48 = vpop.permute.xlu0 %1463  ;;  %v1796_v18 = vpop.permute.xlu2 %1795  ;;  %v1346_v40 = vunpack.c.l.b16 %v464_v0 }
 0x271   :  { %v2031_v7 = vsel %vm2011_vm7, %v1966_v46, %v1464_v48  ;;  %v13300_v48 = vld [vmem:[#allocation67_spill] sm:$0xff] }
 0x273   :  { %1325 = vrot.lane.b32.xlu1 %v8274_v11, %s6588_s29 }
 0x275   :  { %1399 = vrot.lane.b32.xlu0 %v13282_v5, %s6589_s12  ;;  %v1534_v41 = vpop.permute.xlu1 %1533 }
 0x276   :  { %1563 = vrot.lane.b32.xlu2 %v8342_v36, %s6592_s5  ;;  %v2096_v1 = vsel %vm2076_vm8, %v2031_v7, %v1534_v41  ;;  %v8450_v41 = vpack.c.b16 %v1346_v40, %v1345_v29  ;;  %v13306_v40 = vld [vmem:[#allocation11_spill] sm:$0xff] }
 0x277   :  { %v2161_v12 = vsel %vm2141_vm9, %v2096_v1, %v1608_v51 }
 0x278   :  { %v1702_v54 = vpop.permute.xlu0 %1701  ;;  %v1536_v50 = vpop.permute.xlu2 %1535  ;;  %v1424_v63 = vshll.u32 %v8450_v41, 16 }
 0x279   :  { %v2226_v11 = vsel %vm2206_vm10, %v2161_v12, %v1702_v54  ;;  %v1262_v12 = vrot.slane %v13302_v25, 1 }
 0x27a   :  { %v2291_v8 = vsel %vm2271_vm11, %v2226_v11, %v1772_v52  ;;  %v13303_v11 = vld [vmem:[#allocation49_spill] sm:$0xff] }
 0x27b   :  { %6481 = vmatmul.msk.bf16.gmra.mxu0 %vm2351_vm12, %v2291_v8  ;;  %1493 = vrot.lane.b32.xlu1 %v13283_v37, %s6590_s30  ;;  %v1263_v8 = vrot.slane %v13303_v11, 1 }
 0x27d   :  { %1637 = vrot.lane.b32.xlu0 %v13292_v15, %s6591_s4  ;;  %v1320_v20 = vpop.permute.xlu1 %1319 }
 0x27e   :  { %1801 = vrot.lane.b32.xlu2 %v8389_v59, %s6594_s7  ;;  %v1925_v37 = vsel %vm1881_vm4, %v1860_v43, %v1320_v20  ;;  %v8468_v43 = vsel %vm1180_vm3, %v1262_v12, %v1263_v8 }
 0x280   :  { %v1394_v57 = vpop.permute.xlu0 %1393  ;;  %v8404_v51 = vpop.permute.xlu2 %1321 }
 0x281   :  { %v1990_v13 = vsel %vm1946_vm6, %v1925_v37, %v1394_v57  ;;  %v1422_v37 = vshrl.u32 %v8450_v41, 16 }
 0x283   :  { %1731 = vrot.lane.b32.xlu1 %v13295_v56, %s6593_s6 }
 0x285   :  { %1377 = vrot.lane.b32.xlu0 %v13287_v24, %s6589_s12  ;;  %v1488_v23 = vpop.permute.xlu1 %1487 }
 0x286   :  { %1541 = vrot.lane.b32.xlu2 %v13289_v31, %s6592_s5  ;;  %v2055_v55 = vsel %vm2011_vm7, %v1990_v13, %v1488_v23  ;;  %v304_v31 = vld [vmem:[#allocation2 + $0x190] sm:$0x3]  ;;  %v13304_v23 = vld [vmem:[#allocation8_spill] sm:$0xff] }
 0x287   :  { %v2120_v61 = vsel %vm2076_vm8, %v2055_v55, %v1558_v49  ;;  %v1838_v49 = vsel %vm15_vm0, %v7132_v6, %v13297_v35  ;;  %v467_v6 = vpack.c.bf16 %v304_v31, %v304_v31 }
 0x288   :  { %v1632_v16 = vpop.permute.xlu0 %1631  ;;  %v8419_v30 = vpop.permute.xlu2 %1489 }
 0x289   :  { %v2185_v52 = vsel %vm2141_vm9, %v2120_v61, %v1632_v16  ;;  %v1417_v1 = vunpack.c.l.b16 %v467_v6  ;;  %v1862_v16 = vsel %vm15_vm0, %v13269_v39, %v13304_v23 }
 0x28a   :  { %v1927_v61 = vsel %vm1881_vm4, %v1862_v16, %v8404_v51 }
 0x28b   :  { %1471 = vrot.lane.b32.xlu1 %v13288_v9, %s6590_s30  ;;  %v13298_v9 = vld [vmem:[#allocation81_spill] sm:$0xff]  ;;  %v1419_v28 = vpack.c.b16 %v1417_v1, %v1417_v1 }
 0x28d   :  { %1615 = vrot.lane.b32.xlu0 %v13296_v22, %s6591_s4  ;;  %v1726_v42 = vpop.permute.xlu1 %1725  ;;  %v1429_v13 = vshll.u32 %v1419_v28, 16 }
 0x28e   :  { %1327 = vrot.lane.b32.xlu2 %v8342_v36, %s6588_s29  ;;  %v2250_v21 = vsel %vm2206_vm10, %v2185_v52, %v1726_v42  ;;  %v1903_v36 = vsel %vm1881_vm4, %v1838_v49, %v13298_v9  ;;  %v1509_v9 = vrot.slane %v8450_v41, 1 }
 0x28f   :  { %v2315_v53 = vsel %vm2271_vm11, %v2250_v21, %v1796_v18  ;;  %v1431_v21 = vrot.slane %v1429_v13, 1 }
 0x290   :  { %v1372_v47 = vpop.permute.xlu0 %1371  ;;  %v8431_v44 = vpop.permute.xlu2 %1727  ;;  %6493 = vmatmul.msk.bf16.gmra.mxu3 %vm2351_vm12, %v2315_v53 }
 0x291   :  { %v1968_v32 = vsel %vm1946_vm6, %v1903_v36, %v1372_v47  ;;  %v1510_v36 = vrot.slane %v1419_v28, 1 }
 0x293   :  { %1709 = vrot.lane.b32.xlu1 %v13299_v34, %s6593_s6 }
 0x295   :  { %1779 = vrot.lane.b32.xlu0 %v13300_v48, %s6594_s7  ;;  %v1466_v18 = vpop.permute.xlu1 %1465 }
 0x296   :  { %1495 = vrot.lane.b32.xlu2 %v13295_v56, %s6590_s30  ;;  %v2033_v14 = vsel %vm2011_vm7, %v1968_v32, %v1466_v18  ;;  %v1426_v56 = vrot.slane %v1424_v63, 1  ;;  %v305_v32 = vld [vmem:[#allocation2 + $0x198] sm:$0xff]  ;;  %v1511_v18 = vsel %vm1180_vm3, %v1509_v9, %v1510_v36 }
 0x297   :  { %v2098_v7 = vsel %vm2076_vm8, %v2033_v14, %v1536_v50  ;;  %v469_v29 = vpack.c.bf16 %v305_v32, %v305_v32 }
 0x298   :  { %v1610_v27 = vpop.permute.xlu0 %1609  ;;  %v8447_v46 = vpop.permute.xlu2 %1467  ;;  %v1427_v42 = vor.u32 %v1426_v56, %v1422_v37  ;;  %v13308_v56 = vld [vmem:[#allocation59_spill] sm:$0xff] }
 0x299   :  { %v2163_v54 = vsel %vm2141_vm9, %v2098_v7, %v1610_v27  ;;  %v13305_v27 = vld [vmem:[#allocation64_spill] sm:$0xff]  ;;  %v307_v7 = vld [vmem:[#allocation2 + $0x1a8] sm:$0x3]  ;;  %v1583_v12 = vunpack.c.l.b16 %v469_v29 }
 0x29a   :  { %v8488_v62 = vsel %vm731_vm2, %v1427_v42, %v1431_v21  ;;  %v1840_v6 = vsel %vm15_vm0, %v7095_v17, %v13305_v27  ;;  %v473_v17 = vpack.c.bf16 %v307_v7, %v307_v7 }
 0x29b   :  { %1401 = vrot.lane.b32.xlu1 %v13292_v15, %s6589_s12  ;;  %v1905_v14 = vsel %vm1881_vm4, %v1840_v6, %v13306_v40 }
 0x29d   :  { %1565 = vrot.lane.b32.xlu0 %v8389_v59, %s6592_s5  ;;  %v1704_v26 = vpop.permute.xlu1 %1703 }
 0x29e   :  { %1733 = vrot.lane.b32.xlu2 %v13301_v2, %s6593_s6  ;;  %v2228_v50 = vsel %vm2206_vm10, %v2163_v54, %v1704_v26  ;;  %v13307_v26 = vld [vmem:[#allocation53_spill] sm:$0xff] }
 0x29f   :  { %v1265_v13 = vrot.slane %v13307_v26, 1 }
 0x2a0   :  { %v1774_v20 = vpop.permute.xlu0 %1773  ;;  %v8463_v57 = vpop.permute.xlu2 %1705 }
 0x2a1   :  { %v2293_v19 = vsel %vm2271_vm11, %v2228_v50, %v1774_v20 }
 0x2a2   :  { %6482 = vmatmul.msk.bf16.gmra.mxu0 %vm2351_vm12, %v2293_v19  ;;  %v1655_v19 = vunpack.c.l.b16 %v473_v17 }
 0x2a3   :  { %1639 = vrot.lane.b32.xlu1 %v13302_v25, %s6591_s4 }
 0x2a5   :  { %1803 = vrot.lane.b32.xlu0 %v8468_v43, %s6594_s7  ;;  %v1396_v55 = vpop.permute.xlu1 %1395 }
 0x2a6   :  { %1473 = vrot.lane.b32.xlu2 %v13299_v34, %s6590_s30  ;;  %v1992_v47 = vsel %vm1946_vm6, %v1927_v61, %v1396_v55  ;;  %v1657_v61 = vpack.c.b16 %v1655_v19, %v1655_v19 }
 0x2a7   :  { %v2057_v10 = vsel %vm2011_vm7, %v1992_v47, %v8419_v30  ;;  %v13310_v47 = vld [vmem:[#allocation26_spill] sm:$0xff] }
 0x2a8   :  { %v1560_v52 = vpop.permute.xlu0 %1559  ;;  %v8483_v53 = vpop.permute.xlu2 %1397 }
 0x2a9   :  { %v2122_v39 = vsel %vm2076_vm8, %v2057_v10, %v1560_v52  ;;  %v1864_v10 = vsel %vm15_vm0, %v13272_v4, %v13310_v47 }
 0x2ab   :  { %1379 = vrot.lane.b32.xlu1 %v13296_v22, %s6589_s12 }
 0x2ad   :  { %1543 = vrot.lane.b32.xlu0 %v13300_v48, %s6592_s5  ;;  %v1634_v51 = vpop.permute.xlu1 %1633 }
 0x2ae   :  { %1711 = vrot.lane.b32.xlu2 %v8488_v62, %s6593_s6  ;;  %v2187_v35 = vsel %vm2141_vm9, %v2122_v39, %v1634_v51 }
 0x2af   :  { %v2252_v30 = vsel %vm2206_vm10, %v2187_v35, %v8431_v44  ;;  %v306_v44 = vld [vmem:[#allocation2 + $0x1a0] sm:$0xff] }
 0x2b0   :  { %v1798_v49 = vpop.permute.xlu0 %1797  ;;  %v8498_v58 = vpop.permute.xlu2 %1635 }
 0x2b1   :  { %v2317_v0 = vsel %vm2271_vm11, %v2252_v30, %v1798_v49 }
 0x2b2   :  { %6494 = vmatmul.msk.bf16.gmra.mxu3 %vm2351_vm12, %v2317_v0 }
 0x2b3   :  { %1617 = vrot.lane.b32.xlu1 %v8450_v41, %s6591_s4 }
 0x2b5   :  { %1329 = vrot.lane.b32.xlu0 %v8389_v59, %s6588_s29  ;;  %v1374_v34 = vpop.permute.xlu1 %1373  ;;  %v470_v59 = vpack.c.bf16 %v306_v44, %v306_v44  ;;  %v1748_v44 = vrot.slane %v1657_v61, 1 }
 0x2b6   :  { %1403 = vrot.lane.b32.xlu2 %v13302_v25, %s6589_s12  ;;  %v1970_v1 = vsel %vm1946_vm6, %v1905_v14, %v1374_v34 }
 0x2b7   :  { %v1584_v11 = vunpack.c.l.b16 %v470_v59  ;;  %v2035_v8 = vsel %vm2011_vm7, %v1970_v1, %v8447_v46  ;;  %v13309_v46 = vld [vmem:[#allocation55_spill] sm:$0xff] }
 0x2b8   :  { %v1538_v31 = vpop.permute.xlu0 %1537  ;;  %v8511_v48 = vpop.permute.xlu2 %1375  ;;  %v1266_v23 = vrot.slane %v13309_v46, 1 }
 0x2b9   :  { %v2100_v20 = vsel %vm2076_vm8, %v2035_v8, %v1538_v31  ;;  %v1587_v63 = vpack.c.b16 %v1584_v11, %v1583_v12 }
 0x2ba   :  { %v8550_v35 = vsel %vm1180_vm3, %v1265_v13, %v1266_v23 }
 0x2bb   :  { %1781 = vrot.lane.b32.xlu1 %v1511_v18, %s6594_s7  ;;  %v1662_v52 = vshll.u32 %v1587_v63, 16  ;;  %v1747_v32 = vrot.slane %v1587_v63, 1 }
 0x2bd   :  { %1497 = vrot.lane.b32.xlu0 %v13301_v2, %s6590_s30  ;;  %v1612_v54 = vpop.permute.xlu1 %1611  ;;  %v8531_v2 = vpop.f32.mrf.mxu0  ;;  %v1664_v49 = vrot.slane %v1662_v52, 1 }
 0x2be   :  { %1641 = vrot.lane.b32.xlu2 %v13307_v26, %s6591_s4  ;;  %v2165_v37 = vsel %vm2141_vm9, %v2100_v20, %v1612_v54 }
 0x2bf   :  { %v2230_v55 = vsel %vm2206_vm10, %v2165_v37, %v8463_v57  ;;  %v1660_v57 = vshrl.u32 %v1587_v63, 16  ;;  %v13314_v37 = vld [vmem:[#allocation52_spill] sm:$0xff] }
 0x2c0   :  { %v1324_v50 = vpop.permute.xlu0 %1323  ;;  %v8528_v28 = vpop.permute.xlu2 %1613  ;;  %v1269_v13 = vrot.slane %v13314_v37, 1 }
 0x2c1   :  { %v1929_v51 = vsel %vm1881_vm4, %v1864_v10, %v1324_v50  ;;  %v1665_v36 = vor.u32 %v1664_v49, %v1660_v57  ;;  %v13317_v57 = vld [vmem:[#allocation21_spill] sm:$0xff] }
 0x2c2   :  { %v1994_v30 = vsel %vm1946_vm6, %v1929_v51, %v8483_v53 }
 0x2c3   :  { %1567 = vrot.lane.b32.xlu1 %v8468_v43, %s6592_s5 }
 0x2c5   :  { %1735 = vrot.lane.b32.xlu0 %v13308_v56, %s6593_s6  ;;  %v1776_v16 = vpop.permute.xlu1 %1775  ;;  %v8559_v4 = vpop.f32.mrf.mxu0 }
 0x2c6   :  { %1381 = vrot.lane.b32.xlu2 %v8450_v41, %s6589_s12  ;;  %v2295_v42 = vsel %vm2271_vm11, %v2230_v55, %v1776_v16  ;;  %v1667_v41 = vshll.u32 %v1657_v61, 16 }
 0x2c7   :  { %6483 = vmatmul.msk.bf16.gmra.mxu0 %vm2351_vm12, %v2295_v42  ;;  %v13315_v42 = vld [vmem:[#allocation74_spill] sm:$0xff] }
 0x2c8   :  { %v1492_v21 = vpop.permute.xlu0 %1491  ;;  %v1778_v39 = vpop.permute.xlu2 %1777  ;;  %v1669_v34 = vrot.slane %v1667_v41, 1 }
 0x2c9   :  { %v2059_v0 = vsel %vm2011_vm7, %v1994_v30, %v1492_v21  ;;  %v1866_v21 = vsel %vm15_vm0, %v13277_v38, %v13315_v42 }
 0x2ca   :  { %v1670_v53 = vsel %vm731_vm2, %v1665_v36, %v1669_v34 }
 0x2cb   :  { %1805 = vrot.lane.b32.xlu1 %v8550_v35, %s6594_s7 }
 0x2cd   :  { %1475 = vrot.lane.b32.xlu0 %v8488_v62, %s6590_s30  ;;  %v1562_v9 = vpop.permute.xlu1 %1561  ;;  %v1749_v62 = vsel %vm1180_vm3, %v1747_v32, %v1748_v44  ;;  %v8572_v1 = vpop.f32.mrf.mxu0 }
 0x2ce   :  { %1619 = vrot.lane.b32.xlu2 %v1587_v63, %s6591_s4  ;;  %v2124_v27 = vsel %vm2076_vm8, %v2059_v0, %v1562_v9  ;;  %v13313_v63 = vld [vmem:[#allocation51_spill] sm:$0xff]  ;;  %v13318_v0 = vld [vmem:[#allocation24_spill] sm:$0xff] }
 0x2cf   :  { %v2189_v29 = vsel %vm2141_vm9, %v2124_v27, %v8498_v58  ;;  %v13311_v58 = vld [vmem:[#allocation29_spill] sm:$0xff]  ;;  %v1268_v19 = vrot.slane %v13313_v63, 1 }
 0x2d0   :  { %v1730_v31 = vpop.permute.xlu0 %1729  ;;  %v1564_v6 = vpop.permute.xlu2 %1563  ;;  %v1842_v12 = vsel %vm15_vm0, %v7146_v33, %v13311_v58  ;;  %v13319_v27 = vld [vmem:[#allocation25_spill] sm:$0xff] }
 0x2d1   :  { %v2254_v59 = vsel %vm2206_vm10, %v2189_v29, %v1730_v31  ;;  %v8600_v55 = vsel %vm1180_vm3, %v1268_v19, %v1269_v13  ;;  %v13321_v29 = vld [vmem:[#allocation27_spill] sm:$0xff] }
 0x2d3   :  { %1545 = vrot.lane.b32.xlu1 %v1511_v18, %s6592_s5  ;;  %v13312_v18 = vld [vmem:[#allocation79_spill] sm:$0xff] }
 0x2d4   :  { %v1907_v11 = vsel %vm1881_vm4, %v1842_v12, %v13312_v18 }
 0x2d5   :  { %1713 = vrot.lane.b32.xlu0 %v1670_v53, %s6593_s6  ;;  %v1800_v40 = vpop.permute.xlu1 %1799  ;;  %v1972_v17 = vsel %vm1946_vm6, %v1907_v11, %v8511_v48  ;;  %v8595_v23 = vpop.f32.mrf.mxu0  ;;  %v13320_v53 = vld [vmem:[#allocation82_spill] sm:$0xff] }
 0x2d6   :  { %1783 = vrot.lane.b32.xlu2 %v1749_v62, %s6594_s7  ;;  %v2319_v14 = vsel %vm2271_vm11, %v2254_v59, %v1800_v40  ;;  %v13322_v62 = vld [vmem:[#allocation70_spill] sm:$0xff] }
 0x2d7   :  { %6495 = vmatmul.msk.bf16.gmra.mxu3 %vm2351_vm12, %v2319_v14  ;;  %v187_v40 = vld [vmem:[%s12859_s0 + $0x1f0] sm:$0xff] }
 0x2d8   :  { %v1470_v7 = vpop.permute.xlu0 %1469  ;;  %v1802_v54 = vpop.permute.xlu2 %1801  ;;  %252 = vst.msk [vmem:[#allocation2 + $0x331] sm:$0xff] %vm15_vm0, %v187_v40 }
 0x2d9   :  { %v2037_v8 = vsel %vm2011_vm7, %v1972_v17, %v1470_v7  ;;  %v13323_v17 = vld [vmem:[#allocation61_spill] sm:$0xff] }
 0x2db   :  { %1331 = vrot.lane.b32.xlu1 %v8468_v43, %s6588_s29 }
 0x2dd   :  { %1405 = vrot.lane.b32.xlu0 %v13307_v26, %s6589_s12  ;;  %v1540_v50 = vpop.permute.xlu1 %1539  ;;  %v8611_v47 = vpop.f32.mrf.mxu0 }
 0x2de   :  { %1569 = vrot.lane.b32.xlu2 %v8550_v35, %s6592_s5  ;;  %v2102_v33 = vsel %vm2076_vm8, %v2037_v8, %v1540_v50  ;;  %v13324_v8 = vld [vmem:[#allocation56_spill] sm:$0xff] }
 0x2df   :  { %v2167_v48 = vsel %vm2141_vm9, %v2102_v33, %v8528_v28  ;;  %v1271_v50 = vrot.slane %v13324_v8, 1  ;;  %v13325_v33 = vld [vmem:[#allocation58_spill] sm:$0xff] }
 0x2e0   :  { %v1708_v20 = vpop.permute.xlu0 %1707  ;;  %v1542_v43 = vpop.permute.xlu2 %1541 }
 0x2e1   :  { %v2232_v46 = vsel %vm2206_vm10, %v2167_v48, %v1708_v20  ;;  %v1272_v20 = vrot.slane %v13325_v33, 1 }
 0x2e2   :  { %v2297_v16 = vsel %vm2271_vm11, %v2232_v46, %v1778_v39  ;;  %v13316_v39 = vld [vmem:[#allocation57_spill] sm:$0xff] }
 0x2e3   :  { %6484 = vmatmul.msk.bf16.gmra.mxu0 %vm2351_vm12, %v2297_v16  ;;  %1499 = vrot.lane.b32.xlu1 %v13308_v56, %s6590_s30  ;;  %v1273_v46 = vsel %vm1180_vm3, %v1271_v50, %v1272_v20  ;;  %v13326_v16 = vld [vmem:[#allocation75_spill] sm:$0xff] }
 0x2e5   :  { %1643 = vrot.lane.b32.xlu0 %v13313_v63, %s6591_s4  ;;  %v1326_v61 = vpop.permute.xlu1 %1325  ;;  %v8628_v36 = vpop.f32.mrf.mxu0 }
 0x2e6   :  { %1807 = vrot.lane.b32.xlu2 %v8600_v55, %s6594_s7  ;;  %v1931_v10 = vsel %vm1881_vm4, %v1866_v21, %v1326_v61  ;;  %v1868_v61 = vsel %vm15_vm0, %v13282_v5, %v13326_v16 }
 0x2e8   :  { %v1400_v28 = vpop.permute.xlu0 %1399  ;;  %v1328_v52 = vpop.permute.xlu2 %1327 }
 0x2e9   :  { %v1996_v56 = vsel %vm1946_vm6, %v1931_v10, %v1400_v28  ;;  %v1933_v42 = vsel %vm1881_vm4, %v1868_v61, %v1328_v52  ;;  %v13327_v52 = vld [vmem:[#allocation60_spill] sm:$0xff] }
 0x2eb   :  { %1737 = vrot.lane.b32.xlu1 %v13316_v39, %s6593_s6 }
 0x2ed   :  { %1383 = vrot.lane.b32.xlu0 %v13218_v45, %s6589_s12  ;;  %v1494_v51 = vpop.permute.xlu1 %1493  ;;  %v8654_v7 = vpop.f32.mrf.mxu0 }
 0x2ee   :  { %1547 = vrot.lane.b32.xlu2 %v13317_v57, %s6592_s5  ;;  %v2061_v41 = vsel %vm2011_vm7, %v1996_v56, %v1494_v51 }
 0x2ef   :  { %v2126_v30 = vsel %vm2076_vm8, %v2061_v41, %v1564_v6  ;;  %v1844_v6 = vsel %vm15_vm0, %v7184_v60, %v13319_v27  ;;  %v188_v60 = vld [vmem:[%s12859_s0 + $0x1f8] sm:$0xff]  ;;  %s6596_s0 = smov 40  }
 0x2f0   :  { %v1638_v49 = vpop.permute.xlu0 %1637  ;;  %v1496_v38 = vpop.permute.xlu2 %1495  ;;  %253 = vst.msk [vmem:[#allocation2 + $0x339] sm:$0xff] %vm15_vm0, %v188_v60  ;;  %v13328_v27 = vld [vmem:[#allocation63_spill] sm:$0xff] }
 0x2f1   :  { %v2191_v9 = vsel %vm2141_vm9, %v2126_v30, %v1638_v49  ;;  %v356_v49 = vld [vmem:[#allocation2 + $0x330] sm:$0xff] }
 0x2f3   :  { %1477 = vrot.lane.b32.xlu1 %v13318_v0, %s6590_s30 }
 0x2f5   :  { %1621 = vrot.lane.b32.xlu0 %v7262_v3, %s6591_s4  ;;  %v1732_v45 = vpop.permute.xlu1 %1731  ;;  %v1909_v3 = vsel %vm1881_vm4, %v1844_v6, %v13320_v53  ;;  %v13329_v6 = vld [vmem:[#allocation62_spill] sm:$0xff] }
 0x2f6   :  { %1333 = vrot.lane.b32.xlu2 %v8550_v35, %s6588_s29  ;;  %v2256_v34 = vsel %vm2206_vm10, %v2191_v9, %v1732_v45  ;;  %v465_v45 = vpack.c.bf16 %v356_v49, %v356_v49  ;;  %v1275_v53 = vrot.slane %v13329_v6, 1  ;;  %v361_v49 = vld [vmem:[#allocation2 + $0x358] sm:$0x3] }
 0x2f7   :  { %v2321_v32 = vsel %vm2271_vm11, %v2256_v34, %v1802_v54  ;;  %v357_v41 = vld [vmem:[#allocation2 + $0x338] sm:$0xff] }
 0x2f8   :  { %v1378_v31 = vpop.permute.xlu0 %1377  ;;  %v1734_v44 = vpop.permute.xlu2 %1733  ;;  %6496 = vmatmul.msk.bf16.gmra.mxu3 %vm2351_vm12, %v2321_v32  ;;  %v466_v34 = vpack.c.bf16 %v357_v41, %v357_v41  ;;  %v1274_v32 = vrot.slane %v13327_v52, 1 }
 0x2f9   :  { %v1974_v35 = vsel %vm1946_vm6, %v1909_v3, %v1378_v31  ;;  %v358_v31 = vld [vmem:[#allocation2 + $0x340] sm:$0x3]  ;;  %v1347_v3 = vunpack.c.l.b16 %v465_v45 }
 0x2fa   :  { %v1276_v40 = vsel %vm1180_vm3, %v1274_v32, %v1275_v53 }
 0x2fb   :  { %1715 = vrot.lane.b32.xlu1 %v13321_v29, %s6593_s6  ;;  %v1348_v29 = vunpack.c.l.b16 %v466_v34  ;;  %v474_v34 = vpack.c.bf16 %v361_v49, %v361_v49  ;;  %v8779_v49 = vpop.f32.mrf.mxu3 }
 0x2fd   :  { %1785 = vrot.lane.b32.xlu0 %v13322_v62, %s6594_s7  ;;  %v1472_v59 = vpop.permute.xlu1 %1471 }
 0x2fe   :  { %1501 = vrot.lane.b32.xlu2 %v13316_v39, %s6590_s30  ;;  %v2039_v54 = vsel %vm2011_vm7, %v1974_v35, %v1472_v59  ;;  %v468_v35 = vpack.c.bf16 %v358_v31, %v358_v31 }
 0x2ff   :  { %v2104_v12 = vsel %vm2076_vm8, %v2039_v54, %v1542_v43  ;;  %v8675_v43 = vpop.f32.mrf.mxu0 }
 0x300   :  { %v1616_v14 = vpop.permute.xlu0 %1615  ;;  %v8657_v58 = vpop.permute.xlu2 %1473  ;;  %v1418_v54 = vunpack.c.l.b16 %v468_v35 }
 0x301   :  { %v2169_v18 = vsel %vm2141_vm9, %v2104_v12, %v1616_v14  ;;  %v8717_v14 = vpack.c.b16 %v1348_v29, %v1347_v3  ;;  %v13330_v12 = vld [vmem:[#allocation65_spill] sm:$0xff] }
 0x302   :  { %v1420_v33 = vpack.c.b16 %v1418_v54, %v1418_v54 }
 0x303   :  { %1407 = vrot.lane.b32.xlu1 %v13313_v63, %s6589_s12  ;;  %v1436_v20 = vshll.u32 %v8717_v14, 16  ;;  %v1434_v16 = vshrl.u32 %v8717_v14, 16 }
 0x305   :  { %1571 = vrot.lane.b32.xlu0 %v8600_v55, %s6592_s5  ;;  %v1710_v11 = vpop.permute.xlu1 %1709  ;;  %v1438_v61 = vrot.slane %v1436_v20, 1 }
 0x306   :  { %1739 = vrot.lane.b32.xlu2 %v13323_v17, %s6593_s6  ;;  %v2234_v19 = vsel %vm2206_vm10, %v2169_v18, %v1710_v11  ;;  %v1846_v18 = vsel %vm15_vm0, %v13287_v24, %v13330_v12  ;;  %v13331_v11 = vld [vmem:[#allocation83_spill] sm:$0xff] }
 0x307   :  { %v8691_v51 = vpop.f32.mrf.mxu0 }
 0x308   :  { %v1780_v37 = vpop.permute.xlu0 %1779  ;;  %v8672_v48 = vpop.permute.xlu2 %1711 }
 0x309   :  { %v2299_v13 = vsel %vm2271_vm11, %v2234_v19, %v1780_v37 }
 0x30a   :  { %6485 = vmatmul.msk.bf16.gmra.mxu0 %vm2351_vm12, %v2299_v13 }
 0x30b   :  { %1645 = vrot.lane.b32.xlu1 %v13324_v8, %s6591_s4 }
 0x30d   :  { %1809 = vrot.lane.b32.xlu0 %v1273_v46, %s6594_s7  ;;  %v1402_v28 = vpop.permute.xlu1 %1401 }
 0x30e   :  { %1409 = vrot.lane.b32.xlu2 %v13324_v8, %s6589_s12  ;;  %v1998_v10 = vsel %vm1946_vm6, %v1933_v42, %v1402_v28  ;;  %v1441_v28 = vshll.u32 %v1420_v33, 16  ;;  %v1512_v42 = vrot.slane %v8717_v14, 1 }
 0x30f   :  { %v2063_v56 = vsel %vm2011_vm7, %v1998_v10, %v1496_v38  ;;  %v359_v10 = vld [vmem:[#allocation2 + $0x348] sm:$0xff] }
 0x310   :  { %v1566_v21 = vpop.permute.xlu0 %1565  ;;  %v8688_v39 = vpop.permute.xlu2 %1403 }
 0x311   :  { %v2128_v5 = vsel %vm2076_vm8, %v2063_v56, %v1566_v21  ;;  %v1513_v21 = vrot.slane %v1420_v33, 1  ;;  %v360_v56 = vld [vmem:[#allocation2 + $0x350] sm:$0xff] }
 0x312   :  { %v472_v41 = vpack.c.bf16 %v360_v56, %v360_v56 }
 0x313   :  { %1335 = vrot.lane.b32.xlu1 %v8600_v55, %s6588_s29 }
 0x314   :  { %v1586_v3 = vunpack.c.l.b16 %v472_v41 }
 0x315   :  { %1503 = vrot.lane.b32.xlu0 %v13323_v17, %s6590_s30  ;;  %v1640_v57 = vpop.permute.xlu1 %1639  ;;  %v1911_v17 = vsel %vm1881_vm4, %v1846_v18, %v13331_v11 }
 0x316   :  { %1647 = vrot.lane.b32.xlu2 %v13327_v52, %s6591_s4  ;;  %v2193_v30 = vsel %vm2141_vm9, %v2128_v5, %v1640_v57 }
 0x317   :  { %v2258_v9 = vsel %vm2206_vm10, %v2193_v30, %v1734_v44  ;;  %v8711_v44 = vpop.f32.mrf.mxu0  ;;  %v1439_v30 = vor.u32 %v1438_v61, %v1434_v16 }
 0x318   :  { %v1804_v0 = vpop.permute.xlu0 %1803  ;;  %v8701_v38 = vpop.permute.xlu2 %1641 }
 0x319   :  { %v2323_v55 = vsel %vm2271_vm11, %v2258_v9, %v1804_v0  ;;  %v1443_v0 = vrot.slane %v1441_v28, 1  ;;  %v1514_v9 = vsel %vm1180_vm3, %v1512_v42, %v1513_v21 }
 0x31a   :  { %6497 = vmatmul.msk.bf16.gmra.mxu3 %vm2351_vm12, %v2323_v55 }
 0x31b   :  { %1573 = vrot.lane.b32.xlu1 %v1273_v46, %s6592_s5  ;;  %v1444_v35 = vsel %vm731_vm2, %v1439_v30, %v1443_v0 }
 0x31d   :  { %1741 = vrot.lane.b32.xlu0 %v13328_v27, %s6593_s6  ;;  %v1380_v62 = vpop.permute.xlu1 %1379 }
 0x31e   :  { %1337 = vrot.lane.b32.xlu2 %v1273_v46, %s6588_s29  ;;  %v1976_v50 = vsel %vm1946_vm6, %v1911_v17, %v1380_v62 }
 0x31f   :  { %v2041_v37 = vsel %vm2011_vm7, %v1976_v50, %v8657_v58  ;;  %v8732_v13 = vpop.f32.mrf.mxu0  ;;  %v471_v58 = vpack.c.bf16 %v359_v10, %v359_v10 }
 0x320   :  { %v1544_v59 = vpop.permute.xlu0 %1543  ;;  %v8715_v60 = vpop.permute.xlu2 %1381 }
 0x321   :  { %v2106_v46 = vsel %vm2076_vm8, %v2041_v37, %v1544_v59  ;;  %v1585_v53 = vunpack.c.l.b16 %v471_v58  ;;  %v13334_v58 = vld [vmem:[#allocation80_spill] sm:$0xff] }
 0x323   :  { %1811 = vrot.lane.b32.xlu1 %v1276_v40, %s6594_s7  ;;  %v1588_v54 = vpack.c.b16 %v1586_v3, %v1585_v53 }
 0x325   :  { %1411 = vrot.lane.b32.xlu0 %v13327_v52, %s6589_s12  ;;  %v1618_v19 = vpop.permute.xlu1 %1617  ;;  %v1674_v17 = vshll.u32 %v1588_v54, 16  ;;  %v1672_v20 = vshrl.u32 %v1588_v54, 16  ;;  %v1750_v42 = vrot.slane %v1588_v54, 1 }
 0x326   :  { %1575 = vrot.lane.b32.xlu2 %v1276_v40, %s6592_s5  ;;  %v2171_v5 = vsel %vm2141_vm9, %v2106_v46, %v1618_v19 }
 0x327   :  { %v2236_v45 = vsel %vm2206_vm10, %v2171_v5, %v8672_v48  ;;  %v8755_v62 = vpop.f32.mrf.mxu0  ;;  %v1656_v48 = vunpack.c.l.b16 %v474_v34  ;;  %v1676_v19 = vrot.slane %v1674_v17, 1 }
 0x328   :  { %v1330_v24 = vpop.permute.xlu0 %1329  ;;  %v8738_v57 = vpop.permute.xlu2 %1619 }
 0x329   :  { %v1658_v11 = vpack.c.b16 %v1656_v48, %v1656_v48 }
 0x32b   :  { %1505 = vrot.lane.b32.xlu1 %v13328_v27, %s6590_s30  ;;  %v13332_v27 = vld [vmem:[#allocation5_spill] sm:$0xff]  ;;  %v1679_v37 = vshll.u32 %v1658_v11, 16  ;;  %v1751_v21 = vrot.slane %v1658_v11, 1 }
 0x32c   :  { %v1870_v6 = vsel %vm15_vm0, %v13292_v15, %v13332_v27 }
 0x32d   :  { %1649 = vrot.lane.b32.xlu0 %v8717_v14, %s6591_s4  ;;  %v1782_v55 = vpop.permute.xlu1 %1781  ;;  %v1935_v29 = vsel %vm1881_vm4, %v1870_v6, %v1330_v24  ;;  %v1681_v46 = vrot.slane %v1679_v37, 1  ;;  %v1752_v30 = vsel %vm1180_vm3, %v1750_v42, %v1751_v21  ;;  %v8796_v6 = vpop.f32.mrf.mxu3  ;;  %v13339_v42 = vld [vmem:[#allocation84_spill] sm:$0xff] }
 0x32e   :  { %1813 = vrot.lane.b32.xlu2 %v1514_v9, %s6594_s7  ;;  %v2301_v31 = vsel %vm2271_vm11, %v2236_v45, %v1782_v55  ;;  %v2000_v59 = vsel %vm1946_vm6, %v1935_v29, %v8688_v39  ;;  %v1677_v39 = vor.u32 %v1676_v19, %v1672_v20 }
 0x32f   :  { %6486 = vmatmul.msk.bf16.gmra.mxu0 %vm2351_vm12, %v2301_v31  ;;  %v8764_v24 = vpop.f32.mrf.mxu0 }
 0x330   :  { %v1498_v32 = vpop.permute.xlu0 %1497  ;;  %v1784_v15 = vpop.permute.xlu2 %1783  ;;  %v1682_v61 = vsel %vm731_vm2, %v1677_v39, %v1681_v46 }
 0x331   :  { %v2065_v12 = vsel %vm2011_vm7, %v2000_v59, %v1498_v32 }
 0x333   :  { %1743 = vrot.lane.b32.xlu1 %v1444_v35, %s6593_s6 }
 0x335   :  { %1339 = vrot.lane.b32.xlu0 %v1276_v40, %s6588_s29  ;;  %v1568_v18 = vpop.permute.xlu1 %1567  ;;  %v8804_v59 = vpop.f32.mrf.mxu3 }
 0x336   :  { %1507 = vrot.lane.b32.xlu2 %v1444_v35, %s6590_s30  ;;  %v2130_v33 = vsel %vm2076_vm8, %v2065_v12, %v1568_v18  ;;  %v13335_v35 = vld [vmem:[#allocation4_spill] sm:$0xff] }
 0x337   :  { %v2195_v16 = vsel %vm2141_vm9, %v2130_v33, %v8701_v38  ;;  %v13333_v38 = vld [vmem:[#allocation6_spill] sm:$0xff]  ;;  %v1872_v48 = vsel %vm15_vm0, %v13302_v25, %v13335_v35 }
 0x338   :  { %v1736_v50 = vpop.permute.xlu0 %1735  ;;  %v1570_v10 = vpop.permute.xlu2 %1569 }
 0x339   :  { %v2260_v40 = vsel %vm2206_vm10, %v2195_v16, %v1736_v50 }
 0x33b   :  { %1413 = vrot.lane.b32.xlu1 %v8717_v14, %s6589_s12  ;;  %v1848_v14 = vsel %vm15_vm0, %v13296_v22, %v13333_v38 }
 0x33c   :  { %v1913_v41 = vsel %vm1881_vm4, %v1848_v14, %v13334_v58 }
 0x33d   :  { %1577 = vrot.lane.b32.xlu0 %v1514_v9, %s6592_s5  ;;  %v1806_v28 = vpop.permute.xlu1 %1805  ;;  %v1978_v0 = vsel %vm1946_vm6, %v1913_v41, %v8715_v60  ;;  %v8786_v9 = vpop.f32.mrf.mxu0 }
 0x33e   :  { %1745 = vrot.lane.b32.xlu2 %v1682_v61, %s6593_s6  ;;  %v2325_v56 = vsel %vm2271_vm11, %v2260_v40, %v1806_v28  ;;  %v8813_v20 = vpop.f32.mrf.mxu3  ;;  %v13337_v40 = vld [vmem:[#allocation71_spill] sm:$0xff]  ;;  %v13338_v61 = vld [vmem:[#allocation22_spill] sm:$0xff] }
 0x33f   :  { %6498 = vmatmul.msk.bf16.gmra.mxu3 %vm2351_vm12, %v2325_v56  ;;  %13336 = vst [vmem:[#allocation10_spill] sm:$0xff] %v8813_v20  ;;  %v1850_v28 = vsel %vm15_vm0, %v13338_v61, %v13337_v40 }
 0x340   :  { %v1476_v5 = vpop.permute.xlu0 %1475  ;;  %v1808_v32 = vpop.permute.xlu2 %1807  ;;  %v1915_v21 = vsel %vm1881_vm4, %v1850_v28, %v13339_v42  ;;  %v13342_v28 = vld [vmem:[#allocation72_spill] sm:$0xff] }
 0x341   :  { %v2043_v55 = vsel %vm2011_vm7, %v1978_v0, %v1476_v5  ;;  %v1876_v42 = vsel %vm15_vm0, %v13313_v63, %v13342_v28 }
 0x343   :  { %1651 = vrot.lane.b32.xlu1 %v1588_v54, %s6591_s4 }
 0x345   :  { %1815 = vrot.lane.b32.xlu0 %v1752_v30, %s6594_s7  ;;  %v1546_v45 = vpop.permute.xlu1 %1545  ;;  %v8799_v53 = vpop.f32.mrf.mxu0 }
 0x346   :  { %v2108_v22 = vsel %vm2076_vm8, %v2043_v55, %v1546_v45 }
 0x347   :  { %v2173_v31 = vsel %vm2141_vm9, %v2108_v22, %v8738_v57 }
 0x348   :  { %v1714_v34 = vpop.permute.xlu0 %1713  ;;  %v1548_v57 = vpop.permute.xlu2 %1547 }
 0x349   :  { %v2238_v27 = vsel %vm2206_vm10, %v2173_v31, %v1714_v34 }
 0x34a   :  { %v2303_v60 = vsel %vm2271_vm11, %v2238_v27, %v1784_v15 }
 0x34b   :  { %6487 = vmatmul.msk.bf16.gmra.mxu0 %vm2351_vm12, %v2303_v60  ;;  %v13340_v60 = vld [vmem:[#allocation76_spill] sm:$0xff] }
 0x34d   :  { %v1332_v3 = vpop.permute.xlu1 %1331  ;;  %v8808_v15 = vpop.f32.mrf.mxu0 }
 0x34e   :  { %v1937_v54 = vsel %vm1881_vm4, %v1872_v48, %v1332_v3  ;;  %v1874_v3 = vsel %vm15_vm0, %v13307_v26, %v13340_v60 }
 0x350   :  { %v1406_v29 = vpop.permute.xlu0 %1405  ;;  %v1334_v25 = vpop.permute.xlu2 %1333 }
 0x351   :  { %v2002_v12 = vsel %vm1946_vm6, %v1937_v54, %v1406_v29  ;;  %v1939_v48 = vsel %vm1881_vm4, %v1874_v3, %v1334_v25 }
 0x355   :  { %v1500_v18 = vpop.permute.xlu1 %1499  ;;  %v8815_v19 = vpop.f32.mrf.mxu0 }
 0x356   :  { %v2067_v17 = vsel %vm2011_vm7, %v2002_v12, %v1500_v18 }
 0x357   :  { %v2132_v50 = vsel %vm2076_vm8, %v2067_v17, %v1570_v10  ;;  %v8825_v10 = vpop.f32.mrf.mxu3 }
 0x358   :  { %v1644_v11 = vpop.permute.xlu0 %1643  ;;  %v1502_v38 = vpop.permute.xlu2 %1501 }
 0x359   :  { %v2197_v33 = vsel %vm2141_vm9, %v2132_v50, %v1644_v11 }
 0x35d   :  { %v1738_v37 = vpop.permute.xlu1 %1737  ;;  %v8828_v58 = vpop.f32.mrf.mxu0 }
 0x35e   :  { %v2262_v39 = vsel %vm2206_vm10, %v2197_v33, %v1738_v37 }
 0x35f   :  { %v2327_v16 = vsel %vm2271_vm11, %v2262_v39, %v1808_v32  ;;  %v8833_v45 = vpop.f32.mrf.mxu3 }
 0x360   :  { %v1384_v46 = vpop.permute.xlu0 %1383  ;;  %6499 = vmatmul.msk.bf16.gmra.mxu3 %vm2351_vm12, %v2327_v16  ;;  %v1740_v27 = vpop.permute.xlu2 %1739 }
 0x361   :  { %v1980_v56 = vsel %vm1946_vm6, %v1915_v21, %v1384_v46 }
 0x365   :  { %v1478_v5 = vpop.permute.xlu1 %1477  ;;  %v8836_v31 = vpop.f32.mrf.mxu0 }
 0x366   :  { %v2045_v41 = vsel %vm2011_vm7, %v1980_v56, %v1478_v5 }
 0x367   :  { %v2110_v30 = vsel %vm2076_vm8, %v2045_v41, %v1548_v57  ;;  %v8843_v35 = vpop.f32.mrf.mxu3 }
 0x368   :  { %v1622_v14 = vpop.permute.xlu0 %1621  ;;  %v1410_v18 = vpop.permute.xlu2 %1409 }
 0x369   :  { %v2175_v0 = vsel %vm2141_vm9, %v2110_v30, %v1622_v14 }
 0x36d   :  { %v1716_v55 = vpop.permute.xlu1 %1715  ;;  %v8847_v12 = vpop.f32.mrf.mxu0 }
 0x36e   :  { %v2240_v22 = vsel %vm2206_vm10, %v2175_v0, %v1716_v55 }
 0x36f   :  { %v8853_v39 = vpop.f32.mrf.mxu3 }
 0x370   :  { %v1786_v34 = vpop.permute.xlu0 %1785  ;;  %13341 = vst [vmem:[#allocation31_spill] sm:$0xff] %v8853_v39  ;;  %v1648_v16 = vpop.permute.xlu2 %1647 }
 0x371   :  { %v2305_v32 = vsel %vm2271_vm11, %v2240_v22, %v1786_v34 }
 0x372   :  { %6488 = vmatmul.msk.bf16.gmra.mxu0 %vm2351_vm12, %v2305_v32 }
 0x375   :  { %v1408_v29 = vpop.permute.xlu1 %1407  ;;  %v8856_v46 = vpop.f32.mrf.mxu0 }
 0x376   :  { %v2004_v54 = vsel %vm1946_vm6, %v1939_v48, %v1408_v29  ;;  %v13343_v48 = vld [vmem:[#allocation77_spill] sm:$0xff] }
 0x377   :  { %v2069_v11 = vsel %vm2011_vm7, %v2004_v54, %v1502_v38  ;;  %v8862_v21 = vpop.f32.mrf.mxu3 }
 0x378   :  { %v1572_v57 = vpop.permute.xlu0 %1571  ;;  %v1338_v30 = vpop.permute.xlu2 %1337 }
 0x379   :  { %v2134_v17 = vsel %vm2076_vm8, %v2069_v11, %v1572_v57  ;;  %v1878_v57 = vsel %vm15_vm0, %v13324_v8, %v13343_v48 }
 0x37d   :  { %v1646_v50 = vpop.permute.xlu1 %1645  ;;  %v8865_v5 = vpop.f32.mrf.mxu0 }
 0x37e   :  { %v2199_v33 = vsel %vm2141_vm9, %v2134_v17, %v1646_v50 }
 0x37f   :  { %v2264_v26 = vsel %vm2206_vm10, %v2199_v33, %v1740_v27  ;;  %v8870_v22 = vpop.f32.mrf.mxu3 }
 0x380   :  { %v1810_v37 = vpop.permute.xlu0 %1809  ;;  %v1576_v29 = vpop.permute.xlu2 %1575 }
 0x381   :  { %v2329_v25 = vsel %vm2271_vm11, %v2264_v26, %v1810_v37 }
 0x382   :  { %6500 = vmatmul.msk.bf16.gmra.mxu3 %vm2351_vm12, %v2329_v25 }
 0x385   :  { %v1336_v40 = vpop.permute.xlu1 %1335  ;;  %v8873_v63 = vpop.f32.mrf.mxu0 }
 0x386   :  { %v1941_v56 = vsel %vm1881_vm4, %v1876_v42, %v1336_v40 }
 0x387   :  { %v2006_v38 = vsel %vm1946_vm6, %v1941_v56, %v1410_v18  ;;  %v8881_v54 = vpop.f32.mrf.mxu3  ;;  %v1943_v18 = vsel %vm1881_vm4, %v1878_v57, %v1338_v30 }
 0x388   :  { %v1504_v61 = vpop.permute.xlu0 %1503  ;;  %v1814_v26 = vpop.permute.xlu2 %1813 }
 0x389   :  { %v2071_v14 = vsel %vm2011_vm7, %v2006_v38, %v1504_v61 }
 0x38d   :  { %v1574_v41 = vpop.permute.xlu1 %1573  ;;  %v8885_v17 = vpop.f32.mrf.mxu0 }
 0x38e   :  { %v2136_v55 = vsel %vm2076_vm8, %v2071_v14, %v1574_v41  ;;  %v13344_v14 = vld [vmem:[#allocation7_spill] sm:$0xff] }
 0x38f   :  { %v2201_v34 = vsel %vm2141_vm9, %v2136_v55, %v1648_v16  ;;  %v8890_v40 = vpop.f32.mrf.mxu3  ;;  %v1880_v41 = vsel %vm15_vm0, %v13327_v52, %v13344_v14  ;;  %v2589_v52 = vsel %vm1881_vm4, %v8531_v2, 0.0 }
 0x390   :  { %v1742_v0 = vpop.permute.xlu0 %1741  ;;  %v1508_v38 = vpop.permute.xlu2 %1507 }
 0x391   :  { %v2266_v32 = vsel %vm2206_vm10, %v2201_v34, %v1742_v0 }
 0x395   :  { %v1812_v27 = vpop.permute.xlu1 %1811  ;;  %v8892_v8 = vpop.f32.mrf.mxu0 }
 0x396   :  { %v2331_v60 = vsel %vm2271_vm11, %v2266_v32, %v1812_v27 }
 0x397   :  { %6501 = vmatmul.msk.bf16.gmra.mxu3 %vm2351_vm12, %v2331_v60  ;;  %v8900_v30 = vpop.f32.mrf.mxu3 }
 0x398   :  { %v1412_v3 = vpop.permute.xlu0 %1411  ;;  %13345 = vst [vmem:[#allocation12_spill] sm:$0xff] %v8900_v30  ;;  %v1746_v48 = vpop.permute.xlu2 %1745 }
 0x399   :  { %v2008_v11 = vsel %vm1946_vm6, %v1943_v18, %v1412_v3  ;;  %v2592_v18 = vsel %vm1881_vm4, %v8572_v1, 0.0 }
 0x39d   :  { %v1506_v50 = vpop.permute.xlu1 %1505  ;;  %v8903_v32 = vpop.f32.mrf.mxu0 }
 0x39e   :  { %v2073_v37 = vsel %vm2011_vm7, %v2008_v11, %v1506_v50 }
 0x39f   :  { %v2138_v25 = vsel %vm2076_vm8, %v2073_v37, %v1576_v29  ;;  %v2590_v29 = vsel %vm1881_vm4, %v8559_v4, 0.0  ;;  %v8914_v11 = vpop.f32.mrf.mxu3 }
 0x3a0   :  { %v1650_v33 = vpop.permute.xlu0 %1649  ;;  %13346 = vst [vmem:[#allocation30_spill] sm:$0xff] %v8914_v11  ;;  %v2591_v37 = vadd.f32 %v2590_v29, %v2589_v52  ;;  %v2608_v52 = vsel %vm1881_vm4, %v8732_v13, 0.0 }
 0x3a1   :  { %v2203_v16 = vsel %vm2141_vm9, %v2138_v25, %v1650_v33 }
 0x3a5   :  { %v1744_v61 = vpop.permute.xlu1 %1743 }
 0x3a6   :  { %v2268_v28 = vsel %vm2206_vm10, %v2203_v16, %v1744_v61  ;;  %v2594_v16 = vsel %vm1881_vm4, %v8595_v23, 0.0 }
 0x3a7   :  { %v2333_v56 = vsel %vm2271_vm11, %v2268_v28, %v1814_v26  ;;  %v8917_v26 = vpop.f32.mrf.mxu0  ;;  %v2593_v28 = vadd.f32 %v2592_v18, %v2591_v37 }
 0x3a8   :  { %v1340_v42 = vpop.permute.xlu0 %1339  ;;  %6502 = vmatmul.msk.bf16.gmra.mxu3 %vm2351_vm12, %v2333_v56 }
 0x3a9   :  { %v1945_v0 = vsel %vm1881_vm4, %v1880_v41, %v1340_v42  ;;  %v2596_v42 = vsel %vm1881_vm4, %v8611_v47, 0.0  ;;  %v2595_v56 = vadd.f32 %v2594_v16, %v2593_v28  ;;  %v2600_v41 = vsel %vm1881_vm4, %v8654_v7, 0.0 }
 0x3aa   :  { %v2612_v16 = vsel %vm1881_vm4, %v8764_v24, 0.0  ;;  %v2614_v28 = vsel %vm1881_vm4, %v8786_v9, 0.0 }
 0x3ab   :  { %v2597_v14 = vadd.f32 %v2596_v42, %v2595_v56  ;;  %v2616_v56 = vsel %vm1881_vm4, %v8799_v53, 0.0 }
 0x3ad   :  { %v1414_v55 = vpop.permute.xlu1 %1413 }
 0x3ae   :  { %v2010_v27 = vsel %vm1946_vm6, %v1945_v0, %v1414_v55  ;;  %v8930_v0 = vpop.f32.mrf.mxu3  ;;  %vm5126_vm6 = vcmask 326656  }
 0x3af   :  { %v2075_v60 = vsel %vm2011_vm7, %v2010_v27, %v1508_v38  ;;  %v2598_v38 = vsel %vm1881_vm4, %v8628_v36, 0.0  ;;  %13347 = vst [vmem:[#allocation36_spill] sm:$0xff] %v8930_v0 }
 0x3b0   :  { %v1578_v34 = vpop.permute.xlu0 %1577  ;;  %v2599_v55 = vadd.f32 %v2598_v38, %v2597_v14  ;;  %v2618_v14 = vsel %vm1881_vm4, %v8808_v15, 0.0 }
 0x3b1   :  { %v2140_v3 = vsel %vm2076_vm8, %v2075_v60, %v1578_v34  ;;  %v2602_v34 = vsel %vm1881_vm4, %v8675_v43, 0.0  ;;  %v8934_v60 = vpop.f32.mrf.mxu0  ;;  %vm5191_vm8 = vcmask 392192  }
 0x3b2   :  { %v2601_v27 = vadd.f32 %v2600_v41, %v2599_v55 }
 0x3b4   :  { %v2603_v29 = vadd.f32 %v2602_v34, %v2601_v27  ;;  %v2620_v34 = vsel %vm1881_vm4, %v8815_v19, 0.0 }
 0x3b5   :  { %v1652_v57 = vpop.permute.xlu1 %1651 }
 0x3b6   :  { %v2205_v50 = vsel %vm2141_vm9, %v2140_v3, %v1652_v57  ;;  %v2604_v3 = vsel %vm1881_vm4, %v8691_v51, 0.0 }
 0x3b7   :  { %v2270_v25 = vsel %vm2206_vm10, %v2205_v50, %v1746_v48  ;;  %v2606_v48 = vsel %vm1881_vm4, %v8711_v44, 0.0  ;;  %v2605_v57 = vadd.f32 %v2604_v3, %v2603_v29  ;;  %v2610_v50 = vsel %vm1881_vm4, %v8755_v62, 0.0 }
 0x3b8   :  { %v1816_v33 = vpop.permute.xlu0 %1815  ;;  %v2622_v29 = vsel %vm1881_vm4, %v8828_v58, 0.0  ;;  %vm5256_vm10 = vcmask 457728  }
 0x3b9   :  { %v2335_v61 = vsel %vm2271_vm11, %v2270_v25, %v1816_v33  ;;  %v2607_v18 = vadd.f32 %v2606_v48, %v2605_v57  ;;  %v8944_v33 = vpop.f32.mrf.mxu3  ;;  %v8946_v25 = vpop.f32.mrf.mxu0  ;;  %v2624_v57 = vsel %vm1881_vm4, %v8836_v31, 0.0 }
 0x3ba   :  { %6503 = vmatmul.msk.bf16.gmra.mxu3 %vm2351_vm12, %v2335_v61  ;;  %13348 = vst [vmem:[#allocation32_spill] sm:$0xff] %v8944_v33  ;;  %vm5413_vm12 = vcmask 588800  }
 0x3bb   :  { %v2609_v37 = vadd.f32 %v2608_v52, %v2607_v18  ;;  %13349 = vst [vmem:[#allocation15_spill] sm:$0xff] %v8946_v25  ;;  %v2626_v18 = vsel %vm1881_vm4, %v8847_v12, 0.0 }
 0x3bd   :  { %v2611_v61 = vadd.f32 %v2610_v50, %v2609_v37  ;;  %v2628_v37 = vsel %vm1881_vm4, %v8856_v46, 0.0 }
 0x3bf   :  { %v2613_v42 = vadd.f32 %v2612_v16, %v2611_v61 }
 0x3c1   :  { %v2615_v38 = vadd.f32 %v2614_v28, %v2613_v42  ;;  %v8956_v41 = vpop.f32.mrf.mxu3  ;;  %v8960_v3 = vpop.f32.mrf.mxu0  ;;  %v2630_v42 = vsel %vm1881_vm4, %v8865_v5, 0.0 }
 0x3c2   :  { %13350 = vst [vmem:[#allocation37_spill] sm:$0xff] %v8956_v41 }
 0x3c3   :  { %v2617_v55 = vadd.f32 %v2616_v56, %v2615_v38  ;;  %13351 = vst [vmem:[#allocation38_spill] sm:$0xff] %v8960_v3  ;;  %v2632_v38 = vsel %vm1881_vm4, %v8873_v63, 0.0 }
 0x3c5   :  { %v2619_v27 = vadd.f32 %v2618_v14, %v2617_v55  ;;  %v2634_v55 = vsel %vm1881_vm4, %v8885_v17, 0.0 }
 0x3c7   :  { %v2621_v48 = vadd.f32 %v2620_v34, %v2619_v27  ;;  %v2636_v27 = vsel %vm1881_vm4, %v8892_v8, 0.0 }
 0x3c9   :  { %v2623_v52 = vadd.f32 %v2622_v29, %v2621_v48  ;;  %v8970_v16 = vpop.f32.mrf.mxu3  ;;  %v8972_v28 = vpop.f32.mrf.mxu0 }
 0x3ca   :  { %13352 = vst [vmem:[#allocation13_spill] sm:$0xff] %v8970_v16 }
 0x3cb   :  { %v2625_v50 = vadd.f32 %v2624_v57, %v2623_v52  ;;  %v2638_v57 = vsel %vm1881_vm4, %v8903_v32, 0.0 }
 0x3cd   :  { %v2627_v61 = vadd.f32 %v2626_v18, %v2625_v50  ;;  %v2640_v50 = vsel %vm1881_vm4, %v8917_v26, 0.0 }
 0x3cf   :  { %v2629_v56 = vadd.f32 %v2628_v37, %v2627_v61  ;;  %v2642_v61 = vsel %vm1881_vm4, %v8934_v60, 0.0 }
 0x3d1   :  { %v2631_v14 = vadd.f32 %v2630_v42, %v2629_v56  ;;  %v8982_v29 = vpop.f32.mrf.mxu3  ;;  %v8986_v18 = vpop.f32.mrf.mxu0  ;;  %v2644_v56 = vsel %vm1881_vm4, %v8946_v25, 0.0 }
 0x3d2   :  { %13353 = vst [vmem:[#allocation33_spill] sm:$0xff] %v8982_v29 }
 0x3d3   :  { %v2633_v34 = vadd.f32 %v2632_v38, %v2631_v14  ;;  %v2646_v14 = vsel %vm1881_vm4, %v8960_v3, 0.0 }
 0x3d5   :  { %v2635_v48 = vadd.f32 %v2634_v55, %v2633_v34 }
 0x3d7   :  { %v2637_v52 = vadd.f32 %v2636_v27, %v2635_v48  ;;  %v2648_v48 = vsel %vm1881_vm4, %v8972_v28, 0.0 }
 0x3d9   :  { %v2639_v37 = vadd.f32 %v2638_v57, %v2637_v52  ;;  %v8996_v55 = vpop.f32.mrf.mxu3  ;;  %v2650_v52 = vsel %vm1881_vm4, %v8986_v18, 0.0 }
 0x3da   :  { %13354 = vst [vmem:[#allocation35_spill] sm:$0xff] %v8996_v55 }
 0x3db   :  { %v2641_v42 = vadd.f32 %v2640_v50, %v2639_v37 }
 0x3dd   :  { %v2643_v38 = vadd.f32 %v2642_v61, %v2641_v42 }
 0x3df   :  { %v2645_v34 = vadd.f32 %v2644_v56, %v2643_v38 }
 0x3e1   :  { %v2647_v57 = vadd.f32 %v2646_v14, %v2645_v34  ;;  %v2656_v14 = vsel %vm1881_vm4, %v8779_v49, 0.0 }
 0x3e3   :  { %v2649_v50 = vadd.f32 %v2648_v48, %v2647_v57  ;;  %v9006_v42 = vpop.f32.mrf.mxu3  ;;  %v2658_v48 = vsel %vm1881_vm4, %v8796_v6, 0.0 }
 0x3e4   :  { %13356 = vst [vmem:[#allocation16_spill] sm:$0xff] %v9006_v42 }
 0x3e5   :  { %v2651_v61 = vadd.f32 %v2650_v52, %v2649_v50  ;;  %v2660_v52 = vsel %vm1881_vm4, %v8804_v59, 0.0 }
 0x3ef   :  { %v8998_v27 = vpop.f32.mrf.mxu0 }
 0x3f0   :  { %13355 = vst [vmem:[#allocation39_spill] sm:$0xff] %v8998_v27  ;;  %v2652_v37 = vsel %vm1881_vm4, %v8998_v27, 0.0 }
 0x3f1   :  { %v2653_v3 = vadd.f32 %v2652_v37, %v2651_v61  ;;  %v2662_v37 = vsel %vm1881_vm4, %v8813_v20, 0.0  ;;  %v9020_v61 = vpop.f32.mrf.mxu3 }
 0x3f2   :  { %13357 = vst [vmem:[#allocation45_spill] sm:$0xff] %v9020_v61 }
 0x3f7   :  { %v9008_v25 = vpop.f32.mrf.mxu0 }
 0x3f8   :  { %v2654_v56 = vsel %vm1881_vm4, %v9008_v25, 0.0 }
 0x3f9   :  { %v2655_v38 = vadd.f32 %v2654_v56, %v2653_v3  ;;  %v2664_v3 = vsel %vm1881_vm4, %v8825_v10, 0.0 }
 0x3fb   :  { %v2657_v34 = vadd.f32 %v2656_v14, %v2655_v38  ;;  %v2666_v38 = vsel %vm1881_vm4, %v8833_v45, 0.0 }
 0x3fd   :  { %v2659_v57 = vadd.f32 %v2658_v48, %v2657_v34  ;;  %v2668_v34 = vsel %vm1881_vm4, %v8843_v35, 0.0 }
 0x3ff   :  { %v2661_v50 = vadd.f32 %v2660_v52, %v2659_v57  ;;  %v2670_v57 = vsel %vm1881_vm4, %v8853_v39, 0.0  ;;  %v2680_v39 = vsel %vm1881_vm4, %v8900_v30, 0.0  ;;  %v2690_v30 = vsel %vm1881_vm4, %v8970_v16, 0.0 }
 0x401   :  { %v2663_v27 = vadd.f32 %v2662_v37, %v2661_v50  ;;  %v2672_v50 = vsel %vm1881_vm4, %v8862_v21, 0.0 }
 0x403   :  { %v2665_v56 = vadd.f32 %v2664_v3, %v2663_v27  ;;  %v2674_v27 = vsel %vm1881_vm4, %v8870_v22, 0.0 }
 0x405   :  { %v2667_v14 = vadd.f32 %v2666_v38, %v2665_v56  ;;  %v9030_v52 = vpop.f32.mrf.mxu3  ;;  %v2676_v56 = vsel %vm1881_vm4, %v8881_v54, 0.0 }
 0x406   :  { %13358 = vst [vmem:[#allocation40_spill] sm:$0xff] %v9030_v52 }
 0x407   :  { %v2669_v48 = vadd.f32 %v2668_v34, %v2667_v14  ;;  %v2678_v14 = vsel %vm1881_vm4, %v8890_v40, 0.0 }
 0x409   :  { %v2671_v20 = vadd.f32 %v2670_v57, %v2669_v48 }
 0x40b   :  { %v2673_v37 = vadd.f32 %v2672_v50, %v2671_v20  ;;  %v2682_v20 = vsel %vm1881_vm4, %v8914_v11, 0.0 }
 0x40d   :  { %v2675_v3 = vadd.f32 %v2674_v27, %v2673_v37  ;;  %v9042_v48 = vpop.f32.mrf.mxu3  ;;  %v2684_v37 = vsel %vm1881_vm4, %v8930_v0, 0.0 }
 0x40e   :  { %13359 = vst [vmem:[#allocation41_spill] sm:$0xff] %v9042_v48 }
 0x40f   :  { %v2677_v38 = vadd.f32 %v2676_v56, %v2675_v3  ;;  %v2686_v3 = vsel %vm1881_vm4, %v8944_v33, 0.0 }
 0x411   :  { %v2679_v34 = vadd.f32 %v2678_v14, %v2677_v38  ;;  %v2688_v38 = vsel %vm1881_vm4, %v8956_v41, 0.0 }
 0x413   :  { %v2681_v57 = vadd.f32 %v2680_v39, %v2679_v34 }
 0x415   :  { %v2683_v50 = vadd.f32 %v2682_v20, %v2681_v57  ;;  %v2692_v57 = vsel %vm1881_vm4, %v8982_v29, 0.0 }
 0x417   :  { %v2685_v27 = vadd.f32 %v2684_v37, %v2683_v50  ;;  %v2694_v50 = vsel %vm1881_vm4, %v8996_v55, 0.0 }
 0x419   :  { %v2687_v56 = vadd.f32 %v2686_v3, %v2685_v27  ;;  %v2696_v27 = vsel %vm1881_vm4, %v9006_v42, 0.0  ;;  %v6595_v42 = vmov 512.0  }
 0x41a   :  { %v9054_v39 = vpop.f32.mrf.mxu3  ;;  %6580 = vrcp.f32 %v6595_v42 }
 0x41b   :  { %v2689_v14 = vadd.f32 %v2688_v38, %v2687_v56  ;;  %13360 = vst [vmem:[#allocation19_spill] sm:$0xff] %v9054_v39  ;;  %v2698_v56 = vsel %vm1881_vm4, %v9020_v61, 0.0 }
 0x41d   :  { %v2691_v34 = vadd.f32 %v2690_v30, %v2689_v14  ;;  %v2700_v30 = vsel %vm1881_vm4, %v9030_v52, 0.0 }
 0x41f   :  { %v2693_v20 = vadd.f32 %v2692_v57, %v2691_v34  ;;  %v2702_v34 = vsel %vm1881_vm4, %v9042_v48, 0.0 }
 0x421   :  { %v2695_v37 = vadd.f32 %v2694_v50, %v2693_v20  ;;  %v2704_v50 = vsel %vm1881_vm4, %v9054_v39, 0.0  ;;  %v6581_v39 = vpop.eup %6580 }
 0x422   :  { %v9060_v33 = vpop.f32.mrf.mxu3  ;;  %vm2727_vm14 = vweird.f32 %v6581_v39 }
 0x423   :  { %13361 = vst [vmem:[#allocation9_spill] sm:$0xff] %v9060_v33  ;;  %v2697_v3 = vadd.f32 %v2696_v27, %v2695_v37  ;;  %v2706_v37 = vsel %vm1881_vm4, %v9060_v33, 0.0 }
 0x425   :  { %v2699_v38 = vadd.f32 %v2698_v56, %v2697_v3 }
 0x427   :  { %v2701_v14 = vadd.f32 %v2700_v30, %v2699_v38 }
 0x429   :  { %v2703_v57 = vadd.f32 %v2702_v34, %v2701_v14 }
 0x42b   :  { %v2579_v16 = vpop.f32.mrf.mxu3  ;;  %v2705_v55 = vadd.f32 %v2704_v50, %v2703_v57 }
 0x42c   :  { %v2708_v3 = vsel %vm1881_vm4, %v2579_v16, 0.0 }
 0x42d   :  { %v2707_v27 = vadd.f32 %v2706_v37, %v2705_v55  ;;  %v2723_v55 = vmul.f32 512.0, %v6581_v39 }
 0x42f   :  { %v2709_v56 = vadd.f32 %v2708_v3, %v2707_v27  ;;  %v2724_v29 = vsub.f32 1.0, %v2723_v55 }
 0x431   :  { %v2725_v27 = vmul.f32 %v6581_v39, %v2724_v29 }
 0x433   :  { %v2581_v20 = vpop.f32.mrf.mxu3  ;;  %v2726_v0 = vadd.f32 %v6581_v39, %v2725_v27 }
 0x434   :  { %v2710_v52 = vsel %vm1881_vm4, %v2581_v20, 0.0 }
 0x435   :  { %v2711_v30 = vadd.f32 %v2710_v52, %v2709_v56  ;;  %v9078_v52 = vsel %vm2727_vm14, %v6581_v39, %v2726_v0 }
 0x436   :  { %13362 = vst [vmem:[#allocation66_spill] sm:$0xff] %v9078_v52 }
 0x43d   :  { %v2584_v61 = vpop.f32.mrf.mxu3 }
 0x43e   :  { %v2712_v38 = vsel %vm1881_vm4, %v2584_v61, 0.0 }
 0x43f   :  { %v2713_v48 = vadd.f32 %v2712_v38, %v2711_v30 }
 0x445   :  { %v2586_v14 = vpop.f32.mrf.mxu3 }
 0x446   :  { %v2714_v34 = vsel %vm1881_vm4, %v2586_v14, 0.0 }
 0x447   :  { %v2715_v57 = vadd.f32 %v2714_v34, %v2713_v48 }
 0x449   :  { %v2716_v50 = vrot.slane %v2715_v57, 4 }
 0x44b   :  { %v2717_v33 = vadd.f32 %v2716_v50, %v2715_v57 }
 0x44d   :  { %v2718_v37 = vrot.slane %v2717_v33, 2 }
 0x44f   :  { %v2719_v41 = vadd.f32 %v2718_v37, %v2717_v33 }
 0x451   :  { %v2720_v3 = vrot.slane %v2719_v41, 1 }
 0x453   :  { %v2721_v11 = vadd.f32 %v2720_v3, %v2719_v41 }
 0x455   :  { %v9081_v56 = vmul.f32 %v9078_v52, %v2721_v11 }
 0x457   :  { %v9084_v42 = vsub.f32 %v2579_v16, %v9081_v56  ;;  %v9087_v48 = vsub.f32 %v2581_v20, %v9081_v56  ;;  %v9090_v38 = vsub.f32 %v2584_v61, %v9081_v56  ;;  %v9093_v33 = vsub.f32 %v2586_v14, %v9081_v56 }
 0x458   :  { %v9097_v41 = vsub.f32 %v8531_v2, %v9081_v56  ;;  %v9101_v11 = vsub.f32 %v8559_v4, %v9081_v56  ;;  %v9105_v0 = vsub.f32 %v8572_v1, %v9081_v56  ;;  %v9109_v16 = vsub.f32 %v8595_v23, %v9081_v56 }
 0x459   :  { %13363 = vst [vmem:[#allocation44_spill] sm:$0xff] %v9084_v42  ;;  %v9117_v2 = vsub.f32 %v8611_v47, %v9081_v56  ;;  %v9123_v1 = vsub.f32 %v8628_v36, %v9081_v56  ;;  %v9131_v14 = vsub.f32 %v8654_v7, %v9081_v56  ;;  %v9138_v36 = vsub.f32 %v8675_v43, %v9081_v56 }
 0x45a   :  { %13364 = vst [vmem:[#allocation50_spill] sm:$0xff] %v9087_v48  ;;  %v2794_v29 = vmul.f32 %v9097_v41, %v9097_v41  ;;  %v2795_v61 = vmul.f32 %v9101_v11, %v9101_v11  ;;  %v2796_v4 = vmul.f32 %v9105_v0, %v9105_v0  ;;  %v2797_v23 = vmul.f32 %v9109_v16, %v9109_v16 }
 0x45b   :  { %13365 = vst [vmem:[#allocation46_spill] sm:$0xff] %v9090_v38  ;;  %v2798_v47 = vmul.f32 %v9117_v2, %v9117_v2  ;;  %v2799_v50 = vmul.f32 %v9123_v1, %v9123_v1  ;;  %v9145_v7 = vsub.f32 %v8691_v51, %v9081_v56  ;;  %v2800_v27 = vmul.f32 %v9131_v14, %v9131_v14 }
 0x45c   :  { %v2858_v39 = vsel %vm1881_vm4, %v2794_v29, 0.0  ;;  %v2859_v20 = vsel %vm1881_vm4, %v2795_v61, 0.0  ;;  %v2861_v34 = vsel %vm1881_vm4, %v2796_v4, 0.0  ;;  %v2863_v55 = vsel %vm1881_vm4, %v2797_v23, 0.0 }
 0x45d   :  { %v2860_v30 = vadd.f32 %v2859_v20, %v2858_v39  ;;  %v2865_v3 = vsel %vm1881_vm4, %v2798_v47, 0.0  ;;  %v9152_v43 = vsub.f32 %v8711_v44, %v9081_v56  ;;  %v2801_v61 = vmul.f32 %v9138_v36, %v9138_v36 }
 0x45e   :  { %v2867_v4 = vsel %vm1881_vm4, %v2799_v50, 0.0  ;;  %v9159_v51 = vsub.f32 %v8732_v13, %v9081_v56  ;;  %v2802_v39 = vmul.f32 %v9145_v7, %v9145_v7  ;;  %v2869_v20 = vsel %vm1881_vm4, %v2800_v27, 0.0 }
 0x45f   :  { %v2862_v57 = vadd.f32 %v2861_v34, %v2860_v30  ;;  %v9166_v44 = vsub.f32 %v8755_v62, %v9081_v56  ;;  %v2803_v47 = vmul.f32 %v9152_v43, %v9152_v43  ;;  %v2871_v34 = vsel %vm1881_vm4, %v2801_v61, 0.0 }
 0x460   :  { %v9173_v13 = vsub.f32 %v8764_v24, %v9081_v56  ;;  %v2804_v50 = vmul.f32 %v9159_v51, %v9159_v51  ;;  %v9180_v62 = vsub.f32 %v8786_v9, %v9081_v56  ;;  %v9187_v24 = vsub.f32 %v8799_v53, %v9081_v56 }
 0x461   :  { %v2864_v37 = vadd.f32 %v2863_v55, %v2862_v57  ;;  %v2873_v55 = vsel %vm1881_vm4, %v2802_v39, 0.0  ;;  %v2805_v27 = vmul.f32 %v9166_v44, %v9166_v44  ;;  %v9194_v9 = vsub.f32 %v8808_v15, %v9081_v56 }
 0x462   :  { %v2806_v61 = vmul.f32 %v9173_v13, %v9173_v13  ;;  %v2807_v39 = vmul.f32 %v9180_v62, %v9180_v62  ;;  %v9201_v53 = vsub.f32 %v8815_v19, %v9081_v56  ;;  %v9208_v15 = vsub.f32 %v8828_v58, %v9081_v56 }
 0x463   :  { %v2866_v29 = vadd.f32 %v2865_v3, %v2864_v37  ;;  %v2875_v3 = vsel %vm1881_vm4, %v2803_v47, 0.0  ;;  %v2808_v47 = vmul.f32 %v9187_v24, %v9187_v24  ;;  %v9215_v19 = vsub.f32 %v8836_v31, %v9081_v56 }
 0x464   :  { %v9222_v58 = vsub.f32 %v8847_v12, %v9081_v56  ;;  %v9229_v31 = vsub.f32 %v8856_v46, %v9081_v56  ;;  %v9236_v12 = vsub.f32 %v8865_v5, %v9081_v56  ;;  %v9243_v46 = vsub.f32 %v8873_v63, %v9081_v56 }
 0x465   :  { %v2868_v23 = vadd.f32 %v2867_v4, %v2866_v29  ;;  %v2877_v4 = vsel %vm1881_vm4, %v2804_v50, 0.0  ;;  %v2809_v50 = vmul.f32 %v9194_v9, %v9194_v9  ;;  %v9250_v5 = vsub.f32 %v8885_v17, %v9081_v56 }
 0x466   :  { %v9257_v63 = vsub.f32 %v8892_v8, %v9081_v56  ;;  %v9264_v17 = vsub.f32 %v8903_v32, %v9081_v56  ;;  %v9271_v8 = vsub.f32 %v8917_v26, %v9081_v56  ;;  %v9278_v32 = vsub.f32 %v8934_v60, %v9081_v56 }
 0x467   :  { %v2870_v30 = vadd.f32 %v2869_v20, %v2868_v23  ;;  %v2879_v20 = vsel %vm1881_vm4, %v2805_v27, 0.0  ;;  %v2810_v27 = vmul.f32 %v9201_v53, %v9201_v53 }
 0x469   :  { %v2872_v57 = vadd.f32 %v2871_v34, %v2870_v30  ;;  %v2881_v34 = vsel %vm1881_vm4, %v2806_v61, 0.0  ;;  %v2811_v61 = vmul.f32 %v9208_v15, %v9208_v15 }
 0x46b   :  { %v2874_v37 = vadd.f32 %v2873_v55, %v2872_v57  ;;  %v2883_v55 = vsel %vm1881_vm4, %v2807_v39, 0.0  ;;  %v2812_v39 = vmul.f32 %v9215_v19, %v9215_v19 }
 0x46d   :  { %v2876_v29 = vadd.f32 %v2875_v3, %v2874_v37  ;;  %v2885_v3 = vsel %vm1881_vm4, %v2808_v47, 0.0  ;;  %v2813_v47 = vmul.f32 %v9222_v58, %v9222_v58 }
 0x46f   :  { %v2878_v23 = vadd.f32 %v2877_v4, %v2876_v29  ;;  %v2887_v4 = vsel %vm1881_vm4, %v2809_v50, 0.0  ;;  %v2814_v50 = vmul.f32 %v9229_v31, %v9229_v31 }
 0x471   :  { %v2880_v30 = vadd.f32 %v2879_v20, %v2878_v23  ;;  %v2889_v20 = vsel %vm1881_vm4, %v2810_v27, 0.0  ;;  %v2815_v27 = vmul.f32 %v9236_v12, %v9236_v12 }
 0x473   :  { %v2882_v57 = vadd.f32 %v2881_v34, %v2880_v30  ;;  %v2891_v34 = vsel %vm1881_vm4, %v2811_v61, 0.0  ;;  %v2816_v61 = vmul.f32 %v9243_v46, %v9243_v46 }
 0x475   :  { %v2884_v37 = vadd.f32 %v2883_v55, %v2882_v57  ;;  %v2893_v55 = vsel %vm1881_vm4, %v2812_v39, 0.0  ;;  %v2817_v39 = vmul.f32 %v9250_v5, %v9250_v5 }
 0x477   :  { %v2886_v29 = vadd.f32 %v2885_v3, %v2884_v37  ;;  %v2895_v3 = vsel %vm1881_vm4, %v2813_v47, 0.0  ;;  %v2818_v47 = vmul.f32 %v9257_v63, %v9257_v63 }
 0x479   :  { %v2888_v23 = vadd.f32 %v2887_v4, %v2886_v29  ;;  %v2897_v4 = vsel %vm1881_vm4, %v2814_v50, 0.0  ;;  %v2819_v50 = vmul.f32 %v9264_v17, %v9264_v17 }
 0x47b   :  { %v2890_v30 = vadd.f32 %v2889_v20, %v2888_v23  ;;  %v2899_v20 = vsel %vm1881_vm4, %v2815_v27, 0.0  ;;  %v13366_v27 = vld [vmem:[#allocation15_spill] sm:$0xff] }
 0x47c   :  { %v9285_v26 = vsub.f32 %v13366_v27, %v9081_v56 }
 0x47d   :  { %v2892_v57 = vadd.f32 %v2891_v34, %v2890_v30  ;;  %v2901_v34 = vsel %vm1881_vm4, %v2816_v61, 0.0 }
 0x47f   :  { %v2894_v37 = vadd.f32 %v2893_v55, %v2892_v57  ;;  %v2903_v55 = vsel %vm1881_vm4, %v2817_v39, 0.0  ;;  %v2907_v39 = vsel %vm1881_vm4, %v2819_v50, 0.0 }
 0x481   :  { %v2896_v29 = vadd.f32 %v2895_v3, %v2894_v37  ;;  %v2820_v3 = vmul.f32 %v9271_v8, %v9271_v8 }
 0x483   :  { %v2898_v23 = vadd.f32 %v2897_v4, %v2896_v29  ;;  %v2905_v29 = vsel %vm1881_vm4, %v2818_v47, 0.0  ;;  %v13367_v4 = vld [vmem:[#allocation38_spill] sm:$0xff]  ;;  %v2909_v47 = vsel %vm1881_vm4, %v2820_v3, 0.0 }
 0x484   :  { %v9292_v60 = vsub.f32 %v13367_v4, %v9081_v56 }
 0x485   :  { %v2900_v30 = vadd.f32 %v2899_v20, %v2898_v23  ;;  %v2821_v23 = vmul.f32 %v9278_v32, %v9278_v32 }
 0x487   :  { %v2902_v57 = vadd.f32 %v2901_v34, %v2900_v30  ;;  %v9299_v30 = vsub.f32 %v8972_v28, %v9081_v56  ;;  %v2822_v34 = vmul.f32 %v9285_v26, %v9285_v26  ;;  %v2911_v50 = vsel %vm1881_vm4, %v2821_v23, 0.0 }
 0x489   :  { %v2904_v37 = vadd.f32 %v2903_v55, %v2902_v57  ;;  %v9306_v55 = vsub.f32 %v8986_v18, %v9081_v56  ;;  %v2913_v3 = vsel %vm1881_vm4, %v2822_v34, 0.0  ;;  %v9320_v18 = vsub.f32 %v9008_v25, %v9081_v56 }
 0x48a   :  { %v9334_v25 = vsub.f32 %v8796_v6, %v9081_v56 }
 0x48b   :  { %v2906_v61 = vadd.f32 %v2905_v29, %v2904_v37  ;;  %v2823_v37 = vmul.f32 %v9292_v60, %v9292_v60  ;;  %v13368_v29 = vld [vmem:[#allocation39_spill] sm:$0xff] }
 0x48c   :  { %v9313_v28 = vsub.f32 %v13368_v29, %v9081_v56 }
 0x48d   :  { %v2908_v20 = vadd.f32 %v2907_v39, %v2906_v61  ;;  %v2824_v61 = vmul.f32 %v9299_v30, %v9299_v30  ;;  %v2825_v39 = vmul.f32 %v9306_v55, %v9306_v55  ;;  %v2915_v23 = vsel %vm1881_vm4, %v2823_v37, 0.0 }
 0x48f   :  { %v2910_v57 = vadd.f32 %v2909_v47, %v2908_v20  ;;  %v9327_v47 = vsub.f32 %v8779_v49, %v9081_v56  ;;  %v2917_v34 = vsel %vm1881_vm4, %v2824_v61, 0.0  ;;  %v2919_v37 = vsel %vm1881_vm4, %v2825_v39, 0.0 }
 0x490   :  { %v9341_v49 = vsub.f32 %v8804_v59, %v9081_v56  ;;  %v9355_v59 = vsub.f32 %v8825_v10, %v9081_v56  ;;  %v9369_v10 = vsub.f32 %v8843_v35, %v9081_v56  ;;  %v9383_v35 = vsub.f32 %v8862_v21, %v9081_v56 }
 0x491   :  { %v2912_v27 = vadd.f32 %v2911_v50, %v2910_v57  ;;  %v2826_v57 = vmul.f32 %v9313_v28, %v9313_v28  ;;  %v9397_v21 = vsub.f32 %v8881_v54, %v9081_v56 }
 0x492   :  { %13370 = vst [vmem:[#allocation28_spill] sm:$0xff] %v9369_v10 }
 0x493   :  { %v2914_v4 = vadd.f32 %v2913_v3, %v2912_v27  ;;  %v2827_v27 = vmul.f32 %v9320_v18, %v9320_v18  ;;  %v2828_v3 = vmul.f32 %v9327_v47, %v9327_v47  ;;  %v2921_v61 = vsel %vm1881_vm4, %v2826_v57, 0.0  ;;  %13373 = vst [vmem:[#allocation14_spill] sm:$0xff] %v9383_v35 }
 0x494   :  { %13375 = vst [vmem:[#allocation68_spill] sm:$0xff] %v9397_v21 }
 0x495   :  { %v2916_v20 = vadd.f32 %v2915_v23, %v2914_v4  ;;  %v13369_v23 = vld [vmem:[#allocation10_spill] sm:$0xff]  ;;  %v2923_v39 = vsel %vm1881_vm4, %v2827_v27, 0.0  ;;  %v2925_v57 = vsel %vm1881_vm4, %v2828_v3, 0.0 }
 0x496   :  { %v9348_v6 = vsub.f32 %v13369_v23, %v9081_v56  ;;  %v2832_v23 = vmul.f32 %v9355_v59, %v9355_v59 }
 0x497   :  { %v2918_v50 = vadd.f32 %v2917_v34, %v2916_v20  ;;  %v2829_v20 = vmul.f32 %v9334_v25, %v9334_v25 }
 0x499   :  { %v2920_v29 = vadd.f32 %v2919_v37, %v2918_v50  ;;  %v2830_v50 = vmul.f32 %v9341_v49, %v9341_v49  ;;  %v2927_v27 = vsel %vm1881_vm4, %v2829_v20, 0.0 }
 0x49b   :  { %v2922_v4 = vadd.f32 %v2921_v61, %v2920_v29  ;;  %v9362_v29 = vsub.f32 %v8833_v45, %v9081_v56  ;;  %v2831_v61 = vmul.f32 %v9348_v6, %v9348_v6  ;;  %v2929_v3 = vsel %vm1881_vm4, %v2830_v50, 0.0 }
 0x49c   :  { %v2933_v50 = vsel %vm1881_vm4, %v2832_v23, 0.0 }
 0x49d   :  { %v2924_v34 = vadd.f32 %v2923_v39, %v2922_v4  ;;  %v2931_v20 = vsel %vm1881_vm4, %v2831_v61, 0.0 }
 0x49f   :  { %v2926_v37 = vadd.f32 %v2925_v57, %v2924_v34  ;;  %v13371_v34 = vld [vmem:[#allocation31_spill] sm:$0xff]  ;;  %v2833_v57 = vmul.f32 %v9362_v29, %v9362_v29 }
 0x4a0   :  { %v9376_v45 = vsub.f32 %v13371_v34, %v9081_v56 }
 0x4a1   :  { %v2928_v4 = vadd.f32 %v2927_v27, %v2926_v37  ;;  %v2834_v27 = vmul.f32 %v9369_v10, %v9369_v10  ;;  %v2935_v61 = vsel %vm1881_vm4, %v2833_v57, 0.0 }
 0x4a2   :  { %13372 = vst [vmem:[#allocation34_spill] sm:$0xff] %v9376_v45  ;;  %v2835_v34 = vmul.f32 %v9376_v45, %v9376_v45 }
 0x4a3   :  { %v2930_v39 = vadd.f32 %v2929_v3, %v2928_v4  ;;  %v9390_v3 = vsub.f32 %v8870_v22, %v9081_v56  ;;  %v2937_v23 = vsel %vm1881_vm4, %v2834_v27, 0.0  ;;  %v9404_v22 = vsub.f32 %v8890_v40, %v9081_v56 }
 0x4a4   :  { %v2939_v57 = vsel %vm1881_vm4, %v2835_v34, 0.0 }
 0x4a5   :  { %v2932_v37 = vadd.f32 %v2931_v20, %v2930_v39  ;;  %13374 = vst [vmem:[#allocation17_spill] sm:$0xff] %v9390_v3  ;;  %v2836_v20 = vmul.f32 %v9383_v35, %v9383_v35  ;;  %v2838_v35 = vmul.f32 %v9397_v21, %v9397_v21 }
 0x4a6   :  { %13376 = vst [vmem:[#allocation69_spill] sm:$0xff] %v9404_v22 }
 0x4a7   :  { %v2934_v4 = vadd.f32 %v2933_v50, %v2932_v37  ;;  %v2837_v50 = vmul.f32 %v9390_v3, %v9390_v3  ;;  %v2941_v27 = vsel %vm1881_vm4, %v2836_v20, 0.0  ;;  %v2839_v3 = vmul.f32 %v9404_v22, %v9404_v22 }
 0x4a8   :  { %v2945_v20 = vsel %vm1881_vm4, %v2838_v35, 0.0 }
 0x4a9   :  { %v2936_v39 = vadd.f32 %v2935_v61, %v2934_v4  ;;  %v13377_v61 = vld [vmem:[#allocation12_spill] sm:$0xff]  ;;  %v2943_v34 = vsel %vm1881_vm4, %v2837_v50, 0.0  ;;  %v2947_v50 = vsel %vm1881_vm4, %v2839_v3, 0.0 }
 0x4aa   :  { %v9411_v54 = vsub.f32 %v13377_v61, %v9081_v56 }
 0x4ab   :  { %v2938_v37 = vadd.f32 %v2937_v23, %v2936_v39  ;;  %v13379_v23 = vld [vmem:[#allocation30_spill] sm:$0xff] }
 0x4ac   :  { %13378 = vst [vmem:[#allocation78_spill] sm:$0xff] %v9411_v54  ;;  %v9418_v40 = vsub.f32 %v13379_v23, %v9081_v56  ;;  %v2840_v21 = vmul.f32 %v9411_v54, %v9411_v54 }
 0x4ad   :  { %v2940_v4 = vadd.f32 %v2939_v57, %v2938_v37  ;;  %v13381_v57 = vld [vmem:[#allocation36_spill] sm:$0xff] }
 0x4ae   :  { %13380 = vst [vmem:[#allocation42_spill] sm:$0xff] %v9418_v40  ;;  %v9425_v61 = vsub.f32 %v13381_v57, %v9081_v56  ;;  %v2841_v22 = vmul.f32 %v9418_v40, %v9418_v40  ;;  %v2949_v35 = vsel %vm1881_vm4, %v2840_v21, 0.0 }
 0x4af   :  { %v2942_v39 = vadd.f32 %v2941_v27, %v2940_v4  ;;  %v13383_v27 = vld [vmem:[#allocation32_spill] sm:$0xff] }
 0x4b0   :  { %13382 = vst [vmem:[#allocation43_spill] sm:$0xff] %v9425_v61  ;;  %v9432_v23 = vsub.f32 %v13383_v27, %v9081_v56  ;;  %v2842_v54 = vmul.f32 %v9425_v61, %v9425_v61  ;;  %v2951_v3 = vsel %vm1881_vm4, %v2841_v22, 0.0 }
 0x4b1   :  { %v2944_v37 = vadd.f32 %v2943_v34, %v2942_v39  ;;  %v13385_v34 = vld [vmem:[#allocation37_spill] sm:$0xff] }
 0x4b2   :  { %13384 = vst [vmem:[#allocation73_spill] sm:$0xff] %v9432_v23  ;;  %v9439_v57 = vsub.f32 %v13385_v34, %v9081_v56  ;;  %v2843_v40 = vmul.f32 %v9432_v23, %v9432_v23  ;;  %v2953_v21 = vsel %vm1881_vm4, %v2842_v54, 0.0 }
 0x4b3   :  { %v2946_v4 = vadd.f32 %v2945_v20, %v2944_v37  ;;  %v13387_v20 = vld [vmem:[#allocation13_spill] sm:$0xff] }
 0x4b4   :  { %13386 = vst [vmem:[#allocation47_spill] sm:$0xff] %v9439_v57  ;;  %v9446_v27 = vsub.f32 %v13387_v20, %v9081_v56  ;;  %v2844_v61 = vmul.f32 %v9439_v57, %v9439_v57  ;;  %v2955_v22 = vsel %vm1881_vm4, %v2843_v40, 0.0 }
 0x4b5   :  { %v2948_v39 = vadd.f32 %v2947_v50, %v2946_v4  ;;  %v13389_v50 = vld [vmem:[#allocation33_spill] sm:$0xff] }
 0x4b6   :  { %13388 = vst [vmem:[#allocation18_spill] sm:$0xff] %v9446_v27  ;;  %v9453_v34 = vsub.f32 %v13389_v50, %v9081_v56  ;;  %v2845_v23 = vmul.f32 %v9446_v27, %v9446_v27  ;;  %v2957_v54 = vsel %vm1881_vm4, %v2844_v61, 0.0 }
 0x4b7   :  { %v2950_v37 = vadd.f32 %v2949_v35, %v2948_v39  ;;  %v13391_v35 = vld [vmem:[#allocation35_spill] sm:$0xff] }
 0x4b8   :  { %13390 = vst [vmem:[#allocation20_spill] sm:$0xff] %v9453_v34  ;;  %v9460_v20 = vsub.f32 %v13391_v35, %v9081_v56  ;;  %v2846_v57 = vmul.f32 %v9453_v34, %v9453_v34  ;;  %v2959_v40 = vsel %vm1881_vm4, %v2845_v23, 0.0 }
 0x4b9   :  { %v2952_v4 = vadd.f32 %v2951_v3, %v2950_v37  ;;  %v13393_v3 = vld [vmem:[#allocation16_spill] sm:$0xff] }
 0x4ba   :  { %13392 = vst [vmem:[#allocation81_spill] sm:$0xff] %v9460_v20  ;;  %v9467_v50 = vsub.f32 %v13393_v3, %v9081_v56  ;;  %v2847_v27 = vmul.f32 %v9460_v20, %v9460_v20  ;;  %v2961_v61 = vsel %vm1881_vm4, %v2846_v57, 0.0 }
 0x4bb   :  { %v2954_v39 = vadd.f32 %v2953_v21, %v2952_v4  ;;  %v13395_v21 = vld [vmem:[#allocation45_spill] sm:$0xff] }
 0x4bc   :  { %13394 = vst [vmem:[#allocation23_spill] sm:$0xff] %v9467_v50  ;;  %v9474_v35 = vsub.f32 %v13395_v21, %v9081_v56  ;;  %v2848_v34 = vmul.f32 %v9467_v50, %v9467_v50  ;;  %v2963_v23 = vsel %vm1881_vm4, %v2847_v27, 0.0 }
 0x4bd   :  { %v2956_v37 = vadd.f32 %v2955_v22, %v2954_v39  ;;  %v13397_v22 = vld [vmem:[#allocation40_spill] sm:$0xff] }
 0x4be   :  { %13396 = vst [vmem:[#allocation67_spill] sm:$0xff] %v9474_v35  ;;  %v9481_v3 = vsub.f32 %v13397_v22, %v9081_v56  ;;  %v2849_v20 = vmul.f32 %v9474_v35, %v9474_v35  ;;  %v2965_v57 = vsel %vm1881_vm4, %v2848_v34, 0.0 }
 0x4bf   :  { %v2958_v4 = vadd.f32 %v2957_v54, %v2956_v37  ;;  %v13399_v54 = vld [vmem:[#allocation41_spill] sm:$0xff] }
 0x4c0   :  { %13398 = vst [vmem:[#allocation54_spill] sm:$0xff] %v9481_v3  ;;  %v9488_v21 = vsub.f32 %v13399_v54, %v9081_v56  ;;  %v2850_v50 = vmul.f32 %v9481_v3, %v9481_v3  ;;  %v2967_v27 = vsel %vm1881_vm4, %v2849_v20, 0.0  ;;  %v2855_v20 = vmul.f32 %v9087_v48, %v9087_v48 }
 0x4c1   :  { %v2960_v39 = vadd.f32 %v2959_v40, %v2958_v4  ;;  %v13401_v40 = vld [vmem:[#allocation19_spill] sm:$0xff] }
 0x4c2   :  { %13400 = vst [vmem:[#allocation48_spill] sm:$0xff] %v9488_v21  ;;  %v9495_v22 = vsub.f32 %v13401_v40, %v9081_v56  ;;  %v2851_v35 = vmul.f32 %v9488_v21, %v9488_v21  ;;  %v2969_v40 = vsel %vm1881_vm4, %v2850_v50, 0.0  ;;  %v2856_v50 = vmul.f32 %v9090_v38, %v9090_v38 }
 0x4c3   :  { %v2962_v37 = vadd.f32 %v2961_v61, %v2960_v39  ;;  %v13403_v61 = vld [vmem:[#allocation9_spill] sm:$0xff] }
 0x4c4   :  { %13402 = vst [vmem:[#allocation49_spill] sm:$0xff] %v9495_v22  ;;  %v9502_v54 = vsub.f32 %v13403_v61, %v9081_v56  ;;  %v2854_v56 = vmul.f32 %v9084_v42, %v9084_v42 }
 0x4c5   :  { %v2964_v4 = vadd.f32 %v2963_v23, %v2962_v37  ;;  %v2852_v23 = vmul.f32 %v9495_v22, %v9495_v22 }
 0x4c6   :  { %13404 = vst [vmem:[#allocation8_spill] sm:$0xff] %v9502_v54  ;;  %v2853_v34 = vmul.f32 %v9502_v54, %v9502_v54 }
 0x4c7   :  { %v2966_v39 = vadd.f32 %v2965_v57, %v2964_v4  ;;  %v2971_v4 = vsel %vm1881_vm4, %v2851_v35, 0.0  ;;  %v2973_v61 = vsel %vm1881_vm4, %v2852_v23, 0.0  ;;  %v3306_v35 = vld [vmem:[#allocation3 + $0x8] sm:$0xff]  ;;  %v2857_v23 = vmul.f32 %v9093_v33, %v9093_v33 }
 0x4c8   :  { %v3423_v54 = vpack.c.bf16 %v3306_v35, %v3306_v35 }
 0x4c9   :  { %v2968_v37 = vadd.f32 %v2967_v27, %v2966_v39  ;;  %v2975_v39 = vsel %vm1881_vm4, %v2853_v34, 0.0 }
 0x4cb   :  { %v2970_v45 = vadd.f32 %v2969_v40, %v2968_v37  ;;  %v2977_v37 = vsel %vm1881_vm4, %v2854_v56, 0.0  ;;  %v3305_v40 = vld [vmem:[#allocation3] sm:$0xff] }
 0x4cd   :  { %v2972_v57 = vadd.f32 %v2971_v4, %v2970_v45  ;;  %v3422_v4 = vpack.c.bf16 %v3305_v40, %v3305_v40 }
 0x4cf   :  { %v2974_v21 = vadd.f32 %v2973_v61, %v2972_v57  ;;  %v2979_v57 = vsel %vm1881_vm4, %v2855_v20, 0.0  ;;  %v3307_v61 = vld [vmem:[#allocation3 + $0x10] sm:$0x3]  ;;  %v3594_v34 = vunpack.c.l.b16 %v3422_v4 }
 0x4d0   :  { %v3486_v42 = vpack.c.bf16 %v3307_v61, %v3307_v61 }
 0x4d1   :  { %v2976_v27 = vadd.f32 %v2975_v39, %v2974_v21  ;;  %v3595_v21 = vunpack.c.l.b16 %v3423_v54  ;;  %v2981_v39 = vsel %vm1881_vm4, %v2856_v50, 0.0 }
 0x4d2   :  { %v3722_v56 = vunpack.c.l.b16 %v3486_v42 }
 0x4d3   :  { %v2978_v45 = vadd.f32 %v2977_v37, %v2976_v27  ;;  %v9526_v22 = vpack.c.b16 %v3595_v21, %v3594_v34  ;;  %v2983_v27 = vsel %vm1881_vm4, %v2857_v23, 0.0 }
 0x4d4   :  { %v3754_v40 = vpack.c.b16 %v3722_v56, %v3722_v56 }
 0x4d5   :  { %v2980_v48 = vadd.f32 %v2979_v57, %v2978_v45  ;;  %v3789_v35 = vshll.u32 %v9526_v22, 16  ;;  %v3787_v20 = vshrl.u32 %v9526_v22, 16  ;;  %v4234_v21 = vrot.slane %v9526_v22, 1 }
 0x4d6   :  { %v3794_v45 = vshll.u32 %v3754_v40, 16 }
 0x4d7   :  { %v2982_v38 = vadd.f32 %v2981_v39, %v2980_v48  ;;  %v3791_v10 = vrot.slane %v3789_v35, 1  ;;  %v4235_v39 = vrot.slane %v3754_v40, 1 }
 0x4d8   :  { %v3796_v54 = vrot.slane %v3794_v45, 1 }
 0x4d9   :  { %v2984_v37 = vadd.f32 %v2983_v27, %v2982_v38  ;;  %v3792_v4 = vor.u32 %v3791_v10, %v3787_v20  ;;  %v4236_v10 = vsel %vm1180_vm3, %v4234_v21, %v4235_v39 }
 0x4db   :  { %v2985_v3 = vrot.slane %v2984_v37, 4  ;;  %v3797_v48 = vsel %vm731_vm2, %v3792_v4, %v3796_v54 }
 0x4dc   :  { %4170 = vrot.lane.b32.xlu1 %v3797_v48, %s6588_s29 }
 0x4dd   :  { %v2986_v57 = vadd.f32 %v2985_v3, %v2984_v37 }
 0x4df   :  { %v2987_v61 = vrot.slane %v2986_v57, 2 }
 0x4e1   :  { %v2988_v42 = vadd.f32 %v2987_v61, %v2986_v57 }
 0x4e3   :  { %v2989_v50 = vrot.slane %v2988_v42, 1 }
 0x4e4   :  { %4330 = vrot.lane.b32.xlu1 %v4236_v10, %s6590_s30 }
 0x4e5   :  { %v2990_v23 = vadd.f32 %v2989_v50, %v2988_v42 }
 0x4e7   :  { %v2991_v38 = vmul.f32 %v2990_v23, %v9078_v52 }
 0x4e9   :  { %v2992_v34 = vadd.f32 1e-05, %v2991_v38 }
 0x4eb   :  { %6582 = vrsqrt.f32 %v2992_v34  ;;  %vm2999_vm0 = vweird.f32 %v2992_v34 }
 0x4f1   :  { %v6583_v56 = vpop.eup %6582 }
 0x4f2   :  { %v2994_v27 = vmul.f32 %v6583_v56, %v2992_v34  ;;  %vm3000_vm15 = vweird.f32 %v6583_v56 }
 0x4f3   :  { %vm3001_vm1 = vmor %vm2999_vm0, %vm3000_vm15 }
 0x4f4   :  { %v2995_v3 = vmul.f32 %v6583_v56, %v2994_v27 }
 0x4f6   :  { %v2996_v37 = vmul.f32 0.5, %v2995_v3 }
 0x4f8   :  { %v2997_v35 = vsub.f32 1.5, %v2996_v37 }
 0x4fa   :  { %v2998_v20 = vmul.f32 %v6583_v56, %v2997_v35 }
 0x4fc   :  { %v9537_v45 = vsel %vm3001_vm1, %v6583_v56, %v2998_v20 }
 0x4fd   :  { %v3066_v57 = vmul.f32 %v9537_v45, %v9093_v33  ;;  %v3003_v40 = vmul.f32 %v9537_v45, %v9097_v41  ;;  %v3004_v54 = vmul.f32 %v9537_v45, %v9101_v11  ;;  %v3005_v61 = vmul.f32 %v9537_v45, %v9105_v0 }
 0x4fe   :  { %v3006_v48 = vmul.f32 %v9537_v45, %v9109_v16  ;;  %v3007_v42 = vmul.f32 %v9537_v45, %v9117_v2  ;;  %v3008_v33 = vmul.f32 %v9537_v45, %v9123_v1  ;;  %v3009_v50 = vmul.f32 %v9537_v45, %v9131_v14 }
 0x4ff   :  { %v3130_v4 = vmax.f32 %v3066_v57, 0.0  ;;  %v3067_v23 = vmax.f32 %v3003_v40, 0.0  ;;  %v3068_v41 = vmax.f32 %v3004_v54, 0.0  ;;  %v3069_v38 = vmax.f32 %v3005_v61, 0.0  ;;  %v13407_v54 = vld [vmem:[#allocation14_spill] sm:$0xff]  ;;  %v13408_v61 = vld [vmem:[#allocation17_spill] sm:$0xff] }
 0x500   :  { %v3010_v11 = vmul.f32 %v9537_v45, %v9138_v36  ;;  %v3070_v34 = vmax.f32 %v3006_v48, 0.0  ;;  %v3011_v0 = vmul.f32 %v9537_v45, %v9145_v7  ;;  %v3071_v16 = vmax.f32 %v3007_v42, 0.0  ;;  %v13409_v42 = vld [vmem:[#allocation68_spill] sm:$0xff] }
 0x501   :  { %3304 = vst.msk [vmem:[#allocation3 + $0x339] sm:$0xff] %vm1881_vm4, %v3130_v4  ;;  %v3012_v2 = vmul.f32 %v9537_v45, %v9152_v43  ;;  %v3013_v1 = vmul.f32 %v9537_v45, %v9159_v51  ;;  %v3072_v14 = vmax.f32 %v3008_v33, 0.0  ;;  %v3014_v21 = vmul.f32 %v9537_v45, %v9166_v44 }
 0x502   :  { %3241 = vst.msk [vmem:[#allocation3 + $0x19] sm:$0xff] %vm1881_vm4, %v3067_v23  ;;  %v3015_v36 = vmul.f32 %v9537_v45, %v9173_v13  ;;  %v3016_v7 = vmul.f32 %v9537_v45, %v9180_v62  ;;  %v3073_v39 = vmax.f32 %v3009_v50, 0.0  ;;  %v3017_v43 = vmul.f32 %v9537_v45, %v9187_v24  ;;  %v13410_v50 = vld [vmem:[#allocation69_spill] sm:$0xff] }
 0x503   :  { %3242 = vst.msk [vmem:[#allocation3 + $0x21] sm:$0xff] %vm1881_vm4, %v3068_v41  ;;  %v9577_v51 = vmul.f32 %v9537_v45, %v9194_v9  ;;  %v9581_v56 = vmul.f32 %v9537_v45, %v9201_v53  ;;  %v3074_v44 = vmax.f32 %v3010_v11, 0.0  ;;  %v9586_v13 = vmul.f32 %v9537_v45, %v9208_v15  ;;  %v13411_v41 = vld [vmem:[#allocation78_spill] sm:$0xff] }
 0x504   :  { %3243 = vst.msk [vmem:[#allocation3 + $0x31] sm:$0xff] %vm1881_vm4, %v3069_v38  ;;  %v9590_v62 = vmul.f32 %v9537_v45, %v9215_v19  ;;  %v9594_v24 = vmul.f32 %v9537_v45, %v9222_v58  ;;  %v3075_v9 = vmax.f32 %v3011_v0, 0.0  ;;  %v9599_v53 = vmul.f32 %v9537_v45, %v9229_v31 }
 0x505   :  { %3244 = vst.msk [vmem:[#allocation3 + $0x39] sm:$0xff] %vm1881_vm4, %v3070_v34  ;;  %v9603_v27 = vmul.f32 %v9537_v45, %v9236_v12  ;;  %v9607_v15 = vmul.f32 %v9537_v45, %v9243_v46  ;;  %v3076_v19 = vmax.f32 %v3012_v2, 0.0  ;;  %v9612_v58 = vmul.f32 %v9537_v45, %v9250_v5  ;;  %v13412_v34 = vld [vmem:[#allocation42_spill] sm:$0xff] }
 0x506   :  { %3245 = vst.msk [vmem:[#allocation3 + $0x49] sm:$0xff] %vm1881_vm4, %v3071_v16  ;;  %v9616_v10 = vmul.f32 %v9537_v45, %v9257_v63  ;;  %v9620_v31 = vmul.f32 %v9537_v45, %v9264_v17  ;;  %v3077_v12 = vmax.f32 %v3013_v1, 0.0  ;;  %v9625_v46 = vmul.f32 %v9537_v45, %v9271_v8  ;;  %v13413_v16 = vld [vmem:[#allocation43_spill] sm:$0xff]  ;;  %v13414_v1 = vld [vmem:[#allocation73_spill] sm:$0xff] }
 0x507   :  { %3246 = vst.msk [vmem:[#allocation3 + $0x51] sm:$0xff] %vm1881_vm4, %v3072_v14  ;;  %v9629_v3 = vmul.f32 %v9537_v45, %v9278_v32  ;;  %v9633_v5 = vmul.f32 %v9537_v45, %v9285_v26  ;;  %v3078_v63 = vmax.f32 %v3014_v21, 0.0  ;;  %v9638_v17 = vmul.f32 %v9537_v45, %v9292_v60 }
 0x508   :  { %3247 = vst.msk [vmem:[#allocation3 + $0x61] sm:$0xff] %vm1881_vm4, %v3073_v39  ;;  %v9642_v37 = vmul.f32 %v9537_v45, %v9299_v30  ;;  %v9646_v8 = vmul.f32 %v9537_v45, %v9306_v55  ;;  %v3079_v32 = vmax.f32 %v3015_v36, 0.0  ;;  %v9651_v26 = vmul.f32 %v9537_v45, %v9313_v28  ;;  %v13415_v36 = vld [vmem:[#allocation47_spill] sm:$0xff]  ;;  %v13416_v39 = vld [vmem:[#allocation18_spill] sm:$0xff] }
 0x509   :  { %3248 = vst.msk [vmem:[#allocation3 + $0x69] sm:$0xff] %vm1881_vm4, %v3074_v44  ;;  %v9655_v35 = vmul.f32 %v9537_v45, %v9320_v18  ;;  %v9659_v60 = vmul.f32 %v9537_v45, %v9327_v47  ;;  %v3080_v30 = vmax.f32 %v3016_v7, 0.0  ;;  %v9664_v55 = vmul.f32 %v9537_v45, %v9334_v25  ;;  %v13405_v25 = vld [vmem:[#allocation28_spill] sm:$0xff] }
 0x50a   :  { %3249 = vst.msk [vmem:[#allocation3 + $0x79] sm:$0xff] %vm1881_vm4, %v3075_v9  ;;  %v9668_v20 = vmul.f32 %v9537_v45, %v9341_v49  ;;  %v9672_v28 = vmul.f32 %v9537_v45, %v9348_v6  ;;  %v3081_v18 = vmax.f32 %v3017_v43, 0.0  ;;  %v9677_v47 = vmul.f32 %v9537_v45, %v9355_v59  ;;  %v13406_v6 = vld [vmem:[#allocation34_spill] sm:$0xff]  ;;  %v13419_v9 = vld [vmem:[#allocation23_spill] sm:$0xff] }
 0x50b   :  { %3250 = vst.msk [vmem:[#allocation3 + $0x81] sm:$0xff] %vm1881_vm4, %v3076_v19  ;;  %v9681_v57 = vmul.f32 %v9537_v45, %v9362_v29  ;;  %v9685_v4 = vmul.f32 %v9537_v45, %v13405_v25  ;;  %v3082_v49 = vmax.f32 %v9577_v51, 0.0  ;;  %v9691_v40 = vmul.f32 %v9537_v45, %v13406_v6  ;;  %v13417_v51 = vld [vmem:[#allocation20_spill] sm:$0xff] }
 0x50c   :  { %3251 = vst.msk [vmem:[#allocation3 + $0x91] sm:$0xff] %vm1881_vm4, %v3077_v12  ;;  %v9695_v59 = vmul.f32 %v9537_v45, %v13407_v54  ;;  %v9699_v29 = vmul.f32 %v9537_v45, %v13408_v61  ;;  %v3083_v48 = vmax.f32 %v9581_v56, 0.0  ;;  %v9705_v33 = vmul.f32 %v9537_v45, %v13409_v42  ;;  %v13420_v12 = vld [vmem:[#allocation67_spill] sm:$0xff] }
 0x50d   :  { %3252 = vst.msk [vmem:[#allocation3 + $0x99] sm:$0xff] %vm1881_vm4, %v3078_v63  ;;  %v9709_v23 = vmul.f32 %v9537_v45, %v13410_v50  ;;  %v9713_v38 = vmul.f32 %v9537_v45, %v13411_v41  ;;  %v3084_v11 = vmax.f32 %v9586_v13, 0.0  ;;  %v9719_v0 = vmul.f32 %v9537_v45, %v13412_v34  ;;  %v13418_v13 = vld [vmem:[#allocation81_spill] sm:$0xff] }
 0x50e   :  { %3253 = vst.msk [vmem:[#allocation3 + $0xa9] sm:$0xff] %vm1881_vm4, %v3079_v32  ;;  %v9723_v2 = vmul.f32 %v9537_v45, %v13413_v16  ;;  %v9727_v14 = vmul.f32 %v9537_v45, %v13414_v1  ;;  %v3085_v21 = vmax.f32 %v9590_v62, 0.0  ;;  %v9733_v7 = vmul.f32 %v9537_v45, %v13415_v36  ;;  %v3360_v36 = vld [vmem:[#allocation3 + $0x1b8] sm:$0xff] }
 0x50f   :  { %3254 = vst.msk [vmem:[#allocation3 + $0xb1] sm:$0xff] %vm1881_vm4, %v3080_v30  ;;  %v9737_v43 = vmul.f32 %v9537_v45, %v13416_v39  ;;  %v9741_v56 = vmul.f32 %v9537_v45, %v13417_v51  ;;  %v3086_v44 = vmax.f32 %v9594_v24, 0.0  ;;  %v9747_v62 = vmul.f32 %v9537_v45, %v13418_v13  ;;  %v13421_v30 = vld [vmem:[#allocation54_spill] sm:$0xff]  ;;  %v3313_v51 = vld [vmem:[#allocation3 + $0x40] sm:$0x3] }
 0x510   :  { %3255 = vst.msk [vmem:[#allocation3 + $0xc1] sm:$0xff] %vm1881_vm4, %v3081_v18  ;;  %v9751_v19 = vmul.f32 %v9537_v45, %v13419_v9  ;;  %v9755_v63 = vmul.f32 %v9537_v45, %v13420_v12  ;;  %v3087_v32 = vmax.f32 %v9599_v53, 0.0  ;;  %v9761_v24 = vmul.f32 %v9537_v45, %v13421_v30  ;;  %v13422_v18 = vld [vmem:[#allocation48_spill] sm:$0xff]  ;;  %v3312_v30 = vld [vmem:[#allocation3 + $0x38] sm:$0xff] }
 0x511   :  { %3256 = vst.msk [vmem:[#allocation3 + $0xc9] sm:$0xff] %vm1881_vm4, %v3082_v49  ;;  %v9765_v25 = vmul.f32 %v9537_v45, %v13422_v18  ;;  %v13423_v49 = vld [vmem:[#allocation49_spill] sm:$0xff]  ;;  %v3088_v54 = vmax.f32 %v9603_v27, 0.0  ;;  %v3089_v53 = vmax.f32 %v9607_v15, 0.0  ;;  %v3090_v61 = vmax.f32 %v9612_v58, 0.0  ;;  %v13425_v9 = vld [vmem:[#allocation44_spill] sm:$0xff] }
 0x512   :  { %3257 = vst.msk [vmem:[#allocation3 + $0xd9] sm:$0xff] %vm1881_vm4, %v3083_v48  ;;  %v9769_v6 = vmul.f32 %v9537_v45, %v13423_v49  ;;  %v3091_v48 = vmax.f32 %v9616_v10, 0.0  ;;  %v3092_v42 = vmax.f32 %v9620_v31, 0.0  ;;  %v3093_v50 = vmax.f32 %v9625_v46, 0.0  ;;  %v3361_v49 = vld [vmem:[#allocation3 + $0x1c0] sm:$0x3] }
 0x513   :  { %3258 = vst.msk [vmem:[#allocation3 + $0xe1] sm:$0xff] %vm1881_vm4, %v3084_v11  ;;  %v3094_v41 = vmax.f32 %v9629_v3, 0.0  ;;  %v3095_v34 = vmax.f32 %v9633_v5, 0.0  ;;  %v3096_v27 = vmax.f32 %v9638_v17, 0.0  ;;  %v3097_v15 = vmax.f32 %v9642_v37, 0.0  ;;  %v13424_v11 = vld [vmem:[#allocation8_spill] sm:$0xff] }
 0x514   :  { %3259 = vst.msk [vmem:[#allocation3 + $0xf1] sm:$0xff] %vm1881_vm4, %v3085_v21  ;;  %v3098_v58 = vmax.f32 %v9646_v8, 0.0  ;;  %v3099_v10 = vmax.f32 %v9651_v26, 0.0  ;;  %v3100_v31 = vmax.f32 %v9655_v35, 0.0  ;;  %v3101_v46 = vmax.f32 %v9659_v60, 0.0  ;;  %v3359_v21 = vld [vmem:[#allocation3 + $0x1b0] sm:$0xff] }
 0x515   :  { %3260 = vst.msk [vmem:[#allocation3 + $0xf9] sm:$0xff] %vm1881_vm4, %v3086_v44  ;;  %v3102_v3 = vmax.f32 %v9664_v55, 0.0  ;;  %v3103_v5 = vmax.f32 %v9668_v20, 0.0  ;;  %v3104_v17 = vmax.f32 %v9672_v28, 0.0  ;;  %v9795_v37 = vmul.f32 %v9537_v45, %v13424_v11 }
 0x516   :  { %3261 = vst.msk [vmem:[#allocation3 + $0x109] sm:$0xff] %vm1881_vm4, %v3087_v32  ;;  %v3105_v8 = vmax.f32 %v9677_v47, 0.0  ;;  %v3106_v16 = vmax.f32 %v9681_v57, 0.0  ;;  %v3107_v1 = vmax.f32 %v9685_v4, 0.0  ;;  %v3108_v39 = vmax.f32 %v9691_v40, 0.0 }
 0x517   :  { %3262 = vst.msk [vmem:[#allocation3 + $0x111] sm:$0xff] %vm1881_vm4, %v3088_v54  ;;  %v3454_v44 = vpack.c.bf16 %v3359_v21, %v3359_v21  ;;  %v3455_v13 = vpack.c.bf16 %v3360_v36, %v3360_v36  ;;  %v9806_v12 = vmul.f32 %v9537_v45, %v13425_v9  ;;  %v3308_v21 = vld [vmem:[#allocation3 + $0x18] sm:$0xff]  ;;  %v3310_v32 = vld [vmem:[#allocation3 + $0x28] sm:$0x3]  ;;  %v13429_v40 = vmax.f32 %v9699_v29, 0.0 }
 0x518   :  { %3263 = vst.msk [vmem:[#allocation3 + $0x121] sm:$0xff] %vm1881_vm4, %v3089_v53  ;;  %v3502_v53 = vpack.c.bf16 %v3361_v49, %v3361_v49  ;;  %v13427_v49 = vld [vmem:[#allocation46_spill] sm:$0xff] }
 0x519   :  { %3264 = vst.msk [vmem:[#allocation3 + $0x129] sm:$0xff] %vm1881_vm4, %v3090_v61  ;;  %v3626_v61 = vunpack.c.l.b16 %v3454_v44  ;;  %v3627_v11 = vunpack.c.l.b16 %v3455_v13  ;;  %v9841_v36 = vmul.f32 %v9537_v45, %v13427_v49  ;;  %v3427_v49 = vpack.c.bf16 %v3312_v30, %v3312_v30 }
 0x51a   :  { %3265 = vst.msk [vmem:[#allocation3 + $0x139] sm:$0xff] %vm1881_vm4, %v3091_v48  ;;  %v3738_v44 = vunpack.c.l.b16 %v3502_v53 }
 0x51b   :  { %3266 = vst.msk [vmem:[#allocation3 + $0x141] sm:$0xff] %vm1881_vm4, %v3092_v42  ;;  %v9822_v42 = vpack.c.b16 %v3627_v11, %v3626_v61  ;;  %v13426_v61 = vld [vmem:[#allocation50_spill] sm:$0xff] }
 0x51c   :  { %3267 = vst.msk [vmem:[#allocation3 + $0x151] sm:$0xff] %vm1881_vm4, %v3093_v50  ;;  %v9837_v11 = vmul.f32 %v9537_v45, %v13426_v61  ;;  %v3314_v50 = vld [vmem:[#allocation3 + $0x48] sm:$0xff]  ;;  %v3309_v45 = vld [vmem:[#allocation3 + $0x20] sm:$0xff] }
 0x51d   :  { %3268 = vst.msk [vmem:[#allocation3 + $0x159] sm:$0xff] %vm1881_vm4, %v3094_v41  ;;  %v9832_v41 = vpack.c.b16 %v3738_v44, %v3738_v44  ;;  %v3981_v53 = vshll.u32 %v9822_v42, 16  ;;  %v3979_v48 = vshrl.u32 %v9822_v42, 16  ;;  %v3311_v44 = vld [vmem:[#allocation3 + $0x30] sm:$0xff]  ;;  %v3428_v61 = vpack.c.bf16 %v3314_v50, %v3314_v50 }
 0x51e   :  { %3269 = vst.msk [vmem:[#allocation3 + $0x169] sm:$0xff] %vm1881_vm4, %v3095_v34  ;;  %v3424_v34 = vpack.c.bf16 %v3308_v21, %v3308_v21  ;;  %v3425_v54 = vpack.c.bf16 %v3309_v45, %v3309_v45  ;;  %v3128_v60 = vmax.f32 %v9837_v11, 0.0 }
 0x51f   :  { %3270 = vst.msk [vmem:[#allocation3 + $0x171] sm:$0xff] %vm1881_vm4, %v3096_v27  ;;  %v3315_v27 = vld [vmem:[#allocation3 + $0x50] sm:$0xff]  ;;  %v3983_v9 = vrot.slane %v3981_v53, 1  ;;  %v3986_v13 = vshll.u32 %v9832_v41, 16  ;;  %v3600_v53 = vunpack.c.l.b16 %v3428_v61 }
 0x520   :  { %3271 = vst.msk [vmem:[#allocation3 + $0x181] sm:$0xff] %vm1881_vm4, %v3097_v15  ;;  %v3429_v18 = vpack.c.bf16 %v3315_v27, %v3315_v27  ;;  %v3426_v15 = vpack.c.bf16 %v3311_v44, %v3311_v44  ;;  %v3596_v44 = vunpack.c.l.b16 %v3424_v34  ;;  %v3597_v30 = vunpack.c.l.b16 %v3425_v54 }
 0x521   :  { %3272 = vst.msk [vmem:[#allocation3 + $0x189] sm:$0xff] %vm1881_vm4, %v3098_v58  ;;  %v3984_v58 = vor.u32 %v3983_v9, %v3979_v48  ;;  %v3988_v50 = vrot.slane %v3986_v13, 1  ;;  %v3488_v9 = vpack.c.bf16 %v3313_v51, %v3313_v51  ;;  %v3321_v48 = vld [vmem:[#allocation3 + $0x80] sm:$0xff]  ;;  %v3322_v13 = vld [vmem:[#allocation3 + $0x88] sm:$0x3] }
 0x522   :  { %3273 = vst.msk [vmem:[#allocation3 + $0x1c9] sm:$0xff] %vm1881_vm4, %v3099_v10  ;;  %v3601_v27 = vunpack.c.l.b16 %v3429_v18  ;;  %v3598_v26 = vunpack.c.l.b16 %v3426_v15  ;;  %v3599_v10 = vunpack.c.l.b16 %v3427_v49  ;;  %v3127_v18 = vmax.f32 %v9806_v12, 0.0 }
 0x523   :  { %3274 = vst.msk [vmem:[#allocation3 + $0x1d1] sm:$0xff] %vm1881_vm4, %v3100_v31  ;;  %v3989_v35 = vsel %vm731_vm2, %v3984_v58, %v3988_v50  ;;  %v3487_v31 = vpack.c.bf16 %v3310_v32, %v3310_v32  ;;  %v9871_v55 = vpack.c.b16 %v3597_v30, %v3596_v44  ;;  %v3724_v32 = vunpack.c.l.b16 %v3488_v9 }
 0x524   :  { %3275 = vst.msk [vmem:[#allocation3 + $0x1e1] sm:$0xff] %vm1881_vm4, %v3101_v46  ;;  %v9861_v21 = vpack.c.b16 %v3601_v27, %v3600_v53  ;;  %4202 = vrot.lane.b32.xlu2 %v3989_v35, %s6588_s29  ;;  %v9869_v46 = vpack.c.b16 %v3599_v10, %v3598_v26  ;;  %v3433_v50 = vpack.c.bf16 %v3321_v48, %v3321_v48  ;;  %v13428_v10 = vmax.f32 %v9695_v59, 0.0  ;;  %v3323_v35 = vld [vmem:[#allocation3 + $0x90] sm:$0xff]  ;;  %v3324_v59 = vld [vmem:[#allocation3 + $0x98] sm:$0xff]  ;;  %v3325_v48 = vld [vmem:[#allocation3 + $0xa0] sm:$0x3] }
 0x525   :  { %3276 = vst.msk [vmem:[#allocation3 + $0x1e9] sm:$0xff] %vm1881_vm4, %v3102_v3  ;;  %v3316_v3 = vld [vmem:[#allocation3 + $0x58] sm:$0x3]  ;;  %v3723_v51 = vunpack.c.l.b16 %v3487_v31  ;;  %v4237_v28 = vrot.slane %v9871_v55, 1  ;;  %v3756_v47 = vpack.c.b16 %v3724_v32, %v3724_v32  ;;  %v3491_v53 = vpack.c.bf16 %v3322_v13, %v3322_v13 }
 0x526   :  { %3277 = vst.msk [vmem:[#allocation3 + $0x1f9] sm:$0xff] %vm1881_vm4, %v3103_v5  ;;  %4408 = vrot.lane.b32.xlu1 %v9861_v21, %s6591_s4  ;;  %v3489_v54 = vpack.c.bf16 %v3316_v3, %v3316_v3  ;;  %v3823_v20 = vshrl.u32 %v9861_v21, 16  ;;  %v3320_v5 = vld [vmem:[#allocation3 + $0x78] sm:$0xff]  ;;  %4406 = vrot.lane.b32.xlu0 %v9869_v46, %s6591_s4  ;;  %v3811_v34 = vshrl.u32 %v9869_v46, 16  ;;  %v3813_v61 = vshll.u32 %v9869_v46, 16 }
 0x527   :  { %3278 = vst.msk [vmem:[#allocation3 + $0x201] sm:$0xff] %vm1881_vm4, %v3104_v17  ;;  %v4240_v17 = vrot.slane %v9869_v46, 1  ;;  %v9891_v45 = vpack.c.b16 %v3723_v51, %v3723_v51  ;;  %v3432_v58 = vpack.c.bf16 %v3320_v5, %v3320_v5  ;;  %v3818_v27 = vshll.u32 %v3756_v47, 16 }
 0x528   :  { %3279 = vst.msk [vmem:[#allocation3 + $0x211] sm:$0xff] %vm1881_vm4, %v3105_v8  ;;  %v3725_v15 = vunpack.c.l.b16 %v3489_v54  ;;  %v3825_v8 = vshll.u32 %v9861_v21, 16  ;;  %v3815_v49 = vrot.slane %v3813_v61, 1  ;;  %v3605_v30 = vunpack.c.l.b16 %v3433_v50  ;;  %v3330_v61 = vld [vmem:[#allocation3 + $0xc8] sm:$0xff]  ;;  %v3332_v50 = vld [vmem:[#allocation3 + $0xd8] sm:$0xff] }
 0x529   :  { %3280 = vst.msk [vmem:[#allocation3 + $0x219] sm:$0xff] %vm1881_vm4, %v3106_v16  ;;  %v4238_v57 = vrot.slane %v9891_v45, 1  ;;  %v4241_v16 = vrot.slane %v3756_v47, 1  ;;  %v3604_v44 = vunpack.c.l.b16 %v3432_v58  ;;  %v3129_v31 = vmax.f32 %v9841_v36, 0.0  ;;  %v3331_v58 = vld [vmem:[#allocation3 + $0xd0] sm:$0x3] }
 0x52a   :  { %3281 = vst.msk [vmem:[#allocation3 + $0x229] sm:$0xff] %vm1881_vm4, %v3107_v1  ;;  %v9901_v26 = vpack.c.b16 %v3725_v15, %v3725_v15  ;;  %v3816_v4 = vor.u32 %v3815_v49, %v3811_v34  ;;  %v3827_v1 = vrot.slane %v3825_v8, 1  ;;  %v3820_v9 = vrot.slane %v3818_v27, 1 }
 0x52b   :  { %3282 = vst.msk [vmem:[#allocation3 + $0x231] sm:$0xff] %vm1881_vm4, %v3108_v39  ;;  %v9911_v39 = vsel %vm1180_vm3, %v4237_v28, %v4238_v57  ;;  %v13430_v51 = vmax.f32 %v9705_v33, 0.0  ;;  %v9920_v32 = vsel %vm1180_vm3, %v4240_v17, %v4241_v16  ;;  %v9922_v54 = vpack.c.b16 %v3605_v30, %v3604_v44  ;;  %v3333_v30 = vld [vmem:[#allocation3 + $0xe0] sm:$0xff] }
 0x52c   :  { %3283 = vst.msk [vmem:[#allocation3 + $0x241] sm:$0xff] %vm1881_vm4, %v13428_v10  ;;  %v3830_v3 = vshll.u32 %v9901_v26, 16  ;;  %4404 = vrot.lane.b32.xlu2 %v9871_v55, %s6591_s4  ;;  %v3828_v29 = vor.u32 %v3827_v1, %v3823_v20  ;;  %v3727_v5 = vunpack.c.l.b16 %v3491_v53  ;;  %v13431_v13 = vmax.f32 %v9709_v23, 0.0  ;;  %v3329_v20 = vld [vmem:[#allocation3 + $0xc0] sm:$0xff] }
 0x52d   :  { %3284 = vst.msk [vmem:[#allocation3 + $0x249] sm:$0xff] %vm1881_vm4, %v13429_v40  ;;  %v9930_v33 = vsel %vm731_vm2, %v3816_v4, %v3820_v9  ;;  %v4243_v17 = vrot.slane %v9861_v21, 1  ;;  %v3434_v34 = vpack.c.bf16 %v3323_v35, %v3323_v35  ;;  %v13432_v47 = vmax.f32 %v9713_v38, 0.0 }
 0x52e   :  { %3285 = vst.msk [vmem:[#allocation3 + $0x259] sm:$0xff] %vm1881_vm4, %v13430_v51  ;;  %4568 = vrot.lane.b32.xlu1 %v9911_v39, %s6596_s0  ;;  %v3832_v28 = vrot.slane %v3830_v3, 1  ;;  %4644 = vrot.lane.b32.xlu0 %v9861_v21, %s6597_s22  ;;  %v9938_v23 = vpack.c.b16 %v3727_v5, %v3727_v5  ;;  %v3849_v15 = vshll.u32 %v9922_v54, 16  ;;  %v4244_v8 = vrot.slane %v9901_v26, 1  ;;  %v3334_v3 = vld [vmem:[#allocation3 + $0xe8] sm:$0x3] }
 0x52f   :  { %3286 = vst.msk [vmem:[#allocation3 + $0x261] sm:$0xff] %vm1881_vm4, %v13431_v13  ;;  %v3435_v49 = vpack.c.bf16 %v3324_v59, %v3324_v59  ;;  %v13433_v53 = vmax.f32 %v9719_v0, 0.0  ;;  %v3847_v57 = vshrl.u32 %v9922_v54, 16  ;;  %v3492_v16 = vpack.c.bf16 %v3325_v48, %v3325_v48 }
 0x530   :  { %3287 = vst.msk [vmem:[#allocation3 + $0x271] sm:$0xff] %vm1881_vm4, %v13432_v47  ;;  %v9946_v38 = vsel %vm731_vm2, %v3828_v29, %v3832_v28  ;;  %v3606_v27 = vunpack.c.l.b16 %v3434_v34  ;;  %v13434_v10 = vmax.f32 %v9723_v2, 0.0  ;;  %v3851_v4 = vrot.slane %v3849_v15, 1  ;;  %v3372_v52 = vld [vmem:[#allocation3 + $0x218] sm:$0xff] }
 0x531   :  { %3288 = vst.msk [vmem:[#allocation3 + $0x279] sm:$0xff] %vm1881_vm4, %v13433_v53  ;;  %v3854_v26 = vshll.u32 %v9938_v23, 16  ;;  %v3607_v1 = vunpack.c.l.b16 %v3435_v49  ;;  %v3438_v44 = vpack.c.bf16 %v3329_v20, %v3329_v20  ;;  %v13435_v0 = vmax.f32 %v9727_v14, 0.0 }
 0x532   :  { %3289 = vst.msk [vmem:[#allocation3 + $0x289] sm:$0xff] %vm1881_vm4, %v13434_v10  ;;  %v3728_v35 = vunpack.c.l.b16 %v3492_v16  ;;  %v3439_v40 = vpack.c.bf16 %v3330_v61, %v3330_v61  ;;  %v3494_v9 = vpack.c.bf16 %v3331_v58, %v3331_v58  ;;  %v3440_v59 = vpack.c.bf16 %v3332_v50, %v3332_v50 }
 0x533   :  { %3290 = vst.msk [vmem:[#allocation3 + $0x291] sm:$0xff] %vm1881_vm4, %v13435_v0  ;;  %v13436_v51 = vmax.f32 %v9733_v7, 0.0  ;;  %v3852_v2 = vor.u32 %v3851_v4, %v3847_v57  ;;  %v3856_v29 = vrot.slane %v3854_v26, 1  ;;  %v9959_v5 = vpack.c.b16 %v3607_v1, %v3606_v27  ;;  %v3338_v27 = vld [vmem:[#allocation3 + $0x108] sm:$0xff] }
 0x534   :  { %v3610_v48 = vunpack.c.l.b16 %v3438_v44  ;;  %v13437_v13 = vmax.f32 %v9737_v43, 0.0  ;;  %v9964_v14 = vpack.c.b16 %v3728_v35, %v3728_v35  ;;  %v3611_v28 = vunpack.c.l.b16 %v3439_v40  ;;  %4642 = vrot.lane.b32.xlu2 %v9869_v46, %s6597_s22  ;;  %v3339_v40 = vld [vmem:[#allocation3 + $0x110] sm:$0xff]  ;;  %3301 = vst.msk [vmem:[#allocation3 + $0x319] sm:$0xff] %vm1881_vm4, %v3127_v18 }
 0x535   :  { %3291 = vst.msk [vmem:[#allocation3 + $0x2a1] sm:$0xff] %vm1881_vm4, %v13436_v51  ;;  %v3730_v34 = vunpack.c.l.b16 %v3494_v9  ;;  %v3441_v20 = vpack.c.bf16 %v3333_v30, %v3333_v30  ;;  %v13438_v61 = vmax.f32 %v9741_v56, 0.0  ;;  %v9972_v7 = vsel %vm731_vm2, %v3852_v2, %v3856_v29 }
 0x536   :  { %3292 = vst.msk [vmem:[#allocation3 + $0x2a9] sm:$0xff] %vm1881_vm4, %v13437_v13  ;;  %v9975_v47 = vsel %vm1180_vm3, %v4243_v17, %v4244_v8  ;;  %v3861_v43 = vshll.u32 %v9959_v5, 16  ;;  %v3495_v15 = vpack.c.bf16 %v3334_v3, %v3334_v3  ;;  %v13439_v49 = vmax.f32 %v9747_v62, 0.0  ;;  %4806 = vrot.lane.b32.xlu1 %v9920_v32, %s6598_s23  ;;  %4334 = vrot.lane.b32.xlu0 %v9920_v32, %s6590_s30 }
 0x537   :  { %3293 = vst.msk [vmem:[#allocation3 + $0x2b9] sm:$0xff] %vm1881_vm4, %v13438_v61  ;;  %v3866_v56 = vshll.u32 %v9964_v14, 16  ;;  %v9984_v58 = vpack.c.b16 %v3611_v28, %v3610_v48  ;;  %v9986_v50 = vpack.c.b16 %v3730_v34, %v3730_v34  ;;  %v3612_v53 = vunpack.c.l.b16 %v3440_v59  ;;  %v3341_v34 = vld [vmem:[#allocation3 + $0x120] sm:$0xff] }
 0x538   :  { %3294 = vst.msk [vmem:[#allocation3 + $0x2c1] sm:$0xff] %vm1881_vm4, %v13439_v49  ;;  %v13440_v17 = vmax.f32 %v9751_v19, 0.0  ;;  %v3859_v62 = vshrl.u32 %v9959_v5, 16  ;;  %v3863_v8 = vrot.slane %v3861_v43, 1  ;;  %v3613_v57 = vunpack.c.l.b16 %v3441_v20  ;;  %v3343_v49 = vld [vmem:[#allocation3 + $0x130] sm:$0x3] }
 0x539   :  { %v3731_v16 = vunpack.c.l.b16 %v3495_v15  ;;  %v13441_v10 = vmax.f32 %v9755_v63, 0.0  ;;  %v3868_v4 = vrot.slane %v3866_v56, 1  ;;  %v3885_v26 = vshll.u32 %v9984_v58, 16  ;;  %v3342_v15 = vld [vmem:[#allocation3 + $0x128] sm:$0xff]  ;;  %3302 = vst.msk [vmem:[#allocation3 + $0x321] sm:$0xff] %vm1881_vm4, %v3128_v60 }
 0x53a   :  { %3295 = vst.msk [vmem:[#allocation3 + $0x2d1] sm:$0xff] %vm1881_vm4, %v13440_v17  ;;  %v3890_v19 = vshll.u32 %v9986_v50, 16  ;;  %v3799_v1 = vshrl.u32 %v9871_v55, 16  ;;  %v13442_v44 = vmax.f32 %v9761_v24, 0.0  ;;  %v3864_v30 = vor.u32 %v3863_v8, %v3859_v62  ;;  %v3340_v24 = vld [vmem:[#allocation3 + $0x118] sm:$0x3] }
 0x53b   :  { %3296 = vst.msk [vmem:[#allocation3 + $0x2d9] sm:$0xff] %vm1881_vm4, %v13441_v10  ;;  %v10003_v0 = vpack.c.b16 %v3613_v57, %v3612_v53  ;;  %v10005_v35 = vpack.c.b16 %v3731_v16, %v3731_v16  ;;  %v3801_v63 = vshll.u32 %v9871_v55, 16  ;;  %v13445_v9 = vmax.f32 %v9765_v25, 0.0  ;;  %v3317_v62 = vld [vmem:[#allocation3 + $0x60] sm:$0xff]  ;;  %v3319_v10 = vld [vmem:[#allocation3 + $0x70] sm:$0x3] }
 0x53c   :  { %3297 = vst.msk [vmem:[#allocation3 + $0x2e9] sm:$0xff] %vm1881_vm4, %v13442_v44  ;;  %v3883_v3 = vshrl.u32 %v9984_v58, 16  ;;  %v3887_v59 = vrot.slane %v3885_v26, 1  ;;  %v3806_v51 = vshll.u32 %v9891_v45, 16  ;;  %v3444_v2 = vpack.c.bf16 %v3338_v27, %v3338_v27  ;;  %4332 = vrot.lane.b32.xlu2 %v9911_v39, %s6590_s30  ;;  %v3318_v27 = vld [vmem:[#allocation3 + $0x68] sm:$0xff] }
 0x53d   :  { %13443 = vst [vmem:[#allocation64_spill] sm:$0xff] %v10003_v0  ;;  %v13446_v29 = vmax.f32 %v9769_v6, 0.0  ;;  %v10017_v48 = vsel %vm731_vm2, %v3864_v30, %v3868_v4  ;;  %v3892_v13 = vrot.slane %v3890_v19, 1  ;;  %v3897_v28 = vshll.u32 %v10003_v0, 16 }
 0x53e   :  { %13444 = vst [vmem:[#allocation11_spill] sm:$0xff] %v10005_v35  ;;  %v3902_v25 = vshll.u32 %v10005_v35, 16  ;;  %v13447_v20 = vmax.f32 %v9795_v37, 0.0  ;;  %v3888_v45 = vor.u32 %v3887_v59, %v3883_v3  ;;  %v3895_v61 = vshrl.u32 %v10003_v0, 16  ;;  %4176 = vrot.lane.b32.xlu1 %v9946_v38, %s6588_s29  ;;  %4174 = vrot.lane.b32.xlu0 %v9930_v33, %s6588_s29 }
 0x53f   :  { %3298 = vst.msk [vmem:[#allocation3 + $0x2f1] sm:$0xff] %vm1881_vm4, %v13445_v9  ;;  %v3803_v43 = vrot.slane %v3801_v63, 1  ;;  %v3445_v6 = vpack.c.bf16 %v3339_v40, %v3339_v40  ;;  %v3899_v56 = vrot.slane %v3897_v28, 1  ;;  %v3808_v53 = vrot.slane %v3806_v51, 1  ;;  %v3347_v63 = vld [vmem:[#allocation3 + $0x150] sm:$0xff] }
 0x540   :  { %3299 = vst.msk [vmem:[#allocation3 + $0x301] sm:$0xff] %vm1881_vm4, %v13446_v29  ;;  %v3497_v17 = vpack.c.bf16 %v3340_v24, %v3340_v24  ;;  %v3616_v37 = vunpack.c.l.b16 %v3444_v2  ;;  %v3904_v8 = vrot.slane %v3902_v25, 1  ;;  %v3446_v16 = vpack.c.bf16 %v3341_v34, %v3341_v34 }
 0x541   :  { %3300 = vst.msk [vmem:[#allocation3 + $0x309] sm:$0xff] %vm1881_vm4, %v13447_v20  ;;  %v3804_v57 = vor.u32 %v3803_v43, %v3799_v1  ;;  %v3617_v12 = vunpack.c.l.b16 %v3445_v6  ;;  %v10041_v18 = vsel %vm731_vm2, %v3888_v45, %v3892_v13  ;;  %v3447_v39 = vpack.c.bf16 %v3342_v15, %v3342_v15  ;;  %v3348_v13 = vld [vmem:[#allocation3 + $0x158] sm:$0xff]  ;;  %v3349_v20 = vld [vmem:[#allocation3 + $0x160] sm:$0x3] }
 0x542   :  { %3303 = vst.msk [vmem:[#allocation3 + $0x331] sm:$0xff] %vm1881_vm4, %v3129_v31  ;;  %v3733_v11 = vunpack.c.l.b16 %v3497_v17  ;;  %v3498_v60 = vpack.c.bf16 %v3343_v49, %v3343_v49  ;;  %v3900_v4 = vor.u32 %v3899_v56, %v3895_v61  ;;  %v3618_v19 = vunpack.c.l.b16 %v3446_v16  ;;  %v3352_v16 = vld [vmem:[#allocation3 + $0x178] sm:$0x3] }
 0x543   :  { %v10043_v26 = vpack.c.b16 %v3617_v12, %v3616_v37  ;;  %v3430_v1 = vpack.c.bf16 %v3317_v62, %v3317_v62  ;;  %v10046_v36 = vsel %vm731_vm2, %v3804_v57, %v3808_v53  ;;  %v3619_v44 = vunpack.c.l.b16 %v3447_v39  ;;  %v3350_v37 = vld [vmem:[#allocation3 + $0x168] sm:$0xff]  ;;  %v3351_v12 = vld [vmem:[#allocation3 + $0x170] sm:$0xff] }
 0x544   :  { %v10048_v31 = vpack.c.b16 %v3733_v11, %v3733_v11  ;;  %v3734_v30 = vunpack.c.l.b16 %v3498_v60  ;;  %v3431_v3 = vpack.c.bf16 %v3318_v27, %v3318_v27  ;;  %v3490_v59 = vpack.c.bf16 %v3319_v10, %v3319_v10  ;;  %4570 = vrot.lane.b32.xlu2 %v9920_v32, %s6596_s0 }
 0x545   :  { %13448 = vst [vmem:[#allocation53_spill] sm:$0xff] %v10043_v26  ;;  %v3919_v40 = vshrl.u32 %v10043_v26, 16  ;;  %v3921_v9 = vshll.u32 %v10043_v26, 16  ;;  %v10053_v24 = vpack.c.b16 %v3619_v44, %v3618_v19  ;;  %v3602_v29 = vunpack.c.l.b16 %v3430_v1  ;;  %v3326_v44 = vld [vmem:[#allocation3 + $0xa8] sm:$0xff] }
 0x546   :  { %13449 = vst [vmem:[#allocation59_spill] sm:$0xff] %v10048_v31  ;;  %v3926_v51 = vshll.u32 %v10048_v31, 16  ;;  %v10055_v2 = vpack.c.b16 %v3734_v30, %v3734_v30  ;;  %v3603_v25 = vunpack.c.l.b16 %v3431_v3  ;;  %v3726_v34 = vunpack.c.l.b16 %v3490_v59  ;;  %4182 = vrot.lane.b32.xlu1 %v10017_v48, %s6588_s29  ;;  %4180 = vrot.lane.b32.xlu0 %v9972_v7, %s6588_s29  ;;  %v3327_v3 = vld [vmem:[#allocation3 + $0xb0] sm:$0xff]  ;;  %v3385_v31 = vld [vmem:[#allocation3 + $0x280] sm:$0x3] }
 0x547   :  { %13450 = vst [vmem:[#allocation55_spill] sm:$0xff] %v10053_v24  ;;  %v3923_v28 = vrot.slane %v3921_v9, 1  ;;  %v3450_v45 = vpack.c.bf16 %v3347_v63, %v3347_v63  ;;  %v10060_v61 = vsel %vm731_vm2, %v3900_v4, %v3904_v8  ;;  %v3933_v6 = vshll.u32 %v10053_v24, 16 }
 0x548   :  { %13451 = vst [vmem:[#allocation26_spill] sm:$0xff] %v10055_v2  ;;  %v3928_v43 = vrot.slane %v3926_v51, 1  ;;  %v3938_v15 = vshll.u32 %v10055_v2, 16  ;;  %v10066_v56 = vpack.c.b16 %v3603_v25, %v3602_v29  ;;  %v10068_v53 = vpack.c.b16 %v3726_v34, %v3726_v34  ;;  %v3345_v2 = vld [vmem:[#allocation3 + $0x140] sm:$0xff] }
 0x549   :  { %13452 = vst [vmem:[#allocation29_spill] sm:$0xff] %v10060_v61  ;;  %v3924_v49 = vor.u32 %v3923_v28, %v3919_v40  ;;  %v3451_v17 = vpack.c.bf16 %v3348_v13, %v3348_v13  ;;  %v3931_v32 = vshrl.u32 %v10053_v24, 16  ;;  %v3935_v62 = vrot.slane %v3933_v6, 1  ;;  %v3328_v28 = vld [vmem:[#allocation3 + $0xb8] sm:$0x3] }
 0x54a   :  { %v3500_v8 = vpack.c.bf16 %v3349_v20, %v3349_v20  ;;  %v3622_v57 = vunpack.c.l.b16 %v3450_v45  ;;  %v3940_v39 = vrot.slane %v3938_v15, 1  ;;  %v3837_v60 = vshll.u32 %v10066_v56, 16 }
 0x54b   :  { %v10074_v11 = vsel %vm731_vm2, %v3924_v49, %v3928_v43  ;;  %v3842_v27 = vshll.u32 %v10068_v53, 16  ;;  %v3936_v10 = vor.u32 %v3935_v62, %v3931_v32  ;;  %v3623_v4 = vunpack.c.l.b16 %v3451_v17 }
 0x54c   :  { %13453 = vst [vmem:[#allocation79_spill] sm:$0xff] %v10074_v11  ;;  %v3736_v19 = vunpack.c.l.b16 %v3500_v8  ;;  %v3452_v1 = vpack.c.bf16 %v3350_v37, %v3350_v37  ;;  %v3835_v30 = vshrl.u32 %v10066_v56, 16  ;;  %v3839_v63 = vrot.slane %v3837_v60, 1  ;;  %4808 = vrot.lane.b32.xlu2 %v9975_v47, %s6598_s23  ;;  %v3362_v8 = vld [vmem:[#allocation3 + $0x1c8] sm:$0xff] }
 0x54d   :  { %v3453_v40 = vpack.c.bf16 %v3351_v12, %v3351_v12  ;;  %v3501_v9 = vpack.c.bf16 %v3352_v16, %v3352_v16  ;;  %v3844_v59 = vrot.slane %v3842_v27, 1  ;;  %v10079_v51 = vpack.c.b16 %v3623_v4, %v3622_v57  ;;  %v3363_v57 = vld [vmem:[#allocation3 + $0x1d0] sm:$0xff]  ;;  %v3364_v27 = vld [vmem:[#allocation3 + $0x1d8] sm:$0x3] }
 0x54e   :  { %v10081_v29 = vpack.c.b16 %v3736_v19, %v3736_v19  ;;  %v3624_v13 = vunpack.c.l.b16 %v3452_v1  ;;  %v3840_v25 = vor.u32 %v3839_v63, %v3835_v30  ;;  %v3436_v45 = vpack.c.bf16 %v3326_v44, %v3326_v44  ;;  %4188 = vrot.lane.b32.xlu1 %v10060_v61, %s6588_s29  ;;  %4186 = vrot.lane.b32.xlu0 %v10041_v18, %s6588_s29 }
 0x54f   :  { %13454 = vst [vmem:[#allocation51_spill] sm:$0xff] %v10079_v51  ;;  %v3625_v34 = vunpack.c.l.b16 %v3453_v40  ;;  %v3737_v20 = vunpack.c.l.b16 %v3501_v9  ;;  %v10086_v43 = vsel %vm731_vm2, %v3936_v10, %v3940_v39  ;;  %v3957_v6 = vshll.u32 %v10079_v51, 16 }
 0x550   :  { %13455 = vst [vmem:[#allocation52_spill] sm:$0xff] %v10081_v29  ;;  %v3962_v15 = vshll.u32 %v10081_v29, 16  ;;  %v3437_v49 = vpack.c.bf16 %v3327_v3, %v3327_v3  ;;  %v3955_v17 = vshrl.u32 %v10079_v51, 16  ;;  %v3493_v62 = vpack.c.bf16 %v3328_v28, %v3328_v28  ;;  %v3365_v28 = vld [vmem:[#allocation3 + $0x1e0] sm:$0xff] }
 0x551   :  { %13456 = vst [vmem:[#allocation74_spill] sm:$0xff] %v10086_v43  ;;  %v10093_v37 = vpack.c.b16 %v3625_v34, %v3624_v13  ;;  %v10095_v32 = vpack.c.b16 %v3737_v20, %v3737_v20  ;;  %v10100_v12 = vsel %vm731_vm2, %v3840_v25, %v3844_v59  ;;  %v3959_v16 = vrot.slane %v3957_v6, 1  ;;  %v3366_v25 = vld [vmem:[#allocation3 + $0x1e8] sm:$0xff]  ;;  %v3367_v34 = vld [vmem:[#allocation3 + $0x1f0] sm:$0x3] }
 0x552   :  { %v3608_v39 = vunpack.c.l.b16 %v3436_v45  ;;  %v3609_v60 = vunpack.c.l.b16 %v3437_v49  ;;  %v3964_v10 = vrot.slane %v3962_v15, 1  ;;  %v3729_v1 = vunpack.c.l.b16 %v3493_v62 }
 0x553   :  { %13457 = vst [vmem:[#allocation57_spill] sm:$0xff] %v10093_v37  ;;  %v3969_v4 = vshll.u32 %v10093_v37, 16  ;;  %v3974_v19 = vshll.u32 %v10095_v32, 16  ;;  %v3967_v44 = vshrl.u32 %v10093_v37, 16  ;;  %v3456_v63 = vpack.c.bf16 %v3362_v8, %v3362_v8 }
 0x554   :  { %13458 = vst [vmem:[#allocation21_spill] sm:$0xff] %v10095_v32  ;;  %v10105_v30 = vpack.c.b16 %v3609_v60, %v3608_v39  ;;  %v3457_v40 = vpack.c.bf16 %v3363_v57, %v3363_v57  ;;  %v3960_v9 = vor.u32 %v3959_v16, %v3955_v17  ;;  %v10107_v59 = vpack.c.b16 %v3729_v1, %v3729_v1 }
 0x555   :  { %v3971_v3 = vrot.slane %v3969_v4, 1  ;;  %v3503_v13 = vpack.c.bf16 %v3364_v27, %v3364_v27  ;;  %v3976_v20 = vrot.slane %v3974_v19, 1  ;;  %v3628_v15 = vunpack.c.l.b16 %v3456_v63  ;;  %4172 = vrot.lane.b32.xlu2 %v10046_v36, %s6588_s29  ;;  %v3335_v27 = vld [vmem:[#allocation3 + $0xf0] sm:$0xff]  ;;  %v3336_v63 = vld [vmem:[#allocation3 + $0xf8] sm:$0xff] }
 0x556   :  { %v3871_v45 = vshrl.u32 %v10105_v30, 16  ;;  %v3873_v6 = vshll.u32 %v10105_v30, 16  ;;  %v3878_v62 = vshll.u32 %v10107_v59, 16  ;;  %v3629_v39 = vunpack.c.l.b16 %v3457_v40  ;;  %4194 = vrot.lane.b32.xlu1 %v10086_v43, %s6588_s29  ;;  %4192 = vrot.lane.b32.xlu0 %v10074_v11, %s6588_s29  ;;  %v3380_v11 = vld [vmem:[#allocation3 + $0x258] sm:$0xff] }
 0x557   :  { %v3972_v49 = vor.u32 %v3971_v3, %v3967_v44  ;;  %v3739_v8 = vunpack.c.l.b16 %v3503_v13  ;;  %v3458_v57 = vpack.c.bf16 %v3365_v28, %v3365_v28  ;;  %v3459_v16 = vpack.c.bf16 %v3366_v25, %v3366_v25  ;;  %v3337_v25 = vld [vmem:[#allocation3 + $0x100] sm:$0x3] }
 0x558   :  { %v3875_v17 = vrot.slane %v3873_v6, 1  ;;  %v3504_v60 = vpack.c.bf16 %v3367_v34, %v3367_v34  ;;  %v10117_v4 = vsel %vm731_vm2, %v3960_v9, %v3964_v10  ;;  %v10122_v1 = vpack.c.b16 %v3629_v39, %v3628_v15 }
 0x559   :  { %13459 = vst [vmem:[#allocation24_spill] sm:$0xff] %v10117_v4  ;;  %v10120_v19 = vsel %vm731_vm2, %v3972_v49, %v3976_v20  ;;  %v10124_v44 = vpack.c.b16 %v3739_v8, %v3739_v8  ;;  %v3630_v3 = vunpack.c.l.b16 %v3458_v57  ;;  %v3631_v13 = vunpack.c.l.b16 %v3459_v16  ;;  %v3371_v8 = vld [vmem:[#allocation3 + $0x210] sm:$0xff]  ;;  %v3373_v16 = vld [vmem:[#allocation3 + $0x220] sm:$0x3] }
 0x55a   :  { %13460 = vst [vmem:[#allocation25_spill] sm:$0xff] %v10120_v19  ;;  %v3876_v40 = vor.u32 %v3875_v17, %v3871_v45  ;;  %v3740_v28 = vunpack.c.l.b16 %v3504_v60  ;;  %v3880_v34 = vrot.slane %v3878_v62, 1  ;;  %v3993_v10 = vshll.u32 %v10122_v1, 16 }
 0x55b   :  { %v3998_v9 = vshll.u32 %v10124_v44, 16  ;;  %v3442_v20 = vpack.c.bf16 %v3335_v27, %v3335_v27  ;;  %v3991_v6 = vshrl.u32 %v10122_v1, 16  ;;  %v10131_v15 = vpack.c.b16 %v3631_v13, %v3630_v3 }
 0x55c   :  { %v10133_v49 = vpack.c.b16 %v3740_v28, %v3740_v28  ;;  %v3443_v39 = vpack.c.bf16 %v3336_v63, %v3336_v63  ;;  %v10136_v45 = vsel %vm731_vm2, %v3876_v40, %v3880_v34  ;;  %v3995_v17 = vrot.slane %v3993_v10, 1  ;;  %v3374_v10 = vld [vmem:[#allocation3 + $0x228] sm:$0xff] }
 0x55d   :  { %v3496_v57 = vpack.c.bf16 %v3337_v25, %v3337_v25  ;;  %v3614_v62 = vunpack.c.l.b16 %v3442_v20  ;;  %v4000_v60 = vrot.slane %v3998_v9, 1  ;;  %v4005_v32 = vshll.u32 %v10131_v15, 16  ;;  %4178 = vrot.lane.b32.xlu2 %v10100_v12, %s6588_s29  ;;  %v3375_v9 = vld [vmem:[#allocation3 + $0x230] sm:$0xff] }
 0x55e   :  { %v4010_v27 = vshll.u32 %v10133_v49, 16  ;;  %v3615_v37 = vunpack.c.l.b16 %v3443_v39  ;;  %v3996_v3 = vor.u32 %v3995_v17, %v3991_v6  ;;  %v3462_v28 = vpack.c.bf16 %v3371_v8, %v3371_v8  ;;  %4200 = vrot.lane.b32.xlu1 %v10120_v19, %s6588_s29  ;;  %4198 = vrot.lane.b32.xlu0 %v10117_v4, %s6588_s29  ;;  %v3344_v4 = vld [vmem:[#allocation3 + $0x138] sm:$0xff] }
 0x55f   :  { %v3732_v13 = vunpack.c.l.b16 %v3496_v57  ;;  %v3463_v29 = vpack.c.bf16 %v3372_v52, %v3372_v52  ;;  %v4003_v63 = vshrl.u32 %v10131_v15, 16  ;;  %v4007_v40 = vrot.slane %v4005_v32, 1  ;;  %v3376_v52 = vld [vmem:[#allocation3 + $0x238] sm:$0x3] }
 0x560   :  { %v10143_v34 = vpack.c.b16 %v3615_v37, %v3614_v62  ;;  %v3506_v25 = vpack.c.bf16 %v3373_v16, %v3373_v16  ;;  %v4012_v20 = vrot.slane %v4010_v27, 1  ;;  %v3634_v6 = vunpack.c.l.b16 %v3462_v28 }
 0x561   :  { %v10147_v39 = vpack.c.b16 %v3732_v13, %v3732_v13  ;;  %v3635_v8 = vunpack.c.l.b16 %v3463_v29  ;;  %v10152_v17 = vsel %vm731_vm2, %v3996_v3, %v4000_v60  ;;  %v4008_v37 = vor.u32 %v4007_v40, %v4003_v63  ;;  %v3346_v60 = vld [vmem:[#allocation3 + $0x148] sm:$0x3] }
 0x562   :  { %13461 = vst [vmem:[#allocation82_spill] sm:$0xff] %v10143_v34  ;;  %v3909_v32 = vshll.u32 %v10143_v34, 16  ;;  %v3742_v57 = vunpack.c.l.b16 %v3506_v25  ;;  %v3464_v27 = vpack.c.bf16 %v3374_v10, %v3374_v10  ;;  %v3465_v13 = vpack.c.bf16 %v3375_v9, %v3375_v9 }
 0x563   :  { %13462 = vst [vmem:[#allocation27_spill] sm:$0xff] %v10147_v39  ;;  %v3914_v62 = vshll.u32 %v10147_v39, 16  ;;  %v10156_v16 = vpack.c.b16 %v3635_v8, %v3634_v6  ;;  %v3907_v28 = vshrl.u32 %v10143_v34, 16  ;;  %v3507_v51 = vpack.c.bf16 %v3376_v52, %v3376_v52 }
 0x564   :  { %v3911_v29 = vrot.slane %v3909_v32, 1  ;;  %v10159_v19 = vpack.c.b16 %v3742_v57, %v3742_v57  ;;  %v3636_v25 = vunpack.c.l.b16 %v3464_v27  ;;  %v3637_v10 = vunpack.c.l.b16 %v3465_v13  ;;  %v3381_v13 = vld [vmem:[#allocation3 + $0x260] sm:$0xff] }
 0x565   :  { %v3916_v3 = vrot.slane %v3914_v62, 1  ;;  %v4027_v63 = vshrl.u32 %v10156_v16, 16  ;;  %v4029_v40 = vshll.u32 %v10156_v16, 16  ;;  %v3743_v9 = vunpack.c.l.b16 %v3507_v51  ;;  %4184 = vrot.lane.b32.xlu2 %v10136_v45, %s6588_s29 }
 0x566   :  { %v3912_v43 = vor.u32 %v3911_v29, %v3907_v28  ;;  %v4034_v6 = vshll.u32 %v10159_v19, 16  ;;  %v3448_v24 = vpack.c.bf16 %v3344_v4, %v3344_v4  ;;  %v3449_v32 = vpack.c.bf16 %v3345_v2, %v3345_v2  ;;  %4204 = vrot.lane.b32.xlu0 %v10152_v17, %s6588_s29 }
 0x567   :  { %v4031_v8 = vrot.slane %v4029_v40, 1  ;;  %v3499_v57 = vpack.c.bf16 %v3346_v60, %v3346_v60  ;;  %v10167_v52 = vsel %vm731_vm2, %v4008_v37, %v4012_v20  ;;  %v10172_v27 = vpack.c.b16 %v3637_v10, %v3636_v25  ;;  %v3382_v60 = vld [vmem:[#allocation3 + $0x268] sm:$0x3] }
 0x568   :  { %v10170_v62 = vsel %vm731_vm2, %v3912_v43, %v3916_v3  ;;  %v10174_v28 = vpack.c.b16 %v3743_v9, %v3743_v9  ;;  %4206 = vrot.lane.b32.xlu1 %v10167_v52, %s6588_s29  ;;  %v3620_v51 = vunpack.c.l.b16 %v3448_v24  ;;  %v3621_v4 = vunpack.c.l.b16 %v3449_v32  ;;  %v3383_v24 = vld [vmem:[#allocation3 + $0x270] sm:$0xff]  ;;  %v3384_v9 = vld [vmem:[#allocation3 + $0x278] sm:$0xff] }
 0x569   :  { %13463 = vst [vmem:[#allocation70_spill] sm:$0xff] %v10170_v62  ;;  %v4032_v2 = vor.u32 %v4031_v8, %v4027_v63  ;;  %v3735_v29 = vunpack.c.l.b16 %v3499_v57  ;;  %v4036_v20 = vrot.slane %v4034_v6, 1  ;;  %v4041_v43 = vshll.u32 %v10172_v27, 16 }
 0x56a   :  { %13464 = vst [vmem:[#allocation61_spill] sm:$0xff] %v10172_v27  ;;  %v4046_v37 = vshll.u32 %v10174_v28, 16  ;;  %v3468_v3 = vpack.c.bf16 %v3380_v11, %v3380_v11  ;;  %v4039_v40 = vshrl.u32 %v10172_v27, 16  ;;  %v10183_v25 = vpack.c.b16 %v3621_v4, %v3620_v51  ;;  %v3398_v27 = vld [vmem:[#allocation3 + $0x2e8] sm:$0xff] }
 0x56b   :  { %13465 = vst [vmem:[#allocation56_spill] sm:$0xff] %v10174_v28  ;;  %v10185_v10 = vpack.c.b16 %v3735_v29, %v3735_v29  ;;  %v3469_v63 = vpack.c.bf16 %v3381_v13, %v3381_v13  ;;  %v10188_v8 = vsel %vm731_vm2, %v4032_v2, %v4036_v20  ;;  %v4043_v32 = vrot.slane %v4041_v43, 1  ;;  %v3368_v20 = vld [vmem:[#allocation3 + $0x1f8] sm:$0xff] }
 0x56c   :  { %13466 = vst [vmem:[#allocation58_spill] sm:$0xff] %v10183_v25  ;;  %v3509_v57 = vpack.c.bf16 %v3382_v60, %v3382_v60  ;;  %v3640_v6 = vunpack.c.l.b16 %v3468_v3  ;;  %v4048_v26 = vrot.slane %v4046_v37, 1  ;;  %v3945_v39 = vshll.u32 %v10183_v25, 16  ;;  %v3369_v60 = vld [vmem:[#allocation3 + $0x200] sm:$0xff] }
 0x56d   :  { %13467 = vst [vmem:[#allocation75_spill] sm:$0xff] %v10185_v10  ;;  %v3950_v11 = vshll.u32 %v10185_v10, 16  ;;  %v3641_v34 = vunpack.c.l.b16 %v3469_v63  ;;  %v4044_v51 = vor.u32 %v4043_v32, %v4039_v40  ;;  %v3470_v29 = vpack.c.bf16 %v3383_v24, %v3383_v24  ;;  %4190 = vrot.lane.b32.xlu2 %v10170_v62, %s6588_s29  ;;  %v3370_v63 = vld [vmem:[#allocation3 + $0x208] sm:$0x3] }
 0x56e   :  { %v3745_v4 = vunpack.c.l.b16 %v3509_v57  ;;  %v3471_v35 = vpack.c.bf16 %v3384_v9, %v3384_v9  ;;  %v3943_v13 = vshrl.u32 %v10183_v25, 16  ;;  %v3947_v61 = vrot.slane %v3945_v39, 1  ;;  %4210 = vrot.lane.b32.xlu0 %v10188_v8, %s6588_s29 }
 0x56f   :  { %v10193_v0 = vpack.c.b16 %v3641_v34, %v3640_v6  ;;  %v3510_v2 = vpack.c.bf16 %v3385_v31, %v3385_v31  ;;  %v10198_v43 = vsel %vm731_vm2, %v4044_v51, %v4048_v26  ;;  %v3642_v3 = vunpack.c.l.b16 %v3470_v29 }
 0x570   :  { %v10200_v37 = vpack.c.b16 %v3745_v4, %v3745_v4  ;;  %v3643_v40 = vunpack.c.l.b16 %v3471_v35  ;;  %4212 = vrot.lane.b32.xlu1 %v10198_v43, %s6588_s29  ;;  %v3948_v39 = vor.u32 %v3947_v61, %v3943_v13  ;;  %v3952_v34 = vrot.slane %v3950_v11, 1  ;;  %v3389_v61 = vld [vmem:[#allocation3 + $0x2a0] sm:$0xff]  ;;  %v3390_v11 = vld [vmem:[#allocation3 + $0x2a8] sm:$0xff] }
 0x571   :  { %13468 = vst [vmem:[#allocation60_spill] sm:$0xff] %v10193_v0  ;;  %v4065_v31 = vshll.u32 %v10193_v0, 16  ;;  %v3746_v24 = vunpack.c.l.b16 %v3510_v2  ;;  %v3460_v32 = vpack.c.bf16 %v3368_v20, %v3368_v20  ;;  %v3461_v57 = vpack.c.bf16 %v3369_v60, %v3369_v60 }
 0x572   :  { %13469 = vst [vmem:[#allocation63_spill] sm:$0xff] %v10200_v37  ;;  %v4070_v9 = vshll.u32 %v10200_v37, 16  ;;  %v10208_v26 = vpack.c.b16 %v3643_v40, %v3642_v3  ;;  %v4063_v35 = vshrl.u32 %v10193_v0, 16  ;;  %v3505_v4 = vpack.c.bf16 %v3370_v63, %v3370_v63  ;;  %v3391_v40 = vld [vmem:[#allocation3 + $0x2b0] sm:$0x3]  ;;  %v3392_v0 = vld [vmem:[#allocation3 + $0x2b8] sm:$0xff] }
 0x573   :  { %v4067_v6 = vrot.slane %v4065_v31, 1  ;;  %v10211_v51 = vpack.c.b16 %v3746_v24, %v3746_v24  ;;  %v10214_v29 = vsel %vm731_vm2, %v3948_v39, %v3952_v34  ;;  %v3632_v10 = vunpack.c.l.b16 %v3460_v32  ;;  %v3393_v32 = vld [vmem:[#allocation3 + $0x2c0] sm:$0xff] }
 0x574   :  { %13470 = vst [vmem:[#allocation62_spill] sm:$0xff] %v10208_v26  ;;  %v4072_v13 = vrot.slane %v4070_v9, 1  ;;  %v4077_v2 = vshll.u32 %v10208_v26, 16  ;;  %v3633_v20 = vunpack.c.l.b16 %v3461_v57  ;;  %v3741_v60 = vunpack.c.l.b16 %v3505_v4 }
 0x575   :  { %13471 = vst [vmem:[#allocation65_spill] sm:$0xff] %v10211_v51  ;;  %v4068_v25 = vor.u32 %v4067_v6, %v4063_v35  ;;  %v4082_v3 = vshll.u32 %v10211_v51, 16  ;;  %v4075_v31 = vshrl.u32 %v10208_v26, 16  ;;  %v3474_v37 = vpack.c.bf16 %v3389_v61, %v3389_v61  ;;  %4196 = vrot.lane.b32.xlu2 %v10214_v29, %s6588_s29 }
 0x576   :  { %13472 = vst [vmem:[#allocation83_spill] sm:$0xff] %v10214_v29  ;;  %v4079_v24 = vrot.slane %v4077_v2, 1  ;;  %v3475_v63 = vpack.c.bf16 %v3390_v11, %v3390_v11  ;;  %v10222_v34 = vpack.c.b16 %v3633_v20, %v3632_v10  ;;  %v10224_v9 = vpack.c.b16 %v3741_v60, %v3741_v60  ;;  %v3394_v2 = vld [vmem:[#allocation3 + $0x2c8] sm:$0x3] }
 0x577   :  { %v10220_v62 = vsel %vm731_vm2, %v4068_v25, %v4072_v13  ;;  %v4084_v39 = vrot.slane %v4082_v3, 1  ;;  %v3512_v35 = vpack.c.bf16 %v3391_v40, %v3391_v40  ;;  %v3646_v6 = vunpack.c.l.b16 %v3474_v37  ;;  %v3377_v37 = vld [vmem:[#allocation3 + $0x240] sm:$0xff]  ;;  %v3378_v40 = vld [vmem:[#allocation3 + $0x248] sm:$0xff] }
 0x578   :  { %13473 = vst [vmem:[#allocation5_spill] sm:$0xff] %v10220_v62  ;;  %v4080_v57 = vor.u32 %v4079_v24, %v4075_v31  ;;  %v3647_v4 = vunpack.c.l.b16 %v3475_v63  ;;  %v4015_v61 = vshrl.u32 %v10222_v34, 16  ;;  %v4017_v11 = vshll.u32 %v10222_v34, 16  ;;  %4216 = vrot.lane.b32.xlu0 %v10220_v62, %s6588_s29 }
 0x579   :  { %v4022_v25 = vshll.u32 %v10224_v9, 16  ;;  %v3476_v13 = vpack.c.bf16 %v3392_v0, %v3392_v0  ;;  %v3748_v20 = vunpack.c.l.b16 %v3512_v35  ;;  %v3477_v60 = vpack.c.bf16 %v3393_v32, %v3393_v32  ;;  %v3379_v0 = vld [vmem:[#allocation3 + $0x250] sm:$0x3] }
 0x57a   :  { %v10234_v10 = vsel %vm731_vm2, %v4080_v57, %v4084_v39  ;;  %v10236_v3 = vpack.c.b16 %v3647_v4, %v3646_v6  ;;  %v4019_v31 = vrot.slane %v4017_v11, 1  ;;  %v3513_v63 = vpack.c.bf16 %v3394_v2, %v3394_v2 }
 0x57b   :  { %13474 = vst [vmem:[#allocation6_spill] sm:$0xff] %v10234_v10  ;;  %4218 = vrot.lane.b32.xlu1 %v10234_v10, %s6588_s29  ;;  %v4024_v24 = vrot.slane %v4022_v25, 1  ;;  %v3648_v29 = vunpack.c.l.b16 %v3476_v13  ;;  %v10240_v51 = vpack.c.b16 %v3748_v20, %v3748_v20  ;;  %v3649_v57 = vunpack.c.l.b16 %v3477_v60 }
 0x57c   :  { %13475 = vst [vmem:[#allocation80_spill] sm:$0xff] %v10236_v3  ;;  %v4099_v26 = vshrl.u32 %v10236_v3, 16  ;;  %v4101_v39 = vshll.u32 %v10236_v3, 16  ;;  %v4020_v6 = vor.u32 %v4019_v31, %v4015_v61  ;;  %v3749_v35 = vunpack.c.l.b16 %v3513_v63  ;;  %v3399_v3 = vld [vmem:[#allocation3 + $0x2f0] sm:$0xff]  ;;  %v3400_v63 = vld [vmem:[#allocation3 + $0x2f8] sm:$0x3] }
 0x57d   :  { %13476 = vst [vmem:[#allocation4_spill] sm:$0xff] %v10240_v51  ;;  %v3466_v32 = vpack.c.bf16 %v3377_v37, %v3377_v37  ;;  %v3467_v4 = vpack.c.bf16 %v3378_v40, %v3378_v40  ;;  %v4106_v28 = vshll.u32 %v10240_v51, 16  ;;  %v10245_v10 = vpack.c.b16 %v3649_v57, %v3648_v29 }
 0x57e   :  { %v4103_v62 = vrot.slane %v4101_v39, 1  ;;  %v3508_v11 = vpack.c.bf16 %v3379_v0, %v3379_v0  ;;  %v10248_v2 = vsel %vm731_vm2, %v4020_v6, %v4024_v24  ;;  %v10250_v25 = vpack.c.b16 %v3749_v35, %v3749_v35  ;;  %v10259_v0 = vpop.permute.xlu2 %4202 }
 0x57f   :  { %13477 = vst [vmem:[#allocation71_spill] sm:$0xff] %v10245_v10  ;;  %v3638_v13 = vunpack.c.l.b16 %v3466_v32  ;;  %v3639_v20 = vunpack.c.l.b16 %v3467_v4  ;;  %4208 = vrot.lane.b32.xlu2 %v10248_v2, %s6588_s29  ;;  %v4108_v60 = vrot.slane %v4106_v28, 1  ;;  %v4113_v37 = vshll.u32 %v10245_v10, 16  ;;  %v3387_v28 = vld [vmem:[#allocation3 + $0x290] sm:$0xff] }
 0x580   :  { %13478 = vst [vmem:[#allocation22_spill] sm:$0xff] %v10250_v25  ;;  %v4104_v61 = vor.u32 %v4103_v62, %v4099_v26  ;;  %v4111_v29 = vshrl.u32 %v10245_v10, 16  ;;  %v4118_v40 = vshll.u32 %v10250_v25, 16  ;;  %v3744_v24 = vunpack.c.l.b16 %v3508_v11  ;;  %v3386_v62 = vld [vmem:[#allocation3 + $0x288] sm:$0xff]  ;;  %v3388_v11 = vld [vmem:[#allocation3 + $0x298] sm:$0x3] }
 0x581   :  { %v10257_v31 = vpack.c.b16 %v3639_v20, %v3638_v13  ;;  %13480 = vst [vmem:[#allocation76_spill] sm:$0xff] %v10259_v0  ;;  %v4115_v57 = vrot.slane %v4113_v37, 1  ;;  %v3480_v6 = vpack.c.bf16 %v3398_v27, %v3398_v27  ;;  %v3481_v35 = vpack.c.bf16 %v3399_v3, %v3399_v3  ;;  %v3395_v10 = vld [vmem:[#allocation3 + $0x2d0] sm:$0xff]  ;;  %v3396_v0 = vld [vmem:[#allocation3 + $0x2d8] sm:$0xff] }
 0x582   :  { %v10262_v39 = vsel %vm731_vm2, %v4104_v61, %v4108_v60  ;;  %v4120_v26 = vrot.slane %v4118_v40, 1  ;;  %v10266_v32 = vpack.c.b16 %v3744_v24, %v3744_v24  ;;  %v3515_v25 = vpack.c.bf16 %v3400_v63, %v3400_v63 }
 0x583   :  { %13479 = vst [vmem:[#allocation84_spill] sm:$0xff] %v10257_v31  ;;  %4222 = vrot.lane.b32.xlu0 %v10262_v39, %s6588_s29  ;;  %v4051_v4 = vshrl.u32 %v10257_v31, 16  ;;  %v4116_v13 = vor.u32 %v4115_v57, %v4111_v29  ;;  %v4053_v20 = vshll.u32 %v10257_v31, 16  ;;  %v3652_v61 = vunpack.c.l.b16 %v3480_v6 }
 0x584   :  { %13481 = vst [vmem:[#allocation72_spill] sm:$0xff] %v10262_v39  ;;  %v4058_v60 = vshll.u32 %v10266_v32, 16  ;;  %v3653_v27 = vunpack.c.l.b16 %v3481_v35  ;;  %v3472_v3 = vpack.c.bf16 %v3386_v62, %v3386_v62  ;;  %v3473_v37 = vpack.c.bf16 %v3387_v28, %v3387_v28 }
 0x585   :  { %13482 = vst [vmem:[#allocation77_spill] sm:$0xff] %v10266_v32  ;;  %v10272_v51 = vsel %vm731_vm2, %v4116_v13, %v4120_v26  ;;  %v4055_v40 = vrot.slane %v4053_v20, 1  ;;  %v3751_v24 = vunpack.c.l.b16 %v3515_v25  ;;  %v3511_v39 = vpack.c.bf16 %v3388_v11, %v3388_v11  ;;  %v3397_v32 = vld [vmem:[#allocation3 + $0x2e0] sm:$0x3]  ;;  %v10280_v26 = vpop.permute.xlu1 %4170 }
 0x586   :  { %13483 = vst [vmem:[#allocation7_spill] sm:$0xff] %v10272_v51  ;;  %4224 = vrot.lane.b32.xlu1 %v10272_v51, %s6588_s29  ;;  %v4060_v29 = vrot.slane %v4058_v60, 1  ;;  %v10276_v57 = vpack.c.b16 %v3653_v27, %v3652_v61  ;;  %v3644_v63 = vunpack.c.l.b16 %v3472_v3  ;;  %v3645_v6 = vunpack.c.l.b16 %v3473_v37  ;;  %v10288_v61 = vpop.permute.xlu2 %4404 }
 0x587   :  { %v4056_v35 = vor.u32 %v4055_v40, %v4051_v4  ;;  %v10278_v62 = vpack.c.b16 %v3751_v24, %v3751_v24  ;;  %v3747_v28 = vunpack.c.l.b16 %v3511_v39  ;;  %v3478_v31 = vpack.c.bf16 %v3395_v10, %v3395_v10 }
 0x588   :  { %13484 = vst [vmem:[#allocation15_spill] sm:$0xff] %v10276_v57  ;;  %v4137_v25 = vshll.u32 %v10276_v57, 16  ;;  %v10283_v11 = vpack.c.b16 %v3645_v6, %v3644_v63  ;;  %v3479_v13 = vpack.c.bf16 %v3396_v0, %v3396_v0  ;;  %v3514_v4 = vpack.c.bf16 %v3397_v32, %v3397_v32 }
 0x589   :  { %13485 = vst [vmem:[#allocation38_spill] sm:$0xff] %v10278_v62  ;;  %v10286_v20 = vsel %vm731_vm2, %v4056_v35, %v4060_v29  ;;  %v4142_v60 = vshll.u32 %v10278_v62, 16  ;;  %v10291_v27 = vpack.c.b16 %v3747_v28, %v3747_v28  ;;  %v4135_v10 = vshrl.u32 %v10276_v57, 16 }
 0x58a   :  { %4214 = vrot.lane.b32.xlu2 %v10286_v20, %s6588_s29  ;;  %v4139_v39 = vrot.slane %v4137_v25, 1  ;;  %v4089_v3 = vshll.u32 %v10283_v11, 16  ;;  %v4087_v0 = vshrl.u32 %v10283_v11, 16  ;;  %v3650_v40 = vunpack.c.l.b16 %v3478_v31 }
 0x58b   :  { %v4094_v37 = vshll.u32 %v10291_v27, 16  ;;  %v3651_v24 = vunpack.c.l.b16 %v3479_v13  ;;  %v4144_v63 = vrot.slane %v4142_v60, 1  ;;  %v3750_v35 = vunpack.c.l.b16 %v3514_v4 }
 0x58c   :  { %v4140_v29 = vor.u32 %v4139_v39, %v4135_v10  ;;  %v4091_v6 = vrot.slane %v4089_v3, 1 }
 0x58d   :  { %v10299_v28 = vpack.c.b16 %v3651_v24, %v3650_v40  ;;  %v4096_v62 = vrot.slane %v4094_v37, 1  ;;  %v10308_v57 = vpack.c.b16 %v3750_v35, %v3750_v35  ;;  %v10316_v10 = vpop.permute.xlu1 %4330 }
 0x58e   :  { %v10302_v32 = vsel %vm731_vm2, %v4140_v29, %v4144_v63  ;;  %4500 = vrot.lane.b32.xlu1 %v9930_v33, %s6594_s7  ;;  %v4092_v25 = vor.u32 %v4091_v6, %v4087_v0  ;;  %v10314_v60 = vpop.permute.xlu2 %4642 }
 0x58f   :  { %13486 = vst [vmem:[#allocation39_spill] sm:$0xff] %v10299_v28  ;;  %4228 = vrot.lane.b32.xlu0 %v10302_v32, %s6588_s29  ;;  %v4125_v31 = vshll.u32 %v10299_v28, 16  ;;  %v4123_v39 = vshrl.u32 %v10299_v28, 16  ;;  %v4130_v3 = vshll.u32 %v10308_v57, 16  ;;  %v4286_v28 = vrot.slane %v10124_v44, 1 }
 0x590   :  { %13487 = vst [vmem:[#allocation10_spill] sm:$0xff] %v10302_v32  ;;  %v10312_v13 = vsel %vm731_vm2, %v4092_v25, %v4096_v62  ;;  %v4246_v25 = vrot.slane %v10066_v56, 1  ;;  %v4283_v32 = vrot.slane %v9832_v41, 1  ;;  %v4285_v41 = vrot.slane %v10122_v1, 1 }
 0x591   :  { %13488 = vst [vmem:[#allocation31_spill] sm:$0xff] %v10308_v57  ;;  %v4127_v4 = vrot.slane %v4125_v31, 1  ;;  %v4132_v62 = vrot.slane %v4130_v3, 1  ;;  %v4250_v3 = vrot.slane %v9938_v23, 1 }
 0x592   :  { %4220 = vrot.lane.b32.xlu2 %v10312_v13, %s6588_s29 }
 0x593   :  { %v4128_v0 = vor.u32 %v4127_v4, %v4123_v39  ;;  %v4249_v39 = vrot.slane %v9922_v54, 1 }
 0x595   :  { %v10327_v37 = vsel %vm731_vm2, %v4128_v0, %v4132_v62  ;;  %v10377_v62 = vsel %vm1180_vm3, %v4249_v39, %v4250_v3 }
 0x596   :  { %4738 = vrot.lane.b32.xlu1 %v9946_v38, %s6599_s24  ;;  %13489 = vst [vmem:[#allocation12_spill] sm:$0xff] %v10327_v37  ;;  %v10329_v40 = vpop.permute.xlu2 %4332 }
 0x597   :  { %4498 = vrot.lane.b32.xlu0 %v10046_v36, %s6594_s7 }
 0x598   :  { %v10333_v24 = vpop.permute.xlu1 %4408  ;;  %v10335_v29 = vpop.permute.xlu0 %4406 }
 0x59a   :  { %4226 = vrot.lane.b32.xlu2 %v10327_v37, %s6588_s29 }
 0x59e   :  { %4646 = vrot.lane.b32.xlu1 %v10066_v56, %s6597_s22  ;;  %v10341_v36 = vpop.permute.xlu2 %4570 }
 0x59f   :  { %4736 = vrot.lane.b32.xlu0 %v9930_v33, %s6599_s24  ;;  %v4247_v33 = vrot.slane %v10068_v53, 1 }
 0x5a0   :  { %v10345_v63 = vpop.permute.xlu1 %4568  ;;  %v10347_v6 = vpop.permute.xlu0 %4644 }
 0x5a1   :  { %v4248_v4 = vsel %vm1180_vm3, %v4246_v25, %v4247_v33  ;;  %v4282_v33 = vrot.slane %v9822_v42, 1 }
 0x5a2   :  { %4502 = vrot.lane.b32.xlu2 %v9946_v38, %s6594_s7 }
 0x5a6   :  { %4336 = vrot.lane.b32.xlu1 %v9975_v47, %s6590_s30  ;;  %v10353_v35 = vpop.permute.xlu2 %4808 }
 0x5a7   :  { %4572 = vrot.lane.b32.xlu0 %v9975_v47, %s6596_s0 }
 0x5a8   :  { %v10359_v38 = vpop.permute.xlu1 %4806  ;;  %v10361_v31 = vpop.permute.xlu0 %4334 }
 0x5aa   :  { %4740 = vrot.lane.b32.xlu2 %v10100_v12, %s6599_s24 }
 0x5ae   :  { %4574 = vrot.lane.b32.xlu1 %v4248_v4, %s6596_s0 }
 0x5af   :  { %4810 = vrot.lane.b32.xlu0 %v4248_v4, %s6598_s23  ;;  %v10366_v47 = vpop.permute.xlu2 %4172 }
 0x5b0   :  { %v10372_v53 = vpop.permute.xlu1 %4176  ;;  %v10374_v0 = vpop.permute.xlu0 %4174 }
 0x5b2   :  { %4410 = vrot.lane.b32.xlu2 %v10066_v56, %s6591_s4 }
 0x5b6   :  { %4812 = vrot.lane.b32.xlu1 %v10377_v62, %s6598_s23 }
 0x5b7   :  { %4504 = vrot.lane.b32.xlu0 %v10100_v12, %s6594_s7  ;;  %v10383_v25 = vpop.permute.xlu2 %4178  ;;  %v4284_v12 = vsel %vm1180_vm3, %v4282_v33, %v4283_v32 }
 0x5b8   :  { %v10387_v23 = vpop.permute.xlu1 %4182  ;;  %v10391_v37 = vpop.permute.xlu0 %4180 }
 0x5ba   :  { %4648 = vrot.lane.b32.xlu2 %v9922_v54, %s6597_s22 }
 0x5be   :  { %4530 = vrot.lane.b32.xlu1 %v10152_v17, %s6594_s7  ;;  %v4287_v17 = vsel %vm1180_vm3, %v4285_v41, %v4286_v28  ;;  %v4288_v28 = vrot.slane %v10131_v15, 1  ;;  %v4289_v41 = vrot.slane %v10133_v49, 1 }
 0x5bf   :  { %4742 = vrot.lane.b32.xlu0 %v9972_v7, %s6599_s24  ;;  %v10398_v39 = vpop.permute.xlu2 %4184 }
 0x5c0   :  { %v10401_v3 = vpop.permute.xlu1 %4188  ;;  %v10403_v57 = vpop.permute.xlu0 %4186 }
 0x5c1   :  { %13490 = vst [vmem:[#allocation30_spill] sm:$0xff] %v10401_v3 }
 0x5c2   :  { %4362 = vrot.lane.b32.xlu2 %v4284_v12, %s6590_s30  ;;  %13491 = vst [vmem:[#allocation36_spill] sm:$0xff] %v10403_v57 }
 0x5c6   :  { %4768 = vrot.lane.b32.xlu1 %v10167_v52, %s6599_s24 }
 0x5c7   :  { %4436 = vrot.lane.b32.xlu0 %v10122_v1, %s6591_s4  ;;  %v10412_v32 = vpop.permute.xlu2 %4190 }
 0x5c8   :  { %13492 = vst [vmem:[#allocation32_spill] sm:$0xff] %v10412_v32  ;;  %v10415_v33 = vpop.permute.xlu1 %4194  ;;  %v10417_v12 = vpop.permute.xlu0 %4192 }
 0x5c9   :  { %13493 = vst [vmem:[#allocation37_spill] sm:$0xff] %v10415_v33  ;;  %v10435_v33 = vsel %vm1180_vm3, %v4288_v28, %v4289_v41  ;;  %v4252_v28 = vrot.slane %v9959_v5, 1  ;;  %v4253_v41 = vrot.slane %v9964_v14, 1 }
 0x5ca   :  { %4600 = vrot.lane.b32.xlu2 %v4287_v17, %s6596_s0  ;;  %13494 = vst [vmem:[#allocation13_spill] sm:$0xff] %v10417_v12 }
 0x5cb   :  { %v10466_v57 = vsel %vm1180_vm3, %v4252_v28, %v4253_v41  ;;  %v6556_v28 = vld [vmem:[%s12861_s2 + $0x10] sm:$0xff] }
 0x5ce   :  { %4412 = vrot.lane.b32.xlu1 %v9922_v54, %s6591_s4 }
 0x5cf   :  { %4674 = vrot.lane.b32.xlu0 %v10131_v15, %s6597_s22  ;;  %v10423_v44 = vpop.permute.xlu2 %4196 }
 0x5d0   :  { %13495 = vst [vmem:[#allocation33_spill] sm:$0xff] %v10423_v44  ;;  %v10428_v32 = vpop.permute.xlu1 %4200  ;;  %v10430_v51 = vpop.permute.xlu0 %4198 }
 0x5d1   :  { %13496 = vst [vmem:[#allocation35_spill] sm:$0xff] %v10428_v32 }
 0x5d2   :  { %4338 = vrot.lane.b32.xlu2 %v4248_v4, %s6590_s30  ;;  %13497 = vst [vmem:[#allocation16_spill] sm:$0xff] %v10430_v51 }
 0x5d6   :  { %4650 = vrot.lane.b32.xlu1 %v9959_v5, %s6597_s22 }
 0x5d7   :  { %4838 = vrot.lane.b32.xlu0 %v10435_v33, %s6598_s23 }
 0x5d8   :  { %v10445_v49 = vpop.permute.xlu0 %4204 }
 0x5d9   :  { %v10441_v4 = vpop.permute.xlu2 %4208 }
 0x5da   :  { %4506 = vrot.lane.b32.xlu2 %v9972_v7, %s6594_s7  ;;  %v10443_v44 = vpop.permute.xlu1 %4206  ;;  %v3421_v7 = vld [vmem:[%s12861_s2 + $0x20] sm:$0xf] }
 0x5db   :  { %v5403_v51 = vunpack.c.l.b16 %v3421_v7  ;;  %v6557_v7 = vld [vmem:[%s12861_s2 + $0x18] sm:$0xff] }
 0x5dd   :  { %v5408_v3 = vpack.c.b16 %v5403_v51, %v5403_v51 }
 0x5de   :  { %4364 = vrot.lane.b32.xlu1 %v4287_v17, %s6590_s30 }
 0x5df   :  { %4576 = vrot.lane.b32.xlu0 %v10377_v62, %s6596_s0  ;;  %v5480_v14 = vsel %vm5478_vm5, %v5408_v3, 0 }
 0x5e0   :  { %v10457_v32 = vpop.permute.xlu0 %4210  ;;  %5485 = vmatpush.bf16.msra.mxu1 %v5480_v14  ;;  %6561 = vmatpush.bf16.msra.mxu2 %v5480_v14  ;;  %v6555_v14 = vld [vmem:[%s12861_s2 + $0x8] sm:$0xff] }
 0x5e2   :  { %4744 = vrot.lane.b32.xlu2 %v10017_v48, %s6599_s24  ;;  %v10461_v17 = vpop.permute.xlu1 %4212 }
 0x5e4   :  { %v10459_v12 = vpop.permute.xlu2 %4214  ;;  %5486 = vmatpush.bf16.msra.mxu1 %v6557_v7  ;;  %6562 = vmatpush.bf16.msra.mxu2 %v6557_v7 }
 0x5e5   :  { %13498 = vst [vmem:[#allocation45_spill] sm:$0xff] %v10459_v12 }
 0x5e6   :  { %4602 = vrot.lane.b32.xlu1 %v10435_v33, %s6596_s0 }
 0x5e7   :  { %4814 = vrot.lane.b32.xlu0 %v10466_v57, %s6598_s23 }
 0x5e8   :  { %5487 = vmatpush.bf16.msra.mxu1 %v6556_v28  ;;  %6563 = vmatpush.bf16.msra.mxu2 %v6556_v28 }
 0x5ea   :  { %4438 = vrot.lane.b32.xlu2 %v10131_v15, %s6591_s4  ;;  %v10480_v41 = vpop.permute.xlu0 %4216 }
 0x5eb   :  { %13500 = vst [vmem:[#allocation41_spill] sm:$0xff] %v10480_v41 }
 0x5ec   :  { %v10475_v51 = vpop.permute.xlu2 %4220  ;;  %5488 = vmatpush.bf16.msra.mxu1 %v6555_v14  ;;  %6564 = vmatpush.bf16.msra.mxu2 %v6555_v14 }
 0x5ed   :  { %13499 = vst [vmem:[#allocation40_spill] sm:$0xff] %v10475_v51  ;;  %v10484_v3 = vpop.permute.xlu1 %4218  ;;  %v4291_v51 = vrot.slane %v10222_v34, 1 }
 0x5ee   :  { %4340 = vrot.lane.b32.xlu1 %v10377_v62, %s6590_s30  ;;  %13501 = vst [vmem:[#allocation19_spill] sm:$0xff] %v10484_v3  ;;  %v6554_v62 = vld [vmem:[%s12861_s2] sm:$0xff] }
 0x5ef   :  { %4532 = vrot.lane.b32.xlu0 %v10167_v52, %s6594_s7  ;;  %v4292_v52 = vrot.slane %v10224_v9, 1 }
 0x5f0   :  { %5489 = vmatpush.bf16.msra.mxu1 %v6554_v62  ;;  %6565 = vmatpush.bf16.msra.mxu2 %v6554_v62 }
 0x5f2   :  { %4676 = vrot.lane.b32.xlu2 %v10222_v34, %s6597_s22 }
 0x5f4   :  { %v10493_v7 = vpop.permute.xlu2 %4226 }
 0x5f5   :  { %13502 = vst [vmem:[#allocation9_spill] sm:$0xff] %v10493_v7  ;;  %v10504_v28 = vpop.permute.xlu0 %4222  ;;  %v10509_v7 = vsel %vm1180_vm3, %v4291_v51, %v4292_v52  ;;  %v4871_v51 = vsel %vm1881_vm4, %v9526_v22, %v10280_v26  ;;  %v4255_v52 = vrot.slane %v10105_v30, 1 }
 0x5f6   :  { %4508 = vrot.lane.b32.xlu1 %v10017_v48, %s6594_s7  ;;  %13503 = vst [vmem:[#allocation28_spill] sm:$0xff] %v10504_v28  ;;  %v4935_v28 = vsel %vm2011_vm7, %v4871_v51, %v10316_v10 }
 0x5f7   :  { %4770 = vrot.lane.b32.xlu0 %v10248_v2, %s6599_s24  ;;  %v4999_v26 = vsel %vm2141_vm9, %v4935_v28, %v10288_v61  ;;  %v4294_v61 = vrot.slane %v10156_v16, 1 }
 0x5f8   :  { %v10506_v3 = vpop.permute.xlu1 %4224 }
 0x5f9   :  { %13504 = vst [vmem:[#allocation34_spill] sm:$0xff] %v10506_v3  ;;  %v4256_v3 = vrot.slane %v10107_v59, 1 }
 0x5fa   :  { %4840 = vrot.lane.b32.xlu2 %v10509_v7, %s6598_s23 }
 0x5fb   :  { %v10537_v41 = vsel %vm1180_vm3, %v4255_v52, %v4256_v3  ;;  %v4295_v52 = vrot.slane %v10159_v19, 1 }
 0x5fc   :  { %v10513_v14 = vpop.permute.xlu2 %4502 }
 0x5fd   :  { %v10568_v19 = vsel %vm1180_vm3, %v4294_v61, %v4295_v52 }
 0x5fe   :  { %4746 = vrot.lane.b32.xlu1 %v10136_v45, %s6599_s24 }
 0x5ff   :  { %4414 = vrot.lane.b32.xlu0 %v9959_v5, %s6591_s4 }
 0x600   :  { %v4501_v48 = vpop.permute.xlu1 %4500 }
 0x601   :  { %v10519_v9 = vpop.permute.xlu0 %4228 }
 0x602   :  { %13505 = vst [vmem:[#allocation14_spill] sm:$0xff] %v10519_v9  ;;  %4578 = vrot.lane.b32.xlu2 %v10466_v57, %s6596_s0 }
 0x604   :  { %v10526_v62 = vpop.permute.xlu2 %4740 }
 0x606   :  { %4440 = vrot.lane.b32.xlu1 %v10222_v34, %s6591_s4 }
 0x607   :  { %4652 = vrot.lane.b32.xlu0 %v10105_v30, %s6597_s22 }
 0x608   :  { %v4739_v9 = vpop.permute.xlu1 %4738 }
 0x609   :  { %v4499_v22 = vpop.permute.xlu0 %4498 }
 0x60a   :  { %4816 = vrot.lane.b32.xlu2 %v10537_v41, %s6598_s23  ;;  %v5063_v59 = vsel %vm2271_vm11, %v4999_v26, %v4499_v22 }
 0x60b   :  { %v5128_v10 = vsel %vm5126_vm6, %v5063_v59, %v10345_v63  ;;  %v4873_v63 = vsel %vm1881_vm4, %v9871_v55, %v10366_v47 }
 0x60c   :  { %v10544_v12 = vpop.permute.xlu2 %4410  ;;  %v5193_v28 = vsel %vm5191_vm8, %v5128_v10, %v10314_v60  ;;  %v4937_v60 = vsel %vm2011_vm7, %v4873_v63, %v10329_v40 }
 0x60d   :  { %v5001_v55 = vsel %vm2141_vm9, %v4937_v60, %v10335_v29  ;;  %v4877_v60 = vsel %vm1881_vm4, %v9861_v21, %v10372_v53 }
 0x60e   :  { %4678 = vrot.lane.b32.xlu1 %v10156_v16, %s6597_s22 }
 0x60f   :  { %4366 = vrot.lane.b32.xlu0 %v10435_v33, %s6590_s30 }
 0x610   :  { %v4647_v3 = vpop.permute.xlu1 %4646 }
 0x611   :  { %v4737_v51 = vpop.permute.xlu0 %4736 }
 0x612   :  { %4534 = vrot.lane.b32.xlu2 %v10248_v2, %s6594_s7  ;;  %v5258_v33 = vsel %vm5256_vm10, %v5193_v28, %v4737_v51  ;;  %v4258_v28 = vrot.slane %v9984_v58, 1  ;;  %v4259_v51 = vrot.slane %v9986_v50, 1 }
 0x613   :  { %v5323_v22 = vsel %vm5321_vm13, %v5258_v33, %v10359_v38  ;;  %v5065_v38 = vsel %vm2271_vm11, %v5001_v55, %v4501_v48 }
 0x614   :  { %v4649_v26 = vpop.permute.xlu2 %4648  ;;  %6520 = vmatmul.msk.bf16.vlgmr.msra.gmra.mxu1 %vm5413_vm12, %v5323_v22  ;;  %v5130_v40 = vsel %vm5126_vm6, %v5065_v38, %v10341_v36 }
 0x615   :  { %v5195_v10 = vsel %vm5191_vm8, %v5130_v40, %v10347_v6  ;;  %v4875_v6 = vsel %vm1881_vm4, %v9869_v46, %v10374_v0 }
 0x616   :  { %4842 = vrot.lane.b32.xlu1 %v10568_v19, %s6598_s23  ;;  %v5260_v29 = vsel %vm5256_vm10, %v5195_v10, %v4739_v9  ;;  %v4939_v50 = vsel %vm2011_vm7, %v4875_v6, %v10361_v31 }
 0x617   :  { %4604 = vrot.lane.b32.xlu0 %v10509_v7, %s6596_s0  ;;  %v5325_v36 = vsel %vm5321_vm13, %v5260_v29, %v10353_v35  ;;  %v5003_v46 = vsel %vm2141_vm9, %v4939_v50, %v10333_v24  ;;  %v13507_v29 = vld [vmem:[#allocation61_spill] sm:$0xff] }
 0x618   :  { %v4337_v2 = vpop.permute.xlu1 %4336  ;;  %v5067_v0 = vsel %vm2271_vm11, %v5003_v46, %v10513_v14  ;;  %v13509_v46 = vld [vmem:[#allocation64_spill] sm:$0xff] }
 0x619   :  { %v4573_v47 = vpop.permute.xlu0 %4572 }
 0x61a   :  { %4772 = vrot.lane.b32.xlu2 %v10188_v8, %s6599_s24  ;;  %v5132_v63 = vsel %vm5126_vm6, %v5067_v0, %v4573_v47 }
 0x61b   :  { %v5197_v31 = vsel %vm5191_vm8, %v5132_v63, %v4647_v3  ;;  %v4941_v3 = vsel %vm2011_vm7, %v4877_v60, %v4337_v2  ;;  %v13506_v2 = vld [vmem:[#allocation76_spill] sm:$0xff]  ;;  %v13510_v60 = vld [vmem:[#allocation29_spill] sm:$0xff] }
 0x61c   :  { %v4363_v59 = vpop.permute.xlu2 %4362  ;;  %v5262_v24 = vsel %vm5256_vm10, %v5197_v31, %v10526_v62  ;;  %v4903_v47 = vsel %vm1881_vm4, %v9822_v42, %v13506_v2  ;;  %v4297_v42 = vrot.slane %v13507_v29, 1 }
 0x61d   :  { %v4967_v40 = vsel %vm2011_vm7, %v4903_v47, %v4363_v59  ;;  %v13508_v59 = vld [vmem:[#allocation56_spill] sm:$0xff] }
 0x61e   :  { %4580 = vrot.lane.b32.xlu1 %v10537_v41, %s6596_s0 }
 0x61f   :  { %4342 = vrot.lane.b32.xlu0 %v10466_v57, %s6590_s30  ;;  %v10599_v57 = vsel %vm1180_vm3, %v4258_v28, %v4259_v51 }
 0x620   :  { %v4575_v48 = vpop.permute.xlu1 %4574 }
 0x621   :  { %v4811_v61 = vpop.permute.xlu0 %4810 }
 0x622   :  { %4416 = vrot.lane.b32.xlu2 %v10105_v30, %s6591_s4  ;;  %v5327_v14 = vsel %vm5321_vm13, %v5262_v24, %v4811_v61 }
 0x624   :  { %v4601_v52 = vpop.permute.xlu2 %4600  ;;  %6521 = vmatmul.msk.bf16.gmra.mxu1 %vm5413_vm12, %v5325_v36  ;;  %v4298_v36 = vrot.slane %v13508_v59, 1 }
 0x626   :  { %4818 = vrot.lane.b32.xlu1 %v10599_v57, %s6598_s23  ;;  %v10662_v0 = vsel %vm1180_vm3, %v4297_v42, %v4298_v36 }
 0x627   :  { %4510 = vrot.lane.b32.xlu0 %v10136_v45, %s6594_s7 }
 0x628   :  { %v4813_v35 = vpop.permute.xlu1 %4812 }
 0x629   :  { %v4505_v9 = vpop.permute.xlu0 %4504 }
 0x62a   :  { %4654 = vrot.lane.b32.xlu2 %v9984_v58, %s6597_s22 }
 0x62c   :  { %v4339_v33 = vpop.permute.xlu2 %4338 }
 0x62e   :  { %4536 = vrot.lane.b32.xlu1 %v10188_v8, %s6594_s7 }
 0x62f   :  { %4748 = vrot.lane.b32.xlu0 %v10041_v18, %s6599_s24 }
 0x630   :  { %v4531_v45 = vpop.permute.xlu1 %4530 }
 0x631   :  { %v4743_v22 = vpop.permute.xlu0 %4742 }
 0x632   :  { %4368 = vrot.lane.b32.xlu2 %v10509_v7, %s6590_s30  ;;  %v5005_v7 = vsel %vm2141_vm9, %v4941_v3, %v10544_v12 }
 0x633   :  { %v5069_v55 = vsel %vm2271_vm11, %v5005_v7, %v4505_v9  ;;  %v4261_v7 = vrot.slane %v13509_v46, 1 }
 0x634   :  { %v4507_v8 = vpop.permute.xlu2 %4506  ;;  %6522 = vmatmul.msk.bf16.gmra.mxu1 %vm5413_vm12, %v5327_v14  ;;  %v5134_v21 = vsel %vm5126_vm6, %v5069_v55, %v4575_v48 }
 0x635   :  { %v5199_v12 = vsel %vm5191_vm8, %v5134_v21, %v4649_v26 }
 0x636   :  { %4774 = vrot.lane.b32.xlu1 %v10198_v43, %s6599_s24  ;;  %v5264_v61 = vsel %vm5256_vm10, %v5199_v12, %v4743_v22 }
 0x637   :  { %4442 = vrot.lane.b32.xlu0 %v10156_v16, %s6591_s4  ;;  %v5329_v26 = vsel %vm5321_vm13, %v5264_v61, %v4813_v35  ;;  %v13512_v61 = vld [vmem:[#allocation84_spill] sm:$0xff] }
 0x638   :  { %v4769_v62 = vpop.permute.xlu1 %4768 }
 0x639   :  { %v4437_v38 = vpop.permute.xlu0 %4436 }
 0x63a   :  { %4606 = vrot.lane.b32.xlu2 %v10568_v19, %s6596_s0  ;;  %v5031_v10 = vsel %vm2141_vm9, %v4967_v40, %v4437_v38  ;;  %v4905_v40 = vsel %vm1881_vm4, %v10122_v1, %v10445_v49  ;;  %v4300_v1 = vrot.slane %v13512_v61, 1  ;;  %v13513_v49 = vld [vmem:[#allocation77_spill] sm:$0xff] }
 0x63b   :  { %v5095_v51 = vsel %vm2271_vm11, %v5031_v10, %v4531_v45  ;;  %v4879_v45 = vsel %vm1881_vm4, %v10066_v56, %v10383_v25  ;;  %v13511_v56 = vld [vmem:[#allocation11_spill] sm:$0xff]  ;;  %v4301_v42 = vrot.slane %v13513_v49, 1 }
 0x63c   :  { %v4745_v53 = vpop.permute.xlu2 %4744  ;;  %v5160_v50 = vsel %vm5126_vm6, %v5095_v51, %v4601_v52  ;;  %v4943_v22 = vsel %vm2011_vm7, %v4879_v45, %v4339_v33  ;;  %v4262_v25 = vrot.slane %v13511_v56, 1 }
 0x63d   :  { %v10719_v59 = vsel %vm1180_vm3, %v4300_v1, %v4301_v42 }
 0x63e   :  { %4418 = vrot.lane.b32.xlu1 %v9984_v58, %s6591_s4  ;;  %v10690_v55 = vsel %vm1180_vm3, %v4261_v7, %v4262_v25 }
 0x63f   :  { %4680 = vrot.lane.b32.xlu0 %v13507_v29, %s6597_s22 }
 0x640   :  { %v4413_v48 = vpop.permute.xlu1 %4412 }
 0x641   :  { %v4675_v28 = vpop.permute.xlu0 %4674  ;;  %v5007_v24 = vsel %vm2141_vm9, %v4943_v22, %v4413_v48 }
 0x642   :  { %4344 = vrot.lane.b32.xlu2 %v10537_v41, %s6590_s30  ;;  %v5225_v9 = vsel %vm5191_vm8, %v5160_v50, %v4675_v28  ;;  %v5071_v3 = vsel %vm2271_vm11, %v5007_v24, %v4507_v8  ;;  %v13515_v24 = vld [vmem:[#allocation82_spill] sm:$0xff] }
 0x643   :  { %v5290_v35 = vsel %vm5256_vm10, %v5225_v9, %v4769_v62 }
 0x644   :  { %v4439_v6 = vpop.permute.xlu2 %4438  ;;  %6523 = vmatmul.msk.bf16.gmra.mxu1 %vm5413_vm12, %v5329_v26 }
 0x646   :  { %4656 = vrot.lane.b32.xlu1 %v13509_v46, %s6597_s22 }
 0x647   :  { %4844 = vrot.lane.b32.xlu0 %v10662_v0, %s6598_s23 }
 0x648   :  { %v4651_v41 = vpop.permute.xlu1 %4650 }
 0x649   :  { %v4839_v63 = vpop.permute.xlu0 %4838 }
 0x64a   :  { %4512 = vrot.lane.b32.xlu2 %v10041_v18, %s6594_s7  ;;  %v5355_v52 = vsel %vm5321_vm13, %v5290_v35, %v4839_v63  ;;  %v4881_v35 = vsel %vm1881_vm4, %v9922_v54, %v10391_v37 }
 0x64b   :  { %6536 = vmatmul.msk.bf16.vlgmr.msra.gmra.mxu2 %vm5413_vm12, %v5355_v52 }
 0x64c   :  { %v4677_v31 = vpop.permute.xlu2 %4676 }
 0x64e   :  { %4370 = vrot.lane.b32.xlu1 %v10568_v19, %s6590_s30 }
 0x64f   :  { %4582 = vrot.lane.b32.xlu0 %v10599_v57, %s6596_s0 }
 0x650   :  { %v4365_v18 = vpop.permute.xlu1 %4364 }
 0x651   :  { %v4577_v14 = vpop.permute.xlu0 %4576  ;;  %v4969_v12 = vsel %vm2011_vm7, %v4905_v40, %v4365_v18  ;;  %v4264_v18 = vrot.slane %v13515_v24, 1 }
 0x652   :  { %4750 = vrot.lane.b32.xlu2 %v13510_v60, %s6599_s24  ;;  %v5136_v33 = vsel %vm5126_vm6, %v5071_v3, %v4577_v14  ;;  %v5033_v48 = vsel %vm2141_vm9, %v4969_v12, %v4439_v6  ;;  %v13516_v14 = vld [vmem:[#allocation27_spill] sm:$0xff]  ;;  %v4907_v12 = vsel %vm1881_vm4, %v10131_v15, %v10443_v44 }
 0x653   :  { %v5201_v19 = vsel %vm5191_vm8, %v5136_v33, %v4651_v41  ;;  %v13514_v41 = vld [vmem:[#allocation70_spill] sm:$0xff] }
 0x654   :  { %v4841_v62 = vpop.permute.xlu2 %4840  ;;  %v5266_v21 = vsel %vm5256_vm10, %v5201_v19, %v4745_v53 }
 0x656   :  { %4608 = vrot.lane.b32.xlu1 %v10662_v0, %s6596_s0 }
 0x657   :  { %4820 = vrot.lane.b32.xlu0 %v10690_v55, %s6598_s23 }
 0x658   :  { %v4603_v38 = vpop.permute.xlu1 %4602 }
 0x659   :  { %v4815_v8 = vpop.permute.xlu0 %4814 }
 0x65a   :  { %4444 = vrot.lane.b32.xlu2 %v13507_v29, %s6591_s4  ;;  %v5331_v2 = vsel %vm5321_vm13, %v5266_v21, %v4815_v8 }
 0x65b   :  { %6524 = vmatmul.msk.bf16.gmra.mxu1 %vm5413_vm12, %v5331_v2 }
 0x65c   :  { %v4579_v47 = vpop.permute.xlu2 %4578 }
 0x65e   :  { %4346 = vrot.lane.b32.xlu1 %v10599_v57, %s6590_s30 }
 0x65f   :  { %4538 = vrot.lane.b32.xlu0 %v10198_v43, %s6594_s7 }
 0x660   :  { %v4341_v53 = vpop.permute.xlu1 %4340 }
 0x661   :  { %v4533_v10 = vpop.permute.xlu0 %4532 }
 0x662   :  { %4682 = vrot.lane.b32.xlu2 %v13512_v61, %s6597_s22  ;;  %v5097_v28 = vsel %vm2271_vm11, %v5033_v48, %v4533_v10 }
 0x663   :  { %v5162_v57 = vsel %vm5126_vm6, %v5097_v28, %v4603_v38  ;;  %v13517_v38 = vld [vmem:[#allocation60_spill] sm:$0xff] }
 0x664   :  { %v4817_v51 = vpop.permute.xlu2 %4816  ;;  %v5227_v26 = vsel %vm5191_vm8, %v5162_v57, %v4677_v31  ;;  %v4945_v31 = vsel %vm2011_vm7, %v4881_v35, %v4341_v53  ;;  %v4303_v2 = vrot.slane %v13517_v38, 1 }
 0x666   :  { %4514 = vrot.lane.b32.xlu1 %v13510_v60, %s6594_s7  ;;  %v4265_v60 = vrot.slane %v13516_v14, 1 }
 0x667   :  { %4776 = vrot.lane.b32.xlu0 %v10286_v20, %s6599_s24 }
 0x668   :  { %v4509_v43 = vpop.permute.xlu1 %4508  ;;  %v10746_v37 = vsel %vm1180_vm3, %v4264_v18, %v4265_v60 }
 0x669   :  { %v4771_v36 = vpop.permute.xlu0 %4770 }
 0x66a   :  { %4846 = vrot.lane.b32.xlu2 %v10719_v59, %s6598_s23  ;;  %v5292_v6 = vsel %vm5256_vm10, %v5227_v26, %v4771_v36  ;;  %v13520_v26 = vld [vmem:[#allocation53_spill] sm:$0xff] }
 0x66b   :  { %v5357_v50 = vsel %vm5321_vm13, %v5292_v6, %v4841_v62  ;;  %v4267_v6 = vrot.slane %v13520_v26, 1 }
 0x66c   :  { %v4535_v9 = vpop.permute.xlu2 %4534  ;;  %6537 = vmatmul.msk.bf16.gmra.mxu2 %vm5413_vm12, %v5357_v50  ;;  %v13521_v50 = vld [vmem:[#allocation59_spill] sm:$0xff] }
 0x66e   :  { %4752 = vrot.lane.b32.xlu1 %v13514_v41, %s6599_s24 }
 0x66f   :  { %4420 = vrot.lane.b32.xlu0 %v13509_v46, %s6591_s4 }
 0x670   :  { %v4747_v63 = vpop.permute.xlu1 %4746 }
 0x671   :  { %v4415_v52 = vpop.permute.xlu0 %4414 }
 0x672   :  { %4584 = vrot.lane.b32.xlu2 %v10690_v55, %s6596_s0  ;;  %v5009_v45 = vsel %vm2141_vm9, %v4945_v31, %v4415_v52  ;;  %v4883_v52 = vsel %vm1881_vm4, %v9959_v5, %v10387_v23  ;;  %v13522_v23 = vld [vmem:[#allocation79_spill] sm:$0xff] }
 0x673   :  { %v5073_v3 = vsel %vm2271_vm11, %v5009_v45, %v4509_v43 }
 0x674   :  { %v4773_v22 = vpop.permute.xlu2 %4772  ;;  %v5138_v56 = vsel %vm5126_vm6, %v5073_v3, %v4579_v47  ;;  %v13518_v47 = vld [vmem:[#allocation63_spill] sm:$0xff] }
 0x675   :  { %v4304_v40 = vrot.slane %v13518_v47, 1 }
 0x676   :  { %4446 = vrot.lane.b32.xlu1 %v13512_v61, %s6591_s4 }
 0x677   :  { %4658 = vrot.lane.b32.xlu0 %v13515_v24, %s6597_s22  ;;  %v10768_v48 = vsel %vm1180_vm3, %v4303_v2, %v4304_v40  ;;  %v13524_v2 = vld [vmem:[#allocation62_spill] sm:$0xff] }
 0x678   :  { %v4441_v54 = vpop.permute.xlu1 %4440 }
 0x679   :  { %v4653_v7 = vpop.permute.xlu0 %4652 }
 0x67a   :  { %4822 = vrot.lane.b32.xlu2 %v10746_v37, %s6598_s23  ;;  %v5203_v25 = vsel %vm5191_vm8, %v5138_v56, %v4653_v7 }
 0x67b   :  { %v5268_v33 = vsel %vm5256_vm10, %v5203_v25, %v4747_v63  ;;  %v13523_v25 = vld [vmem:[#allocation6_spill] sm:$0xff] }
 0x67c   :  { %v4417_v62 = vpop.permute.xlu2 %4416  ;;  %v5333_v19 = vsel %vm5321_vm13, %v5268_v33, %v4817_v51 }
 0x67d   :  { %6525 = vmatmul.msk.bf16.gmra.mxu1 %vm5413_vm12, %v5333_v19 }
 0x67e   :  { %4684 = vrot.lane.b32.xlu1 %v13517_v38, %s6597_s22 }
 0x67f   :  { %4372 = vrot.lane.b32.xlu0 %v10662_v0, %s6590_s30 }
 0x680   :  { %v4679_v8 = vpop.permute.xlu1 %4678 }
 0x681   :  { %v4367_v21 = vpop.permute.xlu0 %4366 }
 0x682   :  { %4540 = vrot.lane.b32.xlu2 %v10286_v20, %s6594_s7  ;;  %v4971_v53 = vsel %vm2011_vm7, %v4907_v12, %v4367_v21  ;;  %v13519_v20 = vld [vmem:[#allocation5_spill] sm:$0xff] }
 0x683   :  { %v5035_v0 = vsel %vm2141_vm9, %v4971_v53, %v4441_v54  ;;  %v4306_v53 = vrot.slane %v13524_v2, 1 }
 0x684   :  { %v4655_v10 = vpop.permute.xlu2 %4654  ;;  %v5099_v15 = vsel %vm2271_vm11, %v5035_v0, %v4535_v9  ;;  %v4268_v9 = vrot.slane %v13521_v50, 1  ;;  %v13527_v50 = vld [vmem:[#allocation74_spill] sm:$0xff] }
 0x686   :  { %4848 = vrot.lane.b32.xlu1 %v10768_v48, %s6598_s23  ;;  %v10792_v35 = vsel %vm1180_vm3, %v4267_v6, %v4268_v9 }
 0x687   :  { %4610 = vrot.lane.b32.xlu0 %v10719_v59, %s6596_s0 }
 0x688   :  { %v4843_v28 = vpop.permute.xlu1 %4842 }
 0x689   :  { %v4605_v51 = vpop.permute.xlu0 %4604 }
 0x68a   :  { %4778 = vrot.lane.b32.xlu2 %v13519_v20, %s6599_s24  ;;  %v5164_v44 = vsel %vm5126_vm6, %v5099_v15, %v4605_v51  ;;  %v13526_v51 = vld [vmem:[#allocation55_spill] sm:$0xff] }
 0x68b   :  { %v5229_v1 = vsel %vm5191_vm8, %v5164_v44, %v4679_v8 }
 0x68c   :  { %v4369_v49 = vpop.permute.xlu2 %4368  ;;  %v5294_v42 = vsel %vm5256_vm10, %v5229_v1, %v4773_v22 }
 0x68d   :  { %v5359_v57 = vsel %vm5321_vm13, %v5294_v42, %v4843_v28  ;;  %v4885_v42 = vsel %vm1881_vm4, %v10105_v30, %v10398_v39  ;;  %v13528_v30 = vld [vmem:[#allocation26_spill] sm:$0xff] }
 0x68e   :  { %6538 = vmatmul.msk.bf16.gmra.mxu2 %vm5413_vm12, %v5359_v57  ;;  %4586 = vrot.lane.b32.xlu1 %v10746_v37, %s6596_s0  ;;  %v4271_v39 = vrot.slane %v13528_v30, 1 }
 0x68f   :  { %4348 = vrot.lane.b32.xlu0 %v10690_v55, %s6590_s30 }
 0x690   :  { %v4581_v43 = vpop.permute.xlu1 %4580 }
 0x691   :  { %v4343_v36 = vpop.permute.xlu0 %4342 }
 0x692   :  { %4422 = vrot.lane.b32.xlu2 %v13515_v24, %s6591_s4  ;;  %v4947_v55 = vsel %vm2011_vm7, %v4883_v52, %v4343_v36 }
 0x693   :  { %v5011_v22 = vsel %vm2141_vm9, %v4947_v55, %v4417_v62 }
 0x694   :  { %v4607_v63 = vpop.permute.xlu2 %4606 }
 0x696   :  { %4824 = vrot.lane.b32.xlu1 %v10792_v35, %s6598_s23 }
 0x697   :  { %4516 = vrot.lane.b32.xlu0 %v13514_v41, %s6594_s7 }
 0x698   :  { %v4819_v31 = vpop.permute.xlu1 %4818 }
 0x699   :  { %v4511_v45 = vpop.permute.xlu0 %4510 }
 0x69a   :  { %4660 = vrot.lane.b32.xlu2 %v13520_v26, %s6597_s22  ;;  %v5075_v18 = vsel %vm2271_vm11, %v5011_v22, %v4511_v45 }
 0x69b   :  { %v5140_v5 = vsel %vm5126_vm6, %v5075_v18, %v4581_v43 }
 0x69c   :  { %v4345_v14 = vpop.permute.xlu2 %4344  ;;  %v5205_v3 = vsel %vm5191_vm8, %v5140_v5, %v4655_v10 }
 0x69d   :  { %v4949_v57 = vsel %vm2011_vm7, %v4885_v42, %v4345_v14 }
 0x69e   :  { %4542 = vrot.lane.b32.xlu1 %v13519_v20, %s6594_s7 }
 0x69f   :  { %4754 = vrot.lane.b32.xlu0 %v13522_v23, %s6599_s24 }
 0x6a0   :  { %v4537_v60 = vpop.permute.xlu1 %4536 }
 0x6a1   :  { %v4749_v41 = vpop.permute.xlu0 %4748 }
 0x6a2   :  { %4374 = vrot.lane.b32.xlu2 %v10719_v59, %s6590_s30  ;;  %v5270_v54 = vsel %vm5256_vm10, %v5205_v3, %v4749_v41  ;;  %v4909_v59 = vsel %vm1881_vm4, %v10222_v34, %v10441_v4  ;;  %v13525_v34 = vld [vmem:[#allocation65_spill] sm:$0xff] }
 0x6a3   :  { %v5335_v7 = vsel %vm5321_vm13, %v5270_v54, %v4819_v31  ;;  %v4973_v8 = vsel %vm2011_vm7, %v4909_v59, %v4369_v49  ;;  %v4307_v4 = vrot.slane %v13525_v34, 1 }
 0x6a4   :  { %v4513_v56 = vpop.permute.xlu2 %4512  ;;  %6526 = vmatmul.msk.bf16.gmra.mxu1 %vm5413_vm12, %v5335_v7 }
 0x6a5   :  { %v10842_v15 = vsel %vm1180_vm3, %v4306_v53, %v4307_v4 }
 0x6a6   :  { %4780 = vrot.lane.b32.xlu1 %v13523_v25, %s6599_s24 }
 0x6a7   :  { %4448 = vrot.lane.b32.xlu0 %v13517_v38, %s6591_s4 }
 0x6a8   :  { %v4775_v33 = vpop.permute.xlu1 %4774 }
 0x6a9   :  { %v4443_v62 = vpop.permute.xlu0 %4442 }
 0x6aa   :  { %4612 = vrot.lane.b32.xlu2 %v10768_v48, %s6596_s0  ;;  %v5037_v21 = vsel %vm2141_vm9, %v4973_v8, %v4443_v62 }
 0x6ab   :  { %v5101_v12 = vsel %vm2271_vm11, %v5037_v21, %v4537_v60  ;;  %v13529_v21 = vld [vmem:[#allocation83_spill] sm:$0xff] }
 0x6ac   :  { %v4751_v19 = vpop.permute.xlu2 %4750  ;;  %v5166_v0 = vsel %vm5126_vm6, %v5101_v12, %v4607_v63  ;;  %v4270_v63 = vrot.slane %v13526_v51, 1 }
 0x6ae   :  { %4424 = vrot.lane.b32.xlu1 %v13520_v26, %s6591_s4  ;;  %v10870_v31 = vsel %vm1180_vm3, %v4270_v63, %v4271_v39  ;;  %v13534_v39 = vld [vmem:[#allocation4_spill] sm:$0xff] }
 0x6af   :  { %4686 = vrot.lane.b32.xlu0 %v13524_v2, %s6597_s22 }
 0x6b0   :  { %v4419_v47 = vpop.permute.xlu1 %4418 }
 0x6b1   :  { %v4681_v40 = vpop.permute.xlu0 %4680  ;;  %v5013_v43 = vsel %vm2141_vm9, %v4949_v57, %v4419_v47 }
 0x6b2   :  { %4350 = vrot.lane.b32.xlu2 %v10746_v37, %s6590_s30  ;;  %v5231_v28 = vsel %vm5191_vm8, %v5166_v0, %v4681_v40  ;;  %v5077_v9 = vsel %vm2271_vm11, %v5013_v43, %v4513_v56  ;;  %v13530_v40 = vld [vmem:[#allocation36_spill] sm:$0xff]  ;;  %v13531_v0 = vld [vmem:[#allocation58_spill] sm:$0xff] }
 0x6b3   :  { %v5296_v44 = vsel %vm5256_vm10, %v5231_v28, %v4775_v33  ;;  %v4887_v12 = vsel %vm1881_vm4, %v9984_v58, %v13530_v40  ;;  %v4273_v28 = vrot.slane %v13531_v0, 1 }
 0x6b4   :  { %v4445_v10 = vpop.permute.xlu2 %4444 }
 0x6b6   :  { %4662 = vrot.lane.b32.xlu1 %v13526_v51, %s6597_s22 }
 0x6b7   :  { %4850 = vrot.lane.b32.xlu0 %v10842_v15, %s6598_s23 }
 0x6b8   :  { %v4657_v20 = vpop.permute.xlu1 %4656 }
 0x6b9   :  { %v4845_v37 = vpop.permute.xlu0 %4844 }
 0x6ba   :  { %4518 = vrot.lane.b32.xlu2 %v13522_v23, %s6594_s7  ;;  %v5361_v1 = vsel %vm5321_vm13, %v5296_v44, %v4845_v37  ;;  %v4911_v23 = vsel %vm1881_vm4, %v10156_v16, %v10457_v32  ;;  %v4309_v16 = vrot.slane %v10283_v11, 1  ;;  %v4310_v32 = vrot.slane %v10291_v27, 1 }
 0x6bb   :  { %6539 = vmatmul.msk.bf16.gmra.mxu2 %vm5413_vm12, %v5361_v1 }
 0x6bc   :  { %v4683_v49 = vpop.permute.xlu2 %4682  ;;  %v10899_v33 = vsel %vm1180_vm3, %v4309_v16, %v4310_v32  ;;  %v13537_v16 = vld [vmem:[#allocation52_spill] sm:$0xff] }
 0x6bd   :  { %v4277_v32 = vrot.slane %v13537_v16, 1 }
 0x6be   :  { %4376 = vrot.lane.b32.xlu1 %v10768_v48, %s6590_s30 }
 0x6bf   :  { %4588 = vrot.lane.b32.xlu0 %v10792_v35, %s6596_s0 }
 0x6c0   :  { %v4371_v36 = vpop.permute.xlu1 %4370 }
 0x6c1   :  { %v4583_v6 = vpop.permute.xlu0 %4582  ;;  %v4975_v60 = vsel %vm2011_vm7, %v4911_v23, %v4371_v36 }
 0x6c2   :  { %4756 = vrot.lane.b32.xlu2 %v13527_v50, %s6599_s24  ;;  %v5142_v52 = vsel %vm5126_vm6, %v5077_v9, %v4583_v6  ;;  %v5039_v54 = vsel %vm2141_vm9, %v4975_v60, %v4445_v10 }
 0x6c3   :  { %v5207_v48 = vsel %vm5191_vm8, %v5142_v52, %v4657_v20  ;;  %v13532_v20 = vld [vmem:[#allocation75_spill] sm:$0xff]  ;;  %v4313_v52 = vrot.slane %v13534_v39, 1 }
 0x6c4   :  { %v4847_v55 = vpop.permute.xlu2 %4846  ;;  %v5272_v18 = vsel %vm5256_vm10, %v5207_v48, %v4751_v19  ;;  %v4274_v37 = vrot.slane %v13532_v20, 1  ;;  %v13540_v20 = vld [vmem:[#allocation7_spill] sm:$0xff] }
 0x6c6   :  { %4614 = vrot.lane.b32.xlu1 %v10842_v15, %s6596_s0  ;;  %v10926_v1 = vsel %vm1180_vm3, %v4273_v28, %v4274_v37 }
 0x6c7   :  { %4826 = vrot.lane.b32.xlu0 %v10870_v31, %s6598_s23 }
 0x6c8   :  { %v4609_v45 = vpop.permute.xlu1 %4608 }
 0x6c9   :  { %v4821_v22 = vpop.permute.xlu0 %4820 }
 0x6ca   :  { %4450 = vrot.lane.b32.xlu2 %v13524_v2, %s6591_s4  ;;  %v5337_v14 = vsel %vm5321_vm13, %v5272_v18, %v4821_v22 }
 0x6cb   :  { %6527 = vmatmul.msk.bf16.gmra.mxu1 %vm5413_vm12, %v5337_v14 }
 0x6cc   :  { %v4585_v5 = vpop.permute.xlu2 %4584 }
 0x6ce   :  { %4352 = vrot.lane.b32.xlu1 %v10792_v35, %s6590_s30 }
 0x6cf   :  { %4544 = vrot.lane.b32.xlu0 %v13523_v25, %s6594_s7 }
 0x6d0   :  { %v4347_v41 = vpop.permute.xlu1 %4346 }
 0x6d1   :  { %v4539_v3 = vpop.permute.xlu0 %4538  ;;  %v4951_v34 = vsel %vm2011_vm7, %v4887_v12, %v4347_v41  ;;  %v13539_v12 = vld [vmem:[#allocation24_spill] sm:$0xff] }
 0x6d2   :  { %4688 = vrot.lane.b32.xlu2 %v10283_v11, %s6597_s22  ;;  %v5103_v7 = vsel %vm2271_vm11, %v5039_v54, %v4539_v3 }
 0x6d3   :  { %v5168_v35 = vsel %vm5126_vm6, %v5103_v7, %v4609_v45  ;;  %v13536_v7 = vld [vmem:[#allocation51_spill] sm:$0xff] }
 0x6d4   :  { %v4823_v56 = vpop.permute.xlu2 %4822  ;;  %v5233_v19 = vsel %vm5191_vm8, %v5168_v35, %v4683_v49 }
 0x6d6   :  { %4520 = vrot.lane.b32.xlu1 %v13527_v50, %s6594_s7  ;;  %v13533_v50 = vld [vmem:[#allocation80_spill] sm:$0xff] }
 0x6d7   :  { %4782 = vrot.lane.b32.xlu0 %v10312_v13, %s6599_s24  ;;  %v4312_v30 = vrot.slane %v13533_v50, 1 }
 0x6d8   :  { %v4515_v25 = vpop.permute.xlu1 %4514 }
 0x6d9   :  { %v4777_v62 = vpop.permute.xlu0 %4776  ;;  %v10948_v22 = vsel %vm1180_vm3, %v4312_v30, %v4313_v52 }
 0x6da   :  { %4852 = vrot.lane.b32.xlu2 %v10899_v33, %s6598_s23  ;;  %v5298_v27 = vsel %vm5256_vm10, %v5233_v19, %v4777_v62  ;;  %v13538_v62 = vld [vmem:[#allocation30_spill] sm:$0xff] }
 0x6db   :  { %v5363_v59 = vsel %vm5321_vm13, %v5298_v27, %v4847_v55  ;;  %v4913_v55 = vsel %vm1881_vm4, %v13507_v29, %v10461_v17  ;;  %v4889_v19 = vsel %vm1881_vm4, %v13509_v46, %v13538_v62 }
 0x6dc   :  { %v4541_v8 = vpop.permute.xlu2 %4540  ;;  %6540 = vmatmul.msk.bf16.gmra.mxu2 %vm5413_vm12, %v5363_v59 }
 0x6de   :  { %4758 = vrot.lane.b32.xlu1 %v13529_v21, %s6599_s24 }
 0x6df   :  { %4426 = vrot.lane.b32.xlu0 %v13526_v51, %s6591_s4 }
 0x6e0   :  { %v4753_v47 = vpop.permute.xlu1 %4752 }
 0x6e1   :  { %v4421_v53 = vpop.permute.xlu0 %4420 }
 0x6e2   :  { %4590 = vrot.lane.b32.xlu2 %v10870_v31, %s6596_s0  ;;  %v5015_v4 = vsel %vm2141_vm9, %v4951_v34, %v4421_v53 }
 0x6e3   :  { %v5079_v44 = vsel %vm2271_vm11, %v5015_v4, %v4515_v25 }
 0x6e4   :  { %v4779_v10 = vpop.permute.xlu2 %4778  ;;  %v5144_v42 = vsel %vm5126_vm6, %v5079_v44, %v4585_v5 }
 0x6e6   :  { %4452 = vrot.lane.b32.xlu1 %v10283_v11, %s6591_s4 }
 0x6e7   :  { %4664 = vrot.lane.b32.xlu0 %v13531_v0, %s6597_s22 }
 0x6e8   :  { %v4447_v58 = vpop.permute.xlu1 %4446 }
 0x6e9   :  { %v4659_v49 = vpop.permute.xlu0 %4658 }
 0x6ea   :  { %4828 = vrot.lane.b32.xlu2 %v10926_v1, %s6598_s23  ;;  %v5209_v57 = vsel %vm5191_vm8, %v5144_v42, %v4659_v49 }
 0x6eb   :  { %v5274_v43 = vsel %vm5256_vm10, %v5209_v57, %v4753_v47 }
 0x6ec   :  { %v4423_v36 = vpop.permute.xlu2 %4422  ;;  %v5339_v6 = vsel %vm5321_vm13, %v5274_v43, %v4823_v56  ;;  %v4276_v56 = vrot.slane %v13536_v7, 1  ;;  %v13542_v43 = vld [vmem:[#allocation71_spill] sm:$0xff] }
 0x6ed   :  { %6528 = vmatmul.msk.bf16.gmra.mxu1 %vm5413_vm12, %v5339_v6 }
 0x6ee   :  { %4690 = vrot.lane.b32.xlu1 %v13533_v50, %s6597_s22  ;;  %v10972_v25 = vsel %vm1180_vm3, %v4276_v56, %v4277_v32  ;;  %v3353_v32 = vld [vmem:[#allocation3 + $0x180] sm:$0xff] }
 0x6ef   :  { %4378 = vrot.lane.b32.xlu0 %v10842_v15, %s6590_s30 }
 0x6f0   :  { %v4685_v9 = vpop.permute.xlu1 %4684 }
 0x6f1   :  { %v4373_v63 = vpop.permute.xlu0 %4372 }
 0x6f2   :  { %4546 = vrot.lane.b32.xlu2 %v10312_v13, %s6594_s7  ;;  %v4977_v48 = vsel %vm2011_vm7, %v4913_v55, %v4373_v63  ;;  %v13535_v13 = vld [vmem:[#allocation72_spill] sm:$0xff]  ;;  %v4315_v63 = vrot.slane %v13542_v43, 1 }
 0x6f3   :  { %v5041_v15 = vsel %vm2141_vm9, %v4977_v48, %v4447_v58  ;;  %v13544_v48 = vld [vmem:[#allocation57_spill] sm:$0xff] }
 0x6f4   :  { %v4661_v45 = vpop.permute.xlu2 %4660  ;;  %v5105_v17 = vsel %vm2271_vm11, %v5041_v15, %v4541_v8  ;;  %v4279_v56 = vrot.slane %v13544_v48, 1 }
 0x6f6   :  { %4854 = vrot.lane.b32.xlu1 %v10948_v22, %s6598_s23 }
 0x6f7   :  { %4616 = vrot.lane.b32.xlu0 %v10899_v33, %s6596_s0 }
 0x6f8   :  { %v4849_v18 = vpop.permute.xlu1 %4848 }
 0x6f9   :  { %v4611_v14 = vpop.permute.xlu0 %4610 }
 0x6fa   :  { %4784 = vrot.lane.b32.xlu2 %v13535_v13, %s6599_s24  ;;  %v5170_v29 = vsel %vm5126_vm6, %v5105_v17, %v4611_v14 }
 0x6fb   :  { %v5235_v5 = vsel %vm5191_vm8, %v5170_v29, %v4685_v9 }
 0x6fc   :  { %v4375_v23 = vpop.permute.xlu2 %4374  ;;  %v5300_v60 = vsel %vm5256_vm10, %v5235_v5, %v4779_v10 }
 0x6fd   :  { %v5365_v41 = vsel %vm5321_vm13, %v5300_v60, %v4849_v18 }
 0x6fe   :  { %6541 = vmatmul.msk.bf16.gmra.mxu2 %vm5413_vm12, %v5365_v41  ;;  %4592 = vrot.lane.b32.xlu1 %v10926_v1, %s6596_s0 }
 0x6ff   :  { %4354 = vrot.lane.b32.xlu0 %v10870_v31, %s6590_s30 }
 0x700   :  { %v4587_v3 = vpop.permute.xlu1 %4586 }
 0x701   :  { %v4349_v54 = vpop.permute.xlu0 %4348 }
 0x702   :  { %4428 = vrot.lane.b32.xlu2 %v13531_v0, %s6591_s4  ;;  %v4953_v31 = vsel %vm2011_vm7, %v4889_v19, %v4349_v54  ;;  %v3518_v19 = vpack.c.bf16 %v3353_v32, %v3353_v32 }
 0x703   :  { %v5017_v8 = vsel %vm2141_vm9, %v4953_v31, %v4423_v36 }
 0x704   :  { %v4613_v35 = vpop.permute.xlu2 %4612 }
 0x706   :  { %4830 = vrot.lane.b32.xlu1 %v10972_v25, %s6598_s23 }
 0x707   :  { %4522 = vrot.lane.b32.xlu0 %v13529_v21, %s6594_s7 }
 0x708   :  { %v4825_v27 = vpop.permute.xlu1 %4824 }
 0x709   :  { %v4517_v59 = vpop.permute.xlu0 %4516 }
 0x70a   :  { %4666 = vrot.lane.b32.xlu2 %v13536_v7, %s6597_s22  ;;  %v5081_v47 = vsel %vm2271_vm11, %v5017_v8, %v4517_v59 }
 0x70b   :  { %v5146_v46 = vsel %vm5126_vm6, %v5081_v47, %v4587_v3  ;;  %v13546_v3 = vld [vmem:[#allocation25_spill] sm:$0xff]  ;;  %v3355_v47 = vld [vmem:[#allocation3 + $0x190] sm:$0x3] }
 0x70c   :  { %v4351_v40 = vpop.permute.xlu2 %4350  ;;  %v5211_v34 = vsel %vm5191_vm8, %v5146_v46, %v4661_v45 }
 0x70e   :  { %4548 = vrot.lane.b32.xlu1 %v13535_v13, %s6594_s7  ;;  %v13545_v13 = vld [vmem:[#allocation32_spill] sm:$0xff] }
 0x70f   :  { %4760 = vrot.lane.b32.xlu0 %v13539_v12, %s6599_s24  ;;  %v4891_v29 = vsel %vm1881_vm4, %v13515_v24, %v13545_v13  ;;  %v13547_v24 = vld [vmem:[#allocation21_spill] sm:$0xff] }
 0x710   :  { %v4543_v53 = vpop.permute.xlu1 %4542  ;;  %v4955_v5 = vsel %vm2011_vm7, %v4891_v29, %v4351_v40  ;;  %v4280_v16 = vrot.slane %v13547_v24, 1 }
 0x711   :  { %v4755_v21 = vpop.permute.xlu0 %4754 }
 0x712   :  { %4380 = vrot.lane.b32.xlu2 %v10899_v33, %s6590_s30  ;;  %v5276_v4 = vsel %vm5256_vm10, %v5211_v34, %v4755_v21  ;;  %v13541_v33 = vld [vmem:[#allocation45_spill] sm:$0xff]  ;;  %v11050_v59 = vsel %vm1180_vm3, %v4279_v56, %v4280_v16  ;;  %v3522_v34 = vpack.c.bf16 %v3355_v47, %v3355_v47 }
 0x713   :  { %v5341_v10 = vsel %vm5321_vm13, %v5276_v4, %v4825_v27  ;;  %v4915_v49 = vsel %vm1881_vm4, %v13512_v61, %v13541_v33  ;;  %v13543_v61 = vld [vmem:[#allocation22_spill] sm:$0xff] }
 0x714   :  { %v4519_v28 = vpop.permute.xlu2 %4518  ;;  %6529 = vmatmul.msk.bf16.gmra.mxu1 %vm5413_vm12, %v5341_v10  ;;  %v4979_v42 = vsel %vm2011_vm7, %v4915_v49, %v4375_v23  ;;  %v4316_v30 = vrot.slane %v13543_v61, 1 }
 0x716   :  { %4786 = vrot.lane.b32.xlu1 %v13540_v20, %s6599_s24  ;;  %v11022_v45 = vsel %vm1180_vm3, %v4315_v63, %v4316_v30  ;;  %v13550_v63 = vld [vmem:[#allocation31_spill] sm:$0xff] }
 0x717   :  { %4454 = vrot.lane.b32.xlu0 %v13533_v50, %s6591_s4  ;;  %v4319_v61 = vrot.slane %v13550_v63, 1 }
 0x718   :  { %v4781_v37 = vpop.permute.xlu1 %4780 }
 0x719   :  { %v4449_v44 = vpop.permute.xlu0 %4448 }
 0x71a   :  { %4618 = vrot.lane.b32.xlu2 %v10948_v22, %s6596_s0  ;;  %v5043_v57 = vsel %vm2141_vm9, %v4979_v42, %v4449_v44 }
 0x71b   :  { %v5107_v9 = vsel %vm2271_vm11, %v5043_v57, %v4543_v53  ;;  %v13549_v57 = vld [vmem:[#allocation39_spill] sm:$0xff] }
 0x71c   :  { %v4757_v58 = vpop.permute.xlu2 %4756  ;;  %v5172_v52 = vsel %vm5126_vm6, %v5107_v9, %v4613_v35  ;;  %v3354_v35 = vld [vmem:[#allocation3 + $0x188] sm:$0xff] }
 0x71d   :  { %v3519_v31 = vpack.c.bf16 %v3354_v35, %v3354_v35 }
 0x71e   :  { %4430 = vrot.lane.b32.xlu1 %v13536_v7, %s6591_s4 }
 0x71f   :  { %4692 = vrot.lane.b32.xlu0 %v13542_v43, %s6597_s22  ;;  %v4399_v53 = vunpack.c.l.b16 %v3519_v31 }
 0x720   :  { %v4425_v36 = vpop.permute.xlu1 %4424 }
 0x721   :  { %v4687_v6 = vpop.permute.xlu0 %4686  ;;  %v5019_v23 = vsel %vm2141_vm9, %v4955_v5, %v4425_v36 }
 0x722   :  { %4356 = vrot.lane.b32.xlu2 %v10926_v1, %s6590_s30  ;;  %v5237_v55 = vsel %vm5191_vm8, %v5172_v52, %v4687_v6  ;;  %v5083_v54 = vsel %vm2271_vm11, %v5019_v23, %v4519_v28  ;;  %v13548_v28 = vld [vmem:[#allocation41_spill] sm:$0xff]  ;;  %v13551_v52 = vld [vmem:[#allocation12_spill] sm:$0xff] }
 0x723   :  { %v5302_v18 = vsel %vm5256_vm10, %v5237_v55, %v4781_v37  ;;  %v4917_v37 = vsel %vm1881_vm4, %v13517_v38, %v13548_v28  ;;  %v3358_v28 = vld [vmem:[#allocation3 + $0x1a8] sm:$0x3] }
 0x724   :  { %v4451_v39 = vpop.permute.xlu2 %4450 }
 0x726   :  { %4668 = vrot.lane.b32.xlu1 %v13544_v48, %s6597_s22 }
 0x727   :  { %4856 = vrot.lane.b32.xlu0 %v11022_v45, %s6598_s23 }
 0x728   :  { %v4663_v15 = vpop.permute.xlu1 %4662 }
 0x729   :  { %v4851_v1 = vpop.permute.xlu0 %4850 }
 0x72a   :  { %4524 = vrot.lane.b32.xlu2 %v13539_v12, %s6594_s7  ;;  %v5367_v14 = vsel %vm5321_vm13, %v5302_v18, %v4851_v1  ;;  %v4398_v12 = vunpack.c.l.b16 %v3518_v19 }
 0x72b   :  { %6542 = vmatmul.msk.bf16.gmra.mxu2 %vm5413_vm12, %v5367_v14 }
 0x72c   :  { %v4689_v17 = vpop.permute.xlu2 %4688  ;;  %v11059_v10 = vpack.c.b16 %v4399_v53, %v4398_v12  ;;  %v13553_v53 = vld [vmem:[#allocation15_spill] sm:$0xff] }
 0x72e   :  { %4382 = vrot.lane.b32.xlu1 %v10948_v22, %s6590_s30  ;;  %v4477_v42 = vshll.u32 %v11059_v10, 16  ;;  %v4475_v55 = vshrl.u32 %v11059_v10, 16  ;;  %v4562_v35 = vrot.slane %v11059_v10, 1 }
 0x72f   :  { %4594 = vrot.lane.b32.xlu0 %v10972_v25, %s6596_s0 }
 0x730   :  { %v4377_v60 = vpop.permute.xlu1 %4376  ;;  %v4479_v30 = vrot.slane %v4477_v42, 1 }
 0x731   :  { %v4589_v41 = vpop.permute.xlu0 %4588  ;;  %v4981_v44 = vsel %vm2011_vm7, %v4917_v37, %v4377_v60 }
 0x732   :  { %4762 = vrot.lane.b32.xlu2 %v13546_v3, %s6599_s24  ;;  %v5148_v22 = vsel %vm5126_vm6, %v5083_v54, %v4589_v41  ;;  %v5045_v36 = vsel %vm2141_vm9, %v4981_v44, %v4451_v39  ;;  %v4480_v13 = vor.u32 %v4479_v30, %v4475_v55  ;;  %v4321_v44 = vrot.slane %v13553_v53, 1 }
 0x733   :  { %v5213_v27 = vsel %vm5191_vm8, %v5148_v22, %v4663_v15 }
 0x734   :  { %v4853_v62 = vpop.permute.xlu2 %4852  ;;  %v5278_v46 = vsel %vm5256_vm10, %v5213_v27, %v4757_v58  ;;  %v4470_v58 = vunpack.c.l.b16 %v3522_v34  ;;  %v3356_v34 = vld [vmem:[#allocation3 + $0x198] sm:$0xff] }
 0x736   :  { %4620 = vrot.lane.b32.xlu1 %v11022_v45, %s6596_s0  ;;  %v4472_v6 = vpack.c.b16 %v4470_v58, %v4470_v58  ;;  %v13554_v58 = vld [vmem:[#allocation38_spill] sm:$0xff] }
 0x737   :  { %4832 = vrot.lane.b32.xlu0 %v11050_v59, %s6598_s23 }
 0x738   :  { %v4615_v8 = vpop.permute.xlu1 %4614  ;;  %v4482_v39 = vshll.u32 %v4472_v6, 16  ;;  %v4563_v22 = vrot.slane %v4472_v6, 1  ;;  %v3528_v6 = vpack.c.bf16 %v3358_v28, %v3358_v28 }
 0x739   :  { %v4827_v40 = vpop.permute.xlu0 %4826 }
 0x73a   :  { %4456 = vrot.lane.b32.xlu2 %v13542_v43, %s6591_s4  ;;  %v5343_v21 = vsel %vm5321_vm13, %v5278_v46, %v4827_v40  ;;  %v4484_v23 = vrot.slane %v4482_v39, 1  ;;  %v4564_v19 = vsel %vm1180_vm3, %v4562_v35, %v4563_v22  ;;  %v11116_v40 = vpop.f32.mrf.mxu1 }
 0x73b   :  { %6530 = vmatmul.msk.bf16.gmra.mxu1 %vm5413_vm12, %v5343_v21 }
 0x73c   :  { %v4591_v4 = vpop.permute.xlu2 %4590  ;;  %v11092_v41 = vsel %vm731_vm2, %v4480_v13, %v4484_v23  ;;  %v3402_v13 = vld [vmem:[#allocation3 + $0x308] sm:$0xff] }
 0x73e   :  { %4358 = vrot.lane.b32.xlu1 %v10972_v25, %s6590_s30  ;;  %v4318_v25 = vrot.slane %v13549_v57, 1 }
 0x73f   :  { %4550 = vrot.lane.b32.xlu0 %v13540_v20, %s6594_s7 }
 0x740   :  { %v4353_v33 = vpop.permute.xlu1 %4352  ;;  %v11083_v1 = vsel %vm1180_vm3, %v4318_v25, %v4319_v61 }
 0x741   :  { %v4545_v49 = vpop.permute.xlu0 %4544 }
 0x742   :  { %4694 = vrot.lane.b32.xlu2 %v13549_v57, %s6597_s22  ;;  %v5109_v38 = vsel %vm2271_vm11, %v5045_v36, %v4545_v49  ;;  %v13555_v49 = vld [vmem:[#allocation19_spill] sm:$0xff]  ;;  %v11139_v63 = vpop.f32.mrf.mxu1 }
 0x743   :  { %v5174_v20 = vsel %vm5126_vm6, %v5109_v38, %v4615_v8  ;;  %v4919_v42 = vsel %vm1881_vm4, %v13524_v2, %v13555_v49  ;;  %v3524_v38 = vpack.c.bf16 %v3356_v34, %v3356_v34 }
 0x744   :  { %v4829_v9 = vpop.permute.xlu2 %4828  ;;  %v5239_v14 = vsel %vm5191_vm8, %v5174_v20, %v4689_v17  ;;  %v4708_v20 = vunpack.c.l.b16 %v3528_v6 }
 0x745   :  { %v4636_v2 = vunpack.c.l.b16 %v3524_v38 }
 0x746   :  { %4526 = vrot.lane.b32.xlu1 %v13546_v3, %s6594_s7  ;;  %v13552_v3 = vld [vmem:[#allocation13_spill] sm:$0xff]  ;;  %v4710_v23 = vpack.c.b16 %v4708_v20, %v4708_v20 }
 0x747   :  { %4788 = vrot.lane.b32.xlu0 %v13551_v52, %s6599_s24  ;;  %v4893_v54 = vsel %vm1881_vm4, %v13520_v26, %v13552_v3 }
 0x748   :  { %v4521_v15 = vpop.permute.xlu1 %4520  ;;  %v4957_v24 = vsel %vm2011_vm7, %v4893_v54, %v4353_v33  ;;  %v4322_v33 = vrot.slane %v13554_v58, 1 }
 0x749   :  { %v4783_v18 = vpop.permute.xlu0 %4782 }
 0x74a   :  { %4858 = vrot.lane.b32.xlu2 %v11083_v1, %s6598_s23  ;;  %v5304_v29 = vsel %vm5256_vm10, %v5239_v14, %v4783_v18  ;;  %v11137_v25 = vsel %vm1180_vm3, %v4321_v44, %v4322_v33  ;;  %v3401_v14 = vld [vmem:[#allocation3 + $0x300] sm:$0xff]  ;;  %v11159_v35 = vpop.f32.mrf.mxu1 }
 0x74b   :  { %v5369_v5 = vsel %vm5321_vm13, %v5304_v29, %v4853_v62 }
 0x74c   :  { %v4547_v60 = vpop.permute.xlu2 %4546  ;;  %6543 = vmatmul.msk.bf16.gmra.mxu2 %vm5413_vm12, %v5369_v5 }
 0x74e   :  { %4764 = vrot.lane.b32.xlu1 %v11092_v41, %s6599_s24 }
 0x74f   :  { %4432 = vrot.lane.b32.xlu0 %v13544_v48, %s6591_s4 }
 0x750   :  { %v4759_v17 = vpop.permute.xlu1 %4758 }
 0x751   :  { %v4427_v56 = vpop.permute.xlu0 %4426 }
 0x752   :  { %4596 = vrot.lane.b32.xlu2 %v11050_v59, %s6596_s0  ;;  %v5021_v16 = vsel %vm2141_vm9, %v4957_v24, %v4427_v56  ;;  %v3482_v56 = vpack.c.bf16 %v3401_v14, %v3401_v14  ;;  %v3483_v24 = vpack.c.bf16 %v3402_v13, %v3402_v13 }
 0x753   :  { %v5085_v62 = vsel %vm2271_vm11, %v5021_v16, %v4521_v15  ;;  %v13556_v15 = vld [vmem:[#allocation10_spill] sm:$0xff]  ;;  %v4801_v16 = vrot.slane %v4710_v23, 1 }
 0x754   :  { %v4785_v32 = vpop.permute.xlu2 %4784  ;;  %v5150_v27 = vsel %vm5126_vm6, %v5085_v62, %v4591_v4  ;;  %v3357_v4 = vld [vmem:[#allocation3 + $0x1a0] sm:$0xff] }
 0x756   :  { %4458 = vrot.lane.b32.xlu1 %v13549_v57, %s6591_s4 }
 0x757   :  { %4670 = vrot.lane.b32.xlu0 %v11059_v10, %s6597_s22 }
 0x758   :  { %v4453_v26 = vpop.permute.xlu1 %4452 }
 0x759   :  { %v4665_v31 = vpop.permute.xlu0 %4664 }
 0x75a   :  { %4834 = vrot.lane.b32.xlu2 %v4564_v19, %s6598_s23  ;;  %v5215_v8 = vsel %vm5191_vm8, %v5150_v27, %v4665_v31  ;;  %v3655_v27 = vunpack.c.l.b16 %v3483_v24 }
 0x75b   :  { %v5280_v47 = vsel %vm5256_vm10, %v5215_v8, %v4759_v17 }
 0x75c   :  { %v11118_v46 = vpop.permute.xlu2 %4428  ;;  %v5345_v12 = vsel %vm5321_vm13, %v5280_v47, %v4829_v9 }
 0x75d   :  { %6531 = vmatmul.msk.bf16.gmra.mxu1 %vm5413_vm12, %v5345_v12 }
 0x75e   :  { %4696 = vrot.lane.b32.xlu1 %v13553_v53, %s6597_s22 }
 0x75f   :  { %4384 = vrot.lane.b32.xlu0 %v11022_v45, %s6590_s30  ;;  %v3525_v45 = vpack.c.bf16 %v3357_v4, %v3357_v4  ;;  %v13557_v4 = vld [vmem:[#allocation37_spill] sm:$0xff] }
 0x760   :  { %v4691_v21 = vpop.permute.xlu1 %4690  ;;  %v4895_v28 = vsel %vm1881_vm4, %v13526_v51, %v13557_v4 }
 0x761   :  { %v4379_v37 = vpop.permute.xlu0 %4378  ;;  %v4637_v30 = vunpack.c.l.b16 %v3525_v45 }
 0x762   :  { %4552 = vrot.lane.b32.xlu2 %v13551_v52, %s6594_s7  ;;  %v4983_v36 = vsel %vm2011_vm7, %v4919_v42, %v4379_v37 }
 0x763   :  { %v5047_v61 = vsel %vm2141_vm9, %v4983_v36, %v4453_v26  ;;  %v4640_v5 = vpack.c.b16 %v4637_v30, %v4636_v2  ;;  %v3403_v26 = vld [vmem:[#allocation3 + $0x310] sm:$0x3]  ;;  %v11176_v36 = vpop.f32.mrf.mxu1 }
 0x764   :  { %v11134_v9 = vpop.permute.xlu2 %4666  ;;  %v5111_v39 = vsel %vm2271_vm11, %v5047_v61, %v4547_v60  ;;  %v3516_v47 = vpack.c.bf16 %v3403_v26, %v3403_v26 }
 0x765   :  { %v4800_v60 = vrot.slane %v4640_v5, 1  ;;  %v4715_v62 = vshll.u32 %v4640_v5, 16  ;;  %v4713_v12 = vshrl.u32 %v4640_v5, 16 }
 0x766   :  { %4860 = vrot.lane.b32.xlu1 %v11137_v25, %s6598_s23 }
 0x767   :  { %4622 = vrot.lane.b32.xlu0 %v11083_v1, %s6596_s0  ;;  %v4802_v8 = vsel %vm1180_vm3, %v4800_v60, %v4801_v16  ;;  %v3406_v16 = vld [vmem:[#allocation3 + $0x328] sm:$0x3] }
 0x768   :  { %v4855_v52 = vpop.permute.xlu1 %4854 }
 0x769   :  { %v4617_v55 = vpop.permute.xlu0 %4616 }
 0x76a   :  { %4790 = vrot.lane.b32.xlu2 %v13556_v15, %s6599_s24  ;;  %v5176_v18 = vsel %vm5126_vm6, %v5111_v39, %v4617_v55 }
 0x76b   :  { %v5241_v29 = vsel %vm5191_vm8, %v5176_v18, %v4691_v21  ;;  %v4720_v21 = vshll.u32 %v4710_v23, 16  ;;  %v3404_v23 = vld [vmem:[#allocation3 + $0x318] sm:$0xff] }
 0x76c   :  { %v11151_v17 = vpop.permute.xlu2 %4380  ;;  %v5306_v3 = vsel %vm5256_vm10, %v5241_v29, %v4785_v32  ;;  %v3654_v32 = vunpack.c.l.b16 %v3482_v56 }
 0x76d   :  { %v5371_v54 = vsel %vm5321_vm13, %v5306_v3, %v4855_v52  ;;  %v4722_v33 = vrot.slane %v4720_v21, 1  ;;  %v3484_v3 = vpack.c.bf16 %v3404_v23, %v3404_v23 }
 0x76e   :  { %6544 = vmatmul.msk.bf16.gmra.mxu2 %vm5413_vm12, %v5371_v54  ;;  %4598 = vrot.lane.b32.xlu1 %v4564_v19, %s6596_s0  ;;  %v11166_v34 = vpack.c.b16 %v3655_v27, %v3654_v32 }
 0x76f   :  { %4360 = vrot.lane.b32.xlu0 %v11050_v59, %s6590_s30  ;;  %v4717_v59 = vrot.slane %v4715_v62, 1  ;;  %v3656_v60 = vunpack.c.l.b16 %v3484_v3 }
 0x770   :  { %v4593_v22 = vpop.permute.xlu1 %4592  ;;  %v4149_v42 = vshll.u32 %v11166_v34, 16  ;;  %v4147_v30 = vshrl.u32 %v11166_v34, 16  ;;  %v4324_v26 = vrot.slane %v11166_v34, 1 }
 0x771   :  { %v4355_v31 = vpop.permute.xlu0 %4354  ;;  %v4718_v58 = vor.u32 %v4717_v59, %v4713_v12  ;;  %v3517_v12 = vpack.c.bf16 %v3406_v16, %v3406_v16 }
 0x772   :  { %4434 = vrot.lane.b32.xlu2 %v11059_v10, %s6591_s4  ;;  %v4959_v37 = vsel %vm2011_vm7, %v4895_v28, %v4355_v31  ;;  %v3752_v10 = vunpack.c.l.b16 %v3516_v47  ;;  %v4151_v61 = vrot.slane %v4149_v42, 1 }
 0x773   :  { %v5023_v51 = vsel %vm2141_vm9, %v4959_v37, %v11118_v46  ;;  %v3408_v37 = vld [vmem:[#allocation3 + $0x338] sm:$0xff] }
 0x774   :  { %v11164_v19 = vpop.permute.xlu2 %4618  ;;  %v3784_v45 = vpack.c.b16 %v3752_v10, %v3752_v10  ;;  %v4152_v39 = vor.u32 %v4151_v61, %v4147_v30  ;;  %v3753_v10 = vunpack.c.l.b16 %v3517_v12  ;;  %v3521_v42 = vpack.c.bf16 %v3408_v37, %v3408_v37  ;;  %v3409_v61 = vld [vmem:[#allocation3 + $0x340] sm:$0x3] }
 0x776   :  { %4836 = vrot.lane.b32.xlu1 %v4802_v8, %s6598_s23  ;;  %v4154_v20 = vshll.u32 %v3784_v45, 16  ;;  %v4325_v31 = vrot.slane %v3784_v45, 1 }
 0x777   :  { %4528 = vrot.lane.b32.xlu0 %v11092_v41, %s6594_s7  ;;  %v4723_v41 = vsel %vm731_vm2, %v4718_v58, %v4722_v33 }
 0x778   :  { %v4831_v44 = vpop.permute.xlu1 %4830  ;;  %v4156_v13 = vrot.slane %v4154_v20, 1 }
 0x779   :  { %v4523_v49 = vpop.permute.xlu0 %4522 }
 0x77a   :  { %4672 = vrot.lane.b32.xlu2 %v4640_v5, %s6597_s22  ;;  %v5087_v38 = vsel %vm2271_vm11, %v5023_v51, %v4523_v49  ;;  %v4157_v5 = vsel %vm731_vm2, %v4152_v39, %v4156_v13  ;;  %v3523_v39 = vpack.c.bf16 %v3409_v61, %v3409_v61 }
 0x77b   :  { %v5152_v2 = vsel %vm5126_vm6, %v5087_v38, %v4593_v22  ;;  %v13558_v22 = vld [vmem:[#allocation40_spill] sm:$0xff]  ;;  %v3785_v38 = vpack.c.b16 %v3753_v10, %v3753_v10 }
 0x77c   :  { %v11182_v6 = vpop.permute.xlu2 %4356  ;;  %v5217_v55 = vsel %vm5191_vm8, %v5152_v2, %v11134_v9  ;;  %v3405_v9 = vld [vmem:[#allocation3 + $0x320] sm:$0xff]  ;;  %v4921_v62 = vsel %vm1881_vm4, %v10283_v11, %v13558_v22  ;;  %v11223_v11 = vsel %vm1180_vm3, %v4324_v26, %v4325_v31 }
 0x77d   :  { %v3485_v56 = vpack.c.bf16 %v3405_v9, %v3405_v9  ;;  %v4985_v8 = vsel %vm2011_vm7, %v4921_v62, %v11151_v17  ;;  %v3407_v17 = vld [vmem:[#allocation3 + $0x330] sm:$0xff]  ;;  %v4328_v26 = vrot.slane %v3785_v38, 1 }
 0x77e   :  { %4554 = vrot.lane.b32.xlu1 %v13556_v15, %s6594_s7  ;;  %v11196_v15 = vpop.f32.mrf.mxu1  ;;  %v3520_v49 = vpack.c.bf16 %v3407_v17, %v3407_v17 }
 0x77f   :  { %4766 = vrot.lane.b32.xlu0 %v4723_v41, %s6599_s24  ;;  %v3657_v32 = vunpack.c.l.b16 %v3485_v56  ;;  %v4471_v56 = vunpack.c.l.b16 %v3523_v39 }
 0x780   :  { %v4549_v52 = vpop.permute.xlu1 %4548  ;;  %v4400_v20 = vunpack.c.l.b16 %v3520_v49 }
 0x781   :  { %v4761_v46 = vpop.permute.xlu0 %4760  ;;  %v11225_v4 = vpack.c.b16 %v3657_v32, %v3656_v60  ;;  %v4473_v32 = vpack.c.b16 %v4471_v56, %v4471_v56 }
 0x782   :  { %4386 = vrot.lane.b32.xlu2 %v11083_v1, %s6590_s30  ;;  %v5282_v18 = vsel %vm5256_vm10, %v5217_v55, %v4761_v46 }
 0x783   :  { %v5347_v14 = vsel %vm5321_vm13, %v5282_v18, %v4831_v44  ;;  %v4161_v33 = vshll.u32 %v11225_v4, 16  ;;  %v4159_v55 = vshrl.u32 %v11225_v4, 16 }
 0x784   :  { %v11198_v29 = vpop.permute.xlu2 %4524  ;;  %6532 = vmatmul.msk.bf16.gmra.mxu1 %vm5413_vm12, %v5347_v14  ;;  %v13559_v14 = vld [vmem:[#allocation33_spill] sm:$0xff] }
 0x785   :  { %v4163_v30 = vrot.slane %v4161_v33, 1  ;;  %v4897_v13 = vsel %vm1881_vm4, %v13531_v0, %v13559_v14  ;;  %v4566_v14 = vrot.slane %v4473_v32, 1 }
 0x786   :  { %4792 = vrot.lane.b32.xlu1 %v4157_v5, %s6599_s24  ;;  %v11213_v27 = vpop.f32.mrf.mxu1 }
 0x787   :  { %4460 = vrot.lane.b32.xlu0 %v13553_v53, %s6591_s4  ;;  %v4164_v23 = vor.u32 %v4163_v30, %v4159_v55 }
 0x788   :  { %v4787_v1 = vpop.permute.xlu1 %4786 }
 0x789   :  { %v4455_v54 = vpop.permute.xlu0 %4454 }
 0x78a   :  { %4624 = vrot.lane.b32.xlu2 %v11137_v25, %s6596_s0  ;;  %v5049_v47 = vsel %vm2141_vm9, %v4985_v8, %v4455_v54 }
 0x78b   :  { %v5113_v28 = vsel %vm2271_vm11, %v5049_v47, %v4549_v52  ;;  %v4401_v52 = vunpack.c.l.b16 %v3521_v42 }
 0x78c   :  { %v11207_v24 = vpop.permute.xlu2 %4762  ;;  %v5178_v58 = vsel %vm5126_vm6, %v5113_v28, %v11164_v19 }
 0x78d   :  { %v11252_v9 = vpack.c.b16 %v4401_v52, %v4400_v20  ;;  %v3412_v20 = vld [vmem:[#allocation3 + $0x358] sm:$0x3] }
 0x78e   :  { %4462 = vrot.lane.b32.xlu1 %v11166_v34, %s6591_s4  ;;  %v11240_v45 = vpop.f32.mrf.mxu1 }
 0x78f   :  { %4698 = vrot.lane.b32.xlu0 %v11166_v34, %s6597_s22  ;;  %v4489_v22 = vshll.u32 %v11252_v9, 16  ;;  %v4565_v39 = vrot.slane %v11252_v9, 1 }
 0x790   :  { %v4431_v59 = vpop.permute.xlu1 %4430 }
 0x791   :  { %v4693_v21 = vpop.permute.xlu0 %4692  ;;  %v4491_v47 = vrot.slane %v4489_v22, 1  ;;  %v4567_v56 = vsel %vm1180_vm3, %v4565_v39, %v4566_v14 }
 0x792   :  { %4862 = vrot.lane.b32.xlu2 %v11223_v11, %s6598_s23  ;;  %v5243_v51 = vsel %vm5191_vm8, %v5178_v58, %v4693_v21  ;;  %v4487_v21 = vshrl.u32 %v11252_v9, 16 }
 0x793   :  { %v5308_v19 = vsel %vm5256_vm10, %v5243_v51, %v4787_v1  ;;  %v4961_v1 = vsel %vm2011_vm7, %v4897_v13, %v11182_v6  ;;  %v3529_v13 = vpack.c.bf16 %v3412_v20, %v3412_v20 }
 0x794   :  { %v11230_v44 = vpop.permute.xlu2 %4456  ;;  %v5025_v3 = vsel %vm2141_vm9, %v4961_v1, %v4431_v59  ;;  %v4492_v10 = vor.u32 %v4491_v47, %v4487_v21 }
 0x795   :  { %v5089_v6 = vsel %vm2271_vm11, %v5025_v3, %v11198_v29  ;;  %v4494_v29 = vshll.u32 %v4473_v32, 16  ;;  %v4709_v22 = vunpack.c.l.b16 %v3529_v13  ;;  %v13563_v13 = vld [vmem:[#allocation34_spill] sm:$0xff] }
 0x796   :  { %4700 = vrot.lane.b32.xlu1 %v11225_v4, %s6597_s22  ;;  %v11264_v62 = vpop.f32.mrf.mxu1 }
 0x797   :  { %4388 = vrot.lane.b32.xlu0 %v11137_v25, %s6590_s30  ;;  %v4166_v25 = vshll.u32 %v3785_v38, 16  ;;  %v4496_v49 = vrot.slane %v4494_v29, 1  ;;  %v13560_v38 = vld [vmem:[#allocation28_spill] sm:$0xff]  ;;  %v4711_v47 = vpack.c.b16 %v4709_v22, %v4709_v22 }
 0x798   :  { %v4669_v41 = vpop.permute.xlu1 %4668  ;;  %v13561_v29 = vld [vmem:[#allocation16_spill] sm:$0xff] }
 0x799   :  { %v4857_v2 = vpop.permute.xlu0 %4856  ;;  %v4168_v54 = vrot.slane %v4166_v25, 1  ;;  %v4497_v51 = vsel %vm731_vm2, %v4492_v10, %v4496_v49 }
 0x79a   :  { %4556 = vrot.lane.b32.xlu2 %v4157_v5, %s6594_s7  ;;  %v5373_v46 = vsel %vm5321_vm13, %v5308_v19, %v4857_v2  ;;  %v3410_v2 = vld [vmem:[#allocation3 + $0x348] sm:$0xff]  ;;  %v3411_v19 = vld [vmem:[#allocation3 + $0x350] sm:$0xff] }
 0x79b   :  { %6545 = vmatmul.msk.bf16.gmra.mxu2 %vm5413_vm12, %v5373_v46  ;;  %v11261_v16 = vsel %vm731_vm2, %v4164_v23, %v4168_v54  ;;  %v3526_v55 = vpack.c.bf16 %v3410_v2, %v3410_v2  ;;  %v3527_v25 = vpack.c.bf16 %v3411_v19, %v3411_v19 }
 0x79c   :  { %v11247_v18 = vpop.permute.xlu2 %4694 }
 0x79d   :  { %v4638_v3 = vunpack.c.l.b16 %v3526_v55  ;;  %v4639_v54 = vunpack.c.l.b16 %v3527_v25 }
 0x79e   :  { %4230 = vrot.lane.b32.xlu1 %v4157_v5, %s6588_s29  ;;  %v4327_v5 = vrot.slane %v11225_v4, 1  ;;  %v11280_v58 = vpop.f32.mrf.mxu1 }
 0x79f   :  { %4626 = vrot.lane.b32.xlu0 %v11223_v11, %s6596_s0 }
 0x7a0   :  { %v4383_v60 = vpop.permute.xlu1 %4382  ;;  %v4329_v59 = vsel %vm1180_vm3, %v4327_v5, %v4328_v26 }
 0x7a1   :  { %v4595_v0 = vpop.permute.xlu0 %4594 }
 0x7a2   :  { %4794 = vrot.lane.b32.xlu2 %v11261_v16, %s6599_s24  ;;  %v5154_v31 = vsel %vm5126_vm6, %v5089_v6, %v4595_v0 }
 0x7a3   :  { %v5219_v12 = vsel %vm5191_vm8, %v5154_v31, %v4669_v41  ;;  %v4923_v41 = vsel %vm1881_vm4, %v13533_v50, %v13560_v38  ;;  %v4641_v31 = vpack.c.b16 %v4639_v54, %v4638_v3  ;;  %v4732_v38 = vshll.u32 %v4711_v47, 16 }
 0x7a4   :  { %v4859_v8 = vpop.permute.xlu2 %4858  ;;  %v5284_v37 = vsel %vm5256_vm10, %v5219_v12, %v11207_v24  ;;  %v4987_v24 = vsel %vm2011_vm7, %v4923_v41, %v4383_v60  ;;  %v4804_v12 = vrot.slane %v4711_v47, 1 }
 0x7a5   :  { %v5051_v30 = vsel %vm2141_vm9, %v4987_v24, %v11230_v44  ;;  %v11307_v44 = vpop.f32.mrf.mxu2  ;;  %v4727_v21 = vshll.u32 %v4641_v31, 16  ;;  %v4734_v2 = vrot.slane %v4732_v38, 1 }
 0x7a6   :  { %4558 = vrot.lane.b32.xlu1 %v11261_v16, %s6594_s7  ;;  %v11300_v50 = vpop.f32.mrf.mxu1 }
 0x7a7   :  { %4864 = vrot.lane.b32.xlu0 %v4329_v59, %s6598_s23  ;;  %v4729_v49 = vrot.slane %v4727_v21, 1 }
 0x7a8   :  { %v4621_v28 = vpop.permute.xlu1 %4620 }
 0x7a9   :  { %v4833_v17 = vpop.permute.xlu0 %4832 }
 0x7aa   :  { %4390 = vrot.lane.b32.xlu2 %v11223_v11, %s6590_s30  ;;  %v5349_v33 = vsel %vm5321_vm13, %v5284_v37, %v4833_v17 }
 0x7ab   :  { %6533 = vmatmul.msk.bf16.gmra.mxu1 %vm5413_vm12, %v5349_v33  ;;  %v4725_v33 = vshrl.u32 %v4641_v31, 16 }
 0x7ac   :  { %v11286_v42 = vpop.permute.xlu2 %4596 }
 0x7ad   :  { %v11324_v17 = vpop.f32.mrf.mxu2 }
 0x7ae   :  { %4796 = vrot.lane.b32.xlu1 %v4497_v51, %s6599_s24  ;;  %v11315_v26 = vpop.f32.mrf.mxu1  ;;  %13562 = vst [vmem:[#allocation17_spill] sm:$0xff] %v11324_v17 }
 0x7af   :  { %4464 = vrot.lane.b32.xlu0 %v11225_v4, %s6591_s4 }
 0x7b0   :  { %v4359_v11 = vpop.permute.xlu1 %4358 }
 0x7b1   :  { %v4551_v61 = vpop.permute.xlu0 %4550 }
 0x7b2   :  { %4628 = vrot.lane.b32.xlu2 %v4329_v59, %s6596_s0  ;;  %v5115_v52 = vsel %vm2271_vm11, %v5051_v30, %v4551_v61  ;;  %v4730_v61 = vor.u32 %v4729_v49, %v4725_v33 }
 0x7b3   :  { %v5180_v23 = vsel %vm5126_vm6, %v5115_v52, %v4621_v28 }
 0x7b4   :  { %v4835_v46 = vpop.permute.xlu2 %4834  ;;  %v5245_v0 = vsel %vm5191_vm8, %v5180_v23, %v11247_v18  ;;  %v4803_v18 = vrot.slane %v4641_v31, 1  ;;  %v4735_v25 = vsel %vm731_vm2, %v4730_v61, %v4734_v2  ;;  %v4925_v23 = vsel %vm1881_vm4, %v13542_v43, %v13563_v13 }
 0x7b5   :  { %v11338_v30 = vpop.f32.mrf.mxu2 }
 0x7b6   :  { %4392 = vrot.lane.b32.xlu1 %v4329_v59, %s6590_s30  ;;  %v11331_v41 = vpop.f32.mrf.mxu1 }
 0x7b7   :  { %4702 = vrot.lane.b32.xlu0 %v11252_v9, %s6597_s22 }
 0x7b8   :  { %v4527_v1 = vpop.permute.xlu1 %4526 }
 0x7b9   :  { %v4789_v60 = vpop.permute.xlu0 %4788 }
 0x7ba   :  { %4866 = vrot.lane.b32.xlu2 %v4567_v56, %s6598_s23  ;;  %v5310_v6 = vsel %vm5256_vm10, %v5245_v0, %v4789_v60 }
 0x7bb   :  { %v5375_v5 = vsel %vm5321_vm13, %v5310_v6, %v4859_v8  ;;  %v4899_v8 = vsel %vm1881_vm4, %v13536_v7, %v13561_v29  ;;  %v13564_v29 = vld [vmem:[#allocation35_spill] sm:$0xff] }
 0x7bc   :  { %6546 = vmatmul.msk.bf16.gmra.mxu2 %vm5413_vm12, %v5375_v5  ;;  %v4553_v32 = vpop.permute.xlu2 %4552  ;;  %v4963_v37 = vsel %vm2011_vm7, %v4899_v8, %v4359_v11 }
 0x7bd   :  { %v11353_v3 = vpop.f32.mrf.mxu2 }
 0x7be   :  { %4630 = vrot.lane.b32.xlu1 %v4567_v56, %s6596_s0 }
 0x7bf   :  { %4232 = vrot.lane.b32.xlu0 %v11261_v16, %s6588_s29  ;;  %v4805_v16 = vsel %vm1180_vm3, %v4803_v18, %v4804_v12 }
 0x7c0   :  { %v4765_v59 = vpop.permute.xlu1 %4764 }
 0x7c1   :  { %v4433_v28 = vpop.permute.xlu0 %4432 }
 0x7c2   :  { %4466 = vrot.lane.b32.xlu2 %v11252_v9, %s6591_s4  ;;  %v5027_v10 = vsel %vm2141_vm9, %v4963_v37, %v4433_v28 }
 0x7c3   :  { %v5091_v24 = vsel %vm2271_vm11, %v5027_v10, %v4527_v1 }
 0x7c4   :  { %v4791_v7 = vpop.permute.xlu2 %4790  ;;  %v5156_v19 = vsel %vm5126_vm6, %v5091_v24, %v11286_v42 }
 0x7c6   :  { %4868 = vrot.lane.b32.xlu1 %v4805_v16, %s6598_s23 }
 0x7c7   :  { %4560 = vrot.lane.b32.xlu0 %v4497_v51, %s6594_s7  ;;  %v11346_v51 = vpop.f32.mrf.mxu1 }
 0x7c8   :  { %v4459_v11 = vpop.permute.xlu1 %4458 }
 0x7c9   :  { %v4671_v9 = vpop.permute.xlu0 %4670 }
 0x7ca   :  { %v5221_v20 = vsel %vm5191_vm8, %v5156_v19, %v4671_v9  ;;  %4704 = vrot.lane.b32.xlu2 %v4641_v31, %s6597_s22  ;;  %v11361_v31 = vpop.f32.mrf.mxu2 }
 0x7cb   :  { %v5286_v52 = vsel %vm5256_vm10, %v5221_v20, %v4765_v59 }
 0x7cc   :  { %v5351_v55 = vsel %vm5321_vm13, %v5286_v52, %v4835_v46  ;;  %v4435_v42 = vpop.permute.xlu2 %4434 }
 0x7cd   :  { %6534 = vmatmul.msk.bf16.gmra.mxu1 %vm5413_vm12, %v5351_v55  ;;  %v13566_v55 = vld [vmem:[#allocation9_spill] sm:$0xff] }
 0x7cf   :  { %4798 = vrot.lane.b32.xlu0 %v4735_v25, %s6599_s24  ;;  %v11356_v54 = vpop.f32.mrf.mxu1  ;;  %v4927_v25 = vsel %vm1881_vm4, %v13549_v57, %v13566_v55 }
 0x7d0   :  { %v4697_v39 = vpop.permute.xlu1 %4696 }
 0x7d1   :  { %v4385_v14 = vpop.permute.xlu0 %4384 }
 0x7d2   :  { %v4989_v1 = vsel %vm2011_vm7, %v4925_v23, %v4385_v14  ;;  %v11371_v8 = vpop.f32.mrf.mxu2 }
 0x7d3   :  { %v5053_v46 = vsel %vm2141_vm9, %v4989_v1, %v4459_v11 }
 0x7d4   :  { %v5117_v0 = vsel %vm2271_vm11, %v5053_v46, %v4553_v32  ;;  %v4673_v6 = vpop.permute.xlu2 %4672  ;;  %v4901_v32 = vsel %vm1881_vm4, %v13544_v48, %v13564_v29 }
 0x7d7   :  { %v11366_v18 = vpop.f32.mrf.mxu1 }
 0x7d8   :  { %v4861_v56 = vpop.permute.xlu1 %4860 }
 0x7d9   :  { %v4623_v60 = vpop.permute.xlu0 %4622 }
 0x7da   :  { %v5182_v22 = vsel %vm5126_vm6, %v5117_v0, %v4623_v60  ;;  %v11378_v38 = vpop.f32.mrf.mxu2 }
 0x7db   :  { %v5247_v5 = vsel %vm5191_vm8, %v5182_v22, %v4697_v39  ;;  %13565 = vst [vmem:[#allocation68_spill] sm:$0xff] %v11378_v38 }
 0x7dc   :  { %v5312_v43 = vsel %vm5256_vm10, %v5247_v5, %v4791_v7  ;;  %v4387_v21 = vpop.permute.xlu2 %4386 }
 0x7dd   :  { %v5377_v47 = vsel %vm5321_vm13, %v5312_v43, %v4861_v56  ;;  %v4991_v14 = vsel %vm2011_vm7, %v4927_v25, %v4387_v21 }
 0x7de   :  { %6547 = vmatmul.msk.bf16.gmra.mxu2 %vm5413_vm12, %v5377_v47 }
 0x7df   :  { %v11374_v16 = vpop.f32.mrf.mxu1 }
 0x7e0   :  { %v4599_v12 = vpop.permute.xlu1 %4598 }
 0x7e1   :  { %v4361_v59 = vpop.permute.xlu0 %4360 }
 0x7e2   :  { %v4965_v28 = vsel %vm2011_vm7, %v4901_v32, %v4361_v59  ;;  %v11387_v20 = vpop.f32.mrf.mxu2  ;;  %v13567_v59 = vld [vmem:[#allocation14_spill] sm:$0xff] }
 0x7e3   :  { %v5029_v33 = vsel %vm2141_vm9, %v4965_v28, %v4435_v42  ;;  %v4929_v21 = vsel %vm1881_vm4, %v13553_v53, %v13567_v59 }
 0x7e4   :  { %v4625_v7 = vpop.permute.xlu2 %4624 }
 0x7e7   :  { %v11382_v2 = vpop.f32.mrf.mxu1 }
 0x7e8   :  { %v4837_v37 = vpop.permute.xlu1 %4836 }
 0x7e9   :  { %v4529_v10 = vpop.permute.xlu0 %4528 }
 0x7ea   :  { %v5093_v49 = vsel %vm2271_vm11, %v5029_v33, %v4529_v10  ;;  %v11397_v56 = vpop.f32.mrf.mxu2 }
 0x7eb   :  { %v5158_v24 = vsel %vm5126_vm6, %v5093_v49, %v4599_v12 }
 0x7ec   :  { %v5223_v48 = vsel %vm5191_vm8, %v5158_v24, %v4673_v6  ;;  %v4863_v39 = vpop.permute.xlu2 %4862 }
 0x7ef   :  { %v11394_v23 = vpop.f32.mrf.mxu1 }
 0x7f0   :  { %v4555_v11 = vpop.permute.xlu1 %4554 }
 0x7f1   :  { %v4767_v61 = vpop.permute.xlu0 %4766 }
 0x7f2   :  { %v5288_v9 = vsel %vm5256_vm10, %v5223_v48, %v4767_v61  ;;  %v11409_v29 = vpop.f32.mrf.mxu2 }
 0x7f3   :  { %v5353_v19 = vsel %vm5321_vm13, %v5288_v9, %v4837_v37 }
 0x7f4   :  { %6535 = vmatmul.msk.bf16.gmra.mxu1 %vm5413_vm12, %v5353_v19  ;;  %v4557_v6 = vpop.permute.xlu2 %4556 }
 0x7f7   :  { %v11402_v5 = vpop.f32.mrf.mxu1 }
 0x7f8   :  { %v4793_v52 = vpop.permute.xlu1 %4792 }
 0x7f9   :  { %v4461_v42 = vpop.permute.xlu0 %4460 }
 0x7fa   :  { %v5055_v13 = vsel %vm2141_vm9, %v4991_v14, %v4461_v42 }
 0x7fb   :  { %v5119_v1 = vsel %vm2271_vm11, %v5055_v13, %v4555_v11 }
 0x7fc   :  { %v5184_v0 = vsel %vm5126_vm6, %v5119_v1, %v4625_v7  ;;  %v4795_v28 = vpop.permute.xlu2 %4794  ;;  %v11416_v7 = vpop.f32.mrf.mxu2 }
 0x7fd   :  { %13568 = vst [vmem:[#allocation69_spill] sm:$0xff] %v11416_v7 }
 0x7ff   :  { %v11412_v37 = vpop.f32.mrf.mxu1 }
 0x800   :  { %v4463_v46 = vpop.permute.xlu1 %4462 }
 0x801   :  { %v4699_v60 = vpop.permute.xlu0 %4698 }
 0x802   :  { %v5249_v22 = vsel %vm5191_vm8, %v5184_v0, %v4699_v60 }
 0x803   :  { %v5314_v57 = vsel %vm5256_vm10, %v5249_v22, %v4793_v52 }
 0x804   :  { %v5379_v43 = vsel %vm5321_vm13, %v5314_v57, %v4863_v39  ;;  %v4391_v48 = vpop.permute.xlu2 %4390  ;;  %v11425_v25 = vpop.f32.mrf.mxu2 }
 0x805   :  { %6548 = vmatmul.msk.bf16.gmra.mxu2 %vm5413_vm12, %v5379_v43 }
 0x807   :  { %v11419_v61 = vpop.f32.mrf.mxu1 }
 0x808   :  { %v4701_v47 = vpop.permute.xlu1 %4700 }
 0x809   :  { %v4389_v12 = vpop.permute.xlu0 %4388 }
 0x80a   :  { %v4993_v32 = vsel %vm2011_vm7, %v4929_v21, %v4389_v12 }
 0x80b   :  { %v5057_v10 = vsel %vm2141_vm9, %v4993_v32, %v4463_v46 }
 0x80c   :  { %v5121_v24 = vsel %vm2271_vm11, %v5057_v10, %v4557_v6  ;;  %v4629_v14 = vpop.permute.xlu2 %4628  ;;  %v11433_v0 = vpop.f32.mrf.mxu2 }
 0x80f   :  { %v11429_v42 = vpop.f32.mrf.mxu1 }
 0x810   :  { %v4231_v33 = vpop.permute.xlu1 %4230 }
 0x811   :  { %v4627_v49 = vpop.permute.xlu0 %4626  ;;  %v4931_v39 = vsel %vm1881_vm4, %v11166_v34, %v4231_v33 }
 0x812   :  { %v5186_v11 = vsel %vm5126_vm6, %v5121_v24, %v4627_v49  ;;  %v4995_v1 = vsel %vm2011_vm7, %v4931_v39, %v4391_v48  ;;  %v5651_v39 = vsel %vm1881_vm4, %v11116_v40, 0.0 }
 0x813   :  { %v5251_v53 = vsel %vm5191_vm8, %v5186_v11, %v4701_v47 }
 0x814   :  { %v5316_v19 = vsel %vm5256_vm10, %v5251_v53, %v4795_v28  ;;  %v4867_v47 = vpop.permute.xlu2 %4866  ;;  %v11443_v32 = vpop.f32.mrf.mxu2 }
 0x817   :  { %v11436_v6 = vpop.f32.mrf.mxu1 }
 0x818   :  { %v4559_v52 = vpop.permute.xlu1 %4558 }
 0x819   :  { %v4865_v9 = vpop.permute.xlu0 %4864 }
 0x81a   :  { %v5381_v55 = vsel %vm5321_vm13, %v5316_v19, %v4865_v9 }
 0x81b   :  { %6549 = vmatmul.msk.bf16.gmra.mxu2 %vm5413_vm12, %v5381_v55  ;;  %v5652_v55 = vsel %vm1881_vm4, %v11139_v63, 0.0 }
 0x81c   :  { %v4467_v49 = vpop.permute.xlu2 %4466  ;;  %v11449_v24 = vpop.f32.mrf.mxu2 }
 0x81d   :  { %13569 = vst [vmem:[#allocation78_spill] sm:$0xff] %v11449_v24 }
 0x81f   :  { %v11445_v10 = vpop.f32.mrf.mxu1 }
 0x820   :  { %v4797_v60 = vpop.permute.xlu1 %4796 }
 0x821   :  { %v4465_v13 = vpop.permute.xlu0 %4464 }
 0x822   :  { %v5059_v46 = vsel %vm2141_vm9, %v4995_v1, %v4465_v13  ;;  %v5653_v1 = vadd.f32 %v5652_v55, %v5651_v39  ;;  %v5666_v55 = vsel %vm1881_vm4, %v11280_v58, 0.0 }
 0x823   :  { %v5123_v22 = vsel %vm2271_vm11, %v5059_v46, %v4559_v52  ;;  %v5656_v46 = vsel %vm1881_vm4, %v11176_v36, 0.0 }
 0x824   :  { %v5188_v43 = vsel %vm5126_vm6, %v5123_v22, %v4629_v14  ;;  %v4705_v13 = vpop.permute.xlu2 %4704 }
 0x827   :  { %v11453_v19 = vpop.f32.mrf.mxu1 }
 0x828   :  { %v4393_v21 = vpop.permute.xlu1 %4392 }
 0x829   :  { %v4703_v57 = vpop.permute.xlu0 %4702 }
 0x82a   :  { %v5253_v34 = vsel %vm5191_vm8, %v5188_v43, %v4703_v57  ;;  %v11465_v57 = vpop.f32.mrf.mxu2 }
 0x82b   :  { %v5318_v12 = vsel %vm5256_vm10, %v5253_v34, %v4797_v60 }
 0x82c   :  { %v5383_v59 = vsel %vm5321_vm13, %v5318_v12, %v4867_v47  ;;  %v5658_v47 = vsel %vm1881_vm4, %v11196_v15, 0.0 }
 0x82d   :  { %6550 = vmatmul.msk.bf16.gmra.mxu2 %vm5413_vm12, %v5383_v59 }
 0x830   :  { %v4631_v53 = vpop.permute.xlu1 %4630 }
 0x831   :  { %v4233_v28 = vpop.permute.xlu0 %4232 }
 0x832   :  { %v4933_v33 = vsel %vm1881_vm4, %v11225_v4, %v4233_v28  ;;  %v5654_v4 = vsel %vm1881_vm4, %v11159_v35, 0.0  ;;  %v5660_v28 = vsel %vm1881_vm4, %v11213_v27, 0.0 }
 0x833   :  { %v4997_v11 = vsel %vm2011_vm7, %v4933_v33, %v4393_v21  ;;  %v5655_v22 = vadd.f32 %v5654_v4, %v5653_v1  ;;  %v5668_v4 = vsel %vm1881_vm4, %v11300_v50, 0.0  ;;  %v5670_v1 = vsel %vm1881_vm4, %v11315_v26, 0.0 }
 0x834   :  { %v5061_v9 = vsel %vm2141_vm9, %v4997_v11, %v4467_v49  ;;  %v11475_v49 = vpop.f32.mrf.mxu1  ;;  %v5662_v11 = vsel %vm1881_vm4, %v11240_v45, 0.0 }
 0x835   :  { %v5657_v59 = vadd.f32 %v5656_v46, %v5655_v22 }
 0x837   :  { %v5659_v33 = vadd.f32 %v5658_v47, %v5657_v59 }
 0x838   :  { %v4869_v60 = vpop.permute.xlu1 %4868 }
 0x839   :  { %v4561_v48 = vpop.permute.xlu0 %4560 }
 0x83a   :  { %v5125_v52 = vsel %vm2271_vm11, %v5061_v9, %v4561_v48  ;;  %v5664_v48 = vsel %vm1881_vm4, %v11264_v62, 0.0  ;;  %vm6428_vm11 = vcmask 63488  }
 0x83b   :  { %v5190_v14 = vsel %vm5126_vm6, %v5125_v52, %v4631_v53  ;;  %v5661_v53 = vadd.f32 %v5660_v28, %v5659_v33  ;;  %v11481_v52 = vpop.f32.mrf.mxu2 }
 0x83c   :  { %v5255_v43 = vsel %vm5191_vm8, %v5190_v14, %v4705_v13  ;;  %13570 = vst [vmem:[#allocation42_spill] sm:$0xff] %v11481_v52  ;;  %v11487_v13 = vpop.f32.mrf.mxu1 }
 0x83d   :  { %v5663_v9 = vadd.f32 %v5662_v11, %v5661_v53  ;;  %13571 = vst [vmem:[#allocation43_spill] sm:$0xff] %v11487_v13  ;;  %v5680_v11 = vsel %vm1881_vm4, %v11374_v16, 0.0 }
 0x83f   :  { %v5665_v39 = vadd.f32 %v5664_v48, %v5663_v9  ;;  %v5682_v48 = vsel %vm1881_vm4, %v11382_v2, 0.0 }
 0x841   :  { %v4799_v34 = vpop.permute.xlu0 %4798  ;;  %v5667_v14 = vadd.f32 %v5666_v55, %v5665_v39  ;;  %v5684_v39 = vsel %vm1881_vm4, %v11394_v23, 0.0 }
 0x842   :  { %v5320_v12 = vsel %vm5256_vm10, %v5255_v43, %v4799_v34  ;;  %v5674_v43 = vsel %vm1881_vm4, %v11346_v51, 0.0 }
 0x843   :  { %v5385_v21 = vsel %vm5321_vm13, %v5320_v12, %v4869_v60  ;;  %v5669_v46 = vadd.f32 %v5668_v4, %v5667_v14  ;;  %v5672_v60 = vsel %vm1881_vm4, %v11331_v41, 0.0  ;;  %v11495_v47 = vpop.f32.mrf.mxu2  ;;  %v5676_v12 = vsel %vm1881_vm4, %v11356_v54, 0.0 }
 0x844   :  { %6551 = vmatmul.msk.bf16.gmra.mxu2 %vm5413_vm12, %v5385_v21  ;;  %13572 = vst [vmem:[#allocation73_spill] sm:$0xff] %v11495_v47  ;;  %v5678_v21 = vsel %vm1881_vm4, %v11366_v18, 0.0  ;;  %v11501_v33 = vpop.f32.mrf.mxu1  ;;  %v5686_v14 = vsel %vm1881_vm4, %v11402_v5, 0.0 }
 0x845   :  { %v5671_v22 = vadd.f32 %v5670_v1, %v5669_v46 }
 0x847   :  { %v5673_v34 = vadd.f32 %v5672_v60, %v5671_v22  ;;  %v5688_v60 = vsel %vm1881_vm4, %v11412_v37, 0.0 }
 0x849   :  { %v5675_v59 = vadd.f32 %v5674_v43, %v5673_v34  ;;  %v5690_v43 = vsel %vm1881_vm4, %v11419_v61, 0.0 }
 0x84b   :  { %v5677_v28 = vadd.f32 %v5676_v12, %v5675_v59  ;;  %v11507_v55 = vpop.f32.mrf.mxu2  ;;  %v5692_v12 = vsel %vm1881_vm4, %v11429_v42, 0.0 }
 0x84c   :  { %13573 = vst [vmem:[#allocation47_spill] sm:$0xff] %v11507_v55  ;;  %v11513_v46 = vpop.f32.mrf.mxu1 }
 0x84d   :  { %v5679_v53 = vadd.f32 %v5678_v21, %v5677_v28  ;;  %v5694_v28 = vsel %vm1881_vm4, %v11436_v6, 0.0 }
 0x84f   :  { %v5681_v9 = vadd.f32 %v5680_v11, %v5679_v53  ;;  %v5696_v53 = vsel %vm1881_vm4, %v11445_v10, 0.0 }
 0x851   :  { %v5683_v4 = vadd.f32 %v5682_v48, %v5681_v9 }
 0x853   :  { %v5685_v1 = vadd.f32 %v5684_v39, %v5683_v4  ;;  %v11521_v21 = vpop.f32.mrf.mxu2  ;;  %v5698_v39 = vsel %vm1881_vm4, %v11453_v19, 0.0 }
 0x854   :  { %13574 = vst [vmem:[#allocation18_spill] sm:$0xff] %v11521_v21  ;;  %v11527_v9 = vpop.f32.mrf.mxu1 }
 0x855   :  { %v5687_v22 = vadd.f32 %v5686_v14, %v5685_v1  ;;  %v5700_v14 = vsel %vm1881_vm4, %v11475_v49, 0.0 }
 0x857   :  { %v5689_v34 = vadd.f32 %v5688_v60, %v5687_v22  ;;  %v5702_v22 = vsel %vm1881_vm4, %v11487_v13, 0.0 }
 0x859   :  { %v5691_v59 = vadd.f32 %v5690_v43, %v5689_v34  ;;  %v5704_v34 = vsel %vm1881_vm4, %v11501_v33, 0.0 }
 0x85b   :  { %v5693_v11 = vadd.f32 %v5692_v12, %v5691_v59  ;;  %v11533_v60 = vpop.f32.mrf.mxu2 }
 0x85c   :  { %13575 = vst [vmem:[#allocation20_spill] sm:$0xff] %v11533_v60 }
 0x85d   :  { %v5695_v48 = vadd.f32 %v5694_v28, %v5693_v11  ;;  %v5706_v28 = vsel %vm1881_vm4, %v11513_v46, 0.0 }
 0x85f   :  { %v5697_v4 = vadd.f32 %v5696_v53, %v5695_v48  ;;  %v5708_v53 = vsel %vm1881_vm4, %v11527_v9, 0.0 }
 0x861   :  { %v5699_v1 = vadd.f32 %v5698_v39, %v5697_v4 }
 0x863   :  { %v5701_v43 = vadd.f32 %v5700_v14, %v5699_v1  ;;  %v11547_v4 = vpop.f32.mrf.mxu2 }
 0x864   :  { %13577 = vst [vmem:[#allocation23_spill] sm:$0xff] %v11547_v4 }
 0x865   :  { %v5703_v12 = vadd.f32 %v5702_v22, %v5701_v43 }
 0x867   :  { %v5705_v11 = vadd.f32 %v5704_v34, %v5703_v12  ;;  %v5714_v34 = vsel %vm1881_vm4, %v11307_v44, 0.0 }
 0x869   :  { %v5707_v48 = vadd.f32 %v5706_v28, %v5705_v11  ;;  %v5716_v28 = vsel %vm1881_vm4, %v11324_v17, 0.0  ;;  %v5726_v17 = vsel %vm1881_vm4, %v11378_v38, 0.0 }
 0x86b   :  { %v5709_v14 = vadd.f32 %v5708_v53, %v5707_v48  ;;  %v11557_v11 = vpop.f32.mrf.mxu2  ;;  %v5718_v53 = vsel %vm1881_vm4, %v11338_v30, 0.0 }
 0x86c   :  { %13578 = vst [vmem:[#allocation67_spill] sm:$0xff] %v11557_v11 }
 0x871   :  { %v11539_v59 = vpop.f32.mrf.mxu1 }
 0x872   :  { %13576 = vst [vmem:[#allocation81_spill] sm:$0xff] %v11539_v59  ;;  %v5710_v39 = vsel %vm1881_vm4, %v11539_v59, 0.0 }
 0x873   :  { %v5711_v1 = vadd.f32 %v5710_v39, %v5709_v14  ;;  %v5720_v39 = vsel %vm1881_vm4, %v11353_v3, 0.0 }
 0x879   :  { %v11549_v13 = vpop.f32.mrf.mxu1 }
 0x87a   :  { %v5712_v22 = vsel %vm1881_vm4, %v11549_v13, 0.0 }
 0x87b   :  { %v5713_v43 = vadd.f32 %v5712_v22, %v5711_v1  ;;  %v5722_v1 = vsel %vm1881_vm4, %v11361_v31, 0.0 }
 0x87d   :  { %v5715_v12 = vadd.f32 %v5714_v34, %v5713_v43  ;;  %v5724_v43 = vsel %vm1881_vm4, %v11371_v8, 0.0 }
 0x87f   :  { %v5717_v59 = vadd.f32 %v5716_v28, %v5715_v12  ;;  %v11569_v12 = vpop.f32.mrf.mxu2 }
 0x880   :  { %13579 = vst [vmem:[#allocation54_spill] sm:$0xff] %v11569_v12 }
 0x881   :  { %v5719_v48 = vadd.f32 %v5718_v53, %v5717_v59  ;;  %v5728_v59 = vsel %vm1881_vm4, %v11387_v20, 0.0 }
 0x883   :  { %v5721_v14 = vadd.f32 %v5720_v39, %v5719_v48  ;;  %v5730_v48 = vsel %vm1881_vm4, %v11397_v56, 0.0 }
 0x885   :  { %v5723_v22 = vadd.f32 %v5722_v1, %v5721_v14  ;;  %v5732_v14 = vsel %vm1881_vm4, %v11409_v29, 0.0 }
 0x887   :  { %v5725_v34 = vadd.f32 %v5724_v43, %v5723_v22  ;;  %v5734_v22 = vsel %vm1881_vm4, %v11416_v7, 0.0 }
 0x888   :  { %v11579_v38 = vpop.f32.mrf.mxu2 }
 0x889   :  { %v5727_v28 = vadd.f32 %v5726_v17, %v5725_v34  ;;  %13580 = vst [vmem:[#allocation48_spill] sm:$0xff] %v11579_v38  ;;  %v5736_v17 = vsel %vm1881_vm4, %v11425_v25, 0.0 }
 0x88b   :  { %v5729_v53 = vadd.f32 %v5728_v59, %v5727_v28  ;;  %v5738_v28 = vsel %vm1881_vm4, %v11433_v0, 0.0 }
 0x88d   :  { %v5731_v39 = vadd.f32 %v5730_v48, %v5729_v53  ;;  %v5740_v53 = vsel %vm1881_vm4, %v11443_v32, 0.0 }
 0x88f   :  { %v5733_v1 = vadd.f32 %v5732_v14, %v5731_v39  ;;  %v5742_v39 = vsel %vm1881_vm4, %v11449_v24, 0.0 }
 0x890   :  { %v11591_v7 = vpop.f32.mrf.mxu2 }
 0x891   :  { %v5735_v43 = vadd.f32 %v5734_v22, %v5733_v1  ;;  %v5744_v1 = vsel %vm1881_vm4, %v11465_v57, 0.0  ;;  %13581 = vst [vmem:[#allocation49_spill] sm:$0xff] %v11591_v7 }
 0x893   :  { %v5737_v34 = vadd.f32 %v5736_v17, %v5735_v43  ;;  %v5746_v43 = vsel %vm1881_vm4, %v11481_v52, 0.0 }
 0x895   :  { %v5739_v59 = vadd.f32 %v5738_v28, %v5737_v34  ;;  %v5748_v34 = vsel %vm1881_vm4, %v11495_v47, 0.0 }
 0x897   :  { %v5741_v48 = vadd.f32 %v5740_v53, %v5739_v59  ;;  %v5750_v59 = vsel %vm1881_vm4, %v11507_v55, 0.0 }
 0x899   :  { %v5743_v14 = vadd.f32 %v5742_v39, %v5741_v48  ;;  %v5752_v48 = vsel %vm1881_vm4, %v11521_v21, 0.0 }
 0x89b   :  { %v5745_v22 = vadd.f32 %v5744_v1, %v5743_v14  ;;  %v5754_v14 = vsel %vm1881_vm4, %v11533_v60, 0.0 }
 0x89d   :  { %v5747_v17 = vadd.f32 %v5746_v43, %v5745_v22  ;;  %v5756_v22 = vsel %vm1881_vm4, %v11547_v4, 0.0 }
 0x89e   :  { %v11599_v24 = vpop.f32.mrf.mxu2 }
 0x89f   :  { %v5749_v28 = vadd.f32 %v5748_v34, %v5747_v17  ;;  %13582 = vst [vmem:[#allocation8_spill] sm:$0xff] %v11599_v24  ;;  %v5758_v17 = vsel %vm1881_vm4, %v11557_v11, 0.0 }
 0x8a1   :  { %v5751_v53 = vadd.f32 %v5750_v59, %v5749_v28  ;;  %v5760_v59 = vsel %vm1881_vm4, %v11569_v12, 0.0 }
 0x8a3   :  { %v5753_v39 = vadd.f32 %v5752_v48, %v5751_v53  ;;  %v5762_v53 = vsel %vm1881_vm4, %v11579_v38, 0.0 }
 0x8a5   :  { %v5755_v1 = vadd.f32 %v5754_v14, %v5753_v39  ;;  %v5764_v39 = vsel %vm1881_vm4, %v11591_v7, 0.0 }
 0x8a6   :  { %v11605_v52 = vpop.f32.mrf.mxu2 }
 0x8a7   :  { %13583 = vst [vmem:[#allocation44_spill] sm:$0xff] %v11605_v52  ;;  %v5757_v43 = vadd.f32 %v5756_v22, %v5755_v1  ;;  %v5766_v1 = vsel %vm1881_vm4, %v11599_v24, 0.0 }
 0x8a9   :  { %v5759_v34 = vadd.f32 %v5758_v17, %v5757_v43  ;;  %v5768_v43 = vsel %vm1881_vm4, %v11605_v52, 0.0 }
 0x8ab   :  { %v5761_v21 = vadd.f32 %v5760_v59, %v5759_v34 }
 0x8ad   :  { %v5763_v48 = vadd.f32 %v5762_v53, %v5761_v21 }
 0x8af   :  { %v5765_v14 = vadd.f32 %v5764_v39, %v5763_v48 }
 0x8b0   :  { %v5641_v28 = vpop.f32.mrf.mxu2 }
 0x8b1   :  { %v5767_v22 = vadd.f32 %v5766_v1, %v5765_v14  ;;  %v5770_v34 = vsel %vm1881_vm4, %v5641_v28, 0.0 }
 0x8b3   :  { %v5769_v17 = vadd.f32 %v5768_v43, %v5767_v22  ;;  %v13584_v43 = vld [vmem:[#allocation66_spill] sm:$0xff] }
 0x8b5   :  { %v5771_v38 = vadd.f32 %v5770_v34, %v5769_v17 }
 0x8b8   :  { %v5643_v60 = vpop.f32.mrf.mxu2 }
 0x8b9   :  { %v5772_v59 = vsel %vm1881_vm4, %v5643_v60, 0.0 }
 0x8ba   :  { %v5773_v53 = vadd.f32 %v5772_v59, %v5771_v38 }
 0x8c7   :  { %v5646_v11 = vpop.f32.mrf.mxu2 }
 0x8c8   :  { %v5774_v21 = vsel %vm1881_vm4, %v5646_v11, 0.0 }
 0x8c9   :  { %v5775_v7 = vadd.f32 %v5774_v21, %v5773_v53 }
 0x8cf   :  { %v5648_v48 = vpop.f32.mrf.mxu2 }
 0x8d0   :  { %v5776_v39 = vsel %vm1881_vm4, %v5648_v48, 0.0 }
 0x8d1   :  { %v5777_v12 = vadd.f32 %v5776_v39, %v5775_v7 }
 0x8d3   :  { %v5778_v24 = vrot.slane %v5777_v12, 4 }
 0x8d5   :  { %v5779_v14 = vadd.f32 %v5778_v24, %v5777_v12 }
 0x8d7   :  { %v5780_v1 = vrot.slane %v5779_v14, 2 }
 0x8d9   :  { %v5781_v4 = vadd.f32 %v5780_v1, %v5779_v14 }
 0x8db   :  { %v5782_v52 = vrot.slane %v5781_v4, 1 }
 0x8dd   :  { %v5783_v22 = vadd.f32 %v5782_v52, %v5781_v4 }
 0x8df   :  { %v11626_v55 = vmul.f32 %v5783_v22, %v13584_v43 }
 0x8e1   :  { %v11629_v47 = vsub.f32 %v5641_v28, %v11626_v55  ;;  %v11632_v17 = vsub.f32 %v5643_v60, %v11626_v55  ;;  %v11635_v38 = vsub.f32 %v5646_v11, %v11626_v55  ;;  %v11638_v7 = vsub.f32 %v5648_v48, %v11626_v55 }
 0x8e2   :  { %v11642_v24 = vsub.f32 %v11116_v40, %v11626_v55  ;;  %v11646_v52 = vsub.f32 %v11139_v63, %v11626_v55  ;;  %v11650_v4 = vsub.f32 %v11159_v35, %v11626_v55  ;;  %v11654_v60 = vsub.f32 %v11176_v36, %v11626_v55 }
 0x8e3   :  { %13585 = vst [vmem:[#allocation50_spill] sm:$0xff] %v11629_v47  ;;  %v11662_v40 = vsub.f32 %v11196_v15, %v11626_v55  ;;  %v11668_v35 = vsub.f32 %v11213_v27, %v11626_v55  ;;  %v11676_v21 = vsub.f32 %v11240_v45, %v11626_v55  ;;  %v11683_v27 = vsub.f32 %v11264_v62, %v11626_v55 }
 0x8e4   :  { %13586 = vst [vmem:[#allocation46_spill] sm:$0xff] %v11632_v17  ;;  %v5849_v11 = vmul.f32 %v11642_v24, %v11642_v24  ;;  %v5850_v12 = vmul.f32 %v11646_v52, %v11646_v52  ;;  %v5851_v63 = vmul.f32 %v11650_v4, %v11650_v4  ;;  %v5852_v36 = vmul.f32 %v11654_v60, %v11654_v60 }
 0x8e5   :  { %13587 = vst [vmem:[#allocation76_spill] sm:$0xff] %v11635_v38  ;;  %v5853_v15 = vmul.f32 %v11662_v40, %v11662_v40  ;;  %v5854_v39 = vmul.f32 %v11668_v35, %v11668_v35  ;;  %v11690_v45 = vsub.f32 %v11280_v58, %v11626_v55  ;;  %v5855_v22 = vmul.f32 %v11676_v21, %v11676_v21 }
 0x8e6   :  { %13588 = vst [vmem:[#allocation61_spill] sm:$0xff] %v11638_v7  ;;  %v5913_v28 = vsel %vm1881_vm4, %v5849_v11, 0.0  ;;  %v5914_v34 = vsel %vm1881_vm4, %v5850_v12, 0.0  ;;  %v5916_v53 = vsel %vm1881_vm4, %v5851_v63, 0.0  ;;  %v5918_v14 = vsel %vm1881_vm4, %v5852_v36, 0.0 }
 0x8e7   :  { %v5915_v59 = vadd.f32 %v5914_v34, %v5913_v28  ;;  %v5920_v11 = vsel %vm1881_vm4, %v5853_v15, 0.0  ;;  %v11697_v62 = vsub.f32 %v11300_v50, %v11626_v55  ;;  %v5856_v63 = vmul.f32 %v11683_v27, %v11683_v27 }
 0x8e8   :  { %v5922_v36 = vsel %vm1881_vm4, %v5854_v39, 0.0  ;;  %v11704_v58 = vsub.f32 %v11315_v26, %v11626_v55  ;;  %v5857_v34 = vmul.f32 %v11690_v45, %v11690_v45  ;;  %v11711_v50 = vsub.f32 %v11331_v41, %v11626_v55 }
 0x8e9   :  { %v5917_v48 = vadd.f32 %v5916_v53, %v5915_v59  ;;  %v5924_v59 = vsel %vm1881_vm4, %v5855_v22, 0.0  ;;  %v5858_v53 = vmul.f32 %v11697_v62, %v11697_v62  ;;  %v11718_v26 = vsub.f32 %v11346_v51, %v11626_v55 }
 0x8ea   :  { %v11725_v41 = vsub.f32 %v11356_v54, %v11626_v55  ;;  %v11732_v51 = vsub.f32 %v11366_v18, %v11626_v55  ;;  %v11739_v54 = vsub.f32 %v11374_v16, %v11626_v55  ;;  %v11746_v18 = vsub.f32 %v11382_v2, %v11626_v55 }
 0x8eb   :  { %v5919_v1 = vadd.f32 %v5918_v14, %v5917_v48  ;;  %v5926_v48 = vsel %vm1881_vm4, %v5856_v63, 0.0  ;;  %v5859_v14 = vmul.f32 %v11704_v58, %v11704_v58  ;;  %v11753_v16 = vsub.f32 %v11394_v23, %v11626_v55 }
 0x8ec   :  { %v11760_v2 = vsub.f32 %v11402_v5, %v11626_v55  ;;  %v11767_v23 = vsub.f32 %v11412_v37, %v11626_v55  ;;  %v11774_v5 = vsub.f32 %v11419_v61, %v11626_v55  ;;  %v11781_v37 = vsub.f32 %v11429_v42, %v11626_v55 }
 0x8ed   :  { %v5921_v12 = vadd.f32 %v5920_v11, %v5919_v1  ;;  %v5928_v1 = vsel %vm1881_vm4, %v5857_v34, 0.0  ;;  %v5860_v11 = vmul.f32 %v11711_v50, %v11711_v50  ;;  %v11788_v61 = vsub.f32 %v11436_v6, %v11626_v55 }
 0x8ee   :  { %v11795_v42 = vsub.f32 %v11445_v10, %v11626_v55  ;;  %v11802_v6 = vsub.f32 %v11453_v19, %v11626_v55  ;;  %v11809_v10 = vsub.f32 %v11475_v49, %v11626_v55  ;;  %v11823_v49 = vsub.f32 %v11501_v33, %v11626_v55 }
 0x8ef   :  { %v5923_v28 = vadd.f32 %v5922_v36, %v5921_v12  ;;  %v5930_v12 = vsel %vm1881_vm4, %v5858_v53, 0.0  ;;  %v5861_v36 = vmul.f32 %v11718_v26, %v11718_v26  ;;  %v11837_v33 = vsub.f32 %v11527_v9, %v11626_v55 }
 0x8f0   :  { %v11851_v9 = vsub.f32 %v11549_v13, %v11626_v55 }
 0x8f1   :  { %v5925_v15 = vadd.f32 %v5924_v59, %v5923_v28  ;;  %v5932_v28 = vsel %vm1881_vm4, %v5859_v14, 0.0  ;;  %v5862_v59 = vmul.f32 %v11725_v41, %v11725_v41 }
 0x8f3   :  { %v5927_v39 = vadd.f32 %v5926_v48, %v5925_v15  ;;  %v5934_v15 = vsel %vm1881_vm4, %v5860_v11, 0.0  ;;  %v5863_v48 = vmul.f32 %v11732_v51, %v11732_v51 }
 0x8f5   :  { %v5929_v22 = vadd.f32 %v5928_v1, %v5927_v39  ;;  %v5936_v39 = vsel %vm1881_vm4, %v5861_v36, 0.0  ;;  %v5864_v1 = vmul.f32 %v11739_v54, %v11739_v54 }
 0x8f7   :  { %v5931_v63 = vadd.f32 %v5930_v12, %v5929_v22  ;;  %v5938_v22 = vsel %vm1881_vm4, %v5862_v59, 0.0  ;;  %v5865_v12 = vmul.f32 %v11746_v18, %v11746_v18 }
 0x8f9   :  { %v5933_v34 = vadd.f32 %v5932_v28, %v5931_v63  ;;  %v5940_v63 = vsel %vm1881_vm4, %v5863_v48, 0.0  ;;  %v5866_v28 = vmul.f32 %v11753_v16, %v11753_v16 }
 0x8fb   :  { %v5935_v53 = vadd.f32 %v5934_v15, %v5933_v34  ;;  %v5942_v34 = vsel %vm1881_vm4, %v5864_v1, 0.0  ;;  %v5867_v15 = vmul.f32 %v11760_v2, %v11760_v2 }
 0x8fd   :  { %v5937_v14 = vadd.f32 %v5936_v39, %v5935_v53  ;;  %v5944_v53 = vsel %vm1881_vm4, %v5865_v12, 0.0  ;;  %v5868_v39 = vmul.f32 %v11767_v23, %v11767_v23 }
 0x8ff   :  { %v5939_v11 = vadd.f32 %v5938_v22, %v5937_v14  ;;  %v5946_v14 = vsel %vm1881_vm4, %v5866_v28, 0.0  ;;  %v5869_v22 = vmul.f32 %v11774_v5, %v11774_v5 }
 0x901   :  { %v5941_v36 = vadd.f32 %v5940_v63, %v5939_v11  ;;  %v5948_v11 = vsel %vm1881_vm4, %v5867_v15, 0.0  ;;  %v5870_v63 = vmul.f32 %v11781_v37, %v11781_v37 }
 0x903   :  { %v5943_v59 = vadd.f32 %v5942_v34, %v5941_v36  ;;  %v5950_v36 = vsel %vm1881_vm4, %v5868_v39, 0.0  ;;  %v5871_v34 = vmul.f32 %v11788_v61, %v11788_v61 }
 0x905   :  { %v5945_v48 = vadd.f32 %v5944_v53, %v5943_v59  ;;  %v5952_v59 = vsel %vm1881_vm4, %v5869_v22, 0.0  ;;  %v5872_v53 = vmul.f32 %v11795_v42, %v11795_v42  ;;  %v5956_v22 = vsel %vm1881_vm4, %v5871_v34, 0.0 }
 0x907   :  { %v5947_v1 = vadd.f32 %v5946_v14, %v5945_v48  ;;  %v5954_v48 = vsel %vm1881_vm4, %v5870_v63, 0.0  ;;  %v13589_v14 = vld [vmem:[#allocation43_spill] sm:$0xff]  ;;  %v5958_v63 = vsel %vm1881_vm4, %v5872_v53, 0.0 }
 0x908   :  { %v11816_v19 = vsub.f32 %v13589_v14, %v11626_v55  ;;  %v13590_v14 = vld [vmem:[#allocation81_spill] sm:$0xff] }
 0x909   :  { %v5949_v12 = vadd.f32 %v5948_v11, %v5947_v1  ;;  %v5873_v1 = vmul.f32 %v11802_v6, %v11802_v6 }
 0x90b   :  { %v5951_v28 = vadd.f32 %v5950_v36, %v5949_v12  ;;  %v5874_v12 = vmul.f32 %v11809_v10, %v11809_v10  ;;  %v5960_v34 = vsel %vm1881_vm4, %v5873_v1, 0.0 }
 0x90d   :  { %v5953_v15 = vadd.f32 %v5952_v59, %v5951_v28  ;;  %v11830_v28 = vsub.f32 %v11513_v46, %v11626_v55  ;;  %v5875_v59 = vmul.f32 %v11816_v19, %v11816_v19  ;;  %v5962_v53 = vsel %vm1881_vm4, %v5874_v12, 0.0 }
 0x90e   :  { %v11844_v46 = vsub.f32 %v13590_v14, %v11626_v55  ;;  %v5880_v14 = vmul.f32 %v11851_v9, %v11851_v9 }
 0x90f   :  { %v5955_v39 = vadd.f32 %v5954_v48, %v5953_v15  ;;  %v5876_v48 = vmul.f32 %v11823_v49, %v11823_v49  ;;  %v5964_v1 = vsel %vm1881_vm4, %v5875_v59, 0.0 }
 0x911   :  { %v5957_v11 = vadd.f32 %v5956_v22, %v5955_v39  ;;  %v5877_v22 = vmul.f32 %v11830_v28, %v11830_v28  ;;  %v5966_v12 = vsel %vm1881_vm4, %v5876_v48, 0.0 }
 0x913   :  { %v5959_v36 = vadd.f32 %v5958_v63, %v5957_v11  ;;  %v5878_v63 = vmul.f32 %v11837_v33, %v11837_v33  ;;  %v5968_v59 = vsel %vm1881_vm4, %v5877_v22, 0.0 }
 0x915   :  { %v5961_v15 = vadd.f32 %v5960_v34, %v5959_v36  ;;  %v11858_v34 = vsub.f32 %v11307_v44, %v11626_v55  ;;  %v5970_v48 = vsel %vm1881_vm4, %v5878_v63, 0.0  ;;  %v11872_v44 = vsub.f32 %v11338_v30, %v11626_v55 }
 0x916   :  { %v5974_v63 = vsel %vm1881_vm4, %v5880_v14, 0.0  ;;  %v11886_v30 = vsub.f32 %v11361_v31, %v11626_v55 }
 0x917   :  { %v5963_v39 = vadd.f32 %v5962_v53, %v5961_v15  ;;  %v5879_v15 = vmul.f32 %v11844_v46, %v11844_v46 }
 0x919   :  { %v5965_v11 = vadd.f32 %v5964_v1, %v5963_v39  ;;  %v13591_v39 = vld [vmem:[#allocation17_spill] sm:$0xff]  ;;  %v5972_v22 = vsel %vm1881_vm4, %v5879_v15, 0.0 }
 0x91a   :  { %v11865_v13 = vsub.f32 %v13591_v39, %v11626_v55  ;;  %v5883_v39 = vmul.f32 %v11872_v44, %v11872_v44 }
 0x91b   :  { %v5967_v36 = vadd.f32 %v5966_v12, %v5965_v11  ;;  %v5881_v11 = vmul.f32 %v11858_v34, %v11858_v34 }
 0x91d   :  { %v5969_v53 = vadd.f32 %v5968_v59, %v5967_v36  ;;  %v11879_v36 = vsub.f32 %v11353_v3, %v11626_v55  ;;  %v5882_v59 = vmul.f32 %v11865_v13, %v11865_v13  ;;  %v5976_v15 = vsel %vm1881_vm4, %v5881_v11, 0.0 }
 0x91e   :  { %v11893_v3 = vsub.f32 %v11371_v8, %v11626_v55  ;;  %v5980_v11 = vsel %vm1881_vm4, %v5883_v39, 0.0  ;;  %v11907_v8 = vsub.f32 %v11387_v20, %v11626_v55  ;;  %v11921_v20 = vsub.f32 %v11409_v29, %v11626_v55 }
 0x91f   :  { %v5971_v1 = vadd.f32 %v5970_v48, %v5969_v53  ;;  %v5978_v14 = vsel %vm1881_vm4, %v5882_v59, 0.0  ;;  %v11935_v29 = vsub.f32 %v11425_v25, %v11626_v55  ;;  %v11949_v25 = vsub.f32 %v11443_v32, %v11626_v55 }
 0x920   :  { %v11963_v32 = vsub.f32 %v11465_v57, %v11626_v55 }
 0x921   :  { %v5973_v12 = vadd.f32 %v5972_v22, %v5971_v1  ;;  %v5884_v1 = vmul.f32 %v11879_v36, %v11879_v36  ;;  %13596 = vst [vmem:[#allocation29_spill] sm:$0xff] %v11935_v29 }
 0x922   :  { %13598 = vst [vmem:[#allocation84_spill] sm:$0xff] %v11949_v25 }
 0x923   :  { %v5975_v53 = vadd.f32 %v5974_v63, %v5973_v12  ;;  %v13592_v12 = vld [vmem:[#allocation68_spill] sm:$0xff]  ;;  %v5885_v63 = vmul.f32 %v11886_v30, %v11886_v30  ;;  %v5982_v59 = vsel %vm1881_vm4, %v5884_v1, 0.0  ;;  %13601 = vst [vmem:[#allocation70_spill] sm:$0xff] %v11963_v32 }
 0x924   :  { %v11900_v31 = vsub.f32 %v13592_v12, %v11626_v55 }
 0x925   :  { %v5977_v48 = vadd.f32 %v5976_v15, %v5975_v53  ;;  %v5886_v15 = vmul.f32 %v11893_v3, %v11893_v3  ;;  %v5984_v39 = vsel %vm1881_vm4, %v5885_v63, 0.0 }
 0x926   :  { %13593 = vst [vmem:[#allocation56_spill] sm:$0xff] %v11900_v31  ;;  %v5887_v12 = vmul.f32 %v11900_v31, %v11900_v31 }
 0x927   :  { %v5979_v22 = vadd.f32 %v5978_v14, %v5977_v48  ;;  %v11914_v14 = vsub.f32 %v11397_v56, %v11626_v55  ;;  %v5986_v1 = vsel %vm1881_vm4, %v5886_v15, 0.0 }
 0x928   :  { %v5988_v63 = vsel %vm1881_vm4, %v5887_v12, 0.0 }
 0x929   :  { %v5981_v53 = vadd.f32 %v5980_v11, %v5979_v22  ;;  %v5888_v11 = vmul.f32 %v11907_v8, %v11907_v8  ;;  %v5889_v31 = vmul.f32 %v11914_v14, %v11914_v14 }
 0x92b   :  { %v5983_v48 = vadd.f32 %v5982_v59, %v5981_v53  ;;  %v13594_v59 = vld [vmem:[#allocation69_spill] sm:$0xff]  ;;  %v5990_v15 = vsel %vm1881_vm4, %v5888_v11, 0.0  ;;  %v5992_v12 = vsel %vm1881_vm4, %v5889_v31, 0.0 }
 0x92c   :  { %v11928_v56 = vsub.f32 %v13594_v59, %v11626_v55 }
 0x92d   :  { %v5985_v22 = vadd.f32 %v5984_v39, %v5983_v48  ;;  %v5890_v39 = vmul.f32 %v11921_v20, %v11921_v20 }
 0x92e   :  { %13595 = vst [vmem:[#allocation64_spill] sm:$0xff] %v11928_v56  ;;  %v5891_v59 = vmul.f32 %v11928_v56, %v11928_v56 }
 0x92f   :  { %v5987_v53 = vadd.f32 %v5986_v1, %v5985_v22  ;;  %v11942_v1 = vsub.f32 %v11433_v0, %v11626_v55  ;;  %v5994_v11 = vsel %vm1881_vm4, %v5890_v39, 0.0 }
 0x930   :  { %v5996_v31 = vsel %vm1881_vm4, %v5891_v59, 0.0 }
 0x931   :  { %v5989_v48 = vadd.f32 %v5988_v63, %v5987_v53  ;;  %13597 = vst [vmem:[#allocation11_spill] sm:$0xff] %v11942_v1  ;;  %v5892_v63 = vmul.f32 %v11935_v29, %v11935_v29  ;;  %v5893_v56 = vmul.f32 %v11942_v1, %v11942_v1 }
 0x933   :  { %v5991_v22 = vadd.f32 %v5990_v15, %v5989_v48  ;;  %v13599_v15 = vld [vmem:[#allocation78_spill] sm:$0xff]  ;;  %v5998_v39 = vsel %vm1881_vm4, %v5892_v63, 0.0  ;;  %v6000_v59 = vsel %vm1881_vm4, %v5893_v56, 0.0 }
 0x934   :  { %v11956_v0 = vsub.f32 %v13599_v15, %v11626_v55 }
 0x935   :  { %v5993_v53 = vadd.f32 %v5992_v12, %v5991_v22  ;;  %v5894_v12 = vmul.f32 %v11949_v25, %v11949_v25  ;;  %v5896_v25 = vmul.f32 %v11963_v32, %v11963_v32 }
 0x936   :  { %13600 = vst [vmem:[#allocation77_spill] sm:$0xff] %v11956_v0  ;;  %v5895_v1 = vmul.f32 %v11956_v0, %v11956_v0 }
 0x937   :  { %v5995_v48 = vadd.f32 %v5994_v11, %v5993_v53  ;;  %v13602_v11 = vld [vmem:[#allocation42_spill] sm:$0xff]  ;;  %v6002_v63 = vsel %vm1881_vm4, %v5894_v12, 0.0  ;;  %v6006_v12 = vsel %vm1881_vm4, %v5896_v25, 0.0 }
 0x938   :  { %v11970_v15 = vsub.f32 %v13602_v11, %v11626_v55  ;;  %v6004_v56 = vsel %vm1881_vm4, %v5895_v1, 0.0 }
 0x939   :  { %v5997_v22 = vadd.f32 %v5996_v31, %v5995_v48  ;;  %v13604_v31 = vld [vmem:[#allocation73_spill] sm:$0xff] }
 0x93a   :  { %13603 = vst [vmem:[#allocation82_spill] sm:$0xff] %v11970_v15  ;;  %v11977_v57 = vsub.f32 %v13604_v31, %v11626_v55  ;;  %v5897_v0 = vmul.f32 %v11970_v15, %v11970_v15 }
 0x93b   :  { %v5999_v53 = vadd.f32 %v5998_v39, %v5997_v22  ;;  %v13606_v39 = vld [vmem:[#allocation47_spill] sm:$0xff] }
 0x93c   :  { %13605 = vst [vmem:[#allocation27_spill] sm:$0xff] %v11977_v57  ;;  %v11984_v11 = vsub.f32 %v13606_v39, %v11626_v55  ;;  %v5898_v32 = vmul.f32 %v11977_v57, %v11977_v57  ;;  %v6008_v1 = vsel %vm1881_vm4, %v5897_v0, 0.0 }
 0x93d   :  { %v6001_v48 = vadd.f32 %v6000_v59, %v5999_v53  ;;  %v13608_v59 = vld [vmem:[#allocation18_spill] sm:$0xff] }
 0x93e   :  { %13607 = vst [vmem:[#allocation60_spill] sm:$0xff] %v11984_v11  ;;  %v11991_v31 = vsub.f32 %v13608_v59, %v11626_v55  ;;  %v5899_v15 = vmul.f32 %v11984_v11, %v11984_v11  ;;  %v6010_v25 = vsel %vm1881_vm4, %v5898_v32, 0.0 }
 0x93f   :  { %v6003_v22 = vadd.f32 %v6002_v63, %v6001_v48  ;;  %v13610_v63 = vld [vmem:[#allocation20_spill] sm:$0xff] }
 0x940   :  { %13609 = vst [vmem:[#allocation63_spill] sm:$0xff] %v11991_v31  ;;  %v11998_v39 = vsub.f32 %v13610_v63, %v11626_v55  ;;  %v5900_v57 = vmul.f32 %v11991_v31, %v11991_v31  ;;  %v6012_v0 = vsel %vm1881_vm4, %v5899_v15, 0.0 }
 0x941   :  { %v6005_v53 = vadd.f32 %v6004_v56, %v6003_v22  ;;  %v13612_v56 = vld [vmem:[#allocation23_spill] sm:$0xff] }
 0x942   :  { %13611 = vst [vmem:[#allocation5_spill] sm:$0xff] %v11998_v39  ;;  %v12005_v59 = vsub.f32 %v13612_v56, %v11626_v55  ;;  %v5901_v11 = vmul.f32 %v11998_v39, %v11998_v39  ;;  %v6014_v32 = vsel %vm1881_vm4, %v5900_v57, 0.0 }
 0x943   :  { %v6007_v48 = vadd.f32 %v6006_v12, %v6005_v53  ;;  %v13614_v12 = vld [vmem:[#allocation67_spill] sm:$0xff] }
 0x944   :  { %13613 = vst [vmem:[#allocation53_spill] sm:$0xff] %v12005_v59  ;;  %v12012_v63 = vsub.f32 %v13614_v12, %v11626_v55  ;;  %v5902_v31 = vmul.f32 %v12005_v59, %v12005_v59  ;;  %v6016_v15 = vsel %vm1881_vm4, %v5901_v11, 0.0 }
 0x945   :  { %v6009_v22 = vadd.f32 %v6008_v1, %v6007_v48  ;;  %v13616_v1 = vld [vmem:[#allocation54_spill] sm:$0xff] }
 0x946   :  { %13615 = vst [vmem:[#allocation59_spill] sm:$0xff] %v12012_v63  ;;  %v12019_v56 = vsub.f32 %v13616_v1, %v11626_v55  ;;  %v5903_v39 = vmul.f32 %v12012_v63, %v12012_v63  ;;  %v6018_v57 = vsel %vm1881_vm4, %v5902_v31, 0.0 }
 0x947   :  { %v6011_v53 = vadd.f32 %v6010_v25, %v6009_v22  ;;  %v13618_v25 = vld [vmem:[#allocation48_spill] sm:$0xff] }
 0x948   :  { %13617 = vst [vmem:[#allocation79_spill] sm:$0xff] %v12019_v56  ;;  %v12026_v12 = vsub.f32 %v13618_v25, %v11626_v55  ;;  %v5904_v59 = vmul.f32 %v12019_v56, %v12019_v56  ;;  %v6020_v11 = vsel %vm1881_vm4, %v5903_v39, 0.0 }
 0x949   :  { %v6013_v48 = vadd.f32 %v6012_v0, %v6011_v53  ;;  %v13619_v0 = vld [vmem:[#allocation49_spill] sm:$0xff] }
 0x94a   :  { %v12033_v1 = vsub.f32 %v13619_v0, %v11626_v55  ;;  %v5905_v63 = vmul.f32 %v12026_v12, %v12026_v12  ;;  %v6022_v31 = vsel %vm1881_vm4, %v5904_v59, 0.0  ;;  %v5910_v59 = vmul.f32 %v11632_v17, %v11632_v17 }
 0x94b   :  { %v6015_v22 = vadd.f32 %v6014_v32, %v6013_v48  ;;  %v13621_v32 = vld [vmem:[#allocation8_spill] sm:$0xff] }
 0x94c   :  { %13620 = vst [vmem:[#allocation6_spill] sm:$0xff] %v12033_v1  ;;  %v12040_v25 = vsub.f32 %v13621_v32, %v11626_v55  ;;  %v5906_v56 = vmul.f32 %v12033_v1, %v12033_v1  ;;  %v6024_v32 = vsel %vm1881_vm4, %v5905_v63, 0.0  ;;  %v5911_v63 = vmul.f32 %v11635_v38, %v11635_v38 }
 0x94d   :  { %v6017_v53 = vadd.f32 %v6016_v15, %v6015_v22  ;;  %v13622_v15 = vld [vmem:[#allocation44_spill] sm:$0xff] }
 0x94e   :  { %v12047_v0 = vsub.f32 %v13622_v15, %v11626_v55  ;;  %v5909_v55 = vmul.f32 %v11629_v47, %v11629_v47 }
 0x94f   :  { %v6019_v48 = vadd.f32 %v6018_v57, %v6017_v53  ;;  %v5907_v57 = vmul.f32 %v12040_v25, %v12040_v25 }
 0x950   :  { %13623 = vst [vmem:[#allocation62_spill] sm:$0xff] %v12047_v0  ;;  %v5908_v39 = vmul.f32 %v12047_v0, %v12047_v0 }
 0x951   :  { %v6021_v22 = vadd.f32 %v6020_v11, %v6019_v48  ;;  %v6026_v48 = vsel %vm1881_vm4, %v5906_v56, 0.0  ;;  %v6028_v15 = vsel %vm1881_vm4, %v5907_v57, 0.0  ;;  %v6034_v56 = vsel %vm1881_vm4, %v5910_v59, 0.0 }
 0x952   :  { %v6036_v57 = vsel %vm1881_vm4, %v5911_v63, 0.0 }
 0x953   :  { %v6023_v53 = vadd.f32 %v6022_v31, %v6021_v22  ;;  %v6030_v22 = vsel %vm1881_vm4, %v5908_v39, 0.0 }
 0x955   :  { %v6025_v29 = vadd.f32 %v6024_v32, %v6023_v53  ;;  %v6032_v53 = vsel %vm1881_vm4, %v5909_v55, 0.0 }
 0x957   :  { %v6027_v11 = vadd.f32 %v6026_v48, %v6025_v29  ;;  %v5912_v29 = vmul.f32 %v11638_v7, %v11638_v7 }
 0x959   :  { %v6029_v1 = vadd.f32 %v6028_v15, %v6027_v11  ;;  %v6038_v15 = vsel %vm1881_vm4, %v5912_v29, 0.0 }
 0x95b   :  { %v6031_v31 = vadd.f32 %v6030_v22, %v6029_v1 }
 0x95d   :  { %v6033_v32 = vadd.f32 %v6032_v53, %v6031_v31 }
 0x95f   :  { %v6035_v48 = vadd.f32 %v6034_v56, %v6033_v32 }
 0x961   :  { %v6037_v11 = vadd.f32 %v6036_v57, %v6035_v48  ;;  %v13626_v48 = vld [vmem:[#allocation64_spill] sm:$0xff]  ;;  %v13627_v57 = vld [vmem:[#allocation29_spill] sm:$0xff] }
 0x963   :  { %v6039_v17 = vadd.f32 %v6038_v15, %v6037_v11  ;;  %v13629_v15 = vld [vmem:[#allocation11_spill] sm:$0xff] }
 0x965   :  { %v6040_v39 = vrot.slane %v6039_v17, 4 }
 0x967   :  { %v6041_v1 = vadd.f32 %v6040_v39, %v6039_v17  ;;  %v13631_v39 = vld [vmem:[#allocation84_spill] sm:$0xff] }
 0x969   :  { %v6042_v22 = vrot.slane %v6041_v1, 2 }
 0x96b   :  { %v6043_v47 = vadd.f32 %v6042_v22, %v6041_v1  ;;  %v13633_v1 = vld [vmem:[#allocation77_spill] sm:$0xff]  ;;  %v13635_v22 = vld [vmem:[#allocation70_spill] sm:$0xff] }
 0x96d   :  { %v6044_v38 = vrot.slane %v6043_v47, 1 }
 0x96f   :  { %v6045_v0 = vadd.f32 %v6044_v38, %v6043_v47 }
 0x971   :  { %v6046_v55 = vmul.f32 %v6045_v0, %v13584_v43  ;;  %v13624_v0 = vld [vmem:[#allocation56_spill] sm:$0xff] }
 0x973   :  { %v6047_v31 = vadd.f32 1e-05, %v6046_v55 }
 0x975   :  { %6584 = vrsqrt.f32 %v6047_v31  ;;  %vm6054_vm7 = vweird.f32 %v6047_v31 }
 0x97b   :  { %v6585_v53 = vpop.eup %6584 }
 0x97c   :  { %v6049_v7 = vmul.f32 %v6585_v53, %v6047_v31  ;;  %vm6055_vm2 = vweird.f32 %v6585_v53  ;;  %v13637_v31 = vld [vmem:[#allocation82_spill] sm:$0xff] }
 0x97d   :  { %vm6056_vm9 = vmor %vm6054_vm7, %vm6055_vm2 }
 0x97e   :  { %v6050_v59 = vmul.f32 %v6585_v53, %v6049_v7 }
 0x980   :  { %v6051_v32 = vmul.f32 0.5, %v6050_v59  ;;  %v13639_v59 = vld [vmem:[#allocation27_spill] sm:$0xff] }
 0x982   :  { %v6052_v56 = vsub.f32 1.5, %v6051_v32 }
 0x984   :  { %v6053_v63 = vmul.f32 %v6585_v53, %v6052_v56  ;;  %v13641_v56 = vld [vmem:[#allocation60_spill] sm:$0xff] }
 0x986   :  { %v12073_v29 = vsel %vm6056_vm9, %v6585_v53, %v6053_v63 }
 0x987   :  { %v12077_v17 = vmul.f32 %v12073_v29, %v11642_v24  ;;  %v12081_v47 = vmul.f32 %v12073_v29, %v11646_v52  ;;  %v12085_v43 = vmul.f32 %v12073_v29, %v11650_v4  ;;  %v12089_v38 = vmul.f32 %v12073_v29, %v11654_v60 }
 0x988   :  { %v12093_v7 = vmul.f32 %v12073_v29, %v11662_v40  ;;  %v12097_v24 = vmul.f32 %v12073_v29, %v11668_v35  ;;  %v12101_v52 = vmul.f32 %v12073_v29, %v11676_v21  ;;  %v12105_v4 = vmul.f32 %v12073_v29, %v11683_v27 }
 0x989   :  { %v12109_v60 = vmul.f32 %v12073_v29, %v11690_v45  ;;  %v12113_v40 = vmul.f32 %v12073_v29, %v11697_v62  ;;  %v12117_v35 = vmul.f32 %v12073_v29, %v11704_v58  ;;  %v12121_v21 = vmul.f32 %v12073_v29, %v11711_v50 }
 0x98a   :  { %v12125_v27 = vmul.f32 %v12073_v29, %v11718_v26  ;;  %v12129_v45 = vmul.f32 %v12073_v29, %v11725_v41  ;;  %v12133_v62 = vmul.f32 %v12073_v29, %v11732_v51  ;;  %v12137_v58 = vmul.f32 %v12073_v29, %v11739_v54 }
 0x98b   :  { %v12141_v50 = vmul.f32 %v12073_v29, %v11746_v18  ;;  %v12145_v26 = vmul.f32 %v12073_v29, %v11753_v16  ;;  %v12149_v41 = vmul.f32 %v12073_v29, %v11760_v2  ;;  %v12153_v51 = vmul.f32 %v12073_v29, %v11767_v23 }
 0x98c   :  { %v12157_v54 = vmul.f32 %v12073_v29, %v11774_v5  ;;  %v12161_v18 = vmul.f32 %v12073_v29, %v11781_v37  ;;  %v12165_v16 = vmul.f32 %v12073_v29, %v11788_v61  ;;  %v12169_v2 = vmul.f32 %v12073_v29, %v11795_v42 }
 0x98d   :  { %v12173_v23 = vmul.f32 %v12073_v29, %v11802_v6  ;;  %v12177_v5 = vmul.f32 %v12073_v29, %v11809_v10  ;;  %v12181_v37 = vmul.f32 %v12073_v29, %v11816_v19  ;;  %v12185_v61 = vmul.f32 %v12073_v29, %v11823_v49 }
 0x98e   :  { %v12189_v42 = vmul.f32 %v12073_v29, %v11830_v28  ;;  %v12193_v6 = vmul.f32 %v12073_v29, %v11837_v33  ;;  %v12197_v10 = vmul.f32 %v12073_v29, %v11844_v46  ;;  %v12201_v19 = vmul.f32 %v12073_v29, %v11851_v9 }
 0x98f   :  { %v12205_v49 = vmul.f32 %v12073_v29, %v11858_v34  ;;  %v12209_v28 = vmul.f32 %v12073_v29, %v11865_v13  ;;  %v12213_v33 = vmul.f32 %v12073_v29, %v11872_v44  ;;  %v12217_v46 = vmul.f32 %v12073_v29, %v11879_v36 }
 0x990   :  { %v12221_v9 = vmul.f32 %v12073_v29, %v11886_v30  ;;  %v12225_v34 = vmul.f32 %v12073_v29, %v11893_v3  ;;  %v12229_v13 = vmul.f32 %v12073_v29, %v13624_v0  ;;  %v12233_v44 = vmul.f32 %v12073_v29, %v11907_v8  ;;  %v13643_v0 = vld [vmem:[#allocation63_spill] sm:$0xff] }
 0x991   :  { %v12237_v36 = vmul.f32 %v12073_v29, %v11914_v14  ;;  %v12241_v30 = vmul.f32 %v12073_v29, %v11921_v20  ;;  %v12245_v3 = vmul.f32 %v12073_v29, %v13626_v48  ;;  %v12249_v11 = vmul.f32 %v12073_v29, %v13627_v57  ;;  %v13645_v57 = vld [vmem:[#allocation5_spill] sm:$0xff] }
 0x992   :  { %v12253_v8 = vmul.f32 %v12073_v29, %v13629_v15  ;;  %v12257_v14 = vmul.f32 %v12073_v29, %v13631_v39  ;;  %v12261_v20 = vmul.f32 %v12073_v29, %v13633_v1  ;;  %v12265_v55 = vmul.f32 %v12073_v29, %v13635_v22  ;;  %v13646_v39 = vld [vmem:[#allocation53_spill] sm:$0xff]  ;;  %v13648_v22 = vld [vmem:[#allocation59_spill] sm:$0xff] }
 0x993   :  { %13625 = vst [vmem:[#allocation65_spill] sm:$0xff] %v12241_v30  ;;  %v12269_v53 = vmul.f32 %v12073_v29, %v13637_v31  ;;  %v12273_v32 = vmul.f32 %v12073_v29, %v13639_v59  ;;  %v12277_v63 = vmul.f32 %v12073_v29, %v13641_v56  ;;  %v12281_v48 = vmul.f32 %v12073_v29, %v13643_v0  ;;  %v13650_v59 = vld [vmem:[#allocation79_spill] sm:$0xff] }
 0x994   :  { %13628 = vst [vmem:[#allocation55_spill] sm:$0xff] %v12249_v11  ;;  %v12285_v15 = vmul.f32 %v12073_v29, %v13645_v57  ;;  %v12289_v1 = vmul.f32 %v12073_v29, %v13646_v39  ;;  %v12293_v31 = vmul.f32 %v12073_v29, %v13648_v22  ;;  %v12297_v56 = vmul.f32 %v12073_v29, %v13650_v59 }
 0x995   :  { %13630 = vst [vmem:[#allocation74_spill] sm:$0xff] %v12253_v8  ;;  %v12301_v0 = vmul.f32 %v12073_v29, %v12026_v12  ;;  %v12309_v39 = vmul.f32 %v12073_v29, %v12040_v25 }
 0x996   :  { %13632 = vst [vmem:[#allocation26_spill] sm:$0xff] %v12257_v14 }
 0x997   :  { %13634 = vst [vmem:[#allocation83_spill] sm:$0xff] %v12261_v20 }
 0x998   :  { %13636 = vst [vmem:[#allocation36_spill] sm:$0xff] %v12265_v55 }
 0x999   :  { %13638 = vst [vmem:[#allocation58_spill] sm:$0xff] %v12269_v53 }
 0x99a   :  { %13640 = vst [vmem:[#allocation75_spill] sm:$0xff] %v12273_v32 }
 0x99b   :  { %13642 = vst [vmem:[#allocation80_spill] sm:$0xff] %v12277_v63 }
 0x99c   :  { %13644 = vst [vmem:[#allocation4_spill] sm:$0xff] %v12281_v48  ;;  %v13653_v48 = vld [vmem:[#allocation6_spill] sm:$0xff] }
 0x99d   :  { %13647 = vst [vmem:[#allocation72_spill] sm:$0xff] %v12289_v1  ;;  %v12305_v57 = vmul.f32 %v12073_v29, %v13653_v48  ;;  %v13656_v1 = vld [vmem:[#allocation62_spill] sm:$0xff] }
 0x99e   :  { %13649 = vst [vmem:[#allocation51_spill] sm:$0xff] %v12293_v31  ;;  %v12313_v22 = vmul.f32 %v12073_v29, %v13656_v1  ;;  %v13658_v31 = vld [vmem:[#allocation50_spill] sm:$0xff] }
 0x99f   :  { %13651 = vst [vmem:[#allocation52_spill] sm:$0xff] %v12297_v56  ;;  %v12317_v59 = vmul.f32 %v12073_v29, %v13658_v31  ;;  %v13660_v56 = vld [vmem:[#allocation46_spill] sm:$0xff]  ;;  %v13676_v31 = vmax.f32 %v12077_v17, 0.0  ;;  %v13680_v17 = vmax.f32 %v12097_v24, 0.0 }
 0x9a0   :  { %13652 = vst [vmem:[#allocation30_spill] sm:$0xff] %v12301_v0  ;;  %v12321_v12 = vmul.f32 %v12073_v29, %v13660_v56  ;;  %v13662_v0 = vld [vmem:[#allocation76_spill] sm:$0xff] }
 0x9a1   :  { %13654 = vst [vmem:[#allocation24_spill] sm:$0xff] %v12305_v57  ;;  %v12325_v48 = vmul.f32 %v12073_v29, %v13662_v0  ;;  %v13664_v57 = vld [vmem:[#allocation61_spill] sm:$0xff] }
 0x9a2   :  { %13655 = vst [vmem:[#allocation7_spill] sm:$0xff] %v12309_v39  ;;  %v12329_v25 = vmul.f32 %v12073_v29, %v13664_v57  ;;  %v6132_v57 = vmax.f32 %v12117_v35, 0.0  ;;  %v13679_v35 = vmax.f32 %v12093_v7, 0.0  ;;  %v13683_v7 = vmax.f32 %v12113_v40, 0.0 }
 0x9a3   :  { %13657 = vst [vmem:[#allocation45_spill] sm:$0xff] %v12313_v22  ;;  %v6124_v22 = vmax.f32 %v12085_v43, 0.0  ;;  %v13675_v39 = vmov %v12325_v48 }
 0x9a4   :  { %13659 = vst [vmem:[#allocation71_spill] sm:$0xff] %v12317_v59  ;;  %v6136_v59 = vmax.f32 %v12133_v62, 0.0  ;;  %v13666_v30 = vld [vmem:[#allocation72_spill] sm:$0xff]  ;;  %v6186_v62 = vsel %vm1881_vm4, %v13676_v31, -inf  ;;  %v6192_v1 = vsel %vm1881_vm4, %v13679_v35, -inf  ;;  %v6195_v31 = vsel %vm1881_vm4, %v13680_v17, -inf }
 0x9a5   :  { %13661 = vst [vmem:[#allocation22_spill] sm:$0xff] %v12321_v12  ;;  %v6128_v12 = vmax.f32 %v12101_v52, 0.0  ;;  %v13667_v11 = vld [vmem:[#allocation51_spill] sm:$0xff]  ;;  %v6187_v56 = vsel %vm1881_vm4, %v6124_v22, -inf  ;;  %v13677_v52 = vmax.f32 %v12081_v47, 0.0  ;;  %v13681_v22 = vmax.f32 %v12105_v4, 0.0 }
 0x9a6   :  { %13663 = vst [vmem:[#allocation57_spill] sm:$0xff] %v12325_v48  ;;  %v13668_v8 = vld [vmem:[#allocation52_spill] sm:$0xff]  ;;  %v13678_v48 = vmax.f32 %v12089_v38, 0.0  ;;  %v6201_v35 = vsel %vm1881_vm4, %v13683_v7, -inf  ;;  %v13685_v17 = vmax.f32 %v12125_v27, 0.0  ;;  %v12435_v63 = vmax.f32 %v6186_v62, %v6187_v56 }
 0x9a7   :  { %v13669_v14 = vld [vmem:[#allocation30_spill] sm:$0xff]  ;;  %v6189_v0 = vsel %vm1881_vm4, %v13677_v52, -inf  ;;  %v6193_v43 = vsel %vm1881_vm4, %v6128_v12, -inf  ;;  %v6196_v47 = vsel %vm1881_vm4, %v13681_v22, -inf  ;;  %v13682_v52 = vmax.f32 %v12109_v60, 0.0 }
 0x9a8   :  { %v13670_v20 = vld [vmem:[#allocation24_spill] sm:$0xff]  ;;  %v6190_v29 = vsel %vm1881_vm4, %v13678_v48, -inf  ;;  %v6199_v48 = vsel %vm1881_vm4, %v6132_v57, -inf  ;;  %v13684_v12 = vmax.f32 %v12121_v21, 0.0  ;;  %v6204_v4 = vsel %vm1881_vm4, %v13685_v17, -inf }
 0x9a9   :  { %v13671_v55 = vld [vmem:[#allocation7_spill] sm:$0xff]  ;;  %v6198_v38 = vsel %vm1881_vm4, %v13682_v52, -inf  ;;  %v6205_v22 = vsel %vm1881_vm4, %v6136_v59, -inf  ;;  %v13686_v60 = vmax.f32 %v12129_v45, 0.0  ;;  %v13687_v57 = vmax.f32 %v12137_v58, 0.0 }
 0x9aa   :  { %v13672_v53 = vld [vmem:[#allocation45_spill] sm:$0xff]  ;;  %v6202_v24 = vsel %vm1881_vm4, %v13684_v12, -inf  ;;  %v13688_v21 = vmax.f32 %v12141_v50, 0.0  ;;  %v13689_v12 = vmax.f32 %v12149_v41, 0.0  ;;  %v12443_v17 = vmax.f32 %v6189_v0, %v6190_v29 }
 0x9ab   :  { %v13673_v32 = vld [vmem:[#allocation71_spill] sm:$0xff]  ;;  %v6207_v52 = vsel %vm1881_vm4, %v13686_v60, -inf  ;;  %v6208_v40 = vsel %vm1881_vm4, %v13687_v57, -inf  ;;  %v12445_v45 = vmax.f32 %v6192_v1, %v6193_v43  ;;  %v12447_v60 = vmax.f32 %v6195_v31, %v6196_v47 }
 0x9ac   :  { %v6210_v27 = vsel %vm1881_vm4, %v13688_v21, -inf  ;;  %v6211_v59 = vsel %vm1881_vm4, %v13689_v12, -inf  ;;  %v12449_v58 = vmax.f32 %v6198_v38, %v6199_v48  ;;  %v12451_v57 = vmax.f32 %v6201_v35, %v6202_v24 }
 0x9ad   :  { %v12453_v56 = vmax.f32 %v6204_v4, %v6205_v22  ;;  %v12455_v62 = vmax.f32 %v6207_v52, %v6208_v40  ;;  %v13690_v50 = vmax.f32 %v12145_v26, 0.0  ;;  %v12460_v21 = vmax.f32 %v6210_v27, %v6211_v59 }
 0x9ae   :  { %v13691_v0 = vmax.f32 %v12153_v51, 0.0  ;;  %v13692_v29 = vmax.f32 %v12157_v54, 0.0  ;;  %v13693_v31 = vmax.f32 %v12165_v16, 0.0  ;;  %v13694_v38 = vmax.f32 %v12161_v18, 0.0 }
 0x9af   :  { %v6213_v41 = vsel %vm1881_vm4, %v13690_v50, -inf  ;;  %v13695_v48 = vmax.f32 %v12169_v2, 0.0  ;;  %v13696_v51 = vmax.f32 %v12173_v23, 0.0  ;;  %v13697_v54 = vmax.f32 %v12181_v37, 0.0 }
 0x9b0   :  { %v6214_v1 = vsel %vm1881_vm4, %v13691_v0, -inf  ;;  %v6216_v43 = vsel %vm1881_vm4, %v13692_v29, -inf  ;;  %v6217_v47 = vsel %vm1881_vm4, %v13693_v31, -inf  ;;  %v6219_v26 = vsel %vm1881_vm4, %v13694_v38, -inf }
 0x9b1   :  { %v6220_v35 = vsel %vm1881_vm4, %v13695_v48, -inf  ;;  %v6222_v24 = vsel %vm1881_vm4, %v13696_v51, -inf  ;;  %v6223_v4 = vsel %vm1881_vm4, %v13697_v54, -inf  ;;  %v13698_v16 = vmax.f32 %v12177_v5, 0.0 }
 0x9b2   :  { %v13699_v18 = vmax.f32 %v12185_v61, 0.0  ;;  %v13700_v2 = vmax.f32 %v12189_v42, 0.0  ;;  %v13701_v23 = vmax.f32 %v12197_v10, 0.0  ;;  %v13702_v37 = vmax.f32 %v12193_v6, 0.0 }
 0x9b3   :  { %v6225_v22 = vsel %vm1881_vm4, %v13698_v16, -inf  ;;  %v13703_v5 = vmax.f32 %v12201_v19, 0.0  ;;  %v13704_v61 = vmax.f32 %v12205_v49, 0.0  ;;  %v13705_v42 = vmax.f32 %v12213_v33, 0.0 }
 0x9b4   :  { %v6226_v52 = vsel %vm1881_vm4, %v13699_v18, -inf  ;;  %v6228_v40 = vsel %vm1881_vm4, %v13700_v2, -inf  ;;  %v6229_v27 = vsel %vm1881_vm4, %v13701_v23, -inf  ;;  %v6231_v12 = vsel %vm1881_vm4, %v13702_v37, -inf  ;;  %v13714_v37 = vld [vmem:[#allocation65_spill] sm:$0xff] }
 0x9b5   :  { %v6232_v59 = vsel %vm1881_vm4, %v13703_v5, -inf  ;;  %v6234_v50 = vsel %vm1881_vm4, %v13704_v61, -inf  ;;  %v6235_v0 = vsel %vm1881_vm4, %v13705_v42, -inf  ;;  %v13706_v10 = vmax.f32 %v12209_v28, 0.0 }
 0x9b6   :  { %v13707_v6 = vmax.f32 %v12217_v46, 0.0  ;;  %v13708_v19 = vmax.f32 %v12221_v9, 0.0  ;;  %v13709_v49 = vmax.f32 %v12229_v13, 0.0  ;;  %v12519_v51 = vmax.f32 %v6213_v41, %v6214_v1 }
 0x9b7   :  { %v6237_v29 = vsel %vm1881_vm4, %v13706_v10, -inf  ;;  %v12521_v33 = vmax.f32 %v6216_v43, %v6217_v47  ;;  %v13710_v28 = vmax.f32 %v12225_v34, 0.0  ;;  %v13711_v46 = vmax.f32 %v12233_v44, 0.0  ;;  %v13716_v10 = vld [vmem:[#allocation55_spill] sm:$0xff] }
 0x9b8   :  { %v6238_v31 = vsel %vm1881_vm4, %v13707_v6, -inf  ;;  %v6240_v38 = vsel %vm1881_vm4, %v13708_v19, -inf  ;;  %v6241_v48 = vsel %vm1881_vm4, %v13709_v49, -inf  ;;  %v12529_v18 = vmax.f32 %v6219_v26, %v6220_v35 }
 0x9b9   :  { %v6243_v54 = vsel %vm1881_vm4, %v13710_v28, -inf  ;;  %v6244_v16 = vsel %vm1881_vm4, %v13711_v46, -inf  ;;  %v12531_v9 = vmax.f32 %v6222_v24, %v6223_v4  ;;  %v12533_v2 = vmax.f32 %v6225_v22, %v6226_v52  ;;  %v13718_v46 = vld [vmem:[#allocation74_spill] sm:$0xff] }
 0x9ba   :  { %v12535_v13 = vmax.f32 %v6228_v40, %v6229_v27  ;;  %v12537_v41 = vmax.f32 %v6231_v12, %v6232_v59  ;;  %v12539_v1 = vmax.f32 %v6234_v50, %v6235_v0  ;;  %v12541_v43 = vmax.f32 %v6237_v29, %v6238_v31 }
 0x9bb   :  { %v12543_v34 = vmax.f32 %v6240_v38, %v6241_v48  ;;  %v12545_v47 = vmax.f32 %v6243_v54, %v6244_v16  ;;  %v13712_v44 = vmax.f32 %v12237_v36, 0.0  ;;  %v6315_v35 = vrot.slane %v12435_v63, 1 }
 0x9bc   :  { %v6316_v24 = vrot.slane %v12443_v17, 1  ;;  %v6318_v4 = vrot.slane %v12445_v45, 1  ;;  %v6319_v22 = vrot.slane %v12447_v60, 1  ;;  %v6321_v52 = vrot.slane %v12449_v58, 1 }
 0x9bd   :  { %v6246_v26 = vsel %vm1881_vm4, %v13712_v44, -inf  ;;  %v6322_v40 = vrot.slane %v12451_v57, 1  ;;  %v13713_v23 = vmax.f32 %v12245_v3, 0.0  ;;  %v13715_v36 = vmax.f32 %v13714_v37, 0.0 }
 0x9be   :  { %v6324_v5 = vrot.slane %v12453_v56, 1  ;;  %v6325_v59 = vrot.slane %v12455_v62, 1  ;;  %v6327_v61 = vrot.slane %v12460_v21, 1  ;;  %v13150_v50 = vrot.slane %v12519_v51, 1 }
 0x9bf   :  { %v6247_v27 = vsel %vm1881_vm4, %v13713_v23, -inf  ;;  %v6249_v12 = vsel %vm1881_vm4, %v13715_v36, -inf  ;;  %v6330_v42 = vrot.slane %v12521_v33, 1  ;;  %v6331_v0 = vrot.slane %v12529_v18, 1  ;;  %v13722_v36 = vld [vmem:[#allocation26_spill] sm:$0xff] }
 0x9c0   :  { %v13717_v3 = vmax.f32 %v13716_v10, 0.0  ;;  %v6317_v6 = vsel %vm1180_vm3, %v6315_v35, %v6316_v24  ;;  %v6333_v31 = vrot.slane %v12531_v9, 1  ;;  %v6334_v19 = vrot.slane %v12533_v2, 1  ;;  %v13720_v35 = vld [vmem:[#allocation83_spill] sm:$0xff] }
 0x9c1   :  { %v6320_v38 = vsel %vm1180_vm3, %v6318_v4, %v6319_v22  ;;  %v6323_v49 = vsel %vm1180_vm3, %v6321_v52, %v6322_v40  ;;  %v6336_v48 = vrot.slane %v12535_v13, 1  ;;  %v6337_v28 = vrot.slane %v12537_v41, 1 }
 0x9c2   :  { %v6250_v29 = vsel %vm1881_vm4, %v13717_v3, -inf  ;;  %v12580_v54 = vmax.f32 %v6246_v26, %v6247_v27  ;;  %v13719_v16 = vmax.f32 %v13718_v46, 0.0  ;;  %v13721_v23 = vmax.f32 %v13720_v35, 0.0  ;;  %v13724_v46 = vld [vmem:[#allocation36_spill] sm:$0xff] }
 0x9c3   :  { %v6326_v4 = vsel %vm1180_vm3, %v6324_v5, %v6325_v59  ;;  %v13723_v52 = vmax.f32 %v13722_v36, 0.0  ;;  %v6329_v26 = vsel %vm1180_vm3, %v6327_v61, %v13150_v50  ;;  %v6332_v27 = vsel %vm1180_vm3, %v6330_v42, %v6331_v0  ;;  %v13728_v50 = vld [vmem:[#allocation80_spill] sm:$0xff] }
 0x9c4   :  { %v6252_v44 = vsel %vm1881_vm4, %v13719_v16, -inf  ;;  %v6253_v37 = vsel %vm1881_vm4, %v13721_v23, -inf  ;;  %v6395_v3 = vmax.f32 %v12435_v63, %v6317_v6  ;;  %v13725_v16 = vmax.f32 %v13724_v46, 0.0 }
 0x9c5   :  { %v6255_v10 = vsel %vm1881_vm4, %v13723_v52, -inf  ;;  %v6335_v5 = vsel %vm1180_vm3, %v6333_v31, %v6334_v19  ;;  %v6397_v23 = vmax.f32 %v12445_v45, %v6320_v38  ;;  %v6399_v36 = vmax.f32 %v12449_v58, %v6323_v49  ;;  %v13726_v52 = vld [vmem:[#allocation58_spill] sm:$0xff]  ;;  %v13730_v45 = vld [vmem:[#allocation75_spill] sm:$0xff]  ;;  %v13732_v38 = vld [vmem:[#allocation4_spill] sm:$0xff] }
 0x9c6   :  { %v6256_v35 = vsel %vm1881_vm4, %v13725_v16, -inf  ;;  %v13727_v61 = vmax.f32 %v13726_v52, 0.0  ;;  %v13729_v42 = vmax.f32 %v13728_v50, 0.0  ;;  %v6338_v6 = vsel %vm1180_vm3, %v6336_v48, %v6337_v28  ;;  %6427 = vst.msk [vmem:[%s12862_s3] sm:$0xff] %vm1881_vm4, %v6395_v3 }
 0x9c7   :  { %v6401_v46 = vmax.f32 %v12453_v56, %v6326_v4  ;;  %v13731_v58 = vmax.f32 %v13730_v45, 0.0  ;;  %v13733_v49 = vmax.f32 %v13732_v38, 0.0  ;;  %v6403_v16 = vmax.f32 %v12460_v21, %v6329_v26  ;;  %6430 = vst.msk [vmem:[%s12862_s3 + $0x10] sm:$0xff] %vm1881_vm4, %v6397_v23  ;;  %v13745_v45 = vld [vmem:[#allocation22_spill] sm:$0xff] }
 0x9c8   :  { %v6258_v7 = vsel %vm1881_vm4, %v13727_v61, -inf  ;;  %v6259_v63 = vsel %vm1881_vm4, %v13729_v42, -inf  ;;  %v6405_v52 = vmax.f32 %v12521_v33, %v6332_v27  ;;  %v12635_v56 = vmax.f32 %v6249_v12, %v6250_v29  ;;  %6432 = vst.msk [vmem:[%s12862_s3 + $0x20] sm:$0xff] %vm1881_vm4, %v6399_v36 }
 0x9c9   :  { %v6261_v31 = vsel %vm1881_vm4, %v13731_v58, -inf  ;;  %v6262_v50 = vsel %vm1881_vm4, %v13733_v49, -inf  ;;  %v13734_v48 = vmax.f32 %v12285_v15, 0.0  ;;  %v13735_v3 = vmax.f32 %v13667_v11, 0.0  ;;  %6434 = vst.msk [vmem:[%s12862_s3 + $0x30] sm:$0xff] %vm1881_vm4, %v6401_v46 }
 0x9ca   :  { %v6407_v42 = vmax.f32 %v12531_v9, %v6335_v5  ;;  %v12648_v21 = vmax.f32 %v6252_v44, %v6253_v37  ;;  %v13736_v33 = vmax.f32 %v13666_v30, 0.0  ;;  %v13737_v15 = vmax.f32 %v13668_v8, 0.0  ;;  %6436 = vst.msk [vmem:[%s12862_s3 + $0x40] sm:$0xff] %vm1881_vm4, %v6403_v16 }
 0x9cb   :  { %v6264_v4 = vsel %vm1881_vm4, %v13734_v48, -inf  ;;  %v6265_v61 = vsel %vm1881_vm4, %v13735_v3, -inf  ;;  %v6409_v11 = vmax.f32 %v12535_v13, %v6338_v6  ;;  %v12661_v9 = vmax.f32 %v6255_v10, %v6256_v35  ;;  %6438 = vst.msk [vmem:[%s12862_s3 + $0x50] sm:$0xff] %vm1881_vm4, %v6405_v52 }
 0x9cc   :  { %v6267_v12 = vsel %vm1881_vm4, %v13736_v33, -inf  ;;  %v6268_v29 = vsel %vm1881_vm4, %v13737_v15, -inf  ;;  %v12663_v26 = vmax.f32 %v6258_v7, %v6259_v63  ;;  %v12665_v44 = vmax.f32 %v6261_v31, %v6262_v50  ;;  %6440 = vst.msk [vmem:[%s12862_s3 + $0x60] sm:$0xff] %vm1881_vm4, %v6407_v42 }
 0x9cd   :  { %v6396_v30 = vmax.f32 %v12443_v17, %v6316_v24  ;;  %v12672_v8 = vmax.f32 %v6264_v4, %v6265_v61  ;;  %v6339_v13 = vrot.slane %v12539_v1, 1  ;;  %v6340_v37 = vrot.slane %v12541_v43, 1  ;;  %6442 = vst.msk [vmem:[%s12862_s3 + $0x70] sm:$0xff] %vm1881_vm4, %v6409_v11 }
 0x9ce   :  { %v6398_v10 = vmax.f32 %v12447_v60, %v6319_v22  ;;  %v12681_v7 = vmax.f32 %v6267_v12, %v6268_v29  ;;  %v13738_v17 = vmax.f32 %v13669_v14, 0.0  ;;  %v13739_v27 = vmax.f32 %v13671_v55, 0.0 }
 0x9cf   :  { %v6400_v5 = vmax.f32 %v12451_v57, %v6322_v40  ;;  %v6342_v60 = vrot.slane %v12543_v34, 1  ;;  %v6343_v22 = vrot.slane %v12545_v47, 1  ;;  %v6402_v14 = vmax.f32 %v12455_v62, %v6325_v59  ;;  %6429 = vst.msk [vmem:[%s12862_s3 + $0x8] sm:$0x7f] %vm6428_vm11, %v6396_v30 }
 0x9d0   :  { %v6270_v24 = vsel %vm1881_vm4, %v13738_v17, -inf  ;;  %v6271_v35 = vsel %vm1881_vm4, %v13739_v27, -inf  ;;  %v13740_v55 = vmax.f32 %v13670_v20, 0.0  ;;  %v13741_v40 = vmax.f32 %v13672_v53, 0.0  ;;  %6431 = vst.msk [vmem:[%s12862_s3 + $0x18] sm:$0x7f] %vm6428_vm11, %v6398_v10 }
 0x9d1   :  { %v13742_v36 = vmax.f32 %v13673_v32, 0.0  ;;  %v13743_v62 = vrot.slane %v12519_v51, 1  ;;  %v6341_v20 = vsel %vm1180_vm3, %v6339_v13, %v6340_v37  ;;  %v6345_v6 = vrot.slane %v12580_v54, 1  ;;  %6433 = vst.msk [vmem:[%s12862_s3 + $0x28] sm:$0x7f] %vm6428_vm11, %v6400_v5 }
 0x9d2   :  { %v6273_v57 = vsel %vm1881_vm4, %v13740_v55, -inf  ;;  %v6274_v23 = vsel %vm1881_vm4, %v13741_v40, -inf  ;;  %v6346_v53 = vrot.slane %v12635_v56, 1  ;;  %v6406_v32 = vmax.f32 %v12529_v18, %v6331_v0  ;;  %6435 = vst.msk [vmem:[%s12862_s3 + $0x38] sm:$0x7f] %vm6428_vm11, %v6402_v14 }
 0x9d3   :  { %v6276_v63 = vsel %vm1881_vm4, %v13742_v36, -inf  ;;  %v6404_v59 = vmax.f32 %v12519_v51, %v13743_v62  ;;  %v13744_v51 = vmax.f32 %v13675_v39, 0.0  ;;  %v13746_v58 = vmax.f32 %v13745_v45, 0.0 }
 0x9d4   :  { %v13747_v38 = vmax.f32 %v12329_v25, 0.0  ;;  %v6408_v18 = vmax.f32 %v12533_v2, %v6334_v19  ;;  %v6344_v39 = vsel %vm1180_vm3, %v6342_v60, %v6343_v22  ;;  %v6348_v0 = vrot.slane %v12648_v21, 1  ;;  %6439 = vst.msk [vmem:[%s12862_s3 + $0x58] sm:$0x7f] %vm6428_vm11, %v6406_v32 }
 0x9d5   :  { %v6277_v46 = vsel %vm1881_vm4, %v13744_v51, -inf  ;;  %v6279_v31 = vsel %vm1881_vm4, %v13746_v58, -inf  ;;  %v6349_v50 = vrot.slane %v12661_v9, 1  ;;  %v6410_v25 = vmax.f32 %v12537_v41, %v6337_v28  ;;  %6437 = vst.msk [vmem:[%s12862_s3 + $0x48] sm:$0x7f] %vm6428_vm11, %v6404_v59 }
 0x9d6   :  { %v6280_v49 = vsel %vm1881_vm4, %v13747_v38, -inf  ;;  %v6272_v2 = vmax.f32 %v6270_v24, %v6271_v35  ;;  %v6275_v19 = vmax.f32 %v6273_v57, %v6274_v23  ;;  %v6411_v16 = vmax.f32 %v12539_v1, %v6341_v20  ;;  %6441 = vst.msk [vmem:[%s12862_s3 + $0x68] sm:$0x7f] %vm6428_vm11, %v6408_v18 }
 0x9d7   :  { %v6347_v52 = vsel %vm1180_vm3, %v6345_v6, %v6346_v53  ;;  %v6351_v48 = vrot.slane %v12663_v26, 1  ;;  %v6352_v41 = vrot.slane %v12665_v44, 1  ;;  %v6412_v28 = vmax.f32 %v12541_v43, %v6340_v37  ;;  %6443 = vst.msk [vmem:[%s12862_s3 + $0x78] sm:$0x7f] %vm6428_vm11, %v6410_v25 }
 0x9d8   :  { %v6278_v4 = vmax.f32 %v6276_v63, %v6277_v46  ;;  %v6281_v1 = vmax.f32 %v6279_v31, %v6280_v49  ;;  %v6413_v3 = vmax.f32 %v12543_v34, %v6344_v39  ;;  %v6350_v61 = vsel %vm1180_vm3, %v6348_v0, %v6349_v50  ;;  %6444 = vst.msk [vmem:[%s12862_s3 + $0x80] sm:$0xff] %vm1881_vm4, %v6411_v16 }
 0x9d9   :  { %v6354_v42 = vrot.slane %v12672_v8, 1  ;;  %v6355_v43 = vrot.slane %v12681_v7, 1  ;;  %v6414_v33 = vmax.f32 %v12545_v47, %v6343_v22  ;;  %v6415_v34 = vmax.f32 %v12580_v54, %v6347_v52  ;;  %6445 = vst.msk [vmem:[%s12862_s3 + $0x88] sm:$0x7f] %vm6428_vm11, %v6412_v28 }
 0x9da   :  { %v6353_v12 = vsel %vm1180_vm3, %v6351_v48, %v6352_v41  ;;  %v6357_v15 = vrot.slane %v6272_v2, 1  ;;  %v6358_v29 = vrot.slane %v6275_v19, 1  ;;  %v6416_v11 = vmax.f32 %v12635_v56, %v6346_v53  ;;  %6446 = vst.msk [vmem:[%s12862_s3 + $0x90] sm:$0xff] %vm1881_vm4, %v6413_v3 }
 0x9db   :  { %v6417_v47 = vmax.f32 %v12648_v21, %v6350_v61  ;;  %v6356_v54 = vsel %vm1180_vm3, %v6354_v42, %v6355_v43  ;;  %v6360_v30 = vrot.slane %v6278_v4, 1  ;;  %v6361_v13 = vrot.slane %v6281_v1, 1  ;;  %6447 = vst.msk [vmem:[%s12862_s3 + $0x98] sm:$0x7f] %vm6428_vm11, %v6414_v33 }
 0x9dc   :  { %v6418_v37 = vmax.f32 %v12661_v9, %v6349_v50  ;;  %v6419_v56 = vmax.f32 %v12663_v26, %v6353_v12  ;;  %6448 = vst.msk [vmem:[%s12862_s3 + $0xa0] sm:$0xff] %vm1881_vm4, %v6415_v34  ;;  %v6359_v21 = vsel %vm1180_vm3, %v6357_v15, %v6358_v29  ;;  %v6420_v10 = vmax.f32 %v12665_v44, %v6352_v41 }
 0x9dd   :  { %6449 = vst.msk [vmem:[%s12862_s3 + $0xa8] sm:$0x7f] %vm6428_vm11, %v6416_v11  ;;  %v6421_v9 = vmax.f32 %v12672_v8, %v6356_v54  ;;  %v6362_v26 = vsel %vm1180_vm3, %v6360_v30, %v6361_v13  ;;  %v6422_v17 = vmax.f32 %v12681_v7, %v6355_v43  ;;  %v6423_v44 = vmax.f32 %v6272_v2, %v6359_v21 }
 0x9de   :  { %6450 = vst.msk [vmem:[%s12862_s3 + $0xb0] sm:$0xff] %vm1881_vm4, %v6417_v47  ;;  %v6424_v8 = vmax.f32 %v6275_v19, %v6358_v29  ;;  %v6425_v24 = vmax.f32 %v6278_v4, %v6362_v26  ;;  %v6426_v7 = vmax.f32 %v6281_v1, %v6361_v13 }
 0x9df   :  { %6451 = vst.msk [vmem:[%s12862_s3 + $0xb8] sm:$0x7f] %vm6428_vm11, %v6418_v37 }
 0x9e0   :  { %6452 = vst.msk [vmem:[%s12862_s3 + $0xc0] sm:$0xff] %vm1881_vm4, %v6419_v56 }
 0x9e1   :  { %6453 = vst.msk [vmem:[%s12862_s3 + $0xc8] sm:$0x7f] %vm6428_vm11, %v6420_v10 }
 0x9e2   :  { %6454 = vst.msk [vmem:[%s12862_s3 + $0xd0] sm:$0xff] %vm1881_vm4, %v6421_v9 }
 0x9e3   :  { %6455 = vst.msk [vmem:[%s12862_s3 + $0xd8] sm:$0x7f] %vm6428_vm11, %v6422_v17 }
 0x9e4   :  { %6456 = vst.msk [vmem:[%s12862_s3 + $0xe0] sm:$0xff] %vm1881_vm4, %v6423_v44 }
 0x9e5   :  { %6457 = vst.msk [vmem:[%s12862_s3 + $0xe8] sm:$0x7f] %vm6428_vm11, %v6424_v8 }
 0x9e6   :  { %6458 = vst.msk [vmem:[%s12862_s3 + $0xf0] sm:$0xff] %vm1881_vm4, %v6425_v24 }
 0x9e7   :  { %6459 = vst.msk [vmem:[%s12862_s3 + $0xf8] sm:$0x7f] %vm6428_vm11, %v6426_v7 }

</bundles_post_ra>
